<compile_context>
chip_gen: v7x
topology: tpu7x:2x2x1
jax: 0.10.0
libtpu: 0.0.40
codegen_flags: <defaults>
</compile_context>

<pallas_src>
import jax
import jax.numpy as jnp
from jax.experimental import pallas as pl
from jax.experimental.pallas import tpu as pltpu


def _round_up(x, m):
    return ((x + m - 1) // m) * m


def _pick_chunk(m_rows, max_chunk=128):
    """Largest multiple-of-8 divisor of m_rows that is <= max_chunk (else m_rows)."""
    best = None
    for c in range(8, max_chunk + 1, 8):
        if m_rows % c == 0:
            best = c
    return best if best is not None else m_rows


# ------------------------------------------------------------------------------------
# Fused kernel: (1+depth) x [3x3 conv (stride 1, pad 1) + folded eval-mode BN].
# ------------------------------------------------------------------------------------
def _make_decoder_kernel(OH, OW, n_convs, row_off, mfull, chunk, n_scratch):
    Wp = OW + 2
    M = OH * Wp                       # acc rows = all output pixels + wrap columns
    base = row_off - Wp - 1           # slab row read by tap (0,0) for acc row 0 (>= 0)
    taps = [(ky, kx) for ky in range(3) for kx in range(3)]
    tail = mfull - row_off - M        # trailing halo rows
    bounds = [(c * chunk, chunk) for c in range(M // chunk)]
    if M % chunk:
        bounds.append((M - M % chunk, M % chunk))

    def kernel(*refs):
        x_ref = refs[0]                              # (1, MFULL, Cin_total) bf16
        w_refs = refs[1:1 + n_convs]                 # (9, Cin_i, Cout) bf16 each
        scale_ref = refs[1 + n_convs]                # (n_convs, Cout) f32
        bias_ref = refs[2 + n_convs]                 # (n_convs, Cout) f32
        o_ref = refs[3 + n_convs]                    # (1, Cout, M) f32
        scratches = refs[4 + n_convs:]               # (MFULL, Cout) bf16 slabs
        cout = o_ref.shape[1]

        # Keep the zero halo ring of the inter-conv slab(s) exact.  Valid rows are
        # fully rewritten below with their wrap columns masked to zero, so only the
        # (aligned, small) halo regions need a memset.
        for scr in scratches:
            scr[pl.ds(0, row_off), :] = jnp.zeros((row_off, cout), scr.dtype)
            scr[pl.ds(row_off + M, tail), :] = jnp.zeros((tail, cout), scr.dtype)

        def run_conv(load, w_ref, idx, store):
            s = scale_ref[pl.ds(idx, 1), :]          # (1, Cout) folded BN scale
            b = bias_ref[pl.ds(idx, 1), :]           # (1, Cout) folded BN bias
            for m0, rows in bounds:                  # M-chunked f32 accumulator
                acc = jnp.zeros((rows, cout), jnp.float32)
                for t, (ky, kx) in enumerate(taps):
                    a = load(base + ky * Wp + kx + m0, rows)   # contiguous tap slice
                    acc = acc + jnp.dot(a, w_ref[t],
                                        preferred_element_type=jnp.float32)
                # f32 epilogue: folded BN affine; zero the wrap-around columns so the
                # padded-flat layout stays exact for the next conv (mask via iota).
                col = (m0 + jax.lax.broadcasted_iota(jnp.int32, (rows, 1), 0)) % Wp
                y = jnp.where(col < OW, acc * s + b, 0.0)
                store(m0, rows, y)

        def load_input(start, rows):
            return x_ref[0, pl.ds(start, rows), :]

        def make_load(scr):
            return lambda start, rows: scr[pl.ds(start, rows), :]

        def make_store(scr):
            def fn(m0, rows, y):
                # 8-sublane-aligned store into the VMEM inter-conv slab.
                scr[pl.ds(row_off + m0, rows), :] = y.astype(scr.dtype)
            return fn

        def store_out(m0, rows, y):
            # Lane-dense (Cout, rows) final store; the 2D f32 transpose rides the XLU.
            o_ref[0, :, pl.ds(m0, rows)] = jnp.transpose(y).astype(o_ref.dtype)

        load = load_input
        for i in range(n_convs):
            if i == n_convs - 1:
                run_conv(load, w_refs[i], i, store_out)
            else:
                scr = scratches[i % n_scratch]       # ping-pong for depth >= 2
                run_conv(load, w_refs[i], i, make_store(scr))
                load = make_load(scr)

    return kernel


def _decoder_fused_call(slab, weights, scales, biases, OH, OW, row_off, mfull,
                        out_dtype=jnp.float32):
    N = slab.shape[0]
    n_convs = len(weights)
    cout = weights[-1].shape[-1]
    Wp = OW + 2
    M = OH * Wp
    chunk = _pick_chunk(M)
    n_scratch = 0 if n_convs == 1 else (1 if n_convs == 2 else 2)

    kernel = _make_decoder_kernel(OH, OW, n_convs, row_off, mfull, chunk, n_scratch)

    in_specs = [pl.BlockSpec((1,) + slab.shape[1:], lambda n: (n, 0, 0))]
    for w in weights:
        in_specs.append(pl.BlockSpec(w.shape, lambda n: (0, 0, 0)))
    in_specs += [pl.BlockSpec(scales.shape, lambda n: (0, 0)),
                 pl.BlockSpec(biases.shape, lambda n: (0, 0))]

    return pl.pallas_call(
        kernel,
        out_shape=jax.ShapeDtypeStruct((N, cout, M), out_dtype),
        grid_spec=pltpu.PrefetchScalarGridSpec(
            num_scalar_prefetch=0,
            grid=(N,),                       # batch axis; "parallel" for megacore
            in_specs=in_specs,
            out_specs=pl.BlockSpec((1, cout, M), lambda n: (n, 0, 0)),
            scratch_shapes=[pltpu.VMEM((mfull, cout), jnp.bfloat16)
                            for _ in range(n_scratch)],
        ),
        compiler_params=pltpu.CompilerParams(
            dimension_semantics=("parallel",)),
    )(slab, *weights, scales, biases)


# ------------------------------------------------------------------------------------
# Padded-flat slab construction (XLA glue; single fused pad/reshape of the input).
# ------------------------------------------------------------------------------------
def _to_padded_flat(x_nhwc, row_off, mfull):
    """(N,H,W,C) -> (N, mfull, C) with pixel (h,w) at row row_off + h*(W+2) + w and
    exact zeros everywhere else (halo ring + wrap columns)."""
    N, H, W, C = x_nhwc.shape
    Wp = W + 2
    xp = jnp.pad(x_nhwc, ((0, 0), (0, 0), (0, 2), (0, 0)))   # 2 wrap zeros per row
    flat = xp.reshape(N, H * Wp, C)
    return jnp.pad(flat, ((0, 0), (row_off, mfull - row_off - H * Wp), (0, 0)))


# ------------------------------------------------------------------------------------
# Parameters (deterministic synthetic init; conv bias=False, eval-mode BN folded).
# ------------------------------------------------------------------------------------
def _conv_bn_params(key, cin, cout, k=3):
    kw, kg, kb, km, kv = jax.random.split(key, 5)
    fan_in = k * k * cin
    w = jax.random.normal(kw, (k, k, cin, cout), jnp.float32) / jnp.sqrt(float(fan_in))
    gamma = 1.0 + 0.1 * jax.random.normal(kg, (cout,), jnp.float32)
    beta = 0.05 * jax.random.normal(kb, (cout,), jnp.float32)
    run_mean = 0.05 * jax.random.normal(km, (cout,), jnp.float32)
    run_var = 1.0 + 0.1 * jax.random.uniform(kv, (cout,), jnp.float32)
    scale = gamma / jnp.sqrt(run_var + 1e-5)
    bias = beta - run_mean * scale
    return {'w': w.reshape(k * k, cin, cout).astype(jnp.bfloat16),
            'scale': scale, 'bias': bias}


def init_decoder_block_params(key, in_channel, skip_channel, out_channel, depth=1):
    # DecoderBlock.blocks = [conv_bn(in+skip, out)] + [conv_bn(out, out)] * depth
    cins = [in_channel + skip_channel] + [out_channel] * depth
    convs = []
    for cin in cins:
        key, sub = jax.random.split(key)
        convs.append(_conv_bn_params(sub, cin, out_channel, 3))
    return {'in_channel': in_channel, 'skip_channel': skip_channel,
            'out_channel': out_channel, 'convs': convs}


# ------------------------------------------------------------------------------------
# DecoderBlock forward.
# ------------------------------------------------------------------------------------
def decoder_block_forward(params, x_nchw, skip_nchw=None, scale_factor=2):
    x = jnp.transpose(x_nchw, (0, 2, 3, 1)).astype(jnp.float32)
    # F.interpolate(scale_factor=2, mode='nearest')
    x = jnp.repeat(jnp.repeat(x, scale_factor, axis=1), scale_factor, axis=2)
    if params['skip_channel']:
        skip = jnp.transpose(skip_nchw, (0, 2, 3, 1)).astype(jnp.float32)
        # torch.cat([x, skip], dim=1): merged into the slab build so conv1 runs
        # full-K tap matmuls (no K-split).
        x = jnp.concatenate([x, skip], axis=-1)
    N, OH, OW, _ = x.shape

    Wp = OW + 2
    M = OH * Wp
    row_off = _round_up(Wp + 1, 8)                      # aligned pixel-(0,0) row
    mfull = _round_up(row_off + M + Wp + 1, 8)

    slab = _to_padded_flat(x.astype(jnp.bfloat16), row_off, mfull)

    convs = params['convs']
    weights = [c['w'] for c in convs]
    scales = jnp.stack([c['scale'] for c in convs]).astype(jnp.float32)
    biases = jnp.stack([c['bias'] for c in convs]).astype(jnp.float32)

    out_flat = _decoder_fused_call(slab, weights, scales, biases, OH, OW,
                                   row_off, mfull)
    cout = weights[-1].shape[-1]
    # (N, Cout, OH*Wp) -> NCHW via a cheap slice (no final transpose needed).
    return out_flat.reshape(N, cout, OH, Wp)[:, :, :, :OW]


# ------------------------------------------------------------------------------------
# Pure-JAX reference (numerical sanity check).
# ------------------------------------------------------------------------------------
def _ref_decoder_block(params, x_nchw, skip_nchw=None, scale_factor=2):
    x = jnp.transpose(x_nchw, (0, 2, 3, 1)).astype(jnp.float32)
    x = jnp.repeat(jnp.repeat(x, scale_factor, axis=1), scale_factor, axis=2)
    if params['skip_channel']:
        skip = jnp.transpose(skip_nchw, (0, 2, 3, 1)).astype(jnp.float32)
        x = jnp.concatenate([x, skip], axis=-1)
    for c in params['convs']:
        cin, cout = c['w'].shape[1], c['w'].shape[2]
        w = c['w'].astype(jnp.float32).reshape(3, 3, cin, cout)
        x = jax.lax.conv_general_dilated(
            x, w, (1, 1), ((1, 1), (1, 1)),
            dimension_numbers=('NHWC', 'HWIO', 'NHWC'),
            precision=jax.lax.Precision.HIGHEST)
        x = x * c['scale'] + c['bias']
    return jnp.transpose(x, (0, 3, 1, 2))


if __name__ == "__main__":
    key = jax.random.PRNGKey(0)
    pkey, xkey, skey = jax.random.split(key, 3)

    N, H, W = 2, 8, 8
    in_ch, skip_ch, out_ch = 32, 16, 32
    params = init_decoder_block_params(pkey, in_ch, skip_ch, out_ch, depth=1)
    x = jax.random.normal(xkey, (N, in_ch, H, W), jnp.float32)          # NCHW as torch
    skip = jax.random.normal(skey, (N, skip_ch, 2 * H, 2 * W), jnp.float32)

    fwd = jax.jit(lambda xx, ss: decoder_block_forward(params, xx, ss))
    out = jax.block_until_ready(fwd(x, skip))

    assert out.shape == (N, out_ch, 2 * H, 2 * W), out.shape
    assert bool(jnp.all(jnp.isfinite(out)))

    ref = _ref_decoder_block(params, x, skip)
    max_err = float(jnp.max(jnp.abs(out - ref)))
    assert max_err < 0.25, max_err   # bf16-operand tolerance vs f32 reference
    print("KERNEL_OK")
</pallas_src>

<mosaic_0001>
module attributes {stable_mosaic.version = 11 : i64} {
  func.func @kernel(%arg0: i32, %arg1: memref<1x336x48xbf16, #tpu.memory_space<vmem>>, %arg2: memref<9x48x32xbf16, #tpu.memory_space<vmem>>, %arg3: memref<9x32x32xbf16, #tpu.memory_space<vmem>>, %arg4: memref<2x32xf32, #tpu.memory_space<vmem>>, %arg5: memref<2x32xf32, #tpu.memory_space<vmem>>, %arg6: memref<1x32x288xf32, #tpu.memory_space<vmem>>, %arg7: memref<336x32xbf16, #tpu.memory_space<vmem>>) attributes {dimension_semantics = [#tpu.dimension_semantics<parallel>], iteration_bounds = array<i64: 2>, scalar_prefetch = 0 : i64, scratch_operands = 1 : i64, tpu.core_type = #tpu.core_type<tc>, window_params = [{transform_indices = @transform_0, window_bounds = array<i64: 1, 336, 48>}, {pipeline_mode = #tpu.pipeline_mode<synchronous>, transform_indices = @transform_1, window_bounds = array<i64: 9, 48, 32>}, {pipeline_mode = #tpu.pipeline_mode<synchronous>, transform_indices = @transform_2, window_bounds = array<i64: 9, 32, 32>}, {pipeline_mode = #tpu.pipeline_mode<synchronous>, transform_indices = @transform_3, window_bounds = array<i64: 2, 32>}, {pipeline_mode = #tpu.pipeline_mode<synchronous>, transform_indices = @transform_4, window_bounds = array<i64: 2, 32>}, {transform_indices = @transform_5, window_bounds = array<i64: 1, 32, 288>}]} {
    %cst = arith.constant 0.000000e+00 : bf16
    %0 = vector.broadcast %cst : bf16 to vector<24x32xbf16>
    %c0 = arith.constant 0 : index
    %c0_0 = arith.constant 0 : index
    %1 = vector.load %arg7[%c0, %c0_0] : memref<336x32xbf16, #tpu.memory_space<vmem>>, vector<24x32xbf16>
    tpu.vector_store %arg7[%c0, %c0_0], %0 {strides = array<i32>} : memref<336x32xbf16, #tpu.memory_space<vmem>>, vector<24x32xbf16>,
    %cst_1 = arith.constant 0.000000e+00 : bf16
    %2 = vector.broadcast %cst_1 : bf16 to vector<24x32xbf16>
    %c312 = arith.constant 312 : index
    %c0_2 = arith.constant 0 : index
    %3 = vector.load %arg7[%c312, %c0_2] : memref<336x32xbf16, #tpu.memory_space<vmem>>, vector<24x32xbf16>
    tpu.vector_store %arg7[%c312, %c0_2], %2 {strides = array<i32>} : memref<336x32xbf16, #tpu.memory_space<vmem>>, vector<24x32xbf16>,
    %c0_3 = arith.constant 0 : index
    %c0_4 = arith.constant 0 : index
    %4 = vector.load %arg4[%c0_3, %c0_4] : memref<2x32xf32, #tpu.memory_space<vmem>>, vector<1x32xf32>
    %c0_5 = arith.constant 0 : index
    %c0_6 = arith.constant 0 : index
    %5 = vector.load %arg5[%c0_5, %c0_6] : memref<2x32xf32, #tpu.memory_space<vmem>>, vector<1x32xf32>
    %cst_7 = arith.constant 0.000000e+00 : f32
    %6 = vector.broadcast %cst_7 : f32 to vector<96x32xf32>
    %c0_8 = arith.constant 0 : index
    %c5 = arith.constant 5 : index
    %c0_9 = arith.constant 0 : index
    %7 = vector.load %arg1[%c0_8, %c5, %c0_9] : memref<1x336x48xbf16, #tpu.memory_space<vmem>>, vector<1x96x48xbf16>
    %8 = vector.shape_cast %7 : vector<1x96x48xbf16> to vector<96x48xbf16>
    %c0_10 = arith.constant 0 : index
    %c0_11 = arith.constant 0 : index
    %c0_12 = arith.constant 0 : index
    %9 = vector.load %arg2[%c0_10, %c0_11, %c0_12] : memref<9x48x32xbf16, #tpu.memory_space<vmem>>, vector<1x48x32xbf16>
    %10 = vector.shape_cast %9 : vector<1x48x32xbf16> to vector<48x32xbf16>
    %cst_13 = arith.constant dense<0.000000e+00> : vector<96x32xf32>
    %11 = tpu.matmul %8, %10, %cst_13 {dimension_numbers = #tpu.dot_dimension_numbers<[1], [0], [0], [1], [0, 0, 1, 1], [], []>} : vector<96x48xbf16>, vector<48x32xbf16>, vector<96x32xf32> -> vector<96x32xf32>
    %12 = arith.addf %6, %11 : vector<96x32xf32>
    %c0_14 = arith.constant 0 : index
    %c6 = arith.constant 6 : index
    %c0_15 = arith.constant 0 : index
    %13 = vector.load %arg1[%c0_14, %c6, %c0_15] : memref<1x336x48xbf16, #tpu.memory_space<vmem>>, vector<1x96x48xbf16>
    %14 = vector.shape_cast %13 : vector<1x96x48xbf16> to vector<96x48xbf16>
    %c1 = arith.constant 1 : index
    %c0_16 = arith.constant 0 : index
    %c0_17 = arith.constant 0 : index
    %15 = vector.load %arg2[%c1, %c0_16, %c0_17] : memref<9x48x32xbf16, #tpu.memory_space<vmem>>, vector<1x48x32xbf16>
    %16 = vector.shape_cast %15 : vector<1x48x32xbf16> to vector<48x32xbf16>
    %cst_18 = arith.constant dense<0.000000e+00> : vector<96x32xf32>
    %17 = tpu.matmul %14, %16, %cst_18 {dimension_numbers = #tpu.dot_dimension_numbers<[1], [0], [0], [1], [0, 0, 1, 1], [], []>} : vector<96x48xbf16>, vector<48x32xbf16>, vector<96x32xf32> -> vector<96x32xf32>
    %18 = arith.addf %12, %17 : vector<96x32xf32>
    %c0_19 = arith.constant 0 : index
    %c7 = arith.constant 7 : index
    %c0_20 = arith.constant 0 : index
    %19 = vector.load %arg1[%c0_19, %c7, %c0_20] : memref<1x336x48xbf16, #tpu.memory_space<vmem>>, vector<1x96x48xbf16>
    %20 = vector.shape_cast %19 : vector<1x96x48xbf16> to vector<96x48xbf16>
    %c2 = arith.constant 2 : index
    %c0_21 = arith.constant 0 : index
    %c0_22 = arith.constant 0 : index
    %21 = vector.load %arg2[%c2, %c0_21, %c0_22] : memref<9x48x32xbf16, #tpu.memory_space<vmem>>, vector<1x48x32xbf16>
    %22 = vector.shape_cast %21 : vector<1x48x32xbf16> to vector<48x32xbf16>
    %cst_23 = arith.constant dense<0.000000e+00> : vector<96x32xf32>
    %23 = tpu.matmul %20, %22, %cst_23 {dimension_numbers = #tpu.dot_dimension_numbers<[1], [0], [0], [1], [0, 0, 1, 1], [], []>} : vector<96x48xbf16>, vector<48x32xbf16>, vector<96x32xf32> -> vector<96x32xf32>
    %24 = arith.addf %18, %23 : vector<96x32xf32>
    %c0_24 = arith.constant 0 : index
    %c23 = arith.constant 23 : index
    %c0_25 = arith.constant 0 : index
    %25 = vector.load %arg1[%c0_24, %c23, %c0_25] : memref<1x336x48xbf16, #tpu.memory_space<vmem>>, vector<1x96x48xbf16>
    %26 = vector.shape_cast %25 : vector<1x96x48xbf16> to vector<96x48xbf16>
    %c3 = arith.constant 3 : index
    %c0_26 = arith.constant 0 : index
    %c0_27 = arith.constant 0 : index
    %27 = vector.load %arg2[%c3, %c0_26, %c0_27] : memref<9x48x32xbf16, #tpu.memory_space<vmem>>, vector<1x48x32xbf16>
    %28 = vector.shape_cast %27 : vector<1x48x32xbf16> to vector<48x32xbf16>
    %cst_28 = arith.constant dense<0.000000e+00> : vector<96x32xf32>
    %29 = tpu.matmul %26, %28, %cst_28 {dimension_numbers = #tpu.dot_dimension_numbers<[1], [0], [0], [1], [0, 0, 1, 1], [], []>} : vector<96x48xbf16>, vector<48x32xbf16>, vector<96x32xf32> -> vector<96x32xf32>
    %30 = arith.addf %24, %29 : vector<96x32xf32>
    %c0_29 = arith.constant 0 : index
    %c24 = arith.constant 24 : index
    %c0_30 = arith.constant 0 : index
    %31 = vector.load %arg1[%c0_29, %c24, %c0_30] : memref<1x336x48xbf16, #tpu.memory_space<vmem>>, vector<1x96x48xbf16>
    %32 = vector.shape_cast %31 : vector<1x96x48xbf16> to vector<96x48xbf16>
    %c4 = arith.constant 4 : index
    %c0_31 = arith.constant 0 : index
    %c0_32 = arith.constant 0 : index
    %33 = vector.load %arg2[%c4, %c0_31, %c0_32] : memref<9x48x32xbf16, #tpu.memory_space<vmem>>, vector<1x48x32xbf16>
    %34 = vector.shape_cast %33 : vector<1x48x32xbf16> to vector<48x32xbf16>
    %cst_33 = arith.constant dense<0.000000e+00> : vector<96x32xf32>
    %35 = tpu.matmul %32, %34, %cst_33 {dimension_numbers = #tpu.dot_dimension_numbers<[1], [0], [0], [1], [0, 0, 1, 1], [], []>} : vector<96x48xbf16>, vector<48x32xbf16>, vector<96x32xf32> -> vector<96x32xf32>
    %36 = arith.addf %30, %35 : vector<96x32xf32>
    %c0_34 = arith.constant 0 : index
    %c25 = arith.constant 25 : index
    %c0_35 = arith.constant 0 : index
    %37 = vector.load %arg1[%c0_34, %c25, %c0_35] : memref<1x336x48xbf16, #tpu.memory_space<vmem>>, vector<1x96x48xbf16>
    %38 = vector.shape_cast %37 : vector<1x96x48xbf16> to vector<96x48xbf16>
    %c5_36 = arith.constant 5 : index
    %c0_37 = arith.constant 0 : index
    %c0_38 = arith.constant 0 : index
    %39 = vector.load %arg2[%c5_36, %c0_37, %c0_38] : memref<9x48x32xbf16, #tpu.memory_space<vmem>>, vector<1x48x32xbf16>
    %40 = vector.shape_cast %39 : vector<1x48x32xbf16> to vector<48x32xbf16>
    %cst_39 = arith.constant dense<0.000000e+00> : vector<96x32xf32>
    %41 = tpu.matmul %38, %40, %cst_39 {dimension_numbers = #tpu.dot_dimension_numbers<[1], [0], [0], [1], [0, 0, 1, 1], [], []>} : vector<96x48xbf16>, vector<48x32xbf16>, vector<96x32xf32> -> vector<96x32xf32>
    %42 = arith.addf %36, %41 : vector<96x32xf32>
    %c0_40 = arith.constant 0 : index
    %c41 = arith.constant 41 : index
    %c0_41 = arith.constant 0 : index
    %43 = vector.load %arg1[%c0_40, %c41, %c0_41] : memref<1x336x48xbf16, #tpu.memory_space<vmem>>, vector<1x96x48xbf16>
    %44 = vector.shape_cast %43 : vector<1x96x48xbf16> to vector<96x48xbf16>
    %c6_42 = arith.constant 6 : index
    %c0_43 = arith.constant 0 : index
    %c0_44 = arith.constant 0 : index
    %45 = vector.load %arg2[%c6_42, %c0_43, %c0_44] : memref<9x48x32xbf16, #tpu.memory_space<vmem>>, vector<1x48x32xbf16>
    %46 = vector.shape_cast %45 : vector<1x48x32xbf16> to vector<48x32xbf16>
    %cst_45 = arith.constant dense<0.000000e+00> : vector<96x32xf32>
    %47 = tpu.matmul %44, %46, %cst_45 {dimension_numbers = #tpu.dot_dimension_numbers<[1], [0], [0], [1], [0, 0, 1, 1], [], []>} : vector<96x48xbf16>, vector<48x32xbf16>, vector<96x32xf32> -> vector<96x32xf32>
    %48 = arith.addf %42, %47 : vector<96x32xf32>
    %c0_46 = arith.constant 0 : index
    %c42 = arith.constant 42 : index
    %c0_47 = arith.constant 0 : index
    %49 = vector.load %arg1[%c0_46, %c42, %c0_47] : memref<1x336x48xbf16, #tpu.memory_space<vmem>>, vector<1x96x48xbf16>
    %50 = vector.shape_cast %49 : vector<1x96x48xbf16> to vector<96x48xbf16>
    %c7_48 = arith.constant 7 : index
    %c0_49 = arith.constant 0 : index
    %c0_50 = arith.constant 0 : index
    %51 = vector.load %arg2[%c7_48, %c0_49, %c0_50] : memref<9x48x32xbf16, #tpu.memory_space<vmem>>, vector<1x48x32xbf16>
    %52 = vector.shape_cast %51 : vector<1x48x32xbf16> to vector<48x32xbf16>
    %cst_51 = arith.constant dense<0.000000e+00> : vector<96x32xf32>
    %53 = tpu.matmul %50, %52, %cst_51 {dimension_numbers = #tpu.dot_dimension_numbers<[1], [0], [0], [1], [0, 0, 1, 1], [], []>} : vector<96x48xbf16>, vector<48x32xbf16>, vector<96x32xf32> -> vector<96x32xf32>
    %54 = arith.addf %48, %53 : vector<96x32xf32>
    %c0_52 = arith.constant 0 : index
    %c43 = arith.constant 43 : index
    %c0_53 = arith.constant 0 : index
    %55 = vector.load %arg1[%c0_52, %c43, %c0_53] : memref<1x336x48xbf16, #tpu.memory_space<vmem>>, vector<1x96x48xbf16>
    %56 = vector.shape_cast %55 : vector<1x96x48xbf16> to vector<96x48xbf16>
    %c8 = arith.constant 8 : index
    %c0_54 = arith.constant 0 : index
    %c0_55 = arith.constant 0 : index
    %57 = vector.load %arg2[%c8, %c0_54, %c0_55] : memref<9x48x32xbf16, #tpu.memory_space<vmem>>, vector<1x48x32xbf16>
    %58 = vector.shape_cast %57 : vector<1x48x32xbf16> to vector<48x32xbf16>
    %cst_56 = arith.constant dense<0.000000e+00> : vector<96x32xf32>
    %59 = tpu.matmul %56, %58, %cst_56 {dimension_numbers = #tpu.dot_dimension_numbers<[1], [0], [0], [1], [0, 0, 1, 1], [], []>} : vector<96x48xbf16>, vector<48x32xbf16>, vector<96x32xf32> -> vector<96x32xf32>
    %60 = arith.addf %54, %59 : vector<96x32xf32>
    %61 = tpu.iota {dimensions = array<i32: 0>} : vector<96x1xi32>
    %c0_i32 = arith.constant 0 : i32
    %62 = vector.broadcast %c0_i32 : i32 to vector<96x1xi32>
    %63 = arith.addi %62, %61 : vector<96x1xi32>
    %c18_i32 = arith.constant 18 : i32
    %c0_i32_57 = arith.constant 0 : i32
    %64 = arith.cmpi eq, %c18_i32, %c0_i32_57 : i32
    %c1_i32 = arith.constant 1 : i32
    %65 = arith.select %64, %c1_i32, %c18_i32 : i32
    %66 = vector.broadcast %65 : i32 to vector<96x1xi32>
    %67 = arith.remsi %63, %66 : vector<96x1xi32>
    %c0_i32_58 = arith.constant 0 : i32
    %68 = vector.broadcast %c0_i32_58 : i32 to vector<96x1xi32>
    %69 = arith.cmpi ne, %67, %68 : vector<96x1xi32>
    %c0_i32_59 = arith.constant 0 : i32
    %70 = vector.broadcast %c0_i32_59 : i32 to vector<96x1xi32>
    %71 = arith.cmpi slt, %67, %70 : vector<96x1xi32>
    %c0_i32_60 = arith.constant 0 : i32
    %72 = arith.cmpi slt, %65, %c0_i32_60 : i32
    %73 = vector.broadcast %72 : i1 to vector<96x1xi1>
    %74 = vector.broadcast %73 : vector<96x1xi1> to vector<96x1xi1>
    %75 = arith.xori %71, %74 : vector<96x1xi1>
    %76 = arith.andi %75, %69 : vector<96x1xi1>
    %77 = vector.broadcast %65 : i32 to vector<96x1xi32>
    %78 = arith.addi %67, %77 : vector<96x1xi32>
    %79 = arith.select %76, %78, %67 : vector<96x1xi1>, vector<96x1xi32>
    %c16_i32 = arith.constant 16 : i32
    %80 = vector.broadcast %c16_i32 : i32 to vector<96x1xi32>
    %81 = arith.cmpi slt, %79, %80 : vector<96x1xi32>
    %82 = vector.broadcast %4 : vector<1x32xf32> to vector<96x32xf32>
    %83 = arith.mulf %60, %82 : vector<96x32xf32>
    %84 = vector.broadcast %5 : vector<1x32xf32> to vector<96x32xf32>
    %85 = arith.addf %83, %84 : vector<96x32xf32>
    %cst_61 = arith.constant 0.000000e+00 : f32
    %86 = vector.shape_cast %81 : vector<96x1xi1> to vector<96x1xi1>
    %87 = vector.broadcast %86 : vector<96x1xi1> to vector<96x32xi1>
    %88 = vector.broadcast %cst_61 : f32 to vector<96x32xf32>
    %89 = arith.select %87, %85, %88 : vector<96x32xi1>, vector<96x32xf32>
    %90 = arith.truncf %89 : vector<96x32xf32> to vector<96x32xbf16>
    %c24_62 = arith.constant 24 : index
    %c0_63 = arith.constant 0 : index
    %91 = vector.load %arg7[%c24_62, %c0_63] : memref<336x32xbf16, #tpu.memory_space<vmem>>, vector<96x32xbf16>
    tpu.vector_store %arg7[%c24_62, %c0_63], %90 {strides = array<i32>} : memref<336x32xbf16, #tpu.memory_space<vmem>>, vector<96x32xbf16>,
    %cst_64 = arith.constant 0.000000e+00 : f32
    %92 = vector.broadcast %cst_64 : f32 to vector<96x32xf32>
    %c0_65 = arith.constant 0 : index
    %c101 = arith.constant 101 : index
    %c0_66 = arith.constant 0 : index
    %93 = vector.load %arg1[%c0_65, %c101, %c0_66] : memref<1x336x48xbf16, #tpu.memory_space<vmem>>, vector<1x96x48xbf16>
    %94 = vector.shape_cast %93 : vector<1x96x48xbf16> to vector<96x48xbf16>
    %c0_67 = arith.constant 0 : index
    %c0_68 = arith.constant 0 : index
    %c0_69 = arith.constant 0 : index
    %95 = vector.load %arg2[%c0_67, %c0_68, %c0_69] : memref<9x48x32xbf16, #tpu.memory_space<vmem>>, vector<1x48x32xbf16>
    %96 = vector.shape_cast %95 : vector<1x48x32xbf16> to vector<48x32xbf16>
    %cst_70 = arith.constant dense<0.000000e+00> : vector<96x32xf32>
    %97 = tpu.matmul %94, %96, %cst_70 {dimension_numbers = #tpu.dot_dimension_numbers<[1], [0], [0], [1], [0, 0, 1, 1], [], []>} : vector<96x48xbf16>, vector<48x32xbf16>, vector<96x32xf32> -> vector<96x32xf32>
    %98 = arith.addf %92, %97 : vector<96x32xf32>
    %c0_71 = arith.constant 0 : index
    %c102 = arith.constant 102 : index
    %c0_72 = arith.constant 0 : index
    %99 = vector.load %arg1[%c0_71, %c102, %c0_72] : memref<1x336x48xbf16, #tpu.memory_space<vmem>>, vector<1x96x48xbf16>
    %100 = vector.shape_cast %99 : vector<1x96x48xbf16> to vector<96x48xbf16>
    %c1_73 = arith.constant 1 : index
    %c0_74 = arith.constant 0 : index
    %c0_75 = arith.constant 0 : index
    %101 = vector.load %arg2[%c1_73, %c0_74, %c0_75] : memref<9x48x32xbf16, #tpu.memory_space<vmem>>, vector<1x48x32xbf16>
    %102 = vector.shape_cast %101 : vector<1x48x32xbf16> to vector<48x32xbf16>
    %cst_76 = arith.constant dense<0.000000e+00> : vector<96x32xf32>
    %103 = tpu.matmul %100, %102, %cst_76 {dimension_numbers = #tpu.dot_dimension_numbers<[1], [0], [0], [1], [0, 0, 1, 1], [], []>} : vector<96x48xbf16>, vector<48x32xbf16>, vector<96x32xf32> -> vector<96x32xf32>
    %104 = arith.addf %98, %103 : vector<96x32xf32>
    %c0_77 = arith.constant 0 : index
    %c103 = arith.constant 103 : index
    %c0_78 = arith.constant 0 : index
    %105 = vector.load %arg1[%c0_77, %c103, %c0_78] : memref<1x336x48xbf16, #tpu.memory_space<vmem>>, vector<1x96x48xbf16>
    %106 = vector.shape_cast %105 : vector<1x96x48xbf16> to vector<96x48xbf16>
    %c2_79 = arith.constant 2 : index
    %c0_80 = arith.constant 0 : index
    %c0_81 = arith.constant 0 : index
    %107 = vector.load %arg2[%c2_79, %c0_80, %c0_81] : memref<9x48x32xbf16, #tpu.memory_space<vmem>>, vector<1x48x32xbf16>
    %108 = vector.shape_cast %107 : vector<1x48x32xbf16> to vector<48x32xbf16>
    %cst_82 = arith.constant dense<0.000000e+00> : vector<96x32xf32>
    %109 = tpu.matmul %106, %108, %cst_82 {dimension_numbers = #tpu.dot_dimension_numbers<[1], [0], [0], [1], [0, 0, 1, 1], [], []>} : vector<96x48xbf16>, vector<48x32xbf16>, vector<96x32xf32> -> vector<96x32xf32>
    %110 = arith.addf %104, %109 : vector<96x32xf32>
    %c0_83 = arith.constant 0 : index
    %c119 = arith.constant 119 : index
    %c0_84 = arith.constant 0 : index
    %111 = vector.load %arg1[%c0_83, %c119, %c0_84] : memref<1x336x48xbf16, #tpu.memory_space<vmem>>, vector<1x96x48xbf16>
    %112 = vector.shape_cast %111 : vector<1x96x48xbf16> to vector<96x48xbf16>
    %c3_85 = arith.constant 3 : index
    %c0_86 = arith.constant 0 : index
    %c0_87 = arith.constant 0 : index
    %113 = vector.load %arg2[%c3_85, %c0_86, %c0_87] : memref<9x48x32xbf16, #tpu.memory_space<vmem>>, vector<1x48x32xbf16>
    %114 = vector.shape_cast %113 : vector<1x48x32xbf16> to vector<48x32xbf16>
    %cst_88 = arith.constant dense<0.000000e+00> : vector<96x32xf32>
    %115 = tpu.matmul %112, %114, %cst_88 {dimension_numbers = #tpu.dot_dimension_numbers<[1], [0], [0], [1], [0, 0, 1, 1], [], []>} : vector<96x48xbf16>, vector<48x32xbf16>, vector<96x32xf32> -> vector<96x32xf32>
    %116 = arith.addf %110, %115 : vector<96x32xf32>
    %c0_89 = arith.constant 0 : index
    %c120 = arith.constant 120 : index
    %c0_90 = arith.constant 0 : index
    %117 = vector.load %arg1[%c0_89, %c120, %c0_90] : memref<1x336x48xbf16, #tpu.memory_space<vmem>>, vector<1x96x48xbf16>
    %118 = vector.shape_cast %117 : vector<1x96x48xbf16> to vector<96x48xbf16>
    %c4_91 = arith.constant 4 : index
    %c0_92 = arith.constant 0 : index
    %c0_93 = arith.constant 0 : index
    %119 = vector.load %arg2[%c4_91, %c0_92, %c0_93] : memref<9x48x32xbf16, #tpu.memory_space<vmem>>, vector<1x48x32xbf16>
    %120 = vector.shape_cast %119 : vector<1x48x32xbf16> to vector<48x32xbf16>
    %cst_94 = arith.constant dense<0.000000e+00> : vector<96x32xf32>
    %121 = tpu.matmul %118, %120, %cst_94 {dimension_numbers = #tpu.dot_dimension_numbers<[1], [0], [0], [1], [0, 0, 1, 1], [], []>} : vector<96x48xbf16>, vector<48x32xbf16>, vector<96x32xf32> -> vector<96x32xf32>
    %122 = arith.addf %116, %121 : vector<96x32xf32>
    %c0_95 = arith.constant 0 : index
    %c121 = arith.constant 121 : index
    %c0_96 = arith.constant 0 : index
    %123 = vector.load %arg1[%c0_95, %c121, %c0_96] : memref<1x336x48xbf16, #tpu.memory_space<vmem>>, vector<1x96x48xbf16>
    %124 = vector.shape_cast %123 : vector<1x96x48xbf16> to vector<96x48xbf16>
    %c5_97 = arith.constant 5 : index
    %c0_98 = arith.constant 0 : index
    %c0_99 = arith.constant 0 : index
    %125 = vector.load %arg2[%c5_97, %c0_98, %c0_99] : memref<9x48x32xbf16, #tpu.memory_space<vmem>>, vector<1x48x32xbf16>
    %126 = vector.shape_cast %125 : vector<1x48x32xbf16> to vector<48x32xbf16>
    %cst_100 = arith.constant dense<0.000000e+00> : vector<96x32xf32>
    %127 = tpu.matmul %124, %126, %cst_100 {dimension_numbers = #tpu.dot_dimension_numbers<[1], [0], [0], [1], [0, 0, 1, 1], [], []>} : vector<96x48xbf16>, vector<48x32xbf16>, vector<96x32xf32> -> vector<96x32xf32>
    %128 = arith.addf %122, %127 : vector<96x32xf32>
    %c0_101 = arith.constant 0 : index
    %c137 = arith.constant 137 : index
    %c0_102 = arith.constant 0 : index
    %129 = vector.load %arg1[%c0_101, %c137, %c0_102] : memref<1x336x48xbf16, #tpu.memory_space<vmem>>, vector<1x96x48xbf16>
    %130 = vector.shape_cast %129 : vector<1x96x48xbf16> to vector<96x48xbf16>
    %c6_103 = arith.constant 6 : index
    %c0_104 = arith.constant 0 : index
    %c0_105 = arith.constant 0 : index
    %131 = vector.load %arg2[%c6_103, %c0_104, %c0_105] : memref<9x48x32xbf16, #tpu.memory_space<vmem>>, vector<1x48x32xbf16>
    %132 = vector.shape_cast %131 : vector<1x48x32xbf16> to vector<48x32xbf16>
    %cst_106 = arith.constant dense<0.000000e+00> : vector<96x32xf32>
    %133 = tpu.matmul %130, %132, %cst_106 {dimension_numbers = #tpu.dot_dimension_numbers<[1], [0], [0], [1], [0, 0, 1, 1], [], []>} : vector<96x48xbf16>, vector<48x32xbf16>, vector<96x32xf32> -> vector<96x32xf32>
    %134 = arith.addf %128, %133 : vector<96x32xf32>
    %c0_107 = arith.constant 0 : index
    %c138 = arith.constant 138 : index
    %c0_108 = arith.constant 0 : index
    %135 = vector.load %arg1[%c0_107, %c138, %c0_108] : memref<1x336x48xbf16, #tpu.memory_space<vmem>>, vector<1x96x48xbf16>
    %136 = vector.shape_cast %135 : vector<1x96x48xbf16> to vector<96x48xbf16>
    %c7_109 = arith.constant 7 : index
    %c0_110 = arith.constant 0 : index
    %c0_111 = arith.constant 0 : index
    %137 = vector.load %arg2[%c7_109, %c0_110, %c0_111] : memref<9x48x32xbf16, #tpu.memory_space<vmem>>, vector<1x48x32xbf16>
    %138 = vector.shape_cast %137 : vector<1x48x32xbf16> to vector<48x32xbf16>
    %cst_112 = arith.constant dense<0.000000e+00> : vector<96x32xf32>
    %139 = tpu.matmul %136, %138, %cst_112 {dimension_numbers = #tpu.dot_dimension_numbers<[1], [0], [0], [1], [0, 0, 1, 1], [], []>} : vector<96x48xbf16>, vector<48x32xbf16>, vector<96x32xf32> -> vector<96x32xf32>
    %140 = arith.addf %134, %139 : vector<96x32xf32>
    %c0_113 = arith.constant 0 : index
    %c139 = arith.constant 139 : index
    %c0_114 = arith.constant 0 : index
    %141 = vector.load %arg1[%c0_113, %c139, %c0_114] : memref<1x336x48xbf16, #tpu.memory_space<vmem>>, vector<1x96x48xbf16>
    %142 = vector.shape_cast %141 : vector<1x96x48xbf16> to vector<96x48xbf16>
    %c8_115 = arith.constant 8 : index
    %c0_116 = arith.constant 0 : index
    %c0_117 = arith.constant 0 : index
    %143 = vector.load %arg2[%c8_115, %c0_116, %c0_117] : memref<9x48x32xbf16, #tpu.memory_space<vmem>>, vector<1x48x32xbf16>
    %144 = vector.shape_cast %143 : vector<1x48x32xbf16> to vector<48x32xbf16>
    %cst_118 = arith.constant dense<0.000000e+00> : vector<96x32xf32>
    %145 = tpu.matmul %142, %144, %cst_118 {dimension_numbers = #tpu.dot_dimension_numbers<[1], [0], [0], [1], [0, 0, 1, 1], [], []>} : vector<96x48xbf16>, vector<48x32xbf16>, vector<96x32xf32> -> vector<96x32xf32>
    %146 = arith.addf %140, %145 : vector<96x32xf32>
    %147 = tpu.iota {dimensions = array<i32: 0>} : vector<96x1xi32>
    %c96_i32 = arith.constant 96 : i32
    %148 = vector.broadcast %c96_i32 : i32 to vector<96x1xi32>
    %149 = arith.addi %148, %147 : vector<96x1xi32>
    %c18_i32_119 = arith.constant 18 : i32
    %c0_i32_120 = arith.constant 0 : i32
    %150 = arith.cmpi eq, %c18_i32_119, %c0_i32_120 : i32
    %c1_i32_121 = arith.constant 1 : i32
    %151 = arith.select %150, %c1_i32_121, %c18_i32_119 : i32
    %152 = vector.broadcast %151 : i32 to vector<96x1xi32>
    %153 = arith.remsi %149, %152 : vector<96x1xi32>
    %c0_i32_122 = arith.constant 0 : i32
    %154 = vector.broadcast %c0_i32_122 : i32 to vector<96x1xi32>
    %155 = arith.cmpi ne, %153, %154 : vector<96x1xi32>
    %c0_i32_123 = arith.constant 0 : i32
    %156 = vector.broadcast %c0_i32_123 : i32 to vector<96x1xi32>
    %157 = arith.cmpi slt, %153, %156 : vector<96x1xi32>
    %c0_i32_124 = arith.constant 0 : i32
    %158 = arith.cmpi slt, %151, %c0_i32_124 : i32
    %159 = vector.broadcast %158 : i1 to vector<96x1xi1>
    %160 = vector.broadcast %159 : vector<96x1xi1> to vector<96x1xi1>
    %161 = arith.xori %157, %160 : vector<96x1xi1>
    %162 = arith.andi %161, %155 : vector<96x1xi1>
    %163 = vector.broadcast %151 : i32 to vector<96x1xi32>
    %164 = arith.addi %153, %163 : vector<96x1xi32>
    %165 = arith.select %162, %164, %153 : vector<96x1xi1>, vector<96x1xi32>
    %c16_i32_125 = arith.constant 16 : i32
    %166 = vector.broadcast %c16_i32_125 : i32 to vector<96x1xi32>
    %167 = arith.cmpi slt, %165, %166 : vector<96x1xi32>
    %168 = vector.broadcast %4 : vector<1x32xf32> to vector<96x32xf32>
    %169 = arith.mulf %146, %168 : vector<96x32xf32>
    %170 = vector.broadcast %5 : vector<1x32xf32> to vector<96x32xf32>
    %171 = arith.addf %169, %170 : vector<96x32xf32>
    %cst_126 = arith.constant 0.000000e+00 : f32
    %172 = vector.shape_cast %167 : vector<96x1xi1> to vector<96x1xi1>
    %173 = vector.broadcast %172 : vector<96x1xi1> to vector<96x32xi1>
    %174 = vector.broadcast %cst_126 : f32 to vector<96x32xf32>
    %175 = arith.select %173, %171, %174 : vector<96x32xi1>, vector<96x32xf32>
    %176 = arith.truncf %175 : vector<96x32xf32> to vector<96x32xbf16>
    %c120_127 = arith.constant 120 : index
    %c0_128 = arith.constant 0 : index
    %177 = vector.load %arg7[%c120_127, %c0_128] : memref<336x32xbf16, #tpu.memory_space<vmem>>, vector<96x32xbf16>
    tpu.vector_store %arg7[%c120_127, %c0_128], %176 {strides = array<i32>} : memref<336x32xbf16, #tpu.memory_space<vmem>>, vector<96x32xbf16>,
    %cst_129 = arith.constant 0.000000e+00 : f32
    %178 = vector.broadcast %cst_129 : f32 to vector<96x32xf32>
    %c0_130 = arith.constant 0 : index
    %c197 = arith.constant 197 : index
    %c0_131 = arith.constant 0 : index
    %179 = vector.load %arg1[%c0_130, %c197, %c0_131] : memref<1x336x48xbf16, #tpu.memory_space<vmem>>, vector<1x96x48xbf16>
    %180 = vector.shape_cast %179 : vector<1x96x48xbf16> to vector<96x48xbf16>
    %c0_132 = arith.constant 0 : index
    %c0_133 = arith.constant 0 : index
    %c0_134 = arith.constant 0 : index
    %181 = vector.load %arg2[%c0_132, %c0_133, %c0_134] : memref<9x48x32xbf16, #tpu.memory_space<vmem>>, vector<1x48x32xbf16>
    %182 = vector.shape_cast %181 : vector<1x48x32xbf16> to vector<48x32xbf16>
    %cst_135 = arith.constant dense<0.000000e+00> : vector<96x32xf32>
    %183 = tpu.matmul %180, %182, %cst_135 {dimension_numbers = #tpu.dot_dimension_numbers<[1], [0], [0], [1], [0, 0, 1, 1], [], []>} : vector<96x48xbf16>, vector<48x32xbf16>, vector<96x32xf32> -> vector<96x32xf32>
    %184 = arith.addf %178, %183 : vector<96x32xf32>
    %c0_136 = arith.constant 0 : index
    %c198 = arith.constant 198 : index
    %c0_137 = arith.constant 0 : index
    %185 = vector.load %arg1[%c0_136, %c198, %c0_137] : memref<1x336x48xbf16, #tpu.memory_space<vmem>>, vector<1x96x48xbf16>
    %186 = vector.shape_cast %185 : vector<1x96x48xbf16> to vector<96x48xbf16>
    %c1_138 = arith.constant 1 : index
    %c0_139 = arith.constant 0 : index
    %c0_140 = arith.constant 0 : index
    %187 = vector.load %arg2[%c1_138, %c0_139, %c0_140] : memref<9x48x32xbf16, #tpu.memory_space<vmem>>, vector<1x48x32xbf16>
    %188 = vector.shape_cast %187 : vector<1x48x32xbf16> to vector<48x32xbf16>
    %cst_141 = arith.constant dense<0.000000e+00> : vector<96x32xf32>
    %189 = tpu.matmul %186, %188, %cst_141 {dimension_numbers = #tpu.dot_dimension_numbers<[1], [0], [0], [1], [0, 0, 1, 1], [], []>} : vector<96x48xbf16>, vector<48x32xbf16>, vector<96x32xf32> -> vector<96x32xf32>
    %190 = arith.addf %184, %189 : vector<96x32xf32>
    %c0_142 = arith.constant 0 : index
    %c199 = arith.constant 199 : index
    %c0_143 = arith.constant 0 : index
    %191 = vector.load %arg1[%c0_142, %c199, %c0_143] : memref<1x336x48xbf16, #tpu.memory_space<vmem>>, vector<1x96x48xbf16>
    %192 = vector.shape_cast %191 : vector<1x96x48xbf16> to vector<96x48xbf16>
    %c2_144 = arith.constant 2 : index
    %c0_145 = arith.constant 0 : index
    %c0_146 = arith.constant 0 : index
    %193 = vector.load %arg2[%c2_144, %c0_145, %c0_146] : memref<9x48x32xbf16, #tpu.memory_space<vmem>>, vector<1x48x32xbf16>
    %194 = vector.shape_cast %193 : vector<1x48x32xbf16> to vector<48x32xbf16>
    %cst_147 = arith.constant dense<0.000000e+00> : vector<96x32xf32>
    %195 = tpu.matmul %192, %194, %cst_147 {dimension_numbers = #tpu.dot_dimension_numbers<[1], [0], [0], [1], [0, 0, 1, 1], [], []>} : vector<96x48xbf16>, vector<48x32xbf16>, vector<96x32xf32> -> vector<96x32xf32>
    %196 = arith.addf %190, %195 : vector<96x32xf32>
    %c0_148 = arith.constant 0 : index
    %c215 = arith.constant 215 : index
    %c0_149 = arith.constant 0 : index
    %197 = vector.load %arg1[%c0_148, %c215, %c0_149] : memref<1x336x48xbf16, #tpu.memory_space<vmem>>, vector<1x96x48xbf16>
    %198 = vector.shape_cast %197 : vector<1x96x48xbf16> to vector<96x48xbf16>
    %c3_150 = arith.constant 3 : index
    %c0_151 = arith.constant 0 : index
    %c0_152 = arith.constant 0 : index
    %199 = vector.load %arg2[%c3_150, %c0_151, %c0_152] : memref<9x48x32xbf16, #tpu.memory_space<vmem>>, vector<1x48x32xbf16>
    %200 = vector.shape_cast %199 : vector<1x48x32xbf16> to vector<48x32xbf16>
    %cst_153 = arith.constant dense<0.000000e+00> : vector<96x32xf32>
    %201 = tpu.matmul %198, %200, %cst_153 {dimension_numbers = #tpu.dot_dimension_numbers<[1], [0], [0], [1], [0, 0, 1, 1], [], []>} : vector<96x48xbf16>, vector<48x32xbf16>, vector<96x32xf32> -> vector<96x32xf32>
    %202 = arith.addf %196, %201 : vector<96x32xf32>
    %c0_154 = arith.constant 0 : index
    %c216 = arith.constant 216 : index
    %c0_155 = arith.constant 0 : index
    %203 = vector.load %arg1[%c0_154, %c216, %c0_155] : memref<1x336x48xbf16, #tpu.memory_space<vmem>>, vector<1x96x48xbf16>
    %204 = vector.shape_cast %203 : vector<1x96x48xbf16> to vector<96x48xbf16>
    %c4_156 = arith.constant 4 : index
    %c0_157 = arith.constant 0 : index
    %c0_158 = arith.constant 0 : index
    %205 = vector.load %arg2[%c4_156, %c0_157, %c0_158] : memref<9x48x32xbf16, #tpu.memory_space<vmem>>, vector<1x48x32xbf16>
    %206 = vector.shape_cast %205 : vector<1x48x32xbf16> to vector<48x32xbf16>
    %cst_159 = arith.constant dense<0.000000e+00> : vector<96x32xf32>
    %207 = tpu.matmul %204, %206, %cst_159 {dimension_numbers = #tpu.dot_dimension_numbers<[1], [0], [0], [1], [0, 0, 1, 1], [], []>} : vector<96x48xbf16>, vector<48x32xbf16>, vector<96x32xf32> -> vector<96x32xf32>
    %208 = arith.addf %202, %207 : vector<96x32xf32>
    %c0_160 = arith.constant 0 : index
    %c217 = arith.constant 217 : index
    %c0_161 = arith.constant 0 : index
    %209 = vector.load %arg1[%c0_160, %c217, %c0_161] : memref<1x336x48xbf16, #tpu.memory_space<vmem>>, vector<1x96x48xbf16>
    %210 = vector.shape_cast %209 : vector<1x96x48xbf16> to vector<96x48xbf16>
    %c5_162 = arith.constant 5 : index
    %c0_163 = arith.constant 0 : index
    %c0_164 = arith.constant 0 : index
    %211 = vector.load %arg2[%c5_162, %c0_163, %c0_164] : memref<9x48x32xbf16, #tpu.memory_space<vmem>>, vector<1x48x32xbf16>
    %212 = vector.shape_cast %211 : vector<1x48x32xbf16> to vector<48x32xbf16>
    %cst_165 = arith.constant dense<0.000000e+00> : vector<96x32xf32>
    %213 = tpu.matmul %210, %212, %cst_165 {dimension_numbers = #tpu.dot_dimension_numbers<[1], [0], [0], [1], [0, 0, 1, 1], [], []>} : vector<96x48xbf16>, vector<48x32xbf16>, vector<96x32xf32> -> vector<96x32xf32>
    %214 = arith.addf %208, %213 : vector<96x32xf32>
    %c0_166 = arith.constant 0 : index
    %c233 = arith.constant 233 : index
    %c0_167 = arith.constant 0 : index
    %215 = vector.load %arg1[%c0_166, %c233, %c0_167] : memref<1x336x48xbf16, #tpu.memory_space<vmem>>, vector<1x96x48xbf16>
    %216 = vector.shape_cast %215 : vector<1x96x48xbf16> to vector<96x48xbf16>
    %c6_168 = arith.constant 6 : index
    %c0_169 = arith.constant 0 : index
    %c0_170 = arith.constant 0 : index
    %217 = vector.load %arg2[%c6_168, %c0_169, %c0_170] : memref<9x48x32xbf16, #tpu.memory_space<vmem>>, vector<1x48x32xbf16>
    %218 = vector.shape_cast %217 : vector<1x48x32xbf16> to vector<48x32xbf16>
    %cst_171 = arith.constant dense<0.000000e+00> : vector<96x32xf32>
    %219 = tpu.matmul %216, %218, %cst_171 {dimension_numbers = #tpu.dot_dimension_numbers<[1], [0], [0], [1], [0, 0, 1, 1], [], []>} : vector<96x48xbf16>, vector<48x32xbf16>, vector<96x32xf32> -> vector<96x32xf32>
    %220 = arith.addf %214, %219 : vector<96x32xf32>
    %c0_172 = arith.constant 0 : index
    %c234 = arith.constant 234 : index
    %c0_173 = arith.constant 0 : index
    %221 = vector.load %arg1[%c0_172, %c234, %c0_173] : memref<1x336x48xbf16, #tpu.memory_space<vmem>>, vector<1x96x48xbf16>
    %222 = vector.shape_cast %221 : vector<1x96x48xbf16> to vector<96x48xbf16>
    %c7_174 = arith.constant 7 : index
    %c0_175 = arith.constant 0 : index
    %c0_176 = arith.constant 0 : index
    %223 = vector.load %arg2[%c7_174, %c0_175, %c0_176] : memref<9x48x32xbf16, #tpu.memory_space<vmem>>, vector<1x48x32xbf16>
    %224 = vector.shape_cast %223 : vector<1x48x32xbf16> to vector<48x32xbf16>
    %cst_177 = arith.constant dense<0.000000e+00> : vector<96x32xf32>
    %225 = tpu.matmul %222, %224, %cst_177 {dimension_numbers = #tpu.dot_dimension_numbers<[1], [0], [0], [1], [0, 0, 1, 1], [], []>} : vector<96x48xbf16>, vector<48x32xbf16>, vector<96x32xf32> -> vector<96x32xf32>
    %226 = arith.addf %220, %225 : vector<96x32xf32>
    %c0_178 = arith.constant 0 : index
    %c235 = arith.constant 235 : index
    %c0_179 = arith.constant 0 : index
    %227 = vector.load %arg1[%c0_178, %c235, %c0_179] : memref<1x336x48xbf16, #tpu.memory_space<vmem>>, vector<1x96x48xbf16>
    %228 = vector.shape_cast %227 : vector<1x96x48xbf16> to vector<96x48xbf16>
    %c8_180 = arith.constant 8 : index
    %c0_181 = arith.constant 0 : index
    %c0_182 = arith.constant 0 : index
    %229 = vector.load %arg2[%c8_180, %c0_181, %c0_182] : memref<9x48x32xbf16, #tpu.memory_space<vmem>>, vector<1x48x32xbf16>
    %230 = vector.shape_cast %229 : vector<1x48x32xbf16> to vector<48x32xbf16>
    %cst_183 = arith.constant dense<0.000000e+00> : vector<96x32xf32>
    %231 = tpu.matmul %228, %230, %cst_183 {dimension_numbers = #tpu.dot_dimension_numbers<[1], [0], [0], [1], [0, 0, 1, 1], [], []>} : vector<96x48xbf16>, vector<48x32xbf16>, vector<96x32xf32> -> vector<96x32xf32>
    %232 = arith.addf %226, %231 : vector<96x32xf32>
    %233 = tpu.iota {dimensions = array<i32: 0>} : vector<96x1xi32>
    %c192_i32 = arith.constant 192 : i32
    %234 = vector.broadcast %c192_i32 : i32 to vector<96x1xi32>
    %235 = arith.addi %234, %233 : vector<96x1xi32>
    %c18_i32_184 = arith.constant 18 : i32
    %c0_i32_185 = arith.constant 0 : i32
    %236 = arith.cmpi eq, %c18_i32_184, %c0_i32_185 : i32
    %c1_i32_186 = arith.constant 1 : i32
    %237 = arith.select %236, %c1_i32_186, %c18_i32_184 : i32
    %238 = vector.broadcast %237 : i32 to vector<96x1xi32>
    %239 = arith.remsi %235, %238 : vector<96x1xi32>
    %c0_i32_187 = arith.constant 0 : i32
    %240 = vector.broadcast %c0_i32_187 : i32 to vector<96x1xi32>
    %241 = arith.cmpi ne, %239, %240 : vector<96x1xi32>
    %c0_i32_188 = arith.constant 0 : i32
    %242 = vector.broadcast %c0_i32_188 : i32 to vector<96x1xi32>
    %243 = arith.cmpi slt, %239, %242 : vector<96x1xi32>
    %c0_i32_189 = arith.constant 0 : i32
    %244 = arith.cmpi slt, %237, %c0_i32_189 : i32
    %245 = vector.broadcast %244 : i1 to vector<96x1xi1>
    %246 = vector.broadcast %245 : vector<96x1xi1> to vector<96x1xi1>
    %247 = arith.xori %243, %246 : vector<96x1xi1>
    %248 = arith.andi %247, %241 : vector<96x1xi1>
    %249 = vector.broadcast %237 : i32 to vector<96x1xi32>
    %250 = arith.addi %239, %249 : vector<96x1xi32>
    %251 = arith.select %248, %250, %239 : vector<96x1xi1>, vector<96x1xi32>
    %c16_i32_190 = arith.constant 16 : i32
    %252 = vector.broadcast %c16_i32_190 : i32 to vector<96x1xi32>
    %253 = arith.cmpi slt, %251, %252 : vector<96x1xi32>
    %254 = vector.broadcast %4 : vector<1x32xf32> to vector<96x32xf32>
    %255 = arith.mulf %232, %254 : vector<96x32xf32>
    %256 = vector.broadcast %5 : vector<1x32xf32> to vector<96x32xf32>
    %257 = arith.addf %255, %256 : vector<96x32xf32>
    %cst_191 = arith.constant 0.000000e+00 : f32
    %258 = vector.shape_cast %253 : vector<96x1xi1> to vector<96x1xi1>
    %259 = vector.broadcast %258 : vector<96x1xi1> to vector<96x32xi1>
    %260 = vector.broadcast %cst_191 : f32 to vector<96x32xf32>
    %261 = arith.select %259, %257, %260 : vector<96x32xi1>, vector<96x32xf32>
    %262 = arith.truncf %261 : vector<96x32xf32> to vector<96x32xbf16>
    %c216_192 = arith.constant 216 : index
    %c0_193 = arith.constant 0 : index
    %263 = vector.load %arg7[%c216_192, %c0_193] : memref<336x32xbf16, #tpu.memory_space<vmem>>, vector<96x32xbf16>
    tpu.vector_store %arg7[%c216_192, %c0_193], %262 {strides = array<i32>} : memref<336x32xbf16, #tpu.memory_space<vmem>>, vector<96x32xbf16>,
    %c1_194 = arith.constant 1 : index
    %c0_195 = arith.constant 0 : index
    %264 = vector.load %arg4[%c1_194, %c0_195] : memref<2x32xf32, #tpu.memory_space<vmem>>, vector<1x32xf32>
    %c1_196 = arith.constant 1 : index
    %c0_197 = arith.constant 0 : index
    %265 = vector.load %arg5[%c1_196, %c0_197] : memref<2x32xf32, #tpu.memory_space<vmem>>, vector<1x32xf32>
    %cst_198 = arith.constant 0.000000e+00 : f32
    %266 = vector.broadcast %cst_198 : f32 to vector<96x32xf32>
    %c5_199 = arith.constant 5 : index
    %c0_200 = arith.constant 0 : index
    %267 = vector.load %arg7[%c5_199, %c0_200] : memref<336x32xbf16, #tpu.memory_space<vmem>>, vector<96x32xbf16>
    %c0_201 = arith.constant 0 : index
    %c0_202 = arith.constant 0 : index
    %c0_203 = arith.constant 0 : index
    %268 = vector.load %arg3[%c0_201, %c0_202, %c0_203] : memref<9x32x32xbf16, #tpu.memory_space<vmem>>, vector<1x32x32xbf16>
    %269 = vector.shape_cast %268 : vector<1x32x32xbf16> to vector<32x32xbf16>
    %cst_204 = arith.constant dense<0.000000e+00> : vector<96x32xf32>
    %270 = tpu.matmul %267, %269, %cst_204 {dimension_numbers = #tpu.dot_dimension_numbers<[1], [0], [0], [1], [0, 0, 1, 1], [], []>} : vector<96x32xbf16>, vector<32x32xbf16>, vector<96x32xf32> -> vector<96x32xf32>
    %271 = arith.addf %266, %270 : vector<96x32xf32>
    %c6_205 = arith.constant 6 : index
    %c0_206 = arith.constant 0 : index
    %272 = vector.load %arg7[%c6_205, %c0_206] : memref<336x32xbf16, #tpu.memory_space<vmem>>, vector<96x32xbf16>
    %c1_207 = arith.constant 1 : index
    %c0_208 = arith.constant 0 : index
    %c0_209 = arith.constant 0 : index
    %273 = vector.load %arg3[%c1_207, %c0_208, %c0_209] : memref<9x32x32xbf16, #tpu.memory_space<vmem>>, vector<1x32x32xbf16>
    %274 = vector.shape_cast %273 : vector<1x32x32xbf16> to vector<32x32xbf16>
    %cst_210 = arith.constant dense<0.000000e+00> : vector<96x32xf32>
    %275 = tpu.matmul %272, %274, %cst_210 {dimension_numbers = #tpu.dot_dimension_numbers<[1], [0], [0], [1], [0, 0, 1, 1], [], []>} : vector<96x32xbf16>, vector<32x32xbf16>, vector<96x32xf32> -> vector<96x32xf32>
    %276 = arith.addf %271, %275 : vector<96x32xf32>
    %c7_211 = arith.constant 7 : index
    %c0_212 = arith.constant 0 : index
    %277 = vector.load %arg7[%c7_211, %c0_212] : memref<336x32xbf16, #tpu.memory_space<vmem>>, vector<96x32xbf16>
    %c2_213 = arith.constant 2 : index
    %c0_214 = arith.constant 0 : index
    %c0_215 = arith.constant 0 : index
    %278 = vector.load %arg3[%c2_213, %c0_214, %c0_215] : memref<9x32x32xbf16, #tpu.memory_space<vmem>>, vector<1x32x32xbf16>
    %279 = vector.shape_cast %278 : vector<1x32x32xbf16> to vector<32x32xbf16>
    %cst_216 = arith.constant dense<0.000000e+00> : vector<96x32xf32>
    %280 = tpu.matmul %277, %279, %cst_216 {dimension_numbers = #tpu.dot_dimension_numbers<[1], [0], [0], [1], [0, 0, 1, 1], [], []>} : vector<96x32xbf16>, vector<32x32xbf16>, vector<96x32xf32> -> vector<96x32xf32>
    %281 = arith.addf %276, %280 : vector<96x32xf32>
    %c23_217 = arith.constant 23 : index
    %c0_218 = arith.constant 0 : index
    %282 = vector.load %arg7[%c23_217, %c0_218] : memref<336x32xbf16, #tpu.memory_space<vmem>>, vector<96x32xbf16>
    %c3_219 = arith.constant 3 : index
    %c0_220 = arith.constant 0 : index
    %c0_221 = arith.constant 0 : index
    %283 = vector.load %arg3[%c3_219, %c0_220, %c0_221] : memref<9x32x32xbf16, #tpu.memory_space<vmem>>, vector<1x32x32xbf16>
    %284 = vector.shape_cast %283 : vector<1x32x32xbf16> to vector<32x32xbf16>
    %cst_222 = arith.constant dense<0.000000e+00> : vector<96x32xf32>
    %285 = tpu.matmul %282, %284, %cst_222 {dimension_numbers = #tpu.dot_dimension_numbers<[1], [0], [0], [1], [0, 0, 1, 1], [], []>} : vector<96x32xbf16>, vector<32x32xbf16>, vector<96x32xf32> -> vector<96x32xf32>
    %286 = arith.addf %281, %285 : vector<96x32xf32>
    %c24_223 = arith.constant 24 : index
    %c0_224 = arith.constant 0 : index
    %287 = vector.load %arg7[%c24_223, %c0_224] : memref<336x32xbf16, #tpu.memory_space<vmem>>, vector<96x32xbf16>
    %c4_225 = arith.constant 4 : index
    %c0_226 = arith.constant 0 : index
    %c0_227 = arith.constant 0 : index
    %288 = vector.load %arg3[%c4_225, %c0_226, %c0_227] : memref<9x32x32xbf16, #tpu.memory_space<vmem>>, vector<1x32x32xbf16>
    %289 = vector.shape_cast %288 : vector<1x32x32xbf16> to vector<32x32xbf16>
    %cst_228 = arith.constant dense<0.000000e+00> : vector<96x32xf32>
    %290 = tpu.matmul %287, %289, %cst_228 {dimension_numbers = #tpu.dot_dimension_numbers<[1], [0], [0], [1], [0, 0, 1, 1], [], []>} : vector<96x32xbf16>, vector<32x32xbf16>, vector<96x32xf32> -> vector<96x32xf32>
    %291 = arith.addf %286, %290 : vector<96x32xf32>
    %c25_229 = arith.constant 25 : index
    %c0_230 = arith.constant 0 : index
    %292 = vector.load %arg7[%c25_229, %c0_230] : memref<336x32xbf16, #tpu.memory_space<vmem>>, vector<96x32xbf16>
    %c5_231 = arith.constant 5 : index
    %c0_232 = arith.constant 0 : index
    %c0_233 = arith.constant 0 : index
    %293 = vector.load %arg3[%c5_231, %c0_232, %c0_233] : memref<9x32x32xbf16, #tpu.memory_space<vmem>>, vector<1x32x32xbf16>
    %294 = vector.shape_cast %293 : vector<1x32x32xbf16> to vector<32x32xbf16>
    %cst_234 = arith.constant dense<0.000000e+00> : vector<96x32xf32>
    %295 = tpu.matmul %292, %294, %cst_234 {dimension_numbers = #tpu.dot_dimension_numbers<[1], [0], [0], [1], [0, 0, 1, 1], [], []>} : vector<96x32xbf16>, vector<32x32xbf16>, vector<96x32xf32> -> vector<96x32xf32>
    %296 = arith.addf %291, %295 : vector<96x32xf32>
    %c41_235 = arith.constant 41 : index
    %c0_236 = arith.constant 0 : index
    %297 = vector.load %arg7[%c41_235, %c0_236] : memref<336x32xbf16, #tpu.memory_space<vmem>>, vector<96x32xbf16>
    %c6_237 = arith.constant 6 : index
    %c0_238 = arith.constant 0 : index
    %c0_239 = arith.constant 0 : index
    %298 = vector.load %arg3[%c6_237, %c0_238, %c0_239] : memref<9x32x32xbf16, #tpu.memory_space<vmem>>, vector<1x32x32xbf16>
    %299 = vector.shape_cast %298 : vector<1x32x32xbf16> to vector<32x32xbf16>
    %cst_240 = arith.constant dense<0.000000e+00> : vector<96x32xf32>
    %300 = tpu.matmul %297, %299, %cst_240 {dimension_numbers = #tpu.dot_dimension_numbers<[1], [0], [0], [1], [0, 0, 1, 1], [], []>} : vector<96x32xbf16>, vector<32x32xbf16>, vector<96x32xf32> -> vector<96x32xf32>
    %301 = arith.addf %296, %300 : vector<96x32xf32>
    %c42_241 = arith.constant 42 : index
    %c0_242 = arith.constant 0 : index
    %302 = vector.load %arg7[%c42_241, %c0_242] : memref<336x32xbf16, #tpu.memory_space<vmem>>, vector<96x32xbf16>
    %c7_243 = arith.constant 7 : index
    %c0_244 = arith.constant 0 : index
    %c0_245 = arith.constant 0 : index
    %303 = vector.load %arg3[%c7_243, %c0_244, %c0_245] : memref<9x32x32xbf16, #tpu.memory_space<vmem>>, vector<1x32x32xbf16>
    %304 = vector.shape_cast %303 : vector<1x32x32xbf16> to vector<32x32xbf16>
    %cst_246 = arith.constant dense<0.000000e+00> : vector<96x32xf32>
    %305 = tpu.matmul %302, %304, %cst_246 {dimension_numbers = #tpu.dot_dimension_numbers<[1], [0], [0], [1], [0, 0, 1, 1], [], []>} : vector<96x32xbf16>, vector<32x32xbf16>, vector<96x32xf32> -> vector<96x32xf32>
    %306 = arith.addf %301, %305 : vector<96x32xf32>
    %c43_247 = arith.constant 43 : index
    %c0_248 = arith.constant 0 : index
    %307 = vector.load %arg7[%c43_247, %c0_248] : memref<336x32xbf16, #tpu.memory_space<vmem>>, vector<96x32xbf16>
    %c8_249 = arith.constant 8 : index
    %c0_250 = arith.constant 0 : index
    %c0_251 = arith.constant 0 : index
    %308 = vector.load %arg3[%c8_249, %c0_250, %c0_251] : memref<9x32x32xbf16, #tpu.memory_space<vmem>>, vector<1x32x32xbf16>
    %309 = vector.shape_cast %308 : vector<1x32x32xbf16> to vector<32x32xbf16>
    %cst_252 = arith.constant dense<0.000000e+00> : vector<96x32xf32>
    %310 = tpu.matmul %307, %309, %cst_252 {dimension_numbers = #tpu.dot_dimension_numbers<[1], [0], [0], [1], [0, 0, 1, 1], [], []>} : vector<96x32xbf16>, vector<32x32xbf16>, vector<96x32xf32> -> vector<96x32xf32>
    %311 = arith.addf %306, %310 : vector<96x32xf32>
    %312 = tpu.iota {dimensions = array<i32: 0>} : vector<96x1xi32>
    %c0_i32_253 = arith.constant 0 : i32
    %313 = vector.broadcast %c0_i32_253 : i32 to vector<96x1xi32>
    %314 = arith.addi %313, %312 : vector<96x1xi32>
    %c18_i32_254 = arith.constant 18 : i32
    %c0_i32_255 = arith.constant 0 : i32
    %315 = arith.cmpi eq, %c18_i32_254, %c0_i32_255 : i32
    %c1_i32_256 = arith.constant 1 : i32
    %316 = arith.select %315, %c1_i32_256, %c18_i32_254 : i32
    %317 = vector.broadcast %316 : i32 to vector<96x1xi32>
    %318 = arith.remsi %314, %317 : vector<96x1xi32>
    %c0_i32_257 = arith.constant 0 : i32
    %319 = vector.broadcast %c0_i32_257 : i32 to vector<96x1xi32>
    %320 = arith.cmpi ne, %318, %319 : vector<96x1xi32>
    %c0_i32_258 = arith.constant 0 : i32
    %321 = vector.broadcast %c0_i32_258 : i32 to vector<96x1xi32>
    %322 = arith.cmpi slt, %318, %321 : vector<96x1xi32>
    %c0_i32_259 = arith.constant 0 : i32
    %323 = arith.cmpi slt, %316, %c0_i32_259 : i32
    %324 = vector.broadcast %323 : i1 to vector<96x1xi1>
    %325 = vector.broadcast %324 : vector<96x1xi1> to vector<96x1xi1>
    %326 = arith.xori %322, %325 : vector<96x1xi1>
    %327 = arith.andi %326, %320 : vector<96x1xi1>
    %328 = vector.broadcast %316 : i32 to vector<96x1xi32>
    %329 = arith.addi %318, %328 : vector<96x1xi32>
    %330 = arith.select %327, %329, %318 : vector<96x1xi1>, vector<96x1xi32>
    %c16_i32_260 = arith.constant 16 : i32
    %331 = vector.broadcast %c16_i32_260 : i32 to vector<96x1xi32>
    %332 = arith.cmpi slt, %330, %331 : vector<96x1xi32>
    %333 = vector.broadcast %264 : vector<1x32xf32> to vector<96x32xf32>
    %334 = arith.mulf %311, %333 : vector<96x32xf32>
    %335 = vector.broadcast %265 : vector<1x32xf32> to vector<96x32xf32>
    %336 = arith.addf %334, %335 : vector<96x32xf32>
    %cst_261 = arith.constant 0.000000e+00 : f32
    %337 = vector.shape_cast %332 : vector<96x1xi1> to vector<96x1xi1>
    %338 = vector.broadcast %337 : vector<96x1xi1> to vector<96x32xi1>
    %339 = vector.broadcast %cst_261 : f32 to vector<96x32xf32>
    %340 = arith.select %338, %336, %339 : vector<96x32xi1>, vector<96x32xf32>
    %341 = tpu.transpose %340, [1, 0] : vector<96x32xf32> -> vector<32x96xf32>
    %c0_262 = arith.constant 0 : index
    %c0_263 = arith.constant 0 : index
    %c0_264 = arith.constant 0 : index
    %342 = vector.load %arg6[%c0_262, %c0_263, %c0_264] : memref<1x32x288xf32, #tpu.memory_space<vmem>>, vector<1x32x96xf32>
    %343 = vector.shape_cast %342 : vector<1x32x96xf32> to vector<32x96xf32>
    %344 = vector.shape_cast %341 : vector<32x96xf32> to vector<1x32x96xf32>
    tpu.vector_store %arg6[%c0_262, %c0_263, %c0_264], %344 {strides = array<i32>} : memref<1x32x288xf32, #tpu.memory_space<vmem>>, vector<1x32x96xf32>,
    %cst_265 = arith.constant 0.000000e+00 : f32
    %345 = vector.broadcast %cst_265 : f32 to vector<96x32xf32>
    %c101_266 = arith.constant 101 : index
    %c0_267 = arith.constant 0 : index
    %346 = vector.load %arg7[%c101_266, %c0_267] : memref<336x32xbf16, #tpu.memory_space<vmem>>, vector<96x32xbf16>
    %c0_268 = arith.constant 0 : index
    %c0_269 = arith.constant 0 : index
    %c0_270 = arith.constant 0 : index
    %347 = vector.load %arg3[%c0_268, %c0_269, %c0_270] : memref<9x32x32xbf16, #tpu.memory_space<vmem>>, vector<1x32x32xbf16>
    %348 = vector.shape_cast %347 : vector<1x32x32xbf16> to vector<32x32xbf16>
    %cst_271 = arith.constant dense<0.000000e+00> : vector<96x32xf32>
    %349 = tpu.matmul %346, %348, %cst_271 {dimension_numbers = #tpu.dot_dimension_numbers<[1], [0], [0], [1], [0, 0, 1, 1], [], []>} : vector<96x32xbf16>, vector<32x32xbf16>, vector<96x32xf32> -> vector<96x32xf32>
    %350 = arith.addf %345, %349 : vector<96x32xf32>
    %c102_272 = arith.constant 102 : index
    %c0_273 = arith.constant 0 : index
    %351 = vector.load %arg7[%c102_272, %c0_273] : memref<336x32xbf16, #tpu.memory_space<vmem>>, vector<96x32xbf16>
    %c1_274 = arith.constant 1 : index
    %c0_275 = arith.constant 0 : index
    %c0_276 = arith.constant 0 : index
    %352 = vector.load %arg3[%c1_274, %c0_275, %c0_276] : memref<9x32x32xbf16, #tpu.memory_space<vmem>>, vector<1x32x32xbf16>
    %353 = vector.shape_cast %352 : vector<1x32x32xbf16> to vector<32x32xbf16>
    %cst_277 = arith.constant dense<0.000000e+00> : vector<96x32xf32>
    %354 = tpu.matmul %351, %353, %cst_277 {dimension_numbers = #tpu.dot_dimension_numbers<[1], [0], [0], [1], [0, 0, 1, 1], [], []>} : vector<96x32xbf16>, vector<32x32xbf16>, vector<96x32xf32> -> vector<96x32xf32>
    %355 = arith.addf %350, %354 : vector<96x32xf32>
    %c103_278 = arith.constant 103 : index
    %c0_279 = arith.constant 0 : index
    %356 = vector.load %arg7[%c103_278, %c0_279] : memref<336x32xbf16, #tpu.memory_space<vmem>>, vector<96x32xbf16>
    %c2_280 = arith.constant 2 : index
    %c0_281 = arith.constant 0 : index
    %c0_282 = arith.constant 0 : index
    %357 = vector.load %arg3[%c2_280, %c0_281, %c0_282] : memref<9x32x32xbf16, #tpu.memory_space<vmem>>, vector<1x32x32xbf16>
    %358 = vector.shape_cast %357 : vector<1x32x32xbf16> to vector<32x32xbf16>
    %cst_283 = arith.constant dense<0.000000e+00> : vector<96x32xf32>
    %359 = tpu.matmul %356, %358, %cst_283 {dimension_numbers = #tpu.dot_dimension_numbers<[1], [0], [0], [1], [0, 0, 1, 1], [], []>} : vector<96x32xbf16>, vector<32x32xbf16>, vector<96x32xf32> -> vector<96x32xf32>
    %360 = arith.addf %355, %359 : vector<96x32xf32>
    %c119_284 = arith.constant 119 : index
    %c0_285 = arith.constant 0 : index
    %361 = vector.load %arg7[%c119_284, %c0_285] : memref<336x32xbf16, #tpu.memory_space<vmem>>, vector<96x32xbf16>
    %c3_286 = arith.constant 3 : index
    %c0_287 = arith.constant 0 : index
    %c0_288 = arith.constant 0 : index
    %362 = vector.load %arg3[%c3_286, %c0_287, %c0_288] : memref<9x32x32xbf16, #tpu.memory_space<vmem>>, vector<1x32x32xbf16>
    %363 = vector.shape_cast %362 : vector<1x32x32xbf16> to vector<32x32xbf16>
    %cst_289 = arith.constant dense<0.000000e+00> : vector<96x32xf32>
    %364 = tpu.matmul %361, %363, %cst_289 {dimension_numbers = #tpu.dot_dimension_numbers<[1], [0], [0], [1], [0, 0, 1, 1], [], []>} : vector<96x32xbf16>, vector<32x32xbf16>, vector<96x32xf32> -> vector<96x32xf32>
    %365 = arith.addf %360, %364 : vector<96x32xf32>
    %c120_290 = arith.constant 120 : index
    %c0_291 = arith.constant 0 : index
    %366 = vector.load %arg7[%c120_290, %c0_291] : memref<336x32xbf16, #tpu.memory_space<vmem>>, vector<96x32xbf16>
    %c4_292 = arith.constant 4 : index
    %c0_293 = arith.constant 0 : index
    %c0_294 = arith.constant 0 : index
    %367 = vector.load %arg3[%c4_292, %c0_293, %c0_294] : memref<9x32x32xbf16, #tpu.memory_space<vmem>>, vector<1x32x32xbf16>
    %368 = vector.shape_cast %367 : vector<1x32x32xbf16> to vector<32x32xbf16>
    %cst_295 = arith.constant dense<0.000000e+00> : vector<96x32xf32>
    %369 = tpu.matmul %366, %368, %cst_295 {dimension_numbers = #tpu.dot_dimension_numbers<[1], [0], [0], [1], [0, 0, 1, 1], [], []>} : vector<96x32xbf16>, vector<32x32xbf16>, vector<96x32xf32> -> vector<96x32xf32>
    %370 = arith.addf %365, %369 : vector<96x32xf32>
    %c121_296 = arith.constant 121 : index
    %c0_297 = arith.constant 0 : index
    %371 = vector.load %arg7[%c121_296, %c0_297] : memref<336x32xbf16, #tpu.memory_space<vmem>>, vector<96x32xbf16>
    %c5_298 = arith.constant 5 : index
    %c0_299 = arith.constant 0 : index
    %c0_300 = arith.constant 0 : index
    %372 = vector.load %arg3[%c5_298, %c0_299, %c0_300] : memref<9x32x32xbf16, #tpu.memory_space<vmem>>, vector<1x32x32xbf16>
    %373 = vector.shape_cast %372 : vector<1x32x32xbf16> to vector<32x32xbf16>
    %cst_301 = arith.constant dense<0.000000e+00> : vector<96x32xf32>
    %374 = tpu.matmul %371, %373, %cst_301 {dimension_numbers = #tpu.dot_dimension_numbers<[1], [0], [0], [1], [0, 0, 1, 1], [], []>} : vector<96x32xbf16>, vector<32x32xbf16>, vector<96x32xf32> -> vector<96x32xf32>
    %375 = arith.addf %370, %374 : vector<96x32xf32>
    %c137_302 = arith.constant 137 : index
    %c0_303 = arith.constant 0 : index
    %376 = vector.load %arg7[%c137_302, %c0_303] : memref<336x32xbf16, #tpu.memory_space<vmem>>, vector<96x32xbf16>
    %c6_304 = arith.constant 6 : index
    %c0_305 = arith.constant 0 : index
    %c0_306 = arith.constant 0 : index
    %377 = vector.load %arg3[%c6_304, %c0_305, %c0_306] : memref<9x32x32xbf16, #tpu.memory_space<vmem>>, vector<1x32x32xbf16>
    %378 = vector.shape_cast %377 : vector<1x32x32xbf16> to vector<32x32xbf16>
    %cst_307 = arith.constant dense<0.000000e+00> : vector<96x32xf32>
    %379 = tpu.matmul %376, %378, %cst_307 {dimension_numbers = #tpu.dot_dimension_numbers<[1], [0], [0], [1], [0, 0, 1, 1], [], []>} : vector<96x32xbf16>, vector<32x32xbf16>, vector<96x32xf32> -> vector<96x32xf32>
    %380 = arith.addf %375, %379 : vector<96x32xf32>
    %c138_308 = arith.constant 138 : index
    %c0_309 = arith.constant 0 : index
    %381 = vector.load %arg7[%c138_308, %c0_309] : memref<336x32xbf16, #tpu.memory_space<vmem>>, vector<96x32xbf16>
    %c7_310 = arith.constant 7 : index
    %c0_311 = arith.constant 0 : index
    %c0_312 = arith.constant 0 : index
    %382 = vector.load %arg3[%c7_310, %c0_311, %c0_312] : memref<9x32x32xbf16, #tpu.memory_space<vmem>>, vector<1x32x32xbf16>
    %383 = vector.shape_cast %382 : vector<1x32x32xbf16> to vector<32x32xbf16>
    %cst_313 = arith.constant dense<0.000000e+00> : vector<96x32xf32>
    %384 = tpu.matmul %381, %383, %cst_313 {dimension_numbers = #tpu.dot_dimension_numbers<[1], [0], [0], [1], [0, 0, 1, 1], [], []>} : vector<96x32xbf16>, vector<32x32xbf16>, vector<96x32xf32> -> vector<96x32xf32>
    %385 = arith.addf %380, %384 : vector<96x32xf32>
    %c139_314 = arith.constant 139 : index
    %c0_315 = arith.constant 0 : index
    %386 = vector.load %arg7[%c139_314, %c0_315] : memref<336x32xbf16, #tpu.memory_space<vmem>>, vector<96x32xbf16>
    %c8_316 = arith.constant 8 : index
    %c0_317 = arith.constant 0 : index
    %c0_318 = arith.constant 0 : index
    %387 = vector.load %arg3[%c8_316, %c0_317, %c0_318] : memref<9x32x32xbf16, #tpu.memory_space<vmem>>, vector<1x32x32xbf16>
    %388 = vector.shape_cast %387 : vector<1x32x32xbf16> to vector<32x32xbf16>
    %cst_319 = arith.constant dense<0.000000e+00> : vector<96x32xf32>
    %389 = tpu.matmul %386, %388, %cst_319 {dimension_numbers = #tpu.dot_dimension_numbers<[1], [0], [0], [1], [0, 0, 1, 1], [], []>} : vector<96x32xbf16>, vector<32x32xbf16>, vector<96x32xf32> -> vector<96x32xf32>
    %390 = arith.addf %385, %389 : vector<96x32xf32>
    %391 = tpu.iota {dimensions = array<i32: 0>} : vector<96x1xi32>
    %c96_i32_320 = arith.constant 96 : i32
    %392 = vector.broadcast %c96_i32_320 : i32 to vector<96x1xi32>
    %393 = arith.addi %392, %391 : vector<96x1xi32>
    %c18_i32_321 = arith.constant 18 : i32
    %c0_i32_322 = arith.constant 0 : i32
    %394 = arith.cmpi eq, %c18_i32_321, %c0_i32_322 : i32
    %c1_i32_323 = arith.constant 1 : i32
    %395 = arith.select %394, %c1_i32_323, %c18_i32_321 : i32
    %396 = vector.broadcast %395 : i32 to vector<96x1xi32>
    %397 = arith.remsi %393, %396 : vector<96x1xi32>
    %c0_i32_324 = arith.constant 0 : i32
    %398 = vector.broadcast %c0_i32_324 : i32 to vector<96x1xi32>
    %399 = arith.cmpi ne, %397, %398 : vector<96x1xi32>
    %c0_i32_325 = arith.constant 0 : i32
    %400 = vector.broadcast %c0_i32_325 : i32 to vector<96x1xi32>
    %401 = arith.cmpi slt, %397, %400 : vector<96x1xi32>
    %c0_i32_326 = arith.constant 0 : i32
    %402 = arith.cmpi slt, %395, %c0_i32_326 : i32
    %403 = vector.broadcast %402 : i1 to vector<96x1xi1>
    %404 = vector.broadcast %403 : vector<96x1xi1> to vector<96x1xi1>
    %405 = arith.xori %401, %404 : vector<96x1xi1>
    %406 = arith.andi %405, %399 : vector<96x1xi1>
    %407 = vector.broadcast %395 : i32 to vector<96x1xi32>
    %408 = arith.addi %397, %407 : vector<96x1xi32>
    %409 = arith.select %406, %408, %397 : vector<96x1xi1>, vector<96x1xi32>
    %c16_i32_327 = arith.constant 16 : i32
    %410 = vector.broadcast %c16_i32_327 : i32 to vector<96x1xi32>
    %411 = arith.cmpi slt, %409, %410 : vector<96x1xi32>
    %412 = vector.broadcast %264 : vector<1x32xf32> to vector<96x32xf32>
    %413 = arith.mulf %390, %412 : vector<96x32xf32>
    %414 = vector.broadcast %265 : vector<1x32xf32> to vector<96x32xf32>
    %415 = arith.addf %413, %414 : vector<96x32xf32>
    %cst_328 = arith.constant 0.000000e+00 : f32
    %416 = vector.shape_cast %411 : vector<96x1xi1> to vector<96x1xi1>
    %417 = vector.broadcast %416 : vector<96x1xi1> to vector<96x32xi1>
    %418 = vector.broadcast %cst_328 : f32 to vector<96x32xf32>
    %419 = arith.select %417, %415, %418 : vector<96x32xi1>, vector<96x32xf32>
    %420 = tpu.transpose %419, [1, 0] : vector<96x32xf32> -> vector<32x96xf32>
    %c0_329 = arith.constant 0 : index
    %c0_330 = arith.constant 0 : index
    %c96 = arith.constant 96 : index
    %421 = vector.load %arg6[%c0_329, %c0_330, %c96] : memref<1x32x288xf32, #tpu.memory_space<vmem>>, vector<1x32x96xf32>
    %422 = vector.shape_cast %421 : vector<1x32x96xf32> to vector<32x96xf32>
    %423 = vector.shape_cast %420 : vector<32x96xf32> to vector<1x32x96xf32>
    tpu.vector_store %arg6[%c0_329, %c0_330, %c96], %423 {strides = array<i32>} : memref<1x32x288xf32, #tpu.memory_space<vmem>>, vector<1x32x96xf32>,
    %cst_331 = arith.constant 0.000000e+00 : f32
    %424 = vector.broadcast %cst_331 : f32 to vector<96x32xf32>
    %c197_332 = arith.constant 197 : index
    %c0_333 = arith.constant 0 : index
    %425 = vector.load %arg7[%c197_332, %c0_333] : memref<336x32xbf16, #tpu.memory_space<vmem>>, vector<96x32xbf16>
    %c0_334 = arith.constant 0 : index
    %c0_335 = arith.constant 0 : index
    %c0_336 = arith.constant 0 : index
    %426 = vector.load %arg3[%c0_334, %c0_335, %c0_336] : memref<9x32x32xbf16, #tpu.memory_space<vmem>>, vector<1x32x32xbf16>
    %427 = vector.shape_cast %426 : vector<1x32x32xbf16> to vector<32x32xbf16>
    %cst_337 = arith.constant dense<0.000000e+00> : vector<96x32xf32>
    %428 = tpu.matmul %425, %427, %cst_337 {dimension_numbers = #tpu.dot_dimension_numbers<[1], [0], [0], [1], [0, 0, 1, 1], [], []>} : vector<96x32xbf16>, vector<32x32xbf16>, vector<96x32xf32> -> vector<96x32xf32>
    %429 = arith.addf %424, %428 : vector<96x32xf32>
    %c198_338 = arith.constant 198 : index
    %c0_339 = arith.constant 0 : index
    %430 = vector.load %arg7[%c198_338, %c0_339] : memref<336x32xbf16, #tpu.memory_space<vmem>>, vector<96x32xbf16>
    %c1_340 = arith.constant 1 : index
    %c0_341 = arith.constant 0 : index
    %c0_342 = arith.constant 0 : index
    %431 = vector.load %arg3[%c1_340, %c0_341, %c0_342] : memref<9x32x32xbf16, #tpu.memory_space<vmem>>, vector<1x32x32xbf16>
    %432 = vector.shape_cast %431 : vector<1x32x32xbf16> to vector<32x32xbf16>
    %cst_343 = arith.constant dense<0.000000e+00> : vector<96x32xf32>
    %433 = tpu.matmul %430, %432, %cst_343 {dimension_numbers = #tpu.dot_dimension_numbers<[1], [0], [0], [1], [0, 0, 1, 1], [], []>} : vector<96x32xbf16>, vector<32x32xbf16>, vector<96x32xf32> -> vector<96x32xf32>
    %434 = arith.addf %429, %433 : vector<96x32xf32>
    %c199_344 = arith.constant 199 : index
    %c0_345 = arith.constant 0 : index
    %435 = vector.load %arg7[%c199_344, %c0_345] : memref<336x32xbf16, #tpu.memory_space<vmem>>, vector<96x32xbf16>
    %c2_346 = arith.constant 2 : index
    %c0_347 = arith.constant 0 : index
    %c0_348 = arith.constant 0 : index
    %436 = vector.load %arg3[%c2_346, %c0_347, %c0_348] : memref<9x32x32xbf16, #tpu.memory_space<vmem>>, vector<1x32x32xbf16>
    %437 = vector.shape_cast %436 : vector<1x32x32xbf16> to vector<32x32xbf16>
    %cst_349 = arith.constant dense<0.000000e+00> : vector<96x32xf32>
    %438 = tpu.matmul %435, %437, %cst_349 {dimension_numbers = #tpu.dot_dimension_numbers<[1], [0], [0], [1], [0, 0, 1, 1], [], []>} : vector<96x32xbf16>, vector<32x32xbf16>, vector<96x32xf32> -> vector<96x32xf32>
    %439 = arith.addf %434, %438 : vector<96x32xf32>
    %c215_350 = arith.constant 215 : index
    %c0_351 = arith.constant 0 : index
    %440 = vector.load %arg7[%c215_350, %c0_351] : memref<336x32xbf16, #tpu.memory_space<vmem>>, vector<96x32xbf16>
    %c3_352 = arith.constant 3 : index
    %c0_353 = arith.constant 0 : index
    %c0_354 = arith.constant 0 : index
    %441 = vector.load %arg3[%c3_352, %c0_353, %c0_354] : memref<9x32x32xbf16, #tpu.memory_space<vmem>>, vector<1x32x32xbf16>
    %442 = vector.shape_cast %441 : vector<1x32x32xbf16> to vector<32x32xbf16>
    %cst_355 = arith.constant dense<0.000000e+00> : vector<96x32xf32>
    %443 = tpu.matmul %440, %442, %cst_355 {dimension_numbers = #tpu.dot_dimension_numbers<[1], [0], [0], [1], [0, 0, 1, 1], [], []>} : vector<96x32xbf16>, vector<32x32xbf16>, vector<96x32xf32> -> vector<96x32xf32>
    %444 = arith.addf %439, %443 : vector<96x32xf32>
    %c216_356 = arith.constant 216 : index
    %c0_357 = arith.constant 0 : index
    %445 = vector.load %arg7[%c216_356, %c0_357] : memref<336x32xbf16, #tpu.memory_space<vmem>>, vector<96x32xbf16>
    %c4_358 = arith.constant 4 : index
    %c0_359 = arith.constant 0 : index
    %c0_360 = arith.constant 0 : index
    %446 = vector.load %arg3[%c4_358, %c0_359, %c0_360] : memref<9x32x32xbf16, #tpu.memory_space<vmem>>, vector<1x32x32xbf16>
    %447 = vector.shape_cast %446 : vector<1x32x32xbf16> to vector<32x32xbf16>
    %cst_361 = arith.constant dense<0.000000e+00> : vector<96x32xf32>
    %448 = tpu.matmul %445, %447, %cst_361 {dimension_numbers = #tpu.dot_dimension_numbers<[1], [0], [0], [1], [0, 0, 1, 1], [], []>} : vector<96x32xbf16>, vector<32x32xbf16>, vector<96x32xf32> -> vector<96x32xf32>
    %449 = arith.addf %444, %448 : vector<96x32xf32>
    %c217_362 = arith.constant 217 : index
    %c0_363 = arith.constant 0 : index
    %450 = vector.load %arg7[%c217_362, %c0_363] : memref<336x32xbf16, #tpu.memory_space<vmem>>, vector<96x32xbf16>
    %c5_364 = arith.constant 5 : index
    %c0_365 = arith.constant 0 : index
    %c0_366 = arith.constant 0 : index
    %451 = vector.load %arg3[%c5_364, %c0_365, %c0_366] : memref<9x32x32xbf16, #tpu.memory_space<vmem>>, vector<1x32x32xbf16>
    %452 = vector.shape_cast %451 : vector<1x32x32xbf16> to vector<32x32xbf16>
    %cst_367 = arith.constant dense<0.000000e+00> : vector<96x32xf32>
    %453 = tpu.matmul %450, %452, %cst_367 {dimension_numbers = #tpu.dot_dimension_numbers<[1], [0], [0], [1], [0, 0, 1, 1], [], []>} : vector<96x32xbf16>, vector<32x32xbf16>, vector<96x32xf32> -> vector<96x32xf32>
    %454 = arith.addf %449, %453 : vector<96x32xf32>
    %c233_368 = arith.constant 233 : index
    %c0_369 = arith.constant 0 : index
    %455 = vector.load %arg7[%c233_368, %c0_369] : memref<336x32xbf16, #tpu.memory_space<vmem>>, vector<96x32xbf16>
    %c6_370 = arith.constant 6 : index
    %c0_371 = arith.constant 0 : index
    %c0_372 = arith.constant 0 : index
    %456 = vector.load %arg3[%c6_370, %c0_371, %c0_372] : memref<9x32x32xbf16, #tpu.memory_space<vmem>>, vector<1x32x32xbf16>
    %457 = vector.shape_cast %456 : vector<1x32x32xbf16> to vector<32x32xbf16>
    %cst_373 = arith.constant dense<0.000000e+00> : vector<96x32xf32>
    %458 = tpu.matmul %455, %457, %cst_373 {dimension_numbers = #tpu.dot_dimension_numbers<[1], [0], [0], [1], [0, 0, 1, 1], [], []>} : vector<96x32xbf16>, vector<32x32xbf16>, vector<96x32xf32> -> vector<96x32xf32>
    %459 = arith.addf %454, %458 : vector<96x32xf32>
    %c234_374 = arith.constant 234 : index
    %c0_375 = arith.constant 0 : index
    %460 = vector.load %arg7[%c234_374, %c0_375] : memref<336x32xbf16, #tpu.memory_space<vmem>>, vector<96x32xbf16>
    %c7_376 = arith.constant 7 : index
    %c0_377 = arith.constant 0 : index
    %c0_378 = arith.constant 0 : index
    %461 = vector.load %arg3[%c7_376, %c0_377, %c0_378] : memref<9x32x32xbf16, #tpu.memory_space<vmem>>, vector<1x32x32xbf16>
    %462 = vector.shape_cast %461 : vector<1x32x32xbf16> to vector<32x32xbf16>
    %cst_379 = arith.constant dense<0.000000e+00> : vector<96x32xf32>
    %463 = tpu.matmul %460, %462, %cst_379 {dimension_numbers = #tpu.dot_dimension_numbers<[1], [0], [0], [1], [0, 0, 1, 1], [], []>} : vector<96x32xbf16>, vector<32x32xbf16>, vector<96x32xf32> -> vector<96x32xf32>
    %464 = arith.addf %459, %463 : vector<96x32xf32>
    %c235_380 = arith.constant 235 : index
    %c0_381 = arith.constant 0 : index
    %465 = vector.load %arg7[%c235_380, %c0_381] : memref<336x32xbf16, #tpu.memory_space<vmem>>, vector<96x32xbf16>
    %c8_382 = arith.constant 8 : index
    %c0_383 = arith.constant 0 : index
    %c0_384 = arith.constant 0 : index
    %466 = vector.load %arg3[%c8_382, %c0_383, %c0_384] : memref<9x32x32xbf16, #tpu.memory_space<vmem>>, vector<1x32x32xbf16>
    %467 = vector.shape_cast %466 : vector<1x32x32xbf16> to vector<32x32xbf16>
    %cst_385 = arith.constant dense<0.000000e+00> : vector<96x32xf32>
    %468 = tpu.matmul %465, %467, %cst_385 {dimension_numbers = #tpu.dot_dimension_numbers<[1], [0], [0], [1], [0, 0, 1, 1], [], []>} : vector<96x32xbf16>, vector<32x32xbf16>, vector<96x32xf32> -> vector<96x32xf32>
    %469 = arith.addf %464, %468 : vector<96x32xf32>
    %470 = tpu.iota {dimensions = array<i32: 0>} : vector<96x1xi32>
    %c192_i32_386 = arith.constant 192 : i32
    %471 = vector.broadcast %c192_i32_386 : i32 to vector<96x1xi32>
    %472 = arith.addi %471, %470 : vector<96x1xi32>
    %c18_i32_387 = arith.constant 18 : i32
    %c0_i32_388 = arith.constant 0 : i32
    %473 = arith.cmpi eq, %c18_i32_387, %c0_i32_388 : i32
    %c1_i32_389 = arith.constant 1 : i32
    %474 = arith.select %473, %c1_i32_389, %c18_i32_387 : i32
    %475 = vector.broadcast %474 : i32 to vector<96x1xi32>
    %476 = arith.remsi %472, %475 : vector<96x1xi32>
    %c0_i32_390 = arith.constant 0 : i32
    %477 = vector.broadcast %c0_i32_390 : i32 to vector<96x1xi32>
    %478 = arith.cmpi ne, %476, %477 : vector<96x1xi32>
    %c0_i32_391 = arith.constant 0 : i32
    %479 = vector.broadcast %c0_i32_391 : i32 to vector<96x1xi32>
    %480 = arith.cmpi slt, %476, %479 : vector<96x1xi32>
    %c0_i32_392 = arith.constant 0 : i32
    %481 = arith.cmpi slt, %474, %c0_i32_392 : i32
    %482 = vector.broadcast %481 : i1 to vector<96x1xi1>
    %483 = vector.broadcast %482 : vector<96x1xi1> to vector<96x1xi1>
    %484 = arith.xori %480, %483 : vector<96x1xi1>
    %485 = arith.andi %484, %478 : vector<96x1xi1>
    %486 = vector.broadcast %474 : i32 to vector<96x1xi32>
    %487 = arith.addi %476, %486 : vector<96x1xi32>
    %488 = arith.select %485, %487, %476 : vector<96x1xi1>, vector<96x1xi32>
    %c16_i32_393 = arith.constant 16 : i32
    %489 = vector.broadcast %c16_i32_393 : i32 to vector<96x1xi32>
    %490 = arith.cmpi slt, %488, %489 : vector<96x1xi32>
    %491 = vector.broadcast %264 : vector<1x32xf32> to vector<96x32xf32>
    %492 = arith.mulf %469, %491 : vector<96x32xf32>
    %493 = vector.broadcast %265 : vector<1x32xf32> to vector<96x32xf32>
    %494 = arith.addf %492, %493 : vector<96x32xf32>
    %cst_394 = arith.constant 0.000000e+00 : f32
    %495 = vector.shape_cast %490 : vector<96x1xi1> to vector<96x1xi1>
    %496 = vector.broadcast %495 : vector<96x1xi1> to vector<96x32xi1>
    %497 = vector.broadcast %cst_394 : f32 to vector<96x32xf32>
    %498 = arith.select %496, %494, %497 : vector<96x32xi1>, vector<96x32xf32>
    %499 = tpu.transpose %498, [1, 0] : vector<96x32xf32> -> vector<32x96xf32>
    %c0_395 = arith.constant 0 : index
    %c0_396 = arith.constant 0 : index
    %c192 = arith.constant 192 : index
    %500 = vector.load %arg6[%c0_395, %c0_396, %c192] : memref<1x32x288xf32, #tpu.memory_space<vmem>>, vector<1x32x96xf32>
    %501 = vector.shape_cast %500 : vector<1x32x96xf32> to vector<32x96xf32>
    %502 = vector.shape_cast %499 : vector<32x96xf32> to vector<1x32x96xf32>
    tpu.vector_store %arg6[%c0_395, %c0_396, %c192], %502 {strides = array<i32>} : memref<1x32x288xf32, #tpu.memory_space<vmem>>, vector<1x32x96xf32>,
    return
  }
  func.func @transform_0(%arg0: i32) -> (i32, i32, i32) {
    %c0_i32 = arith.constant 0 : i32
    %c0_i32_0 = arith.constant 0 : i32
    %c0_i32_1 = arith.constant 0 : i32
    return %arg0, %c0_i32, %c0_i32_0 : i32, i32, i32
  }
  func.func @transform_1(%arg0: i32) -> (i32, i32, i32) {
    %c0_i32 = arith.constant 0 : i32
    %c0_i32_0 = arith.constant 0 : i32
    %c0_i32_1 = arith.constant 0 : i32
    %c0_i32_2 = arith.constant 0 : i32
    return %c0_i32, %c0_i32_0, %c0_i32_1 : i32, i32, i32
  }
  func.func @transform_2(%arg0: i32) -> (i32, i32, i32) {
    %c0_i32 = arith.constant 0 : i32
    %c0_i32_0 = arith.constant 0 : i32
    %c0_i32_1 = arith.constant 0 : i32
    %c0_i32_2 = arith.constant 0 : i32
    return %c0_i32, %c0_i32_0, %c0_i32_1 : i32, i32, i32
  }
  func.func @transform_3(%arg0: i32) -> (i32, i32) {
    %c0_i32 = arith.constant 0 : i32
    %c0_i32_0 = arith.constant 0 : i32
    %c0_i32_1 = arith.constant 0 : i32
    return %c0_i32, %c0_i32_0 : i32, i32
  }
  func.func @transform_4(%arg0: i32) -> (i32, i32) {
    %c0_i32 = arith.constant 0 : i32
    %c0_i32_0 = arith.constant 0 : i32
    %c0_i32_1 = arith.constant 0 : i32
    return %c0_i32, %c0_i32_0 : i32, i32
  }
  func.func @transform_5(%arg0: i32) -> (i32, i32, i32) {
    %c0_i32 = arith.constant 0 : i32
    %c0_i32_0 = arith.constant 0 : i32
    %c0_i32_1 = arith.constant 0 : i32
    return %arg0, %c0_i32, %c0_i32_0 : i32, i32, i32
  }
}

</mosaic_0001>

<bundles_post_ra>
// kernel: _lambda_.1
= control target key start
LH: loop header
LB: loop body
LE: loop exit
PB: predicated region body
PF: predicated region fallthrough
CT: control target
= control target key end

     0   :  { %s14377_s18 = smov 0   ;;  %s18770_s0 = inlined_call_operand.vmem [shape: bf16[2,336,48], index: 0, kind: input, shape index: {}]   ;;  %s18771_s1 = inlined_call_operand.vmem [shape: bf16[9,48,32], index: 1, kind: input, shape index: {}]   ;;  %s18772_s2 = inlined_call_operand.vmem [shape: bf16[9,32,32], index: 2, kind: input, shape index: {}]   ;;  %s18773_s3 = inlined_call_operand.vmem [shape: f32[2,32], index: 3, kind: input, shape index: {}]   ;;  %s18774_s4 = inlined_call_operand.vmem [shape: f32[2,32], index: 4, kind: input, shape index: {}]   ;;  %s18775_s5 = inlined_call_operand.vmem [shape: f32[2,32,288], index: 5, kind: output, shape index: {}]  }
   0x1 LB: > { %s11219_s19 = sadd.s32 4294967295, %s14342_s18   ;;  %p11223_p0 = scmp.ge.s32.totalorder %s14342_s18, 1  ;;  %s14342_s18 = sphi %s14377_s18, %s15_s18  }
   0x2   : > { %p187_p1 = scmp.lt.s32.totalorder %s14342_s18, 3 }
   0x4   : > { %p188_p2 = pnand %p11223_p0, %p187_p1 }
   0x6   : > { %191 = sbr.rel (%p188_p2) target bundleno = 1382 (0x566), region = 40 }
   0xd   : > { %v14084_v0 = vld [vmem:[%s18771_s1 + $0x18] sm:$0xff]   ;;  %p215_p3 = scmp.lt.s32.totalorder %s11219_s19, 1  ;;  %v14086_v2 = vld [vmem:[%s18771_s1 + $0x20] sm:$0xff]   ;;  %v14088_v4 = vld [vmem:[%s18771_s1 + $0x28] sm:$0xff]   ;;  %vm18779_vm0 = vcmask 1044480   ;;  %vm18807_vm1 = vcmask 392192  }
   0xe   : > { %v14085_v1 = vld [vmem:[%s18771_s1 + $0x18] sm:$0xff]   ;;  %12504 = vmatprep.subr.bf16.mxu0 %v14084_v0  ;;  %v14087_v3 = vld [vmem:[%s18771_s1 + $0x20] sm:$0xff]   ;;  %v14089_v5 = vld [vmem:[%s18771_s1 + $0x28] sm:$0xff]   ;;  %vm18777_vm2 = vsmask.f32 5376  ;;  %vm1654_vm5 = vcmask 1046528  }
   0xf   : > { %s19592_s19 = smov (!%p215_p3, %s11219_s19), 1  ;;  %12666 = vmatprep.subr.bf16.mxu1 %v14085_v1  ;;  %12505 = vmatpush3.bf16.msra.mxu0 %v14084_v0  ;;  %v14097_v6 = vld [vmem:[%s18771_s1] sm:$0xff]   ;;  %v14102_v35 = vld [vmem:[%s18771_s1 + $0x8] sm:$0xff]   ;;  %v14108_v50 = vld [vmem:[%s18771_s1 + $0x10] sm:$0xff]   ;;  %vm18776_vm3 = vsmask.f32 4352 }
  0x10   : > { %12667 = vmatpush3.bf16.msra.mxu1 %v14085_v1  ;;  %12506 = vmatprep.subr.bf16.mxu0 %v14086_v2  ;;  %s13998_s30 = smul.u32 168, %s19592_s19  ;;  %v14104_v41 = vld [vmem:[%s18771_s1] sm:$0xff]   ;;  %v14110_v56 = vld [vmem:[%s18771_s1 + $0x8] sm:$0xff]   ;;  %v14111_v59 = vld [vmem:[%s18771_s1 + $0x10] sm:$0xff]   ;;  %vm1227_vm4 = vsmask.f32 7424 }
  0x11   : > { %12668 = vmatprep.subr.bf16.mxu1 %v14087_v3  ;;  %v14521_v0 = vld [vmem:[%s18771_s1 + $0x30] sm:$0xff]   ;;  %vm18796_vm6 = vsmask.f32 6400  ;;  %vm18785_vm7 = vcmask 261120   ;;  %vm18792_vm8 = vcmask 261124   ;;  %vm18778_vm9 = vcmask 257024  }
  0x12   : > { %s14409_s10 = scalar_lea.vmem %s18770_s0, %s13998_s30  ;;  %s13999_s14 = smul.u32 96, %s19592_s19 }
  0x13   : > { %12507 = vmatpush3.bf16.msra.mxu0 %v14086_v2  ;;  %v235_v7 = vld [vmem:[%s14409_s10] sm:$0xc]  ;;  %v236_v8 = vld [vmem:[%s14409_s10 + $0x4] sm:$0xf]  ;;  %v14418_v10 = vld [vmem:[%s14409_s10 + $0x8] sm:$0xff]   ;;  %s14345_s19 = smov 96  }
  0x14   : > { %12669 = vmatpush3.bf16.msra.mxu1 %v14087_v3  ;;  %12508 = vmatprep.subr.bf16.mxu0 %v14088_v4  ;;  %v254_v9 = vld [vmem:[%s14409_s10] sm:$0x8]  ;;  %v2299_v12 = vld [vmem:[%s14409_s10 + $0x34] sm:$0xf]  ;;  %v297_v13 = vrot.slane %v14418_v10, 3  ;;  %v14426_v15 = vld [vmem:[%s14409_s10 + $0x38] sm:$0xff]   ;;  %v14429_v17 = vcombine.low %v235_v7, %v236_v8  ;;  %s18693_s16 = scalar_lea.vmem %s18775_s5, %s13999_s14 }
  0x15   : > { %12670 = vmatprep.subr.bf16.mxu1 %v14089_v5  ;;  %v14420_v11 = vcombine.low %v254_v9, %v236_v8  ;;  %v2317_v14 = vld [vmem:[%s14409_s10 + $0x30] sm:$0x8]  ;;  %v2358_v20 = vrot.slane %v14426_v15, 3  ;;  %v14438_v21 = vld [vmem:[%s14409_s10 + $0x40] sm:$0xff]   ;;  %v14446_v26 = vld [vmem:[%s14409_s10 + $0x18] sm:$0xff]   ;;  %v440_v62 = vshrl.u32 %v14418_v10, 16 }
  0x16   : > { %v14431_v18 = vcombine.low %v2317_v14, %v2299_v12  ;;  %v14434_v19 = vld [vmem:[%s14409_s10 + $0x10] sm:$0xff]   ;;  %v2360_v25 = vrot.slane %v14438_v21, 3  ;;  %v14451_v29 = vld [vmem:[%s14409_s10 + $0x48] sm:$0xff]   ;;  %v432_v30 = vshrl.u32 %v14429_v17, 16  ;;  %v301_v32 = vrot.slane %v14446_v26, 3  ;;  %v14459_v33 = vld [vmem:[%s14409_s10 + $0x20] sm:$0xff]  }
  0x17   : > { %12509 = vmatpush3.bf16.msra.mxu0 %v14088_v4  ;;  %v296_v16 = vrot.slane %v14420_v11, 3  ;;  %v299_v24 = vrot.slane %v14434_v19, 3  ;;  %v2362_v34 = vrot.slane %v14451_v29, 3  ;;  %v2298_v36 = vld [vmem:[%s14409_s10 + $0x30] sm:$0xc]  ;;  %v303_v38 = vrot.slane %v14459_v33, 3 }
  0x18   : > { %12671 = vmatpush3.bf16.msra.mxu1 %v14089_v5  ;;  %12522 = vmatprep.subr.bf16.mxu0 %v14097_v6  ;;  %v2357_v23 = vrot.slane %v14431_v18, 3  ;;  %v2361_v31 = vsel %vm18779_vm0, %v2358_v20, %v2360_v25  ;;  %v14470_v39 = vld [vmem:[%s14409_s10 + $0x50] sm:$0xff]   ;;  %v14477_v42 = vrot.slane %v432_v30, 2  ;;  %v14482_v44 = vld [vmem:[%s14409_s10 + $0x28] sm:$0xff]   ;;  %v14486_v46 = vld [vmem:[%s14409_s10 + $0x58] sm:$0xff]   ;;  %v11417_v51 = vcombine.low %v2298_v36, %v2299_v12  ;;  %s14346_s17 = smov 64  }
  0x19   : > { %v298_v22 = vsel %vm18779_vm0, %v296_v16, %v297_v13  ;;  %v300_v28 = vsel %vm18779_vm0, %v297_v13, %v299_v24  ;;  %v302_v37 = vsel %vm18779_vm0, %v299_v24, %v301_v32  ;;  %v2363_v40 = vsel %vm18779_vm0, %v2360_v25, %v2362_v34  ;;  %12684 = vmatprep.subr.bf16.mxu1 %v14104_v41  ;;  %v14489_v47 = vld [vmem:[%s14409_s10 + $0x30] ss:$0 sps:$4 sm:$0x77]   ;;  %v14501_v55 = vld [vmem:[%s14409_s10 + $0x60] ss:$0 sps:$4 sm:$0x77]  }
  0x1a   : > { %12510 = vmatprep.mubr.msk.bf16.mxu0 %vm18807_vm1, %v298_v22  ;;  %v2359_v27 = vsel %vm18779_vm0, %v2357_v23, %v2358_v20  ;;  %v2364_v43 = vrot.slane %v14470_v39, 3  ;;  %v304_v45 = vsel %vm18779_vm0, %v301_v32, %v303_v38  ;;  %v305_v49 = vrot.slane %v14482_v44, 3  ;;  %v14537_v16 = vld [vmem:[%s18771_s1 + $0x30] sm:$0xff]  }
  0x1b   : > { %12672 = vmatprep.mubr.msk.bf16.mxu1 %vm18807_vm1, %v2359_v27  ;;  %12511 = vmatmul.mubr.msk.bf16.vlgmr.msra.gmra.mrb[0].mxu0 %vm18807_vm1, %v300_v28  ;;  %v2366_v52 = vrot.slane %v14486_v46, 3  ;;  %v307_v53 = vrot.slane %v14489_v47, 3  ;;  %v435_v60 = vshll.u32 %v14429_v17, 16  ;;  %v2368_v61 = vrot.slane %v14501_v55, 3 }
  0x1c   : > { %12673 = vmatmul.mubr.msk.bf16.vlgmr.msra.gmra.mrb[0].mxu1 %vm18807_vm1, %v2361_v31  ;;  %12523 = vmatpush3.bf16.msra.mxu0 %v14097_v6  ;;  %v2365_v48 = vsel %vm18779_vm0, %v2362_v34, %v2364_v43  ;;  %v306_v54 = vsel %vm18779_vm0, %v303_v38, %v305_v49  ;;  %v443_v63 = vshll.u32 %v14418_v10, 16  ;;  %v2491_v2 = vshrl.u32 %v11417_v51, 16 }
  0x1d   : > { %12514 = vmatprep.mubr.msk.bf16.mxu0 %vm18807_vm1, %v302_v37  ;;  %12524 = vmatprep.subr.bf16.mxu0 %v14102_v35  ;;  %v2367_v57 = vsel %vm18779_vm0, %v2364_v43, %v2366_v52  ;;  %v308_v58 = vsel %vm18779_vm0, %v305_v49, %v307_v53  ;;  %v437_v1 = vrot.slane %v435_v60, 3  ;;  %v2494_v3 = vshll.u32 %v11417_v51, 16 }
  0x1e   : > { %12676 = vmatprep.mubr.msk.bf16.mxu1 %vm18807_vm1, %v2363_v40  ;;  %12685 = vmatpush3.bf16.msra.mxu1 %v14104_v41  ;;  %v2499_v4 = vshrl.u32 %v14426_v15, 16  ;;  %v2369_v5 = vsel %vm18779_vm0, %v2366_v52, %v2368_v61  ;;  %v442_v6 = vrot.slane %v440_v62, 2  ;;  %v445_v7 = vrot.slane %v443_v63, 3  ;;  %v14113_v61 = vld [vmem:[%s18771_s1 + $0x38] sm:$0xff]  }
  0x1f   : > { %12686 = vmatprep.subr.bf16.mxu1 %v14110_v56  ;;  %v2502_v8 = vshll.u32 %v14426_v15, 16  ;;  %v438_v9 = vor.u32 %v437_v1, %v14477_v42  ;;  %v2493_v12 = vrot.slane %v2491_v2, 2  ;;  %v2496_v13 = vrot.slane %v2494_v3, 3 }
  0x20   : > { %12525 = vmatpush3.bf16.msra.mxu0 %v14102_v35  ;;  %v2501_v14 = vrot.slane %v2499_v4, 2  ;;  %v446_v17 = vor.u32 %v445_v7, %v442_v6  ;;  %v449_v22 = vshrl.u32 %v14434_v19, 16  ;;  %v452_v23 = vshll.u32 %v14434_v19, 16 }
  0x21   : > { %12526 = vmatprep.subr.bf16.mxu0 %v14108_v50  ;;  %v2504_v20 = vrot.slane %v2502_v8, 3  ;;  %v2497_v24 = vor.u32 %v2496_v13, %v2493_v12  ;;  %v2508_v25 = vshrl.u32 %v14438_v21, 16  ;;  %v2511_v27 = vshll.u32 %v14438_v21, 16 }
  0x22   : > { %12687 = vmatpush3.bf16.msra.mxu1 %v14110_v56  ;;  %v458_v28 = vshrl.u32 %v14446_v26, 16  ;;  %v447_v30 = vsel %vm18777_vm2, %v438_v9, %v446_v17  ;;  %v451_v32 = vrot.slane %v449_v22, 2  ;;  %v454_v34 = vrot.slane %v452_v23, 3 }
  0x23   : > { %12515 = vmatmul.mubr.msk.bf16.gmra.mrb[4].mxu0 %vm18807_vm1, %v304_v45  ;;  %12688 = vmatprep.subr.bf16.mxu1 %v14111_v59  ;;  %v2505_v31 = vor.u32 %v2504_v20, %v2501_v14  ;;  %v2510_v35 = vrot.slane %v2508_v25, 2  ;;  %v2513_v36 = vrot.slane %v2511_v27, 3  ;;  %v461_v38 = vshll.u32 %v14446_v26, 16 }
  0x24   : > { %12677 = vmatmul.mubr.msk.bf16.gmra.mrb[4].mxu1 %vm18807_vm1, %v2365_v48  ;;  %12518 = vmatprep.mubr.msk.bf16.mxu0 %vm18807_vm1, %v306_v54  ;;  %v460_v37 = vrot.slane %v458_v28, 2  ;;  %v455_v41 = vor.u32 %v454_v34, %v451_v32  ;;  %v2517_v42 = vshrl.u32 %v14451_v29, 16  ;;  %v2520_v43 = vshll.u32 %v14451_v29, 16 }
  0x25   : > { %12680 = vmatprep.mubr.msk.bf16.mxu1 %vm18807_vm1, %v2367_v57  ;;  %12527 = vmatpush3.bf16.msra.mxu0 %v14108_v50  ;;  %v2506_v40 = vsel %vm18777_vm2, %v2497_v24, %v2505_v31  ;;  %v2514_v45 = vor.u32 %v2513_v36, %v2510_v35  ;;  %v463_v48 = vrot.slane %v461_v38, 3  ;;  %v467_v49 = vshrl.u32 %v14459_v33, 16 }
  0x26   : > { %12540 = vmatprep.subr.bf16.mxu0 %v14521_v0  ;;  %12689 = vmatpush3.bf16.msra.mxu1 %v14111_v59  ;;  %v470_v50 = vshll.u32 %v14459_v33, 16  ;;  %v456_v51 = vsel %vm18777_vm2, %v446_v17, %v455_v41  ;;  %v2519_v52 = vrot.slane %v2517_v42, 2  ;;  %v2522_v53 = vrot.slane %v2520_v43, 3  ;;  %v14116_v17 = vld [vmem:[%s18771_s1 + $0x38] sm:$0xff]  }
  0x27   : > { %12702 = vmatprep.subr.bf16.mxu1 %v14537_v16  ;;  %v2526_v54 = vshrl.u32 %v14470_v39, 16  ;;  %v2515_v56 = vsel %vm18777_vm2, %v2505_v31, %v2514_v45  ;;  %v464_v57 = vor.u32 %v463_v48, %v460_v37  ;;  %v2529_v2 = vshll.u32 %v14470_v39, 16 }
  0x28   : > { %v472_v59 = vrot.slane %v470_v50, 3  ;;  %v2523_v60 = vor.u32 %v2522_v53, %v2519_v52  ;;  %v476_v3 = vshrl.u32 %v14482_v44, 16  ;;  %v479_v6 = vshll.u32 %v14482_v44, 16  ;;  %v14719_v44 = vld [vmem:[%s14409_s10 + $0x44] sm:$0xf] }
  0x29   : > { %v2528_v1 = vrot.slane %v2526_v54, 2  ;;  %v2535_v7 = vshrl.u32 %v14486_v46, 16  ;;  %v2531_v12 = vrot.slane %v2529_v2, 3  ;;  %v2538_v14 = vshll.u32 %v14486_v46, 16 }
  0x2a   : > { %v2524_v9 = vsel %vm18777_vm2, %v2514_v45, %v2523_v60  ;;  %v478_v13 = vrot.slane %v476_v3, 2  ;;  %v481_v24 = vrot.slane %v479_v6, 3  ;;  %v485_v31 = vshrl.u32 %v14489_v47, 16  ;;  %v14117_v45 = vld [vmem:[%s18771_s1 + $0x40] sm:$0xff]  }
  0x2b   : > { %12519 = vmatmul.mubr.msk.bf16.gmra.mrb[8].mxu0 %vm18807_vm1, %v308_v58  ;;  %v469_v58 = vrot.slane %v467_v49, 2  ;;  %v2532_v32 = vor.u32 %v2531_v12, %v2528_v1  ;;  %v2540_v34 = vrot.slane %v2538_v14, 3  ;;  %v488_v35 = vshll.u32 %v14489_v47, 16 }
  0x2c   : > { %12681 = vmatmul.mubr.msk.bf16.gmra.mrb[8].mxu1 %vm18807_vm1, %v2369_v5  ;;  %12528 = vmatprep.mubr.msk.bf16.mxu0 %vm18807_vm1, %v447_v30  ;;  %v465_v5 = vsel %vm18777_vm2, %v455_v41, %v464_v57  ;;  %v2537_v30 = vrot.slane %v2535_v7, 2  ;;  %v2544_v36 = vshrl.u32 %v14501_v55, 16  ;;  %v482_v37 = vor.u32 %v481_v24, %v478_v13 }
  0x2d   : > { %12690 = vmatprep.mubr.msk.bf16.mxu1 %vm18807_vm1, %v2506_v40  ;;  %v473_v20 = vor.u32 %v472_v59, %v469_v58  ;;  %v487_v40 = vrot.slane %v485_v31, 2  ;;  %v2547_v41 = vshll.u32 %v14501_v55, 16  ;;  %v2533_v58 = vsel %vm18777_vm2, %v2523_v60, %v2532_v32 }
  0x2e   : > { %v2541_v48 = vor.u32 %v2540_v34, %v2537_v30  ;;  %v2546_v47 = vrot.slane %v2544_v36, 2  ;;  %v630_v59 = vrot.slane %v440_v62, 3  ;;  %v631_v1 = vrot.slane %v443_v63, 4  ;;  %v14645_v63 = vld [vmem:[%s18771_s1 + $0x48] sm:$0xff]  }
  0x2f   : > { %v474_v52 = vsel %vm18777_vm2, %v464_v57, %v473_v20  ;;  %v2549_v53 = vrot.slane %v2547_v41, 3  ;;  %v483_v55 = vsel %vm18777_vm2, %v473_v20, %v482_v37  ;;  %v2683_v10 = vshll.u32 %v14431_v18, 16 }
  0x30   : > { %v2687_v62 = vrot.slane %v2499_v4, 3  ;;  %v2688_v24 = vrot.slane %v2502_v8, 4  ;;  %v634_v30 = vrot.slane %v449_v22, 3  ;;  %v2691_v15 = vrot.slane %v2508_v25, 3 }
  0x31   : > { %v2550_v12 = vor.u32 %v2549_v53, %v2546_v47  ;;  %v2692_v8 = vrot.slane %v2511_v27, 4  ;;  %v638_v19 = vrot.slane %v458_v28, 3  ;;  %v2695_v21 = vrot.slane %v2517_v42, 3  ;;  %v788_v28 = vld [vmem:[%s14409_s10 + $0x8] sm:$0x8] }
  0x32   : > { %v2689_v4 = vor.u32 %v2688_v24, %v2687_v62  ;;  %v2696_v25 = vrot.slane %v2520_v43, 4  ;;  %v642_v26 = vrot.slane %v467_v49, 3  ;;  %v643_v29 = vrot.slane %v470_v50, 4  ;;  %v14688_v42 = vld [vmem:[%s14409_s10 + $0x10] sm:$0xf] }
  0x33   : > { %12529 = vmatmul.mubr.msk.bf16.vlgmr.msra.gmra.mrb[0].mxu0 %vm18807_vm1, %v456_v51  ;;  %v490_v51 = vrot.slane %v488_v35, 3  ;;  %v2551_v22 = vsel %vm18777_vm2, %v2541_v48, %v2550_v12  ;;  %v2700_v33 = vrot.slane %v2529_v2, 4  ;;  %v646_v49 = vrot.slane %v476_v3, 3  ;;  %v14716_v3 = vld [vmem:[%s14409_s10 + $0x40] sm:$0xf]  ;;  %v14742_v12 = vld [vmem:[%s18771_s1 + $0x58] sm:$0xff]  }
  0x34   : > { %12691 = vmatmul.mubr.msk.bf16.vlgmr.msra.gmra.mrb[0].mxu1 %vm18807_vm1, %v2515_v56  ;;  %12541 = vmatpush3.bf16.msra.mxu0 %v14521_v0  ;;  %v14115_v0 = vld [vmem:[%s18771_s1 + $0x40] sm:$0xff]   ;;  %v623_v56 = vshrl.u32 %v14420_v11, 16  ;;  %v14691_v41 = vor.u32 %v2696_v25, %v2695_v21  ;;  %v647_v50 = vrot.slane %v479_v6, 4  ;;  %v2703_v39 = vrot.slane %v2535_v7, 3  ;;  %v14751_v24 = vld [vmem:[%s14409_s10 + $0x4c] sm:$0xf] }
  0x35   : > { %12532 = vmatprep.mubr.msk.bf16.mxu0 %vm18807_vm1, %v465_v5  ;;  %12694 = vmatprep.mubr.msk.bf16.mxu1 %vm18807_vm1, %v2524_v9  ;;  %v2542_v5 = vsel %vm18777_vm2, %v2532_v32, %v2541_v48  ;;  %v2680_v9 = vshrl.u32 %v14431_v18, 16  ;;  %v491_v60 = vor.u32 %v490_v51, %v487_v40  ;;  %v2685_v18 = vrot.slane %v2683_v10, 4  ;;  %v14678_v40 = vld [vmem:[%s14409_s10 + $0xc] sm:$0xf]  ;;  %v14696_v48 = vld [vmem:[%s14409_s10 + $0x14] sm:$0xf] }
  0x36   : > { %12542 = vmatprep.subr.bf16.mxu0 %v14113_v61  ;;  %12703 = vmatpush3.bf16.msra.mxu1 %v14537_v16  ;;  %v626_v16 = vshll.u32 %v14420_v11, 16  ;;  %v625_v57 = vrot.slane %v623_v56, 3  ;;  %v14636_v11 = vld [vmem:[%s18771_s1 + $0x48] sm:$0xff]   ;;  %v635_v32 = vrot.slane %v452_v23, 4  ;;  %v639_v23 = vrot.slane %v461_v38, 4  ;;  %v14124_v10 = vld [vmem:[%s18771_s1 + $0x50] sm:$0xff]  }
  0x37   : > { %12704 = vmatprep.subr.bf16.mxu1 %v14116_v17  ;;  %v2682_v20 = vrot.slane %v2680_v9, 3  ;;  %v492_v34 = vsel %vm18777_vm2, %v482_v37, %v491_v60  ;;  %v2693_v37 = vor.u32 %v2692_v8, %v2691_v15  ;;  %v14123_v38 = vld [vmem:[%s14409_s10 + $0x60] ss:$0 sps:$4 sm:$0xff]   ;;  %v2845_v51 = vld [vmem:[%s14409_s10 + $0x38] sm:$0x8]  ;;  %v11280_v47 = vcombine.low %v788_v28, %v14678_v40 }
  0x38   : > { %12543 = vmatpush3.bf16.msra.mxu0 %v14113_v61  ;;  %v628_v61 = vrot.slane %v626_v16, 4  ;;  %v636_v36 = vor.u32 %v635_v32, %v634_v30  ;;  %v640_v43 = vor.u32 %v639_v23, %v638_v19  ;;  %v2704_v2 = vrot.slane %v2538_v14, 4  ;;  %v14727_v14 = vld [vmem:[%s14409_s10 + $0x18] sm:$0xf]  ;;  %v14768_v15 = vld [vmem:[%s14409_s10 + $0x20] sm:$0xf] }
  0x39   : > { %12544 = vmatprep.subr.bf16.mxu0 %v14115_v0  ;;  %v2686_v31 = vor.u32 %v2685_v18, %v2682_v20  ;;  %v2694_v53 = vsel %vm18776_vm3, %v2689_v4, %v2693_v37  ;;  %v644_v6 = vor.u32 %v643_v29, %v642_v26  ;;  %v2708_v7 = vshrl.u32 %v14123_v38, 16  ;;  %v14748_v20 = vld [vmem:[%s14409_s10 + $0x48] sm:$0xf]  ;;  %v14771_v8 = vld [vmem:[%s14409_s10 + $0x24] sm:$0xf] }
  0x3a   : > { %12705 = vmatpush3.bf16.msra.mxu1 %v14116_v17  ;;  %v629_v13 = vor.u32 %v628_v61, %v625_v57  ;;  %v632_v17 = vor.u32 %v631_v1, %v630_v59  ;;  %v2698_v59 = vsel %vm18776_vm3, %v2693_v37, %v14691_v41  ;;  %v2711_v46 = vshll.u32 %v14123_v38, 16  ;;  %v14730_v1 = vld [vmem:[%s14409_s10 + $0x1c] sm:$0xf]  ;;  %v14783_v23 = vld [vmem:[%s14409_s10 + $0x50] sm:$0xf] }
  0x3b   : > { %12533 = vmatmul.mubr.msk.bf16.gmra.mrb[4].mxu0 %vm18807_vm1, %v474_v52  ;;  %12706 = vmatprep.subr.bf16.mxu1 %v14117_v45  ;;  %v2690_v27 = vsel %vm18776_vm3, %v2686_v31, %v2689_v4  ;;  %v14707_v52 = vld [vmem:[%s14409_s10 + $0x3c] sm:$0xf]  ;;  %v14735_v61 = vor.u32 %v647_v50, %v646_v49  ;;  %v842_v9 = vshrl.u32 %v11280_v47, 16  ;;  %v845_v62 = vshll.u32 %v11280_v47, 16  ;;  %v14788_v26 = vld [vmem:[%s14409_s10 + $0x54] sm:$0xf] }
  0x3c   : > { %12695 = vmatmul.mubr.msk.bf16.gmra.mrb[4].mxu1 %vm18807_vm1, %v2533_v58  ;;  %12536 = vmatprep.mubr.msk.bf16.mxu0 %vm18807_vm1, %v483_v55  ;;  %v633_v35 = vsel %vm18776_vm3, %v629_v13, %v632_v17  ;;  %v11281_v58 = vcombine.low %v14688_v42, %v14696_v48  ;;  %v641_v55 = vsel %vm18776_vm3, %v636_v36, %v640_v43  ;;  %v14810_v50 = vld [vmem:[%s18771_s1 + $0x60] sm:$0xff]  }
  0x3d   : > { %12698 = vmatprep.mubr.msk.bf16.mxu1 %vm18807_vm1, %v2542_v5  ;;  %12545 = vmatpush3.bf16.msra.mxu0 %v14115_v0  ;;  %v14121_v0 = vld [vmem:[%s14409_s10 + $0x30] ss:$0 sps:$4 sm:$0xff]   ;;  %v11449_v60 = vcombine.low %v2845_v51, %v14707_v52  ;;  %v11450_v18 = vcombine.low %v14716_v3, %v14719_v44  ;;  %v14757_v4 = vor.u32 %v2704_v2, %v2703_v39  ;;  %v14817_v2 = vld [vmem:[%s14409_s10 + $0x28] sm:$0xf] }
  0x3e   : > { %12707 = vmatpush3.bf16.msra.mxu1 %v14117_v45  ;;  %12558 = vmatprep.subr.bf16.mxu0 %v14636_v11  ;;  %v2699_v45 = vrot.slane %v2526_v54, 3  ;;  %v637_v54 = vsel %vm18776_vm3, %v632_v17, %v636_v36  ;;  %v651_v56 = vshrl.u32 %v14121_v0, 16  ;;  %v654_v16 = vshll.u32 %v14121_v0, 16  ;;  %v14119_v5 = vld [vmem:[%s18771_s1 + $0x50] sm:$0xff]  }
  0x3f   : > { %12720 = vmatprep.subr.bf16.mxu1 %v14645_v63  ;;  %v850_v13 = vshrl.u32 %v11281_v58, 16  ;;  %v853_v17 = vshll.u32 %v11281_v58, 16  ;;  %v14765_v32 = vcombine.low %v14727_v14, %v14730_v1  ;;  %v2901_v19 = vshll.u32 %v11449_v60, 16 }
  0x40   : > { %v2701_v57 = vor.u32 %v2700_v33, %v2699_v45  ;;  %v14759_v30 = vrot.slane %v651_v56, 3  ;;  %v14761_v31 = vrot.slane %v654_v16, 4  ;;  %v645_v21 = vsel %vm18776_vm3, %v640_v43, %v644_v6  ;;  %v14800_v45 = vld [vmem:[%s18771_s1 + $0x60] sm:$0xff]  }
  0x41   : > { %v2906_v25 = vshrl.u32 %v11450_v18, 16  ;;  %v844_v0 = vrot.slane %v842_v9, 3  ;;  %v847_v36 = vrot.slane %v845_v62, 4  ;;  %v852_v37 = vrot.slane %v850_v13, 3  ;;  %v14835_v9 = vld [vmem:[%s14409_s10 + $0x30] sm:$0xf] }
  0x42   : > { %v855_v28 = vrot.slane %v853_v17, 4  ;;  %v2702_v29 = vsel %vm18776_vm3, %v14691_v41, %v2701_v57  ;;  %v649_v38 = vsel %vm18776_vm3, %v644_v6, %v14735_v61  ;;  %v859_v43 = vshrl.u32 %v14765_v32, 16  ;;  %v14820_v6 = vld [vmem:[%s14409_s10 + $0x2c] sm:$0xf]  ;;  %v14843_v13 = vld [vmem:[%s14409_s10 + $0x60] sm:$0xf] }
  0x43   : > { %12537 = vmatmul.mubr.msk.bf16.gmra.mrb[8].mxu0 %vm18807_vm1, %v492_v34  ;;  %v14775_v34 = vrot.slane %v2708_v7, 3  ;;  %v2706_v51 = vsel %vm18776_vm3, %v2701_v57, %v14757_v4  ;;  %v2903_v33 = vrot.slane %v2901_v19, 4  ;;  %v11283_v49 = vcombine.low %v14768_v15, %v14771_v8 }
  0x44   : > { %12699 = vmatmul.mubr.msk.bf16.gmra.mrb[8].mxu1 %vm18807_vm1, %v2551_v22  ;;  %12546 = vmatprep.mubr.msk.bf16.mxu0 %vm18807_vm1, %v633_v35  ;;  %v14125_v22 = vld [vmem:[%s18771_s1 + $0x58] sm:$0xff]   ;;  %v2898_v35 = vshrl.u32 %v11449_v60, 16  ;;  %v657_v47 = vor.u32 %v14761_v31, %v14759_v30  ;;  %v11452_v39 = vcombine.low %v14783_v23, %v14788_v26  ;;  %v848_v16 = vor.u32 %v847_v36, %v844_v0  ;;  %v14838_v60 = vld [vmem:[%s14409_s10 + $0x34] sm:$0xf] }
  0x45   : > { %12708 = vmatprep.mubr.msk.bf16.mxu1 %vm18807_vm1, %v2690_v27  ;;  %v2909_v27 = vshll.u32 %v11450_v18, 16  ;;  %v856_v58 = vor.u32 %v855_v28, %v852_v37  ;;  %v861_v7 = vrot.slane %v859_v43, 3  ;;  %v871_v62 = vshll.u32 %v11283_v49, 16 }
  0x46   : > { %v2900_v41 = vrot.slane %v2898_v35, 3  ;;  %v2924_v30 = vshrl.u32 %v11452_v39, 16  ;;  %v2927_v31 = vshll.u32 %v11452_v39, 16 }
  0x48   : > { %v2904_v17 = vor.u32 %v2903_v33, %v2900_v41  ;;  %v2926_v36 = vrot.slane %v2924_v30, 3  ;;  %v2929_v37 = vrot.slane %v2927_v31, 4  ;;  %v14871_v33 = vld [vmem:[%s14409_s10 + $0x68] sm:$0xf] }
  0x4a   : > { %v2930_v39 = vor.u32 %v2929_v37, %v2926_v36 }
  0x4b   : > { %12547 = vmatmul.mubr.msk.bf16.vlgmr.msra.gmra.mrb[0].mxu0 %vm18807_vm1, %v637_v54  ;;  %v2908_v54 = vrot.slane %v2906_v25, 3 }
  0x4c   : > { %12709 = vmatmul.mubr.msk.bf16.vlgmr.msra.gmra.mrb[0].mxu1 %vm18807_vm1, %v2694_v53  ;;  %12559 = vmatpush3.bf16.msra.mxu0 %v14636_v11  ;;  %v14777_v11 = vrot.slane %v2711_v46, 4  ;;  %v2911_v53 = vrot.slane %v2909_v27, 4  ;;  %v862_v46 = vshll.u32 %v14765_v32, 16  ;;  %v14847_v32 = vld [vmem:[%s14409_s10 + $0x64] sm:$0xf] }
  0x4d   : > { %12550 = vmatprep.mubr.msk.bf16.mxu0 %vm18807_vm1, %v641_v55  ;;  %12712 = vmatprep.mubr.msk.bf16.mxu1 %vm18807_vm1, %v2698_v59  ;;  %v14826_v55 = vld [vmem:[%s14409_s10 + $0x58] sm:$0xf]  ;;  %v14829_v59 = vld [vmem:[%s14409_s10 + $0x5c] sm:$0xf]  ;;  %v11454_v28 = vcombine.low %v14843_v13, %v14847_v32 }
  0x4e   : > { %12560 = vmatprep.subr.bf16.mxu0 %v14119_v5  ;;  %12721 = vmatpush3.bf16.msra.mxu1 %v14645_v63  ;;  %v11451_v63 = vcombine.low %v14748_v20, %v14751_v24  ;;  %v2714_v56 = vor.u32 %v14777_v11, %v14775_v34  ;;  %v2912_v18 = vor.u32 %v2911_v53, %v2908_v54  ;;  %v864_v35 = vrot.slane %v862_v46, 4 }
  0x4f   : > { %12722 = vmatprep.subr.bf16.mxu1 %v14124_v10  ;;  %v658_v34 = vsel %vm18776_vm3, %v14735_v61, %v657_v47  ;;  %v873_v61 = vrot.slane %v871_v62, 4 }
  0x50   : > { %12561 = vmatpush3.bf16.msra.mxu0 %v14119_v5  ;;  %v2915_v5 = vshrl.u32 %v11451_v63, 16  ;;  %v2918_v57 = vshll.u32 %v11451_v63, 16  ;;  %v2715_v11 = vsel %vm18776_vm3, %v14757_v4, %v2714_v56  ;;  %v11285_v4 = vcombine.low %v14835_v9, %v14838_v60  ;;  %v14866_v63 = vld [vmem:[%s14409_s10 + $0x38] sm:$0xf] }
  0x51   : > { %12562 = vmatprep.subr.bf16.mxu0 %v14742_v12  ;;  %v2913_v0 = vsel %vm18776_vm3, %v2904_v17, %v2912_v18  ;;  %v865_v43 = vor.u32 %v864_v35, %v861_v7  ;;  %v2942_v56 = vshrl.u32 %v11454_v28, 16  ;;  %v14138_v7 = vld [vmem:[%s18771_s1 + $0x68] sm:$0xff]   ;;  %v11286_v17 = vcombine.low %v14866_v63, %v14866_v63 }
  0x52   : > { %12723 = vmatpush3.bf16.msra.mxu1 %v14124_v10  ;;  %v868_v10 = vshrl.u32 %v11283_v49, 16  ;;  %v2917_v19 = vrot.slane %v2915_v5, 3  ;;  %v2920_v25 = vrot.slane %v2918_v57, 4  ;;  %v886_v47 = vshrl.u32 %v11285_v4, 16 }
  0x53   : > { %12551 = vmatmul.mubr.msk.bf16.gmra.mrb[4].mxu0 %vm18807_vm1, %v645_v21  ;;  %12724 = vmatprep.subr.bf16.mxu1 %v14125_v22  ;;  %v11453_v21 = vcombine.low %v14826_v55, %v14829_v59  ;;  %v889_v54 = vshll.u32 %v11285_v4, 16  ;;  %v866_v57 = vsel %vm18776_vm3, %v856_v58, %v865_v43  ;;  %v14144_v4 = vld [vmem:[%s18771_s1 + $0x70] sm:$0xff]  }
  0x54   : > { %12713 = vmatmul.mubr.msk.bf16.gmra.mrb[4].mxu1 %vm18807_vm1, %v2702_v29  ;;  %12554 = vmatprep.mubr.msk.bf16.mxu0 %vm18807_vm1, %v649_v38  ;;  %v870_v27 = vrot.slane %v868_v10, 3  ;;  %v2921_v49 = vor.u32 %v2920_v25, %v2917_v19  ;;  %v888_v31 = vrot.slane %v886_v47, 3  ;;  %v14146_v19 = vld [vmem:[%s18771_s1 + $0x68] sm:$0xff]   ;;  %v898_v25 = vshll.u32 %v11286_v17, 16  ;;  %v14150_v47 = vld [vmem:[%s18771_s1 + $0x78] sm:$0xff]  }
  0x55   : > { %12716 = vmatprep.mubr.msk.bf16.mxu1 %vm18807_vm1, %v2706_v51  ;;  %12563 = vmatpush3.bf16.msra.mxu0 %v14742_v12  ;;  %v11284_v12 = vcombine.low %v14817_v2, %v14820_v6  ;;  %v2933_v51 = vshrl.u32 %v11453_v21, 16  ;;  %v2936_v41 = vshll.u32 %v11453_v21, 16  ;;  %v895_v21 = vshrl.u32 %v11286_v17, 16 }
  0x56   : > { %12725 = vmatpush3.bf16.msra.mxu1 %v14125_v22  ;;  %12576 = vmatprep.subr.bf16.mxu0 %v14800_v45  ;;  %v857_v22 = vsel %vm18776_vm3, %v848_v16, %v856_v58  ;;  %v874_v53 = vor.u32 %v873_v61, %v870_v27  ;;  %v2945_v16 = vshll.u32 %v11454_v28, 16  ;;  %v2922_v30 = vsel %vm18776_vm3, %v2912_v18, %v2921_v49 }
  0x57   : > { %12738 = vmatprep.subr.bf16.mxu1 %v14810_v50  ;;  %v877_v29 = vshrl.u32 %v11284_v12, 16  ;;  %v880_v38 = vshll.u32 %v11284_v12, 16  ;;  %v2935_v10 = vrot.slane %v2933_v51, 3  ;;  %v2938_v62 = vrot.slane %v2936_v41, 4 }
  0x58   : > { %v875_v12 = vsel %vm18776_vm3, %v865_v43, %v874_v53  ;;  %v2931_v58 = vsel %vm18776_vm3, %v2921_v49, %v2930_v39  ;;  %v2947_v35 = vrot.slane %v2945_v16, 4  ;;  %v11302_v16 = vcombine.low %v14678_v40, %v14688_v42 }
  0x59   : > { %v879_v46 = vrot.slane %v877_v29, 3  ;;  %v882_v5 = vrot.slane %v880_v38, 4  ;;  %v2939_v27 = vor.u32 %v2938_v62, %v2935_v10  ;;  %v897_v29 = vrot.slane %v895_v21, 3  ;;  %v14166_v10 = vld [vmem:[%s14409_s10 + $0x3c] sm:$0xff]  }
  0x5a   : > { %v900_v38 = vrot.slane %v898_v25, 4  ;;  %v11472_v40 = vcombine.low %v14719_v44, %v14748_v20  ;;  %v11304_v42 = vcombine.low %v14730_v1, %v14768_v15  ;;  %v14160_v44 = vld [vmem:[%s18771_s1 + $0x88] sm:$0xff]   ;;  %v11305_v15 = vcombine.low %v14771_v8, %v14817_v2  ;;  %v14964_v8 = vld [vmem:[%s18771_s1 + $0x90] sm:$0xff]  }
  0x5b   : > { %12555 = vmatmul.mubr.msk.bf16.gmra.mrb[8].mxu0 %vm18807_vm1, %v658_v34  ;;  %v891_v34 = vrot.slane %v889_v54, 4  ;;  %v883_v18 = vor.u32 %v882_v5, %v879_v46  ;;  %v2940_v43 = vsel %vm18776_vm3, %v2930_v39, %v2939_v27  ;;  %v14156_v54 = vld [vmem:[%s18771_s1 + $0x78] sm:$0xff]   ;;  %v11471_v5 = vcombine.low %v14707_v52, %v14716_v3  ;;  %v14154_v3 = vld [vmem:[%s18771_s1 + $0x80] sm:$0xff]  }
  0x5c   : > { %12717 = vmatmul.mubr.msk.bf16.gmra.mrb[8].mxu1 %vm18807_vm1, %v2715_v11  ;;  %12564 = vmatprep.mubr.msk.bf16.mxu0 %vm18807_vm1, %v857_v22  ;;  %v11455_v11 = vcombine.low %v14871_v33, %v14871_v33  ;;  %v2944_v22 = vrot.slane %v2942_v56, 3  ;;  %v11473_v52 = vcombine.low %v14751_v24, %v14783_v23  ;;  %v14167_v20 = vld [vmem:[%s14409_s10 + $0x44] sm:$0xff]   ;;  %v3284_v24 = vshll.u32 %v14166_v10, 16 }
  0x5d   : > { %12726 = vmatprep.mubr.msk.bf16.mxu1 %vm18807_vm1, %v2913_v0  ;;  %v892_v61 = vor.u32 %v891_v34, %v888_v31  ;;  %v884_v28 = vsel %vm18776_vm3, %v874_v53, %v883_v18  ;;  %v901_v53 = vor.u32 %v900_v38, %v897_v29  ;;  %v14163_v23 = vld [vmem:[%s18771_s1 + $0x88] sm:$0xff]   ;;  %v11474_v62 = vcombine.low %v14788_v26, %v14826_v55  ;;  %v14168_v31 = vld [vmem:[%s14409_s10 + $0x1c] sm:$0xff]  }
  0x5e   : > { %v2951_v0 = vshrl.u32 %v11455_v11, 16  ;;  %v2954_v36 = vshll.u32 %v11455_v11, 16  ;;  %v2948_v37 = vor.u32 %v2947_v35, %v2944_v22  ;;  %v11306_v17 = vcombine.low %v14820_v6, %v14835_v9  ;;  %v14170_v26 = vld [vmem:[%s14409_s10 + $0x4c] sm:$0xff]   ;;  %v14968_v55 = vld [vmem:[%s14409_s10 + $0x24] sm:$0xff]  }
  0x5f   : > { %v893_v51 = vsel %vm18776_vm3, %v883_v18, %v892_v61  ;;  %v902_v56 = vsel %vm18776_vm3, %v892_v61, %v901_v53  ;;  %v3286_v6 = vrot.slane %v3284_v24, 1  ;;  %v3289_v9 = vshll.u32 %v14167_v20, 16  ;;  %v15003_v53 = vld [vmem:[%s14409_s10 + $0x64] sm:$0xff]   ;;  %v14179_v24 = vld [vmem:[%s14409_s10 + $0x3c] ss:$0 sps:$4 sm:$0x11]  }
  0x60   : > { %v2953_v41 = vrot.slane %v2951_v0, 3  ;;  %v2956_v49 = vrot.slane %v2954_v36, 4  ;;  %v1244_v18 = vshll.u32 %v14168_v31, 16  ;;  %v11307_v21 = vcombine.low %v14838_v60, %v14866_v63 }
  0x61   : > { %v3297_v25 = vshll.u32 %v14170_v26, 16  ;;  %v11476_v61 = vcombine.low %v14847_v32, %v14871_v33  ;;  %v3293_v0 = vshrl.u32 %v14167_v20, 16  ;;  %v3301_v63 = vshrl.u32 %v14170_v26, 16  ;;  %v15039_v26 = vld [vmem:[%s14409_s10 + $0x1c] sm:$0xff]  }
  0x62   : > { %v2957_v39 = vor.u32 %v2956_v49, %v2953_v41  ;;  %v1246_v29 = vrot.slane %v1244_v18, 1  ;;  %v1256_v33 = vshrl.u32 %v14968_v55, 16  ;;  %v3321_v20 = vshll.u32 %v15003_v53, 16 }
  0x63   : > { %12565 = vmatmul.mubr.msk.bf16.vlgmr.msra.gmra.mrb[0].mxu0 %vm18807_vm1, %v866_v57  ;;  %v11303_v57 = vcombine.low %v14696_v48, %v14727_v14  ;;  %v14162_v48 = vld [vmem:[%s18771_s1 + $0x80] sm:$0xff]   ;;  %v14165_v14 = vld [vmem:[%s14409_s10 + $0x14] sm:$0xff]   ;;  %v3299_v38 = vrot.slane %v3297_v25, 1  ;;  %v1276_v18 = vshll.u32 %v14179_v24, 16 }
  0x64   : > { %12727 = vmatmul.mubr.msk.bf16.vlgmr.msra.gmra.mrb[0].mxu1 %vm18807_vm1, %v2922_v30  ;;  %12577 = vmatpush3.bf16.msra.mxu0 %v14800_v45  ;;  %v14147_v45 = vld [vmem:[%s18771_s1 + $0x70] sm:$0xff]   ;;  %v2958_v46 = vsel %vm18776_vm3, %v2948_v37, %v2957_v39  ;;  %v11475_v30 = vcombine.low %v14829_v59, %v14843_v13  ;;  %v1236_v11 = vshll.u32 %v14165_v14, 16  ;;  %v15112_v24 = vld [vmem:[%s14409_s10 + $0x3c] sm:$0xff]  }
  0x65   : > { %12568 = vmatprep.mubr.msk.bf16.mxu0 %vm18807_vm1, %v875_v12  ;;  %12730 = vmatprep.mubr.msk.bf16.mxu1 %vm18807_vm1, %v2931_v58  ;;  %v3282_v12 = vshrl.u32 %v14166_v10, 16  ;;  %v14974_v59 = vld [vmem:[%s18771_s1 + $0x90] sm:$0xff]  }
  0x66   : > { %12578 = vmatprep.subr.bf16.mxu0 %v14138_v7  ;;  %12739 = vmatpush3.bf16.msra.mxu1 %v14810_v50  ;;  %v2949_v50 = vsel %vm18776_vm3, %v2939_v27, %v2948_v37  ;;  %v14979_v13 = vld [vmem:[%s14409_s10 + $0x54] sm:$0xff]   ;;  %v1238_v22 = vrot.slane %v1236_v11, 1  ;;  %v1252_v27 = vshll.u32 %v14968_v55, 16 }
  0x67   : > { %12740 = vmatprep.subr.bf16.mxu1 %v14146_v19  ;;  %v3287_v35 = vor.u32 %v3286_v6, %v3282_v12  ;;  %v3305_v36 = vshll.u32 %v14979_v13, 16  ;;  %v1409_v39 = vld [vmem:[%s14409_s10 + $0x14] sm:$0xf]  ;;  %v14180_v12 = vld [vmem:[%s18771_s1 + $0xa0] sm:$0xff]   ;;  %v3323_v6 = vrot.slane %v3321_v20, 1 }
  0x68   : > { %12579 = vmatpush3.bf16.msra.mxu0 %v14138_v7  ;;  %v14164_v7 = vld [vmem:[%s14409_s10 + $0xc] sm:$0xff]   ;;  %v1254_v32 = vrot.slane %v1252_v27, 1 }
  0x69   : > { %12580 = vmatprep.subr.bf16.mxu0 %v14144_v4  ;;  %v1231_v1 = vshll.u32 %v14164_v7, 16  ;;  %v1229_v2 = vshrl.u32 %v14164_v7, 16  ;;  %v3307_v49 = vrot.slane %v3305_v36, 1  ;;  %v14174_v7 = vld [vmem:[%s18771_s1 + $0x98] sm:$0xff]  }
  0x6a   : > { %12741 = vmatpush3.bf16.msra.mxu1 %v14146_v19  ;;  %v3291_v19 = vrot.slane %v3289_v9, 1  ;;  %v15043_v9 = vld [vmem:[%s14409_s10 + $0x4c] sm:$0xff]  }
  0x6b   : > { %12569 = vmatmul.mubr.msk.bf16.gmra.mrb[4].mxu0 %vm18807_vm1, %v884_v28  ;;  %12742 = vmatprep.subr.bf16.mxu1 %v14147_v45  ;;  %v1233_v34 = vrot.slane %v1231_v1, 1  ;;  %v14173_v28 = vld [vmem:[%s14409_s10 + $0x2c] sm:$0xff]  }
  0x6c   : > { %12731 = vmatmul.mubr.msk.bf16.gmra.mrb[4].mxu1 %vm18807_vm1, %v2940_v43  ;;  %12572 = vmatprep.mubr.msk.bf16.mxu0 %vm18807_vm1, %v893_v51  ;;  %v3292_v60 = vsel %vm1227_vm4, %v3287_v35, %v3291_v19  ;;  %v14175_v43 = vld [vmem:[%s14409_s10 + $0x5c] sm:$0xff]   ;;  %v3295_v41 = vor.u32 %v3293_v0, %v3291_v19  ;;  %v1264_v10 = vshrl.u32 %v14173_v28, 16  ;;  %v15055_v0 = vld [vmem:[%s14409_s10 + $0x24] sm:$0xff]  }
  0x6d   : > { %12734 = vmatprep.mubr.msk.bf16.mxu1 %vm18807_vm1, %v2949_v50  ;;  %12581 = vmatpush3.bf16.msra.mxu0 %v14144_v4  ;;  %v1234_v58 = vor.u32 %v1233_v34, %v1229_v2  ;;  %v1240_v4 = vshrl.u32 %v14165_v14, 16  ;;  %v14999_v50 = vld [vmem:[%s14409_s10 + $0x34] sm:$0xff]   ;;  %v3317_v1 = vshrl.u32 %v14175_v43, 16  ;;  %v14181_v2 = vld [vmem:[%s14409_s10 + $0x6c] ss:$0 sps:$4 sm:$0x11]  }
  0x6e   : > { %12743 = vmatpush3.bf16.msra.mxu1 %v14147_v45  ;;  %12594 = vmatprep.subr.bf16.mxu0 %v14150_v47  ;;  %v1248_v45 = vshrl.u32 %v14168_v31, 16  ;;  %v14183_v35 = vld [vmem:[%s18771_s1 + $0xa0] sm:$0xff]  }
  0x6f   : > { %12756 = vmatprep.subr.bf16.mxu1 %v14156_v54  ;;  %v1239_v37 = vsel %vm1227_vm4, %v1234_v58, %v1238_v22  ;;  %v1242_v51 = vor.u32 %v1240_v4, %v1238_v22  ;;  %v1272_v22 = vshrl.u32 %v14999_v50, 16  ;;  %v1470_v4 = vshll.u32 %v15039_v26, 16 }
  0x73   : > { %12573 = vmatmul.mubr.msk.bf16.gmra.mrb[8].mxu0 %vm18807_vm1, %v902_v56  ;;  %v3303_v56 = vor.u32 %v3301_v63, %v3299_v38  ;;  %v15066_v63 = vld [vmem:[%s14409_s10 + $0x54] sm:$0xff]  }
  0x74   : > { %12735 = vmatmul.mubr.msk.bf16.gmra.mrb[8].mxu1 %vm18807_vm1, %v2958_v46  ;;  %12582 = vmatprep.mubr.msk.bf16.mxu0 %vm18807_vm1, %v11302_v16  ;;  %v15007_v16 = vld [vmem:[%s14409_s10 + $0x18] sm:$0xf]  ;;  %v3462_v46 = vld [vmem:[%s14409_s10 + $0x44] sm:$0xf] }
  0x75   : > { %12744 = vmatprep.mubr.msk.bf16.mxu1 %vm18807_vm1, %v11471_v5  ;;  %v15011_v5 = vld [vmem:[%s14409_s10 + $0x48] sm:$0xf]  ;;  %v3308_v14 = vsel %vm1227_vm4, %v3303_v56, %v3307_v49 }
  0x7b   : > { %12583 = vmatmul.mubr.msk.bf16.vlgmr.msra.gmra.mrb[0].mxu0 %vm18807_vm1, %v11303_v57  ;;  %v1247_v57 = vsel %vm1227_vm4, %v1242_v51, %v1246_v29 }
  0x7c   : > { %12745 = vmatmul.mubr.msk.bf16.vlgmr.msra.gmra.mrb[0].mxu1 %vm18807_vm1, %v11472_v40  ;;  %12595 = vmatpush3.bf16.msra.mxu0 %v14150_v47  ;;  %v1250_v47 = vor.u32 %v1248_v45, %v1246_v29  ;;  %v3300_v40 = vsel %vm1227_vm4, %v3295_v41, %v3299_v38  ;;  %v15071_v29 = vld [vmem:[%s18771_s1 + $0xa8] sm:$0xff]   ;;  %v1472_v41 = vrot.slane %v1470_v4, 1 }
  0x7d   : > { %12586 = vmatprep.mubr.msk.bf16.mxu0 %vm18807_vm1, %v11304_v42  ;;  %12748 = vmatprep.mubr.msk.bf16.mxu1 %vm18807_vm1, %v11473_v52  ;;  %v3309_v42 = vshrl.u32 %v14979_v13, 16  ;;  %v3313_v52 = vshll.u32 %v14175_v43, 16 }
  0x7e   : > { %12596 = vmatprep.subr.bf16.mxu0 %v14154_v3  ;;  %12757 = vmatpush3.bf16.msra.mxu1 %v14156_v54  ;;  %v1260_v54 = vshll.u32 %v14173_v28, 16  ;;  %v3522_v28 = vshll.u32 %v15043_v9, 16 }
  0x7f   : > { %12758 = vmatprep.subr.bf16.mxu1 %v14162_v48  ;;  %v3315_v31 = vrot.slane %v3313_v52, 1 }
  0x80   : > { %12597 = vmatpush3.bf16.msra.mxu0 %v14154_v3  ;;  %v1255_v3 = vsel %vm1227_vm4, %v1250_v47, %v1254_v32 }
  0x81   : > { %12598 = vmatprep.subr.bf16.mxu0 %v14160_v44 }
  0x82   : > { %12759 = vmatpush3.bf16.msra.mxu1 %v14162_v48  ;;  %v1268_v48 = vshll.u32 %v14999_v50, 16  ;;  %v15080_v50 = vld [vmem:[%s14409_s10 + $0x2c] sm:$0xff]  }
  0x83   : > { %12587 = vmatmul.mubr.msk.bf16.gmra.mrb[4].mxu0 %vm18807_vm1, %v11305_v15  ;;  %12760 = vmatprep.subr.bf16.mxu1 %v14163_v23  ;;  %v11514_v15 = vcombine.low %v3462_v46, %v15011_v5 }
  0x84   : > { %12749 = vmatmul.mubr.msk.bf16.gmra.mrb[4].mxu1 %vm18807_vm1, %v11474_v62  ;;  %12590 = vmatprep.mubr.msk.bf16.mxu0 %vm18807_vm1, %v11306_v17  ;;  %v1262_v62 = vrot.slane %v1260_v54, 1  ;;  %v14182_v17 = vld [vmem:[%s18771_s1 + $0x98] sm:$0xff]   ;;  %v1270_v11 = vrot.slane %v1268_v48, 1  ;;  %v3524_v54 = vrot.slane %v3522_v28, 1  ;;  %v3534_v48 = vshrl.u32 %v15066_v63, 16 }
  0x85   : > { %12752 = vmatprep.mubr.msk.bf16.mxu1 %vm18807_vm1, %v11475_v30  ;;  %12599 = vmatpush3.bf16.msra.mxu0 %v14160_v44  ;;  %v11345_v44 = vcombine.low %v1409_v39, %v15007_v16  ;;  %v3311_v30 = vor.u32 %v3309_v42, %v3307_v49  ;;  %v3517_v13 = vshll.u32 %v11514_v15, 16  ;;  %v1478_v49 = vshll.u32 %v15055_v0, 16 }
  0x86   : > { %12761 = vmatpush3.bf16.msra.mxu1 %v14163_v23  ;;  %12612 = vmatprep.subr.bf16.mxu0 %v14964_v8  ;;  %v1258_v23 = vor.u32 %v1256_v33, %v1254_v32  ;;  %v1266_v34 = vor.u32 %v1264_v10, %v1262_v62  ;;  %v1274_v38 = vor.u32 %v1272_v22, %v1270_v11  ;;  %v1278_v32 = vrot.slane %v1276_v18, 1  ;;  %v14194_v18 = vld [vmem:[%s18771_s1 + $0xb0] sm:$0xff]  }
  0x87   : > { %12774 = vmatprep.subr.bf16.mxu1 %v14974_v59  ;;  %v1465_v55 = vshll.u32 %v11345_v44, 16  ;;  %v3316_v19 = vsel %vm1227_vm4, %v3311_v30, %v3315_v31  ;;  %v1463_v27 = vshrl.u32 %v11345_v44, 16  ;;  %v3519_v45 = vrot.slane %v3517_v13, 1 }
  0x88   : > { %v1263_v58 = vsel %vm1227_vm4, %v1258_v23, %v1262_v62  ;;  %v1271_v25 = vsel %vm1227_vm4, %v1266_v34, %v1270_v11  ;;  %v3530_v39 = vshll.u32 %v15066_v63, 16  ;;  %v1279_v56 = vsel %vm1227_vm4, %v1274_v38, %v1278_v32  ;;  %v15122_v62 = vld [vmem:[%s14409_s10 + $0x6c] sm:$0xff]   ;;  %v14200_v38 = vld [vmem:[%s18771_s1 + $0xb8] sm:$0xff]  }
  0x89   : > { %v1480_v52 = vrot.slane %v1478_v49, 1  ;;  %v1490_v34 = vshrl.u32 %v15080_v50, 16  ;;  %v3554_v22 = vshll.u32 %v15122_v62, 16 }
  0x8a   : > { %v3532_v20 = vrot.slane %v3530_v39, 1 }
  0x8b   : > { %12591 = vmatmul.mubr.msk.bf16.gmra.mrb[8].mxu0 %vm18807_vm1, %v11307_v21  ;;  %v3329_v21 = vshll.u32 %v14181_v2, 16  ;;  %v3556_v32 = vrot.slane %v3554_v22, 1 }
  0x8c   : > { %12753 = vmatmul.mubr.msk.bf16.gmra.mrb[8].mxu1 %vm18807_vm1, %v11476_v61  ;;  %12600 = vmatprep.mubr.msk.bf16.mxu0 %vm18807_vm1, %v1239_v37  ;;  %v1467_v61 = vrot.slane %v1465_v55, 1  ;;  %v3515_v37 = vshrl.u32 %v11514_v15, 16 }
  0x8d   : > { %12762 = vmatprep.mubr.msk.bf16.mxu1 %vm18807_vm1, %v3292_v60  ;;  %v15062_v60 = vld [vmem:[%s18771_s1 + $0xa8] sm:$0xff]   ;;  %v3331_v43 = vrot.slane %v3329_v21, 1 }
  0x8e   : > { %v1468_v51 = vor.u32 %v1467_v61, %v1463_v27  ;;  %v3520_v47 = vor.u32 %v3519_v45, %v3515_v37  ;;  %v15164_v45 = vld [vmem:[%s14409_s10 + $0x44] ss:$0 sps:$4 sm:$0x11]  }
  0x90   : > { %v1473_v42 = vsel %vm1227_vm4, %v1468_v51, %v1472_v41  ;;  %v3525_v10 = vsel %vm1227_vm4, %v3520_v47, %v3524_v54  ;;  %v1643_v51 = vld [vmem:[%s14409_s10 + $0x14] sm:$0xe]  ;;  %v3695_v47 = vld [vmem:[%s14409_s10 + $0x44] sm:$0xe] }
  0x93   : > { %12601 = vmatmul.mubr.msk.bf16.vlgmr.msra.gmra.mrb[0].mxu0 %vm18807_vm1, %v1247_v57  ;;  %v1474_v57 = vshrl.u32 %v15039_v26, 16 }
  0x94   : > { %12763 = vmatmul.mubr.msk.bf16.vlgmr.msra.gmra.mrb[0].mxu1 %vm18807_vm1, %v3300_v40  ;;  %12613 = vmatpush3.bf16.msra.mxu0 %v14964_v8  ;;  %v3319_v8 = vor.u32 %v3317_v1, %v3315_v31  ;;  %v3526_v40 = vshrl.u32 %v15043_v9, 16  ;;  %v15106_v1 = vld [vmem:[%s14409_s10 + $0x64] sm:$0xff]   ;;  %v3536_v31 = vor.u32 %v3534_v48, %v3532_v20 }
  0x95   : > { %12604 = vmatprep.mubr.msk.bf16.mxu0 %vm18807_vm1, %v1255_v3  ;;  %12766 = vmatprep.mubr.msk.bf16.mxu1 %vm18807_vm1, %v3308_v14  ;;  %v1482_v3 = vshrl.u32 %v15055_v0, 16  ;;  %v15103_v14 = vld [vmem:[%s14409_s10 + $0x34] sm:$0xff]   ;;  %v1476_v15 = vor.u32 %v1474_v57, %v1472_v41 }
  0x96   : > { %12614 = vmatprep.subr.bf16.mxu0 %v14174_v7  ;;  %12775 = vmatpush3.bf16.msra.mxu1 %v14974_v59  ;;  %v3325_v59 = vshrl.u32 %v15003_v53, 16  ;;  %v3324_v36 = vsel %vm1227_vm4, %v3319_v8, %v3323_v6  ;;  %v15086_v53 = vld [vmem:[%s14409_s10 + $0x5c] sm:$0xff]   ;;  %v3528_v23 = vor.u32 %v3526_v40, %v3524_v54  ;;  %v1494_v11 = vshll.u32 %v15103_v14, 16 }
  0x97   : > { %12776 = vmatprep.subr.bf16.mxu1 %v14182_v17  ;;  %v3538_v44 = vshll.u32 %v15086_v53, 16  ;;  %v1481_v55 = vsel %vm1227_vm4, %v1476_v15, %v1480_v52  ;;  %v3546_v8 = vshll.u32 %v15106_v1, 16  ;;  %v14203_v41 = vld [vmem:[%s18771_s1 + $0xb8] sm:$0xff]  }
  0x98   : > { %12615 = vmatpush3.bf16.msra.mxu0 %v14174_v7  ;;  %v3327_v33 = vor.u32 %v3325_v59, %v3323_v6  ;;  %v1486_v7 = vshll.u32 %v15080_v50, 16  ;;  %v1502_v6 = vshll.u32 %v15112_v24, 16  ;;  %v3533_v13 = vsel %vm1227_vm4, %v3528_v23, %v3532_v20 }
  0x99   : > { %12616 = vmatprep.subr.bf16.mxu0 %v14180_v12  ;;  %v3540_v2 = vrot.slane %v3538_v44, 1  ;;  %v3550_v59 = vshrl.u32 %v15106_v1, 16  ;;  %v1496_v21 = vrot.slane %v1494_v11, 1  ;;  %v11367_v20 = vcombine.low %v1643_v51, %v15007_v16 }
  0x9a   : > { %12777 = vmatpush3.bf16.msra.mxu1 %v14182_v17  ;;  %v3332_v46 = vsel %vm1227_vm4, %v3327_v33, %v3331_v43  ;;  %v1484_v17 = vor.u32 %v1482_v3, %v1480_v52  ;;  %v1488_v30 = vrot.slane %v1486_v7, 1  ;;  %v1504_v37 = vrot.slane %v1502_v6, 1  ;;  %v15176_v33 = vld [vmem:[%s14409_s10 + $0x74] ss:$0 sps:$4 sm:$0x11]  }
  0x9b   : > { %12605 = vmatmul.mubr.msk.bf16.gmra.mrb[4].mxu0 %vm18807_vm1, %v1263_v58  ;;  %12778 = vmatprep.subr.bf16.mxu1 %v14183_v35  ;;  %v1498_v58 = vshrl.u32 %v15103_v14, 16  ;;  %v3558_v52 = vshrl.u32 %v15122_v62, 16  ;;  %v11536_v23 = vcombine.low %v3695_v47, %v15011_v5  ;;  %v1662_v51 = vrot.slane %v15103_v14, 1 }
  0x9c   : > { %12767 = vmatmul.mubr.msk.bf16.gmra.mrb[4].mxu1 %vm18807_vm1, %v3316_v19  ;;  %12608 = vmatprep.mubr.msk.bf16.mxu0 %vm18807_vm1, %v1271_v25  ;;  %v3541_v19 = vsel %vm1227_vm4, %v3536_v31, %v3540_v2  ;;  %v14202_v25 = vld [vmem:[%s18771_s1 + $0xb0] sm:$0xff]   ;;  %v1492_v27 = vor.u32 %v1490_v34, %v1488_v30  ;;  %v3714_v47 = vrot.slane %v15122_v62, 1 }
  0x9d   : > { %12770 = vmatprep.mubr.msk.bf16.mxu1 %vm18807_vm1, %v3324_v36  ;;  %12617 = vmatpush3.bf16.msra.mxu0 %v14180_v12  ;;  %v3542_v12 = vshrl.u32 %v15086_v53, 16  ;;  %v3548_v36 = vrot.slane %v3546_v8, 1  ;;  %v3560_v31 = vor.u32 %v3558_v52, %v3556_v32 }
  0x9e   : > { %12779 = vmatpush3.bf16.msra.mxu1 %v14183_v35  ;;  %12630 = vmatprep.subr.bf16.mxu0 %v15062_v60  ;;  %v1489_v35 = vsel %vm1227_vm4, %v1484_v17, %v1488_v30  ;;  %v1497_v54 = vsel %vm1227_vm4, %v1492_v27, %v1496_v21  ;;  %v15199_v17 = vld [vmem:[%s18771_s1 + $0xc0] sm:$0xff]  }
  0x9f   : > { %12792 = vmatprep.subr.bf16.mxu1 %v15071_v29  ;;  %v3544_v61 = vor.u32 %v3542_v12, %v3540_v2  ;;  %v3552_v43 = vor.u32 %v3550_v59, %v3548_v36  ;;  %v15205_v30 = vld [vmem:[%s18771_s1 + $0xc0] sm:$0xff]  }
  0xa1   : > { %v3557_v15 = vsel %vm1227_vm4, %v3552_v43, %v3556_v32  ;;  %v3708_v32 = vrot.slane %v15066_v63, 1  ;;  %v3710_v43 = vrot.slane %v15086_v53, 1  ;;  %v14209_v63 = vld [vmem:[%s18771_s1 + $0xd0] sm:$0xff]   ;;  %v15303_v53 = vrot.slane %v3546_v8, 2 }
  0xa3   : > { %12609 = vmatmul.mubr.msk.bf16.gmra.mrb[8].mxu0 %vm18807_vm1, %v1279_v56  ;;  %v3549_v56 = vsel %vm1227_vm4, %v3544_v61, %v3548_v36  ;;  %v1810_v61 = vshrl.u32 %v11367_v20, 16  ;;  %v15227_v36 = vrot.slane %v3534_v48, 1  ;;  %v3712_v48 = vrot.slane %v15106_v1, 1 }
  0xa4   : > { %12771 = vmatmul.mubr.msk.bf16.gmra.mrb[8].mxu1 %vm18807_vm1, %v3332_v46  ;;  %12618 = vmatprep.mubr.msk.bf16.mxu0 %vm18807_vm1, %v1473_v42  ;;  %v1506_v46 = vshrl.u32 %v15112_v24, 16  ;;  %v1510_v42 = vshll.u32 %v15164_v45, 16  ;;  %v3881_v1 = vrot.slane %v3558_v52, 1 }
  0xa5   : > { %12780 = vmatprep.mubr.msk.bf16.mxu1 %vm18807_vm1, %v3525_v10  ;;  %v3562_v10 = vshll.u32 %v15176_v33, 16 }
  0xa6   : > { %v1508_v16 = vor.u32 %v1506_v46, %v1504_v37  ;;  %v1512_v5 = vrot.slane %v1510_v42, 1  ;;  %v15244_v42 = vrot.slane %v1810_v61, 1  ;;  %v15312_v14 = vrot.slane %v1506_v46, 1 }
  0xa7   : > { %v3564_v2 = vrot.slane %v3562_v10, 1  ;;  %v3861_v10 = vshll.u32 %v11536_v23, 16  ;;  %v3713_v46 = vsel %vm1654_vm5, %v3710_v43, %v3712_v48 }
  0xab   : > { %12619 = vmatmul.mubr.msk.bf16.vlgmr.msra.gmra.mrb[0].mxu0 %vm18807_vm1, %v1481_v55  ;;  %v1655_v55 = vrot.slane %v11367_v20, 1 }
  0xac   : > { %12781 = vmatmul.mubr.msk.bf16.vlgmr.msra.gmra.mrb[0].mxu1 %vm18807_vm1, %v3533_v13  ;;  %12631 = vmatpush3.bf16.msra.mxu0 %v15062_v60  ;;  %v1500_v60 = vor.u32 %v1498_v58, %v1496_v21  ;;  %v1656_v13 = vrot.slane %v15039_v26, 1  ;;  %v15221_v21 = vrot.slane %v1482_v3, 1  ;;  %v1660_v3 = vrot.slane %v15080_v50, 1  ;;  %v14210_v26 = vld [vmem:[%s18771_s1 + $0xc8] sm:$0xff]  }
  0xad   : > { %12622 = vmatprep.mubr.msk.bf16.mxu0 %vm18807_vm1, %v1489_v35  ;;  %12784 = vmatprep.mubr.msk.bf16.mxu1 %vm18807_vm1, %v3541_v19  ;;  %v3705_v35 = vrot.slane %v11536_v23, 1  ;;  %v3706_v19 = vrot.slane %v15043_v9, 1  ;;  %v15293_v50 = vrot.slane %v1494_v11, 2  ;;  %v14215_v11 = vld [vmem:[%s14409_s10 + $0x74] ss:$0 sps:$4 sm:$0x33]  }
  0xae   : > { %12632 = vmatprep.subr.bf16.mxu0 %v14194_v18  ;;  %12793 = vmatpush3.bf16.msra.mxu1 %v15071_v29  ;;  %v1505_v29 = vsel %vm1227_vm4, %v1500_v60, %v1504_v37  ;;  %v1657_v27 = vsel %vm1654_vm5, %v1655_v55, %v1656_v13  ;;  %v1813_v60 = vshll.u32 %v11367_v20, 16  ;;  %v15262_v55 = vrot.slane %v1478_v49, 2 }
  0xaf   : > { %12794 = vmatprep.subr.bf16.mxu1 %v14202_v25  ;;  %v3707_v37 = vsel %vm1654_vm5, %v3705_v35, %v3706_v19  ;;  %v14214_v35 = vld [vmem:[%s14409_s10 + $0x44] ss:$0 sps:$4 sm:$0x33]   ;;  %v1826_v49 = vrot.slane %v1486_v7, 2  ;;  %v15299_v7 = vrot.slane %v3550_v59, 1  ;;  %v1663_v59 = vsel %vm1654_vm5, %v1660_v3, %v1662_v51 }
  0xb0   : > { %12633 = vmatpush3.bf16.msra.mxu0 %v14194_v18  ;;  %v1513_v18 = vsel %vm1227_vm4, %v1508_v16, %v1512_v5  ;;  %v15246_v20 = vrot.slane %v1813_v60, 2  ;;  %v1818_v16 = vrot.slane %v1470_v4, 2  ;;  %v3865_v5 = vrot.slane %v3526_v40, 1 }
  0xb1   : > { %12634 = vmatprep.subr.bf16.mxu0 %v14200_v38  ;;  %v3863_v40 = vrot.slane %v3861_v10, 2  ;;  %v1838_v8 = vshrl.u32 %v14214_v35, 16  ;;  %v3886_v52 = vshrl.u32 %v14215_v11, 16  ;;  %v4337_v10 = vld [vmem:[%s14409_s10 + $0x64] sm:$0xf] }
  0xb2   : > { %12795 = vmatpush3.bf16.msra.mxu1 %v14202_v25  ;;  %v3565_v25 = vsel %vm1227_vm4, %v3560_v31, %v3564_v2  ;;  %v14207_v2 = vld [vmem:[%s18771_s1 + $0xc8] sm:$0xff]  }
  0xb3   : > { %12623 = vmatmul.mubr.msk.bf16.gmra.mrb[4].mxu0 %vm18807_vm1, %v1497_v54  ;;  %12796 = vmatprep.subr.bf16.mxu1 %v14203_v41  ;;  %v1666_v54 = vrot.slane %v15164_v45, 1 }
  0xb4   : > { %12785 = vmatmul.mubr.msk.bf16.gmra.mrb[4].mxu1 %vm18807_vm1, %v3549_v56  ;;  %12626 = vmatprep.mubr.msk.bf16.mxu0 %vm18807_vm1, %v1505_v29  ;;  %v3716_v56 = vrot.slane %v15176_v33, 1  ;;  %v3858_v29 = vshrl.u32 %v11536_v23, 16  ;;  %v3866_v23 = vrot.slane %v3522_v28, 2  ;;  %v3711_v28 = vsel %vm1654_vm5, %v3708_v32, %v3710_v43 }
  0xb5   : > { %12788 = vmatprep.mubr.msk.bf16.mxu1 %vm18807_vm1, %v3557_v15  ;;  %12635 = vmatpush3.bf16.msra.mxu0 %v14200_v38  ;;  %v1658_v38 = vrot.slane %v15055_v0, 1  ;;  %v1817_v15 = vrot.slane %v1474_v57, 1  ;;  %v3709_v57 = vsel %vm1654_vm5, %v3706_v19, %v3708_v32  ;;  %v1825_v0 = vrot.slane %v1490_v34, 1 }
  0xb6   : > { %12797 = vmatpush3.bf16.msra.mxu1 %v14203_v41  ;;  %12648 = vmatprep.subr.bf16.mxu0 %v15199_v17  ;;  %v1664_v41 = vrot.slane %v15112_v24, 1  ;;  %v3860_v4 = vrot.slane %v3858_v29, 1  ;;  %v3874_v19 = vrot.slane %v3538_v44, 2  ;;  %v14211_v44 = vld [vmem:[%s18771_s1 + $0xd0] sm:$0xff]   ;;  %v15316_v34 = vrot.slane %v1502_v6, 2  ;;  %v14212_v6 = vld [vmem:[%s18771_s1 + $0x18] sm:$0xff]  }
  0xb7   : > { %12810 = vmatprep.subr.bf16.mxu1 %v15205_v30  ;;  %v1659_v31 = vsel %vm1654_vm5, %v1656_v13, %v1658_v38  ;;  %v15270_v13 = vrot.slane %v3530_v39, 2  ;;  %v1661_v9 = vsel %vm1654_vm5, %v1658_v38, %v1660_v3  ;;  %v3873_v39 = vrot.slane %v3542_v12, 1 }
  0xb8   : > { %v3882_v12 = vrot.slane %v3554_v22, 2  ;;  %v3715_v22 = vsel %vm1654_vm5, %v3712_v48, %v3714_v47  ;;  %v3864_v61 = vor.u32 %v3863_v40, %v3860_v4  ;;  %v1667_v38 = vsel %vm1654_vm5, %v1664_v41, %v1666_v54  ;;  %v14220_v4 = vld [vmem:[%s18771_s1] sm:$0xff]  }
  0xb9   : > { %v3717_v60 = vsel %vm1654_vm5, %v3714_v47, %v3716_v56  ;;  %v1840_v43 = vrot.slane %v1838_v8, 1  ;;  %v1823_v24 = vor.u32 %v15262_v55, %v15221_v21  ;;  %v3871_v62 = vor.u32 %v15270_v13, %v15227_v36  ;;  %v14226_v8 = vld [vmem:[%s18771_s1 + $0x10] sm:$0xff]  }
  0xba   : > { %v1827_v45 = vor.u32 %v1826_v49, %v1825_v0  ;;  %v3875_v33 = vor.u32 %v3874_v19, %v3873_v39  ;;  %v3888_v56 = vrot.slane %v3886_v52, 1  ;;  %v15406_v49 = vld [vmem:[%s14409_s10 + $0x78] sm:$0xff]  }
  0xbb   : > { %12627 = vmatmul.mubr.msk.bf16.gmra.mrb[8].mxu0 %vm18807_vm1, %v1513_v18  ;;  %v15289_v18 = vrot.slane %v1498_v58, 1  ;;  %v1841_v58 = vshll.u32 %v14214_v35, 16 }
  0xbc   : > { %12789 = vmatmul.mubr.msk.bf16.gmra.mrb[8].mxu1 %vm18807_vm1, %v3565_v25  ;;  %12636 = vmatprep.mubr.msk.bf16.mxu0 %vm18807_vm1, %v1657_v27  ;;  %v1816_v25 = vor.u32 %v15246_v20, %v15244_v42  ;;  %v1819_v27 = vor.u32 %v1818_v16, %v1817_v15  ;;  %v1828_v54 = vsel %vm18796_vm6, %v1823_v24, %v1827_v45  ;;  %v14216_v42 = vld [vmem:[%s18771_s1 + $0x28] sm:$0xff]   ;;  %v4355_v20 = vld [vmem:[%s14409_s10 + $0x60] sm:$0x8] }
  0xbd   : > { %12798 = vmatprep.mubr.msk.bf16.mxu1 %vm18807_vm1, %v3707_v37  ;;  %v3867_v37 = vor.u32 %v3866_v23, %v3865_v5  ;;  %v3876_v21 = vsel %vm18796_vm6, %v3871_v62, %v3875_v33  ;;  %v1831_v29 = vor.u32 %v15293_v50, %v15289_v18  ;;  %v3879_v15 = vor.u32 %v15303_v53, %v15299_v7  ;;  %v15416_v50 = vld [vmem:[%s14409_s10 + $0x80] sm:$0xff]   ;;  %v14223_v53 = vld [vmem:[%s18771_s1 + $0x8] sm:$0xff]  }
  0xbe   : > { %v1820_v32 = vsel %vm18796_vm6, %v1816_v25, %v1819_v27  ;;  %v1824_v48 = vsel %vm18796_vm6, %v1819_v27, %v1823_v24  ;;  %v1835_v16 = vor.u32 %v15316_v34, %v15312_v14  ;;  %v3883_v5 = vor.u32 %v3882_v12, %v3881_v1  ;;  %v4336_v7 = vld [vmem:[%s14409_s10 + $0x60] sm:$0xc]  ;;  %v15424_v14 = vld [vmem:[%s14409_s10 + $0x88] sm:$0xff]  }
  0xbf   : > { %v3868_v3 = vsel %vm18796_vm6, %v3864_v61, %v3867_v37  ;;  %v3872_v47 = vsel %vm18796_vm6, %v3867_v37, %v3871_v62  ;;  %v3880_v23 = vsel %vm18796_vm6, %v3875_v33, %v3879_v15  ;;  %v4400_v18 = vrot.slane %v15406_v49, 3  ;;  %v14228_v37 = vld [vmem:[%s18771_s1 + $0x30] sm:$0xff]  }
  0xc0   : > { %v1836_v55 = vsel %vm18796_vm6, %v1831_v29, %v1835_v16  ;;  %v4402_v1 = vrot.slane %v15416_v50, 3  ;;  %v4404_v12 = vrot.slane %v15424_v14, 3 }
  0xc3   : > { %12637 = vmatmul.mubr.msk.bf16.vlgmr.msra.gmra.mrb[0].mxu0 %vm18807_vm1, %v1659_v31  ;;  %v15384_v31 = vld [vmem:[%s14409_s10 + $0x68] sm:$0xff]  }
  0xc4   : > { %12799 = vmatmul.mubr.msk.bf16.vlgmr.msra.gmra.mrb[0].mxu1 %vm18807_vm1, %v3709_v57  ;;  %12649 = vmatpush3.bf16.msra.mxu0 %v15199_v17  ;;  %v1665_v17 = vsel %vm1654_vm5, %v1662_v51, %v1664_v41  ;;  %v1843_v51 = vrot.slane %v1841_v58, 2  ;;  %v14213_v41 = vld [vmem:[%s18771_s1 + $0x20] sm:$0xff]   ;;  %v15389_v57 = vcombine.low %v4355_v20, %v4337_v10  ;;  %v4537_v58 = vshrl.u32 %v15384_v31, 16 }
  0xc5   : > { %12640 = vmatprep.mubr.msk.bf16.mxu0 %vm18807_vm1, %v1661_v9  ;;  %12802 = vmatprep.mubr.msk.bf16.mxu1 %vm18807_vm1, %v3711_v28  ;;  %v4396_v9 = vrot.slane %v15384_v31, 3  ;;  %v15402_v28 = vld [vmem:[%s14409_s10 + $0x70] sm:$0xff]  }
  0xc6   : > { %12650 = vmatprep.subr.bf16.mxu0 %v14207_v2  ;;  %12811 = vmatpush3.bf16.msra.mxu1 %v15205_v30  ;;  %v3889_v30 = vshll.u32 %v14215_v11, 16  ;;  %v1844_v40 = vor.u32 %v1843_v51, %v1840_v43  ;;  %v4395_v35 = vrot.slane %v15389_v57, 3  ;;  %v4398_v19 = vrot.slane %v15402_v28, 3 }
  0xc7   : > { %12812 = vmatprep.subr.bf16.mxu1 %v14210_v26  ;;  %v11584_v11 = vcombine.low %v4336_v7, %v4337_v10  ;;  %v4539_v52 = vrot.slane %v4537_v58, 2  ;;  %v4558_v43 = vshll.u32 %v15406_v49, 16 }
  0xc8   : > { %12651 = vmatpush3.bf16.msra.mxu0 %v14207_v2  ;;  %v3891_v36 = vrot.slane %v3889_v30, 2  ;;  %v1832_v2 = vsel %vm18796_vm6, %v1827_v45, %v1831_v29  ;;  %v1845_v0 = vsel %vm18796_vm6, %v1835_v16, %v1844_v40  ;;  %v4397_v39 = vsel %vm18779_vm0, %v4395_v35, %v4396_v9  ;;  %v14230_v35 = vld [vmem:[%s18771_s1 + $0x40] sm:$0xff]  }
  0xc9   : > { %12652 = vmatprep.subr.bf16.mxu0 %v14209_v63  ;;  %v4401_v34 = vsel %vm18779_vm0, %v4398_v19, %v4400_v18  ;;  %v4405_v30 = vsel %vm18779_vm0, %v4402_v1, %v4404_v12  ;;  %v4576_v29 = vshll.u32 %v15424_v14, 16  ;;  %v4718_v40 = vshrl.u32 %v15389_v57, 16 }
  0xca   : > { %12813 = vmatpush3.bf16.msra.mxu1 %v14210_v26  ;;  %v3884_v26 = vsel %vm18796_vm6, %v3879_v15, %v3883_v5  ;;  %v3892_v13 = vor.u32 %v3891_v36, %v3888_v56  ;;  %v4567_v56 = vshll.u32 %v15416_v50, 16 }
  0xcb   : > { %12641 = vmatmul.mubr.msk.bf16.gmra.mrb[4].mxu0 %vm18807_vm1, %v1663_v59  ;;  %12814 = vmatprep.subr.bf16.mxu1 %v14211_v44  ;;  %v4540_v59 = vshll.u32 %v15384_v31, 16 }
  0xcc   : > { %12803 = vmatmul.mubr.msk.bf16.gmra.mrb[4].mxu1 %vm18807_vm1, %v3713_v46  ;;  %12644 = vmatprep.mubr.msk.bf16.mxu0 %vm18807_vm1, %v1665_v17  ;;  %v4532_v46 = vshll.u32 %v11584_v11, 16  ;;  %v14225_v17 = vld [vmem:[%s14409_s10 + $0x90] ss:$0 sps:$4 sm:$0x77]   ;;  %v4569_v15 = vrot.slane %v4567_v56, 3 }
  0xcd   : > { %12806 = vmatprep.mubr.msk.bf16.mxu1 %vm18807_vm1, %v3715_v22  ;;  %12653 = vmatpush3.bf16.msra.mxu0 %v14209_v63  ;;  %v3893_v63 = vsel %vm18796_vm6, %v3883_v5, %v3892_v13  ;;  %v4403_v22 = vsel %vm18779_vm0, %v4400_v18, %v4402_v1  ;;  %v4542_v61 = vrot.slane %v4540_v59, 3  ;;  %v14229_v5 = vld [vmem:[%s18771_s1 + $0x38] sm:$0xff]   ;;  %v4725_v18 = vrot.slane %v4537_v58, 3 }
  0xce   : > { %12815 = vmatpush3.bf16.msra.mxu1 %v14211_v44  ;;  %12828 = vmatprep.subr.bf16.mxu0 %v14212_v6  ;;  %v4399_v44 = vsel %vm18779_vm0, %v4396_v9, %v4398_v19  ;;  %v4534_v27 = vrot.slane %v4532_v46, 3  ;;  %v4721_v9 = vshll.u32 %v15389_v57, 16  ;;  %v14231_v57 = vld [vmem:[%s18771_s1 + $0x48] sm:$0xff]   ;;  %v15492_v46 = vld [vmem:[%s14409_s10 + $0x70] sm:$0xf] }
  0xcf   : > { %v4543_v24 = vor.u32 %v4542_v61, %v4539_v52  ;;  %v14233_v52 = vld [vmem:[%s14409_s10 + $0x90] ss:$0 sps:$4 sm:$0xff]   ;;  %v4742_v61 = vrot.slane %v4576_v29, 4 }
  0xd0   : > { %v4723_v19 = vrot.slane %v4721_v9, 4 }
  0xd3   : > { %12645 = vmatmul.mubr.msk.bf16.gmra.mrb[8].mxu0 %vm18807_vm1, %v1667_v38  ;;  %v4546_v38 = vshrl.u32 %v15402_v28, 16 }
  0xd4   : > { %12807 = vmatmul.mubr.msk.bf16.gmra.mrb[8].mxu1 %vm18807_vm1, %v3717_v60  ;;  %12654 = vmatprep.mubr.msk.bf16.mxu0 %vm18807_vm1, %v1820_v32  ;;  %v4549_v60 = vshll.u32 %v15402_v28, 16  ;;  %v4406_v32 = vrot.slane %v14225_v17, 3 }
  0xd5   : > { %12816 = vmatprep.mubr.msk.bf16.mxu1 %vm18807_vm1, %v3868_v3  ;;  %v4555_v3 = vshrl.u32 %v15406_v49, 16  ;;  %v4548_v62 = vrot.slane %v4546_v38, 2 }
  0xd6   : > { %v4551_v45 = vrot.slane %v4549_v60, 3  ;;  %v4407_v33 = vsel %vm18779_vm0, %v4404_v12, %v4406_v32  ;;  %v4734_v12 = vrot.slane %v4558_v43, 4 }
  0xd7   : > { %v4733_v1 = vrot.slane %v4555_v3, 3 }
  0xd9   : > { %v4735_v58 = vor.u32 %v4734_v12, %v4733_v1 }
  0xdb   : > { %12655 = vmatmul.mubr.msk.bf16.vlgmr.msra.gmra.mrb[0].mxu0 %vm18807_vm1, %v1824_v48  ;;  %v4557_v48 = vrot.slane %v4555_v3, 2  ;;  %v4746_v3 = vshrl.u32 %v14233_v52, 16 }
  0xdc   : > { %12817 = vmatmul.mubr.msk.bf16.vlgmr.msra.gmra.mrb[0].mxu1 %vm18807_vm1, %v3872_v47  ;;  %12829 = vmatpush3.bf16.msra.mxu0 %v14212_v6  ;;  %v4529_v6 = vshrl.u32 %v11584_v11, 16 }
  0xdd   : > { %12658 = vmatprep.mubr.msk.bf16.mxu0 %vm18807_vm1, %v1828_v54  ;;  %12820 = vmatprep.mubr.msk.bf16.mxu1 %vm18807_vm1, %v3876_v21  ;;  %v4552_v54 = vor.u32 %v4551_v45, %v4548_v62  ;;  %v4564_v21 = vshrl.u32 %v15416_v50, 16  ;;  %v4726_v50 = vrot.slane %v4540_v59, 4  ;;  %v4883_v59 = vld [vmem:[%s14409_s10 + $0x68] sm:$0x8]  ;;  %v4749_v62 = vshll.u32 %v14233_v52, 16  ;;  %v14234_v45 = vld [vmem:[%s18771_s1 + $0x58] sm:$0xff]  }
  0xde   : > { %12830 = vmatprep.subr.bf16.mxu0 %v14213_v41  ;;  %v4531_v25 = vrot.slane %v4529_v6, 2  ;;  %v15489_v6 = vld [vmem:[%s14409_s10 + $0x6c] sm:$0xf] }
  0xdf   : > { %v4553_v10 = vsel %vm18777_vm2, %v4543_v24, %v4552_v54  ;;  %v4566_v20 = vrot.slane %v4564_v21, 2 }
  0xe0   : > { %12831 = vmatpush3.bf16.msra.mxu0 %v14213_v41  ;;  %v4535_v51 = vor.u32 %v4534_v27, %v4531_v25  ;;  %v4560_v41 = vrot.slane %v4558_v43, 3  ;;  %v4738_v25 = vrot.slane %v4567_v56, 4  ;;  %v15508_v43 = vld [vmem:[%s14409_s10 + $0x78] sm:$0xf]  ;;  %v15521_v56 = vld [vmem:[%s14409_s10 + $0x84] sm:$0xf] }
  0xe1   : > { %12832 = vmatprep.subr.bf16.mxu0 %v14216_v42 }
  0xe2   : > { %v4544_v47 = vsel %vm18777_vm2, %v4535_v51, %v4543_v24  ;;  %v4561_v36 = vor.u32 %v4560_v41, %v4557_v48  ;;  %v15518_v48 = vld [vmem:[%s14409_s10 + $0x80] sm:$0xf] }
  0xe3   : > { %12659 = vmatmul.mubr.msk.bf16.gmra.mrb[4].mxu0 %vm18807_vm1, %v1832_v2 }
  0xe4   : > { %12821 = vmatmul.mubr.msk.bf16.gmra.mrb[4].mxu1 %vm18807_vm1, %v3880_v23  ;;  %12662 = vmatprep.mubr.msk.bf16.mxu0 %vm18807_vm1, %v1836_v55  ;;  %v4562_v16 = vsel %vm18777_vm2, %v4552_v54, %v4561_v36  ;;  %v4578_v23 = vrot.slane %v4576_v29, 3  ;;  %v4570_v55 = vor.u32 %v4569_v15, %v4566_v20  ;;  %v4751_v20 = vrot.slane %v4749_v62, 4  ;;  %v14245_v62 = vld [vmem:[%s18771_s1 + $0x70] sm:$0xff]  }
  0xe5   : > { %12824 = vmatprep.mubr.msk.bf16.mxu1 %vm18807_vm1, %v3884_v26  ;;  %12833 = vmatpush3.bf16.msra.mxu0 %v14216_v42  ;;  %v4573_v42 = vshrl.u32 %v15424_v14, 16  ;;  %v4582_v26 = vshrl.u32 %v14225_v17, 16  ;;  %v4729_v14 = vrot.slane %v4546_v38, 3  ;;  %v14232_v38 = vld [vmem:[%s18771_s1 + $0x50] sm:$0xff]   ;;  %v11619_v15 = vcombine.low %v15518_v48, %v15521_v56 }
  0xe6   : > { %12846 = vmatprep.subr.bf16.mxu0 %v14220_v4  ;;  %v4571_v28 = vsel %vm18777_vm2, %v4561_v36, %v4570_v55  ;;  %v4748_v36 = vrot.slane %v4746_v3, 3 }
  0xe7   : > { %v4575_v2 = vrot.slane %v4573_v42, 2  ;;  %v4741_v27 = vrot.slane %v4573_v42, 3 }
  0xe9   : > { %v4579_v13 = vor.u32 %v4578_v23, %v4575_v2  ;;  %v4743_v24 = vor.u32 %v4742_v61, %v4741_v27  ;;  %v14242_v27 = vld [vmem:[%s18771_s1 + $0x68] sm:$0xff]  }
  0xeb   : > { %12663 = vmatmul.mubr.msk.bf16.gmra.mrb[8].mxu0 %vm18807_vm1, %v1845_v0  ;;  %v4584_v0 = vrot.slane %v4582_v26, 2 }
  0xec   : > { %12825 = vmatmul.mubr.msk.bf16.gmra.mrb[8].mxu1 %vm18807_vm1, %v3893_v63  ;;  %12834 = vmatprep.mubr.msk.bf16.mxu0 %vm18807_vm1, %v4397_v39  ;;  %v4720_v63 = vrot.slane %v4718_v40, 3  ;;  %v4580_v39 = vsel %vm18777_vm2, %v4570_v55, %v4579_v13  ;;  %v14239_v55 = vld [vmem:[%s18771_s1 + $0x60] sm:$0xff]   ;;  %v4752_v40 = vor.u32 %v4751_v20, %v4748_v36 }
  0xf3   : > { %12835 = vmatmul.mubr.msk.bf16.vlgmr.msra.gmra.mrb[12].mxu0 %vm18807_vm1, %v4399_v44  ;;  %v4727_v44 = vor.u32 %v4726_v50, %v4725_v18  ;;  %v4753_v50 = vsel %vm18776_vm3, %v4743_v24, %v4752_v40 }
  0xf4   : > { %12847 = vmatpush3.bf16.msra.mxu0 %v14220_v4  ;;  %12838 = vmatprep.mubr.msk.bf16.mxu0 %vm18807_vm1, %v4401_v34  ;;  %v4585_v4 = vshll.u32 %v14225_v17, 16  ;;  %v4730_v34 = vrot.slane %v4549_v60, 4  ;;  %v15495_v17 = vld [vmem:[%s14409_s10 + $0x74] sm:$0xf]  ;;  %v11616_v60 = vcombine.low %v4883_v59, %v15489_v6 }
  0xf5   : > { %12848 = vmatprep.subr.bf16.mxu0 %v14223_v53  ;;  %v11617_v32 = vcombine.low %v15492_v46, %v15495_v17  ;;  %v11639_v20 = vcombine.low %v15495_v17, %v15508_v43  ;;  %v14258_v17 = vld [vmem:[%s14409_s10 + $0x84] sm:$0xff]  }
  0xf6   : > { %v4587_v49 = vrot.slane %v4585_v4, 3  ;;  %v4936_v41 = vshrl.u32 %v11616_v60, 16 }
  0xf7   : > { %v4944_v54 = vshrl.u32 %v11617_v32, 16 }
  0xf8   : > { %12849 = vmatpush3.bf16.msra.mxu0 %v14223_v53  ;;  %v4588_v7 = vor.u32 %v4587_v49, %v4584_v0  ;;  %v4724_v53 = vor.u32 %v4723_v19, %v4720_v63  ;;  %v15535_v0 = vld [vmem:[%s14409_s10 + $0x88] sm:$0xf]  ;;  %v15538_v49 = vld [vmem:[%s14409_s10 + $0x8c] sm:$0xf]  ;;  %v15541_v63 = vld [vmem:[%s14409_s10 + $0x90] sm:$0xf] }
  0xf9   : > { %12850 = vmatprep.subr.bf16.mxu0 %v14226_v8  ;;  %v4946_v2 = vrot.slane %v4944_v54, 3 }
  0xfa   : > { %v4589_v31 = vsel %vm18777_vm2, %v4579_v13, %v4588_v7  ;;  %v4728_v11 = vsel %vm18776_vm3, %v4724_v53, %v4727_v44  ;;  %v4962_v13 = vshrl.u32 %v11619_v15, 16  ;;  %v11620_v53 = vcombine.low %v15535_v0, %v15538_v49 }
  0xfb   : > { %12839 = vmatmul.mubr.msk.bf16.gmra.mrb[16].mxu0 %vm18807_vm1, %v4403_v22  ;;  %v4737_v22 = vrot.slane %v4564_v21, 3  ;;  %v4947_v21 = vshll.u32 %v11617_v32, 16 }
  0xfc   : > { %12842 = vmatprep.mubr.msk.bf16.mxu0 %vm18807_vm1, %v4405_v30  ;;  %12851 = vmatpush3.bf16.msra.mxu0 %v14226_v8  ;;  %v4731_v8 = vor.u32 %v4730_v34, %v4729_v14  ;;  %v4974_v1 = vshll.u32 %v11620_v53, 16 }
  0xfd   : > { %12864 = vmatprep.subr.bf16.mxu0 %v14228_v37  ;;  %v4739_v51 = vor.u32 %v4738_v25, %v4737_v22  ;;  %v4949_v23 = vrot.slane %v4947_v21, 4  ;;  %v14247_v21 = vld [vmem:[%s18771_s1 + $0x78] sm:$0xff]  }
  0xfe   : > { %v4732_v30 = vsel %vm18776_vm3, %v4727_v44, %v4731_v8 }
  0xff   : > { %v4740_v29 = vsel %vm18776_vm3, %v4735_v58, %v4739_v51 }
 0x103   : > { %12843 = vmatmul.mubr.msk.bf16.gmra.mrb[20].mxu0 %vm18807_vm1, %v4407_v33  ;;  %v15515_v33 = vld [vmem:[%s14409_s10 + $0x7c] sm:$0xf] }
 0x104   : > { %12852 = vmatprep.mubr.msk.bf16.mxu0 %vm18807_vm1, %v4544_v47  ;;  %v4939_v47 = vshll.u32 %v11616_v60, 16  ;;  %v11618_v42 = vcombine.low %v15508_v43, %v15515_v33  ;;  %v14344_v60 = vmov 0   ;;  %v14253_v43 = vld [vmem:[%s18771_s1 + $0x88] sm:$0xff]  }
 0x105   : > { %227 = vst.msk [vmem:[#allocation2] sm:$0xff] %vm18785_vm7, %v14344_v60  ;;  %232 = vst.msk [vmem:[#allocation2 + $0xa0] sm:$0xff] %vm18785_vm7, %v14344_v60 }
 0x106   : > { %v4953_v26 = vshrl.u32 %v11618_v42, 16  ;;  %v4956_v4 = vshll.u32 %v11618_v42, 16  ;;  %231 = vst.msk [vmem:[#allocation2 + $0x98] sm:$0xf0] %vm18792_vm8, %v14344_v60  ;;  %v14279_v42 = vld [vmem:[%s18772_s2 + $0x18] sm:$0xff]  }
 0x107   : > { %229 = vst.msk [vmem:[#allocation2 + $0x8] sm:$0xf] %vm18778_vm9, %v14344_v60  ;;  %v15655_v60 = vld [vmem:[%s14409_s10 + $0x9c] sm:$0xff]  }
 0x108   : > { %v4955_v19 = vrot.slane %v4953_v26, 3  ;;  %v4958_v18 = vrot.slane %v4956_v4, 4 }
 0x10a   : > { %v4959_v14 = vor.u32 %v4958_v18, %v4955_v19  ;;  %v14259_v19 = vld [vmem:[%s14409_s10 + $0x8c] sm:$0xff]   ;;  %v1975_v18 = vlaneseq }
 0x10b   : > { %12853 = vmatmul.mubr.msk.bf16.vlgmr.msra.gmra.mrb[12].mxu0 %vm18807_vm1, %v4553_v10  ;;  %v4744_v10 = vsel %vm18776_vm3, %v4739_v51, %v4743_v24 }
 0x10c   : > { %12865 = vmatpush3.bf16.msra.mxu0 %v14228_v37  ;;  %12856 = vmatprep.mubr.msk.bf16.mxu0 %vm18807_vm1, %v4562_v16  ;;  %v4736_v37 = vsel %vm18776_vm3, %v4731_v8, %v4735_v58  ;;  %v4938_v16 = vrot.slane %v4936_v41, 3  ;;  %v15555_v58 = vld [vmem:[%s14409_s10 + $0x98] sm:$0xf] }
 0x10d   : > { %12866 = vmatprep.subr.bf16.mxu0 %v14229_v5  ;;  %v11622_v25 = vcombine.low %v15555_v58, %v15555_v58 }
 0x10f   : > { %v4989_v3 = vshrl.u32 %v11622_v25, 16  ;;  %v4992_v51 = vshll.u32 %v11622_v25, 16  ;;  %v15645_v25 = vld [vmem:[%s14409_s10 + $0x84] sm:$0xff]  }
 0x110   : > { %12867 = vmatpush3.bf16.msra.mxu0 %v14229_v5  ;;  %v4941_v5 = vrot.slane %v4939_v47, 4 }
 0x111   : > { %12868 = vmatprep.subr.bf16.mxu0 %v14230_v35  ;;  %v4991_v41 = vrot.slane %v4989_v3, 3  ;;  %v4994_v47 = vrot.slane %v4992_v51, 4 }
 0x112   : > { %v4942_v9 = vor.u32 %v4941_v5, %v4938_v16  ;;  %v14255_v16 = vld [vmem:[%s14409_s10 + $0x74] sm:$0xff]   ;;  %v11640_v5 = vcombine.low %v15515_v33, %v15518_v48  ;;  %v11641_v33 = vcombine.low %v15521_v56, %v15535_v0 }
 0x113   : > { %12857 = vmatmul.mubr.msk.bf16.gmra.mrb[16].mxu0 %vm18807_vm1, %v4571_v28  ;;  %v4950_v28 = vor.u32 %v4949_v23, %v4946_v2  ;;  %v4995_v36 = vor.u32 %v4994_v47, %v4991_v41  ;;  %v14250_v2 = vld [vmem:[%s18771_s1 + $0x80] sm:$0xff]   ;;  %v15618_v56 = vld [vmem:[%s18771_s1 + $0x90] sm:$0xff]  }
 0x114   : > { %12860 = vmatprep.mubr.msk.bf16.mxu0 %vm18807_vm1, %v4580_v39  ;;  %12869 = vmatpush3.bf16.msra.mxu0 %v14230_v35  ;;  %v4965_v35 = vshll.u32 %v11619_v15, 16  ;;  %v15544_v39 = vld [vmem:[%s14409_s10 + $0x94] sm:$0xf]  ;;  %v14254_v15 = vld [vmem:[%s14409_s10 + $0x6c] sm:$0xff]  }
 0x115   : > { %12882 = vmatprep.subr.bf16.mxu0 %v14231_v57  ;;  %v4951_v44 = vsel %vm18776_vm3, %v4942_v9, %v4950_v28  ;;  %v4960_v59 = vsel %vm18776_vm3, %v4950_v28, %v4959_v14  ;;  %v5322_v23 = vshll.u32 %v14254_v15, 16  ;;  %v5320_v26 = vshrl.u32 %v14254_v15, 16  ;;  %v15667_v47 = vld [vmem:[%s14409_s10 + $0xa4] ss:$0 sps:$4 sm:$0x11]  }
 0x116   : > { %v4967_v7 = vrot.slane %v4965_v35, 4  ;;  %v11642_v35 = vcombine.low %v15538_v49, %v15541_v63  ;;  %v5343_v28 = vshll.u32 %v14258_v17, 16 }
 0x117   : > { %v5324_v4 = vrot.slane %v5322_v23, 1 }
 0x119   : > { %v5325_v49 = vor.u32 %v5324_v4, %v5320_v26  ;;  %v18781_v26 = vshrl.u32 %v15655_v60, 16 }
 0x11b   : > { %12861 = vmatmul.mubr.msk.bf16.gmra.mrb[20].mxu0 %vm18807_vm1, %v4589_v31  ;;  %v11621_v31 = vcombine.low %v15541_v63, %v15544_v39 }
 0x11c   : > { %12870 = vmatprep.mubr.msk.bf16.mxu0 %vm18807_vm1, %v4728_v11  ;;  %v4971_v11 = vshrl.u32 %v11620_v53, 16 }
 0x11d   : > { %v4980_v12 = vshrl.u32 %v11621_v31, 16  ;;  %v4983_v8 = vshll.u32 %v11621_v31, 16  ;;  %v5351_v31 = vshll.u32 %v14259_v19, 16 }
 0x11e   : > { %v4973_v52 = vrot.slane %v4971_v11, 3 }
 0x11f   : > { %v4982_v61 = vrot.slane %v4980_v12, 3  ;;  %v5355_v12 = vshrl.u32 %v14259_v19, 16 }
 0x123   : > { %12871 = vmatmul.mubr.msk.bf16.vlgmr.msra.gmra.mrb[12].mxu0 %vm18807_vm1, %v4732_v30  ;;  %v4976_v30 = vrot.slane %v4974_v1, 4  ;;  %v15634_v1 = vld [vmem:[%s14409_s10 + $0x7c] sm:$0xff]  }
 0x124   : > { %12883 = vmatpush3.bf16.msra.mxu0 %v14231_v57  ;;  %12874 = vmatprep.mubr.msk.bf16.mxu0 %vm18807_vm1, %v4736_v37  ;;  %v4964_v57 = vrot.slane %v4962_v13, 3  ;;  %v4985_v37 = vrot.slane %v4983_v8, 4  ;;  %v5331_v13 = vshrl.u32 %v14255_v16, 16  ;;  %v5560_v51 = vshll.u32 %v15634_v1, 16 }
 0x125   : > { %12884 = vmatprep.subr.bf16.mxu0 %v14232_v38  ;;  %v4977_v32 = vor.u32 %v4976_v30, %v4973_v52  ;;  %v11643_v52 = vcombine.low %v15544_v39, %v15555_v58 }
 0x126   : > { %v4968_v34 = vor.u32 %v4967_v7, %v4964_v57  ;;  %v4986_v24 = vor.u32 %v4985_v37, %v4982_v61  ;;  %v5500_v57 = vld [vmem:[%s14409_s10 + $0x74] sm:$0xf]  ;;  %v15625_v7 = vld [vmem:[%s14409_s10 + $0x78] sm:$0xf] }
 0x127   : > { %v11681_v11 = vcombine.low %v5500_v57, %v15625_v7 }
 0x128   : > { %12885 = vmatpush3.bf16.msra.mxu0 %v14232_v38  ;;  %v4969_v22 = vsel %vm18776_vm3, %v4959_v14, %v4968_v34  ;;  %v14278_v38 = vld [vmem:[%s18772_s2 + $0x10] sm:$0xff]   ;;  %v4987_v54 = vsel %vm18776_vm3, %v4977_v32, %v4986_v24  ;;  %v15629_v14 = vshrl.u32 %v1975_v18, 7 }
 0x129   : > { %12886 = vmatprep.subr.bf16.mxu0 %v14234_v45  ;;  %12990 = vmatprep.subr.bf16.mxu1 %v14278_v38  ;;  %v5555_v58 = vshll.u32 %v11681_v11, 16 }
 0x12a   : > { %12991 = vmatpush3.bf16.msra.mxu1 %v14278_v38  ;;  %18903 = vst [vmem:[#allocation3_spill] sm:$0xff] %v15629_v14  ;;  %v15652_v38 = vrot.slane %v5351_v31, 1 }
 0x12b   : > { %12875 = vmatmul.mubr.msk.bf16.gmra.mrb[16].mxu0 %vm18807_vm1, %v4740_v29  ;;  %12992 = vmatprep.subr.bf16.mxu1 %v14279_v42  ;;  %v4996_v29 = vsel %vm18776_vm3, %v4986_v24, %v4995_v36 }
 0x12c   : > { %12878 = vmatprep.mubr.msk.bf16.mxu0 %vm18807_vm1, %v4744_v10  ;;  %12887 = vmatpush3.bf16.msra.mxu0 %v14234_v45  ;;  %v4978_v45 = vsel %vm18776_vm3, %v4968_v34, %v4977_v32  ;;  %v11638_v10 = vcombine.low %v15489_v6, %v15492_v46  ;;  %v14281_v6 = vld [vmem:[%s18772_s2] sm:$0xff]   ;;  %v5347_v34 = vshrl.u32 %v14258_v17, 16  ;;  %v15658_v32 = vadd.s32 16, %v15629_v14 }
 0x12d   : > { %12900 = vmatprep.subr.bf16.mxu0 %v14239_v55  ;;  %v14256_v46 = vld [vmem:[%s14409_s10 + $0x7c] sm:$0xff]   ;;  %v15663_v24 = vor.u32 %v5355_v12, %v15652_v38  ;;  %v5600_v17 = vshll.u32 %v15667_v47, 16 }
 0x12e   : > { %12993 = vmatpush3.bf16.msra.mxu1 %v14279_v42  ;;  %v5335_v48 = vshll.u32 %v14256_v46, 16  ;;  %v5339_v9 = vshrl.u32 %v14256_v46, 16  ;;  %18904 = vst [vmem:[#allocation4_spill] sm:$0xff] %v15658_v32  ;;  %v15673_v36 = vmul.u32.u64.low 3817748708, %v15658_v32  ;;  %v15674_v42 = vmul.u32.u64.high 3817748708, %v15658_v32, %v15673_v36 }
 0x12f   : > { %13006 = vmatprep.subr.bf16.mxu1 %v14281_v6  ;;  %v15680_v15 = vadd.s32 96, %v15658_v32  ;;  %v15686_v6 = vadd.s32 24, %v15629_v14 }
 0x130   : > { %v5337_v0 = vrot.slane %v5335_v48, 1  ;;  %v2016_v31 = vshrl.u32 %v15674_v42, 4 }
 0x131   : > { %18905 = vst [vmem:[#allocation5_spill] sm:$0xff] %v15686_v6 }
 0x132   : > { %v5341_v53 = vor.u32 %v5339_v9, %v5337_v0  ;;  %v15706_v9 = vadd.s32 96, %v15629_v14 }
 0x133   : > { %12879 = vmatmul.mubr.msk.bf16.gmra.mrb[20].mxu0 %vm18807_vm1, %v4753_v50  ;;  %v15621_v50 = vld [vmem:[%s14409_s10 + $0x94] sm:$0xff]  }
 0x134   : > { %12888 = vmatprep.mubr.msk.bf16.mxu0 %vm18807_vm1, %v4951_v44  ;;  %v5345_v44 = vrot.slane %v5343_v28, 1  ;;  %v5359_v8 = vshll.u32 %v15621_v50, 16  ;;  %v5363_v39 = vshrl.u32 %v15621_v50, 16  ;;  %v14260_v28 = vld [vmem:[%s18771_s1 + $0x98] sm:$0xff]   ;;  %v15714_v50 = vadd.s32 96, %v15686_v6 }
 0x136   : > { %v5346_v37 = vsel %vm1227_vm4, %v5341_v53, %v5345_v44  ;;  %v5349_v3 = vor.u32 %v5347_v34, %v5345_v44  ;;  %v5602_v53 = vrot.slane %v5600_v17, 1 }
 0x138   : > { %v5354_v42 = vsel %vm1227_vm4, %v5349_v3, %v15652_v38  ;;  %v15771_v38 = vld [vmem:[%s18771_s1 + $0xa8] sm:$0xff]  }
 0x13b   : > { %12889 = vmatmul.mubr.msk.bf16.vlgmr.msra.gmra.mrb[12].mxu0 %vm18807_vm1, %v4960_v59  ;;  %v14262_v59 = vld [vmem:[%s14409_s10 + $0x9c] ss:$0 sps:$4 sm:$0x11]  }
 0x13c   : > { %12901 = vmatpush3.bf16.msra.mxu0 %v14239_v55  ;;  %12892 = vmatprep.mubr.msk.bf16.mxu0 %vm18807_vm1, %v4969_v22  ;;  %v5327_v55 = vshll.u32 %v14255_v16, 16  ;;  %v15639_v22 = vld [vmem:[%s14409_s10 + $0x8c] sm:$0xff]   ;;  %v5557_v16 = vrot.slane %v5555_v58, 1  ;;  %v5746_v58 = vrot.slane %v15645_v25, 1 }
 0x13d   : > { %12902 = vmatprep.subr.bf16.mxu0 %v14242_v27  ;;  %v18784_v41 = vshll.u32 %v15639_v22, 16  ;;  %v5580_v23 = vshrl.u32 %v15639_v22, 16 }
 0x13e   : > { %v5329_v40 = vrot.slane %v5327_v55, 1 }
 0x13f   : > { %v5578_v46 = vrot.slane %v18784_v41, 1  ;;  %v16049_v41 = vadd.s32 64, %v15629_v14 }
 0x140   : > { %12903 = vmatpush3.bf16.msra.mxu0 %v14242_v27  ;;  %v5333_v63 = vor.u32 %v5331_v13, %v5329_v40  ;;  %v5330_v30 = vsel %vm1227_vm4, %v5325_v49, %v5329_v40  ;;  %v15648_v27 = vld [vmem:[%s14409_s10 + $0x94] sm:$0xff]  }
 0x141   : > { %12904 = vmatprep.subr.bf16.mxu0 %v14245_v62  ;;  %v18783_v55 = vshrl.u32 %v15648_v27, 16  ;;  %v5733_v40 = vld [vmem:[%s14409_s10 + $0x74] sm:$0xe]  ;;  %v5582_v49 = vor.u32 %v5580_v23, %v5578_v46  ;;  %18936 = vst [vmem:[#allocation22_spill] sm:$0xff] %v16049_v41 }
 0x142   : > { %v5338_v61 = vsel %vm1227_vm4, %v5333_v63, %v5337_v0  ;;  %v15722_v44 = vcombine.low %v5733_v40, %v15625_v7  ;;  %v15738_v7 = vadd.s32 8, %v15629_v14 }
 0x143   : > { %12893 = vmatmul.mubr.msk.bf16.gmra.mrb[16].mxu0 %vm18807_vm1, %v4978_v45  ;;  %v5367_v45 = vshll.u32 %v14262_v59, 16 }
 0x144   : > { %12896 = vmatprep.mubr.msk.bf16.mxu0 %vm18807_vm1, %v4987_v54  ;;  %12905 = vmatpush3.bf16.msra.mxu0 %v14245_v62  ;;  %v5361_v62 = vrot.slane %v5359_v8, 1  ;;  %v5568_v54 = vshll.u32 %v15645_v25, 16  ;;  %v15734_v8 = vmul.u32.u64.low 3817748708, %v15706_v9  ;;  %v15735_v59 = vmul.u32.u64.high 3817748708, %v15706_v9, %v15734_v8  ;;  %18906 = vst [vmem:[#allocation6_spill] sm:$0xff] %v15738_v7 }
 0x145   : > { %12918 = vmatprep.subr.bf16.mxu0 %v14247_v21 }
 0x146   : > { %v5365_v19 = vor.u32 %v5363_v39, %v5361_v62  ;;  %v5744_v39 = vrot.slane %v15634_v1, 1  ;;  %v5362_v17 = vsel %vm1227_vm4, %v15663_v24, %v5361_v62 }
 0x14b   : > { %12897 = vmatmul.mubr.msk.bf16.gmra.mrb[20].mxu0 %vm18807_vm1, %v4996_v29  ;;  %v5553_v29 = vshrl.u32 %v11681_v11, 16  ;;  %v15726_v34 = vmul.u32.u64.low 3817748708, %v15629_v14  ;;  %v15727_v11 = vmul.u32.u64.high 3817748708, %v15629_v14, %v15726_v34 }
 0x14c   : > { %12906 = vmatprep.mubr.msk.bf16.mxu0 %vm18807_vm1, %v11638_v10  ;;  %v5564_v10 = vshrl.u32 %v15634_v1, 16  ;;  %v18931_v1 = vmov 0 }
 0x14d   : > { %v5558_v18 = vor.u32 %v5557_v16, %v5553_v29  ;;  %v5743_v29 = vrot.slane %v15722_v44, 1  ;;  %v2017_v16 = vmul.u32 18, %v2016_v31 }
 0x153   : > { %12907 = vmatmul.mubr.msk.bf16.vlgmr.msra.gmra.mrb[12].mxu0 %vm18807_vm1, %v11639_v20  ;;  %v18780_v20 = vshll.u32 %v15655_v60, 16 }
 0x154   : > { %12919 = vmatpush3.bf16.msra.mxu0 %v14247_v21  ;;  %12910 = vmatprep.mubr.msk.bf16.mxu0 %vm18807_vm1, %v11640_v5  ;;  %v18782_v21 = vshll.u32 %v15648_v27, 16  ;;  %v5562_v5 = vrot.slane %v5560_v51, 1 }
 0x155   : > { %12920 = vmatprep.subr.bf16.mxu0 %v14250_v2  ;;  %v5594_v4 = vrot.slane %v18780_v20, 1 }
 0x156   : > { %v5586_v48 = vrot.slane %v18782_v21, 1  ;;  %v5566_v0 = vor.u32 %v5564_v10, %v5562_v5  ;;  %v16014_v21 = vadd.s32 40, %v15629_v14 }
 0x157   : > { %v5598_v12 = vor.u32 %v18781_v26, %v5594_v4 }
 0x158   : > { %12921 = vmatpush3.bf16.msra.mxu0 %v14250_v2  ;;  %v5572_v2 = vshrl.u32 %v15645_v25, 16  ;;  %v5590_v63 = vor.u32 %v18783_v55, %v5586_v48  ;;  %v15779_v24 = vsel %vm1227_vm4, %v5582_v49, %v5586_v48  ;;  %v1994_v48 = vshrl.u32 %v15727_v11, 4  ;;  %18934 = vst [vmem:[#allocation20_spill] sm:$0xff] %v16014_v21 }
 0x159   : > { %12922 = vmatprep.subr.bf16.mxu0 %v14253_v43  ;;  %v5754_v49 = vrot.slane %v15667_v47, 1 }
 0x15a   : > { %v15782_v62 = vsel %vm1227_vm4, %v5590_v63, %v5594_v4  ;;  %v15802_v4 = vadd.s32 48, %v15629_v14 }
 0x15b   : > { %12911 = vmatmul.mubr.msk.bf16.gmra.mrb[16].mxu0 %vm18807_vm1, %v11641_v33  ;;  %v5570_v33 = vrot.slane %v5568_v54, 1 }
 0x15c   : > { %12914 = vmatprep.mubr.msk.bf16.mxu0 %vm18807_vm1, %v11642_v35  ;;  %12923 = vmatpush3.bf16.msra.mxu0 %v14253_v43  ;;  %v5369_v43 = vrot.slane %v5367_v45, 1  ;;  %v15702_v13 = vmul.u32.u64.low 3817748708, %v15680_v15  ;;  %v15703_v35 = vmul.u32.u64.high 3817748708, %v15680_v15, %v15702_v13  ;;  %18907 = vst [vmem:[#allocation7_spill] sm:$0xff] %v15802_v4 }
 0x15d   : > { %12936 = vmatprep.subr.bf16.mxu0 %v15618_v56  ;;  %v5574_v57 = vor.u32 %v5572_v2, %v5570_v33  ;;  %v15754_v45 = vmul.u32.u64.low 3817748708, %v15738_v7  ;;  %v15755_v36 = vmul.u32.u64.high 3817748708, %v15738_v7, %v15754_v45  ;;  %v5563_v13 = vsel %vm1227_vm4, %v5558_v18, %v5562_v5 }
 0x15e   : > { %v5370_v40 = vsel %vm1227_vm4, %v5365_v19, %v5369_v43  ;;  %v4063_v34 = vshrl.u32 %v15703_v35, 4  ;;  %v15766_v8 = vsel %vm1227_vm4, %v5566_v0, %v5570_v33  ;;  %v15785_v5 = vsel %vm1227_vm4, %v5598_v12, %v5602_v53 }
 0x15f   : > { %v15774_v3 = vsel %vm1227_vm4, %v5574_v57, %v5578_v46  ;;  %v15788_v43 = vsel %vm1654_vm5, %v5744_v39, %v5746_v58  ;;  %v15791_v33 = vadd.s32 96, %v15738_v7  ;;  %v15798_v46 = vsub.s32 %v15658_v32, %v2017_v16 }
 0x160   : > { %v5748_v35 = vrot.slane %v15639_v22, 1  ;;  %v5750_v19 = vrot.slane %v15648_v27, 1  ;;  %v4064_v18 = vmul.u32 18, %v4063_v34  ;;  %v4041_v0 = vshrl.u32 %v15735_v59, 4 }
 0x161   : > { %v5752_v57 = vrot.slane %v15655_v60, 1  ;;  %v2005_v31 = vshrl.u32 %v15755_v36, 4  ;;  %v15815_v11 = vmul.u32.u64.low 3817748708, %v15791_v33  ;;  %v15816_v12 = vmul.u32.u64.high 3817748708, %v15791_v33, %v15815_v11 }
 0x162   : > { %vm2122_vm10 = vcmp.ne.s32.totalorder %v15798_v46, 0  ;;  %vm2134_vm11 = vcmp.lt.s32.totalorder %v15798_v46, 0  ;;  %v1995_v59 = vmul.u32 18, %v1994_v48  ;;  %v15825_v47 = vsub.s32 %v15680_v15, %v4064_v18 }
 0x163   : > { %12915 = vmatmul.mubr.msk.bf16.gmra.mrb[20].mxu0 %vm18807_vm1, %v11643_v52  ;;  %v14263_v52 = vld [vmem:[%s18771_s1 + $0xa0] sm:$0xff]   ;;  %v15835_v45 = vsel %vm1654_vm5, %v5748_v35, %v5750_v19  ;;  %v15838_v36 = vadd.s32 18, %v15798_v46  ;;  %v15844_v15 = vsel %vm1654_vm5, %v5752_v57, %v5754_v49  ;;  %vm15846_vm12 = vmand %vm2134_vm11, %vm2122_vm10  ;;  %v2006_v48 = vmul.u32 18, %v2005_v31 }
 0x164   : > { %12924 = vmatprep.mubr.msk.bf16.mxu0 %vm18807_vm1, %v5330_v30  ;;  %18908 = vst [vmem:[#allocation8_spill] sm:$0xff] %v15844_v15  ;;  %v15853_v34 = vsub.s32 %v15629_v14, %v1995_v59  ;;  %vm4169_vm13 = vcmp.ne.s32.totalorder %v15825_v47, 0  ;;  %vm4181_vm14 = vcmp.lt.s32.totalorder %v15825_v47, 0  ;;  %v4052_v49 = vshrl.u32 %v15816_v12, 4 }
 0x165   : > { %v15894_v11 = vsub.s32 %v15738_v7, %v2006_v48  ;;  %vm15909_vm11 = vmand %vm4181_vm14, %vm4169_vm13 }
 0x166   : > { %vm2120_vm15 = vcmp.ne.s32.totalorder %v15853_v34, 0  ;;  %vm2132_vm4 = vcmp.lt.s32.totalorder %v15853_v34, 0  ;;  %v15891_v31 = vadd.s32 18, %v15853_v34 }
 0x167   : > { %18914 = vst [vmem:[#allocation12_spill] sm:$0xff] %v15894_v11  ;;  %vm15922_vm9 = vmand %vm2132_vm4, %vm2120_vm15  ;;  %vm2121_vm15 = vcmp.ne.s32.totalorder %v15894_v11, 0  ;;  %vm2133_vm4 = vcmp.lt.s32.totalorder %v15894_v11, 0 }
 0x16b   : > { %12925 = vmatmul.mubr.msk.bf16.vlgmr.msra.gmra.mrb[12].mxu0 %vm18807_vm1, %v5338_v61 }
 0x16c   : > { %12937 = vmatpush3.bf16.msra.mxu0 %v15618_v56  ;;  %12928 = vmatprep.mubr.msk.bf16.mxu0 %vm18807_vm1, %v5346_v37  ;;  %v15744_v30 = vmul.u32.u64.low 3817748708, %v15686_v6  ;;  %v15745_v56 = vmul.u32.u64.high 3817748708, %v15686_v6, %v15744_v30  ;;  %v15748_v61 = vmul.u32.u64.low 3817748708, %v15714_v50  ;;  %v15749_v37 = vmul.u32.u64.high 3817748708, %v15714_v50, %v15748_v61 }
 0x16d   : > { %12938 = vmatprep.subr.bf16.mxu0 %v14260_v28  ;;  %v15822_v30 = vadd.s32 96, %v15802_v4 }
 0x16e   : > { %v2027_v63 = vshrl.u32 %v15745_v56, 4  ;;  %v4074_v53 = vshrl.u32 %v15749_v37, 4  ;;  %v4042_v56 = vmul.u32 18, %v4041_v0 }
 0x16f   : > { %v15828_v61 = vmul.u32.u64.low 3817748708, %v15802_v4  ;;  %v15829_v37 = vmul.u32.u64.high 3817748708, %v15802_v4, %v15828_v61 }
 0x170   : > { %12939 = vmatpush3.bf16.msra.mxu0 %v14260_v28  ;;  %v15776_v28 = vrot.slane %v5572_v2, 1  ;;  %v15795_v2 = vsel %vm1654_vm5, %v5743_v29, %v5744_v39  ;;  %v15832_v39 = vsel %vm1654_vm5, %v5746_v58, %v5748_v35  ;;  %v15841_v29 = vsel %vm1654_vm5, %v5750_v19, %v5752_v57 }
 0x171   : > { %12940 = vmatprep.subr.bf16.mxu0 %v14263_v52  ;;  %v5899_v58 = vshll.u32 %v15722_v44, 16  ;;  %v15856_v35 = vmul.u32.u64.low 3817748708, %v15822_v30  ;;  %v15857_v19 = vmul.u32.u64.high 3817748708, %v15822_v30, %v15856_v35  ;;  %v15862_v18 = vsub.s32 %v15706_v9, %v4042_v56 }
 0x172   : > { %v15875_v57 = vadd.s32 18, %v15825_v47  ;;  %v2060_v12 = vshrl.u32 %v15829_v37, 4 }
 0x173   : > { %12929 = vmatmul.mubr.msk.bf16.gmra.mrb[16].mxu0 %vm18807_vm1, %v5354_v42  ;;  %v2028_v42 = vmul.u32 18, %v2027_v63  ;;  %18911 = vst [vmem:[#allocation9_spill] sm:$0xff] %v15862_v18  ;;  %vm4167_vm5 = vcmp.ne.s32.totalorder %v15862_v18, 0  ;;  %vm4179_vm10 = vcmp.lt.s32.totalorder %v15862_v18, 0  ;;  %v15915_v56 = vrot.slane %v5899_v58, 2 }
 0x174   : > { %12932 = vmatprep.mubr.msk.bf16.mxu0 %vm18807_vm1, %v5362_v17  ;;  %12941 = vmatpush3.bf16.msra.mxu0 %v14263_v52  ;;  %v5896_v52 = vshrl.u32 %v15722_v44, 16  ;;  %v4075_v17 = vmul.u32 18, %v4074_v53  ;;  %v15867_v44 = vadd.s32 32, %v15629_v14  ;;  %vm15937_vm0 = vmand %vm4179_vm10, %vm4167_vm5  ;;  %v18920_v58 = vmov 0 }
 0x175   : > { %12954 = vmatprep.subr.bf16.mxu0 %v15771_v38  ;;  %v18921_v58 = vsel %vm15937_vm0, 4294967295, %v18920_v58  ;;  %v4107_v35 = vshrl.u32 %v15857_v19, 4  ;;  %v2061_v19 = vmul.u32 18, %v2060_v12  ;;  %v5908_v12 = vrot.slane %v5568_v54, 2 }
 0x176   : > { %v15864_v0 = vrot.slane %v5896_v52, 1  ;;  %18912 = vst [vmem:[#allocation10_spill] sm:$0xff] %v15867_v44  ;;  %v15881_v9 = vsub.s32 %v15714_v50, %v4075_v17  ;;  %v15885_v63 = vmul.u32.u64.low 3817748708, %v15867_v44  ;;  %v15886_v53 = vmul.u32.u64.high 3817748708, %v15867_v44, %v15885_v63  ;;  %v14270_v52 = vld [vmem:[%s18771_s1 + $0xb0] sm:$0xff]   ;;  %18922 = vst [vmem:[#allocation14_spill] sm:$0xff] %v18921_v58 }
 0x177   : > { %v15899_v50 = vadd.s32 18, %v15862_v18  ;;  %v15918_v61 = vadd.s32 96, %v15867_v44  ;;  %v4053_v17 = vmul.u32 18, %v4052_v49  ;;  %v15959_v49 = vadd.s32 18, %v15894_v11 }
 0x178   : > { %18913 = vst [vmem:[#allocation11_spill] sm:$0xff] %v15881_v9  ;;  %vm4170_vm13 = vcmp.ne.s32.totalorder %v15881_v9, 0  ;;  %vm4182_vm14 = vcmp.lt.s32.totalorder %v15881_v9, 0  ;;  %v15942_v48 = vadd.s32 18, %v15881_v9  ;;  %v5903_v63 = vrot.slane %v5564_v10, 1 }
 0x179   : > { %18915 = vst [vmem:[#allocation13_spill] sm:$0xff] %v15899_v50  ;;  %18926 = vst [vmem:[#allocation16_spill] sm:$0xff] %v15959_v49  ;;  %v5904_v10 = vrot.slane %v5560_v51, 2  ;;  %v15982_v20 = vmul.u32.u64.low 3817748708, %v15918_v61  ;;  %v15983_v26 = vmul.u32.u64.high 3817748708, %v15918_v61, %v15982_v20  ;;  %v16002_v25 = vsub.s32 %v15791_v33, %v4053_v17 }
 0x17a   : > { %18923 = vst [vmem:[#allocation15_spill] sm:$0xff] %v15942_v48  ;;  %v2038_v51 = vshrl.u32 %v15886_v53, 4  ;;  %v4108_v55 = vmul.u32 18, %v4107_v35  ;;  %v5902_v53 = vor.u32 %v15915_v56, %v15864_v0  ;;  %v16023_v17 = vsub.s32 %v15802_v4, %v2061_v19  ;;  %v16031_v35 = vld [vmem:[%s18771_s1 + $0xc0] sm:$0xff]  }
 0x17b   : > { %12933 = vmatmul.mubr.msk.bf16.gmra.mrb[20].mxu0 %vm18807_vm1, %v5370_v40  ;;  %v18928_v40 = vmov 0  ;;  %v5905_v33 = vor.u32 %v5904_v10, %v5903_v63  ;;  %v16038_v0 = vor.u32 %v5908_v12, %v15776_v28  ;;  %v16041_v56 = vadd.s32 80, %v15629_v14 }
 0x17c   : > { %12942 = vmatprep.mubr.msk.bf16.mxu0 %vm18807_vm1, %v5563_v13  ;;  %v15878_v13 = vsub.s32 %v15686_v6, %v2028_v42  ;;  %vm4168_vm10 = vcmp.ne.s32.totalorder %v16002_v25, 0  ;;  %v2039_v19 = vmul.u32 18, %v2038_v51  ;;  %v16046_v20 = vrot.slane %v5580_v23, 1 }
 0x17d   : > { %18935 = vst [vmem:[#allocation21_spill] sm:$0xff] %v16041_v56  ;;  %v16054_v63 = vsub.s32 %v15822_v30, %v4108_v55  ;;  %v16061_v12 = vadd.s32 96, %v16014_v21  ;;  %v4085_v55 = vshrl.u32 %v15983_v26, 4  ;;  %v16075_v30 = vadd.s32 96, %v16041_v56 }
 0x17e   : > { %vm2123_vm3 = vcmp.ne.s32.totalorder %v15878_v13, 0  ;;  %vm2135_vm2 = vcmp.lt.s32.totalorder %v15878_v13, 0  ;;  %v15927_v42 = vadd.s32 18, %v15878_v13  ;;  %v16139_v9 = vadd.s32 18, %v16023_v17 }
 0x17f   : > { %vm15954_vm5 = vmand %vm2135_vm2, %vm2123_vm3  ;;  %18937 = vst [vmem:[#allocation23_spill] sm:$0xff] %v16054_v63  ;;  %vm4185_vm7 = vcmp.lt.s32.totalorder %v16054_v63, 0  ;;  %v16097_v4 = vmul.u32.u64.low 3817748708, %v16041_v56  ;;  %v16098_v7 = vmul.u32.u64.high 3817748708, %v16041_v56, %v16097_v4 }
 0x180   : > { %vm15973_vm2 = vmand %vm4182_vm14, %vm4170_vm13  ;;  %vm4180_vm13 = vcmp.lt.s32.totalorder %v16002_v25, 0  ;;  %vm2126_vm14 = vcmp.ne.s32.totalorder %v16023_v17, 0  ;;  %v16105_v6 = vmul.u32.u64.low 3817748708, %v16075_v30  ;;  %v16106_v32 = vmul.u32.u64.high 3817748708, %v16075_v30, %v16105_v6 }
 0x181   : > { %v18929_v40 = vsel %vm15973_vm2, 4294967295, %v18928_v40  ;;  %vm15997_vm3 = vmand %vm2133_vm4, %vm2121_vm15  ;;  %vm2138_vm15 = vcmp.lt.s32.totalorder %v16023_v17, 0  ;;  %vm4173_vm4 = vcmp.ne.s32.totalorder %v16054_v63, 0  ;;  %v16120_v4 = vadd.s32 18, %v16002_v25 }
 0x182   : > { %18930 = vst [vmem:[#allocation18_spill] sm:$0xff] %v18929_v40  ;;  %v18932_v1 = vsel %vm15997_vm3, 4294967295, %v18931_v1  ;;  %vm16115_vm8 = vmand %vm4180_vm13, %vm4168_vm10  ;;  %v18999_v59 = vsel %vm15954_vm5, %v15927_v42, %v15878_v13  ;;  %v19008_v42 = vld [vmem:[#allocation8_spill] sm:$0xff]  ;;  %vm19009_vm5 = vcmask 392192  }
 0x183   : > { %12943 = vmatmul.mubr.msk.bf16.vlgmr.msra.gmra.mrb[12].mxu0 %vm18807_vm1, %v15766_v8  ;;  %18933 = vst [vmem:[#allocation19_spill] sm:$0xff] %v18932_v1  ;;  %vm16134_vm10 = vmand %vm2138_vm15, %vm2126_vm14  ;;  %v18943_v1 = vmov 0  ;;  %vm18948_vm15 = vsmask.f32 6400  ;;  %v19027_v8 = vld [vmem:[#allocation12_spill] sm:$0xff] }
 0x184   : > { %12955 = vmatpush3.bf16.msra.mxu0 %v15771_v38  ;;  %12946 = vmatprep.mubr.msk.bf16.mxu0 %vm18807_vm1, %v15774_v3  ;;  %v15964_v38 = vadd.s32 56, %v15629_v14  ;;  %v14273_v3 = vld [vmem:[%s18771_s1 + $0xb8] sm:$0xff]   ;;  %v18944_v1 = vsel %vm16134_vm10, 4294967295, %v18943_v1  ;;  %vm16152_vm14 = vmand %vm4185_vm7, %vm4173_vm4  ;;  %v16163_v18 = vsel %vm18948_vm15, %v5902_v53, %v5905_v33  ;;  %v18951_v53 = vmov 0 }
 0x185   : > { %12956 = vmatprep.subr.bf16.mxu0 %v14270_v52  ;;  %vm18949_vm7 = vmmov %vm18948_vm15 }
 0x186   : > { %18927 = vst [vmem:[#allocation17_spill] sm:$0xff] %v15964_v38  ;;  %v16026_v54 = vadd.s32 96, %v15964_v38  ;;  %v16057_v28 = vmul.u32.u64.low 3817748708, %v15964_v38  ;;  %v16058_v10 = vmul.u32.u64.high 3817748708, %v15964_v38, %v16057_v28  ;;  %v16174_v15 = vsel %vm18949_vm7, %v5905_v33, %v16038_v0  ;;  %v14276_v33 = vld [vmem:[%s18771_s1 + $0xc8] sm:$0xff]  }
 0x187   : > { %v16084_v51 = vmul.u32.u64.low 3817748708, %v16014_v21  ;;  %v16085_v28 = vmul.u32.u64.high 3817748708, %v16014_v21, %v16084_v51 }
 0x188   : > { %12957 = vmatpush3.bf16.msra.mxu0 %v14270_v52  ;;  %v16093_v26 = vmul.u32.u64.low 3817748708, %v16061_v12  ;;  %v16094_v52 = vmul.u32.u64.high 3817748708, %v16061_v12, %v16093_v26  ;;  %v4086_v51 = vmul.u32 18, %v4085_v55  ;;  %v18942_v55 = vshll.u32 %v15639_v22, 16 }
 0x189   : > { %12958 = vmatprep.subr.bf16.mxu0 %v14273_v3  ;;  %v18940_v26 = vmov 0  ;;  %v16142_v22 = vadd.s32 18, %v16054_v63  ;;  %v4151_v63 = vshrl.u32 %v16106_v32, 4 }
 0x18a   : > { %v18941_v26 = vsel %vm16115_vm8, 4294967295, %v18940_v26 }
 0x18b   : > { %12947 = vmatmul.mubr.msk.bf16.gmra.mrb[16].mxu0 %vm18807_vm1, %v15779_v24  ;;  %v16068_v23 = vmul.u32.u64.low 3817748708, %v16026_v54  ;;  %v16069_v24 = vmul.u32.u64.high 3817748708, %v16026_v54, %v16068_v23  ;;  %18945 = vst [vmem:[#allocation26_spill] sm:$0xff] %v16142_v22 }
 0x18c   : > { %12950 = vmatprep.mubr.msk.bf16.mxu0 %vm18807_vm1, %v15782_v62  ;;  %12959 = vmatpush3.bf16.msra.mxu0 %v14273_v3  ;;  %v16078_v62 = vadd.s32 88, %v15629_v14  ;;  %v16081_v3 = vsub.s32 %v15867_v44, %v2039_v19  ;;  %v16088_v23 = vadd.s32 96, %v16049_v41 }
 0x18d   : > { %12972 = vmatprep.subr.bf16.mxu0 %v16031_v35  ;;  %v16101_v19 = vmul.u32.u64.low 3817748708, %v16049_v41  ;;  %v16102_v44 = vmul.u32.u64.high 3817748708, %v16049_v41, %v16101_v19 }
 0x18e   : > { %18938 = vst [vmem:[#allocation24_spill] sm:$0xff] %v16078_v62  ;;  %18939 = vst [vmem:[#allocation25_spill] sm:$0xff] %v16081_v3  ;;  %v16109_v11 = vadd.s32 96, %v16078_v62  ;;  %v5912_v19 = vrot.slane %v18942_v55, 2  ;;  %v16125_v49 = vmul.u32.u64.low 3817748708, %v16088_v23  ;;  %v16126_v6 = vmul.u32.u64.high 3817748708, %v16088_v23, %v16125_v49 }
 0x18f   : > { %vm2124_vm13 = vcmp.ne.s32.totalorder %v16081_v3, 0  ;;  %vm2136_vm6 = vcmp.lt.s32.totalorder %v16081_v3, 0  ;;  %v2071_v49 = vshrl.u32 %v16058_v10, 4  ;;  %v4118_v55 = vshrl.u32 %v16069_v24, 4 }
 0x190   : > { %v16159_v48 = vmul.u32.u64.low 3817748708, %v16078_v62  ;;  %v16160_v40 = vmul.u32.u64.high 3817748708, %v16078_v62, %v16159_v48  ;;  %v16169_v50 = vmul.u32.u64.low 3817748708, %v16109_v11  ;;  %v16170_v58 = vmul.u32.u64.high 3817748708, %v16109_v11, %v16169_v50  ;;  %vm16199_vm4 = vmand %vm2136_vm6, %vm2124_vm13 }
 0x191   : > { %v16177_v10 = vadd.s32 18, %v16081_v3  ;;  %v2049_v24 = vshrl.u32 %v16085_v28, 4  ;;  %v16181_v48 = vadd.s32 72, %v15629_v14  ;;  %v18952_v53 = vsel %vm16199_vm4, 4294967295, %v18951_v53 }
 0x192   : > { %v4096_v28 = vshrl.u32 %v16094_v52, 4  ;;  %v16205_v14 = vor.u32 %v5912_v19, %v16046_v20  ;;  %v2104_v50 = vshrl.u32 %v16098_v7, 4  ;;  %v2082_v22 = vshrl.u32 %v16102_v44, 4 }
 0x193   : > { %12951 = vmatmul.mubr.msk.bf16.gmra.mrb[20].mxu0 %vm18807_vm1, %v15785_v5  ;;  %v18946_v5 = vmov 0  ;;  %18950 = vst [vmem:[#allocation27_spill] sm:$0xff] %v16181_v48  ;;  %v2050_v52 = vmul.u32 18, %v2049_v24  ;;  %v4129_v7 = vshrl.u32 %v16126_v6, 4  ;;  %v16221_v19 = vadd.s32 96, %v16181_v48 }
 0x194   : > { %12960 = vmatprep.mubr.msk.bf16.mxu0 %vm18807_vm1, %v15795_v2  ;;  %v18947_v5 = vsel %vm16152_vm14, 4294967295, %v18946_v5  ;;  %v16166_v2 = vsub.s32 %v15918_v61, %v4086_v51  ;;  %v2072_v51 = vmul.u32 18, %v2071_v49  ;;  %v4119_v61 = vmul.u32 18, %v4118_v55 }
 0x195   : > { %v4097_v32 = vmul.u32 18, %v4096_v28  ;;  %v16229_v44 = vmul.u32.u64.low 3817748708, %v16181_v48  ;;  %v16230_v55 = vmul.u32.u64.high 3817748708, %v16181_v48, %v16229_v44  ;;  %v18953_v6 = vmov 0 }
 0x196   : > { %vm4171_vm15 = vcmp.ne.s32.totalorder %v16166_v2, 0  ;;  %vm4183_vm6 = vcmp.lt.s32.totalorder %v16166_v2, 0  ;;  %v16226_v49 = vadd.s32 18, %v16166_v2  ;;  %v16247_v24 = vsel %vm18949_vm7, %v16038_v0, %v16205_v14 }
 0x197   : > { %vm16237_vm13 = vmand %vm4183_vm6, %vm4171_vm15  ;;  %18955 = vst [vmem:[#allocation28_spill] sm:$0xff] %v16247_v24  ;;  %v2105_v28 = vmul.u32 18, %v2104_v50  ;;  %v16254_v44 = vsub.s32 %v16026_v54, %v4119_v61  ;;  %v4152_v20 = vmul.u32 18, %v4151_v63  ;;  %v16269_v54 = vsub.s32 %v16061_v12, %v4097_v32 }
 0x198   : > { %v18954_v6 = vsel %vm16237_vm13, 4294967295, %v18953_v6  ;;  %v2083_v3 = vmul.u32 18, %v2082_v22  ;;  %v4130_v0 = vmul.u32 18, %v4129_v7  ;;  %v18956_v63 = vshrl.u32 %v15648_v27, 16 }
 0x199   : > { %v16261_v50 = vmul.u32.u64.low 3817748708, %v16221_v19  ;;  %v16262_v24 = vmul.u32.u64.high 3817748708, %v16221_v19, %v16261_v50 }
 0x19a   : > { %v5915_v22 = vrot.slane %v18956_v63, 1  ;;  %v16283_v12 = vsub.s32 %v16049_v41, %v2083_v3  ;;  %v18963_v3 = vmov 0  ;;  %v18980_v63 = vshrl.u32 %v15655_v60, 16 }
 0x19b   : > { %12961 = vmatmul.mubr.msk.bf16.vlgmr.msra.gmra.mrb[12].mxu0 %vm18807_vm1, %v15788_v43  ;;  %v16242_v43 = vsub.s32 %v15964_v38, %v2072_v51  ;;  %v4162_v51 = vshrl.u32 %v16170_v58, 4  ;;  %v16258_v38 = vsub.s32 %v16014_v21, %v2050_v52  ;;  %v18957_v58 = vshll.u32 %v15648_v27, 16  ;;  %v16288_v27 = vld [vmem:[%s18772_s2 + $0x10] sm:$0xff]   ;;  %v19018_v21 = vld [vmem:[#allocation15_spill] sm:$0xff] }
 0x19c   : > { %12973 = vmatpush3.bf16.msra.mxu0 %v16031_v35  ;;  %12964 = vmatprep.mubr.msk.bf16.mxu0 %vm18807_vm1, %v15832_v39  ;;  %v2115_v35 = vshrl.u32 %v16160_v40, 4  ;;  %v14277_v39 = vld [vmem:[%s18771_s1 + $0xd0] sm:$0xff]   ;;  %v16278_v52 = vsub.s32 %v16041_v56, %v2105_v28  ;;  %18958 = vst [vmem:[#allocation29_spill] sm:$0xff] %v16288_v27  ;;  %v16296_v28 = vsub.s32 %v16088_v23, %v4130_v0  ;;  %vm18960_vm1 = vcmask 392192  }
 0x19d   : > { %12974 = vmatprep.subr.bf16.mxu0 %v14276_v33  ;;  %v5916_v61 = vrot.slane %v18957_v58, 2  ;;  %v4163_v32 = vmul.u32 18, %v4162_v51  ;;  %vm18961_vm7 = vcmp.ne.s32.totalorder %v16242_v43, 0  ;;  %vm18962_vm13 = vcmp.lt.s32.totalorder %v16242_v43, 0  ;;  %vm18965_vm14 = vmmov %vm18960_vm1 }
 0x19e   : > { %v2116_v7 = vmul.u32 18, %v2115_v35  ;;  %18959 = vst [vmem:[#allocation30_spill] sm:$0xff] %v16296_v28  ;;  %vm16304_vm4 = vmand %vm18962_vm13, %vm18961_vm7  ;;  %v16309_v35 = vadd.s32 18, %v16242_v43  ;;  %vm18967_vm13 = vcmp.lt.s32.totalorder %v16254_v44, 0  ;;  %v16325_v23 = vadd.s32 18, %v16254_v44 }
 0x19f   : > { %v18964_v3 = vsel %vm16304_vm4, 4294967295, %v18963_v3  ;;  %vm2130_vm15 = vcmp.ne.s32.totalorder %v16278_v52, 0  ;;  %vm2142_vm6 = vcmp.lt.s32.totalorder %v16278_v52, 0  ;;  %vm18971_vm10 = vcmp.lt.s32.totalorder %v16258_v38, 0 }
 0x1a0   : > { %12975 = vmatpush3.bf16.msra.mxu0 %v14276_v33  ;;  %v16293_v33 = vsub.s32 %v16075_v30, %v4152_v20  ;;  %v2093_v30 = vshrl.u32 %v16230_v55, 4  ;;  %v16330_v20 = vsub.s32 %v16078_v62, %v2116_v7  ;;  %v16341_v55 = vadd.s32 18, %v16258_v38 }
 0x1a1   : > { %12976 = vmatprep.subr.bf16.mxu0 %v14277_v39  ;;  %vm18975_vm4 = vcmp.lt.s32.totalorder %v16269_v54, 0  ;;  %v5919_v58 = vrot.slane %v18980_v63, 1  ;;  %v18981_v7 = vshll.u32 %v15655_v60, 16  ;;  %v16371_v40 = vadd.s32 18, %v16269_v54 }
 0x1a2   : > { %v2094_v50 = vmul.u32 18, %v2093_v30  ;;  %v5917_v62 = vor.u32 %v5916_v61, %v5915_v22  ;;  %v14280_v30 = vld [vmem:[%s14409_s10 + $0xa4] ss:$0 sps:$4 sm:$0x33]   ;;  %v18986_v60 = vsel %vm15846_vm12, %v15838_v36, %v15798_v46  ;;  %v18987_v22 = vmov 0 }
 0x1a3   : > { %12965 = vmatmul.mubr.msk.bf16.gmra.mrb[16].mxu0 %vm18960_vm1, %v15835_v45  ;;  %vm18966_vm1 = vcmp.ne.s32.totalorder %v16254_v44, 0  ;;  %v18968_v45 = vmov 0  ;;  %v16394_v61 = vadd.s32 18, %v16278_v52  ;;  %v16405_v16 = vadd.s32 18, %v16283_v12 }
 0x1a4   : > { %12968 = vmatprep.mubr.msk.bf16.mxu0 %vm18965_vm14, %v15841_v29  ;;  %12977 = vmatpush3.bf16.msra.mxu0 %v14277_v39  ;;  %vm16320_vm7 = vmand %vm18967_vm13, %vm18966_vm1  ;;  %vm18970_vm14 = vcmp.ne.s32.totalorder %v16258_v38, 0  ;;  %v18972_v29 = vmov 0  ;;  %v16346_v39 = vsub.s32 %v16109_v11, %v4163_v32  ;;  %vm4189_vm1 = vcmp.lt.s32.totalorder %v16293_v33, 0 }
 0x1a5   : > { %v18969_v45 = vsel %vm16320_vm7, 4294967295, %v18968_v45  ;;  %vm16336_vm8 = vmand %vm18971_vm10, %vm18970_vm14  ;;  %13134 = vmatprep.subr.bf16.mxu0 %v16288_v27  ;;  %vm18974_vm7 = vcmp.ne.s32.totalorder %v16269_v54, 0  ;;  %vm4177_vm14 = vcmp.ne.s32.totalorder %v16293_v33, 0  ;;  %v4140_v11 = vshrl.u32 %v16262_v24, 4 }
 0x1a6   : > { %v18973_v29 = vsel %vm16336_vm8, 4294967295, %v18972_v29  ;;  %vm16353_vm10 = vmand %vm18975_vm4, %vm18974_vm7  ;;  %v5920_v32 = vrot.slane %v18981_v7, 2  ;;  %vm18982_vm4 = vcmp.ne.s32.totalorder %v16283_v12, 0  ;;  %v18984_v24 = vmov 0 }
 0x1a7   : > { %vm16361_vm8 = vmand %vm2142_vm6, %vm2130_vm15  ;;  %vm18983_vm15 = vcmp.lt.s32.totalorder %v16283_v12, 0  ;;  %vm2131_vm7 = vcmp.ne.s32.totalorder %v16330_v20, 0  ;;  %vm16389_vm13 = vcmp.lt.s32.totalorder %v18986_v60, 16  ;;  %v18991_v46 = vsel %vm15909_vm11, %v15875_v57, %v15825_v47 }
 0x1a8   : > { %vm16377_vm6 = vmand %vm18983_vm15, %vm18982_vm4  ;;  %v18988_v22 = vsel %vm16389_vm13, 4294967295, %v18987_v22  ;;  %vm16414_vm3 = vcmp.lt.s32.totalorder %v18991_v46, 16  ;;  %v18992_v36 = vmov 0  ;;  %v18995_v7 = vsel %vm15922_vm9, %v15891_v31, %v15853_v34  ;;  %v19011_v46 = vld [vmem:[#allocation13_spill] sm:$0xff] }
 0x1a9   : > { %v18985_v24 = vsel %vm16377_vm6, 4294967295, %v18984_v24  ;;  %vm16400_vm4 = vmand %vm4189_vm1, %vm4177_vm14  ;;  %v18993_v36 = vsel %vm16414_vm3, 4294967295, %v18992_v36  ;;  %vm16423_vm1 = vcmp.lt.s32.totalorder %v18995_v7, 16  ;;  %v18996_v60 = vmov 0  ;;  %v19012_v7 = vld [vmem:[#allocation9_spill] sm:$0xff] }
 0x1aa   : > { %18994 = vst [vmem:[#allocation31_spill] sm:$0xff] %v18993_v36  ;;  %v18997_v60 = vsel %vm16423_vm1, 4294967295, %v18996_v60  ;;  %vm16432_vm14 = vcmp.lt.s32.totalorder %v18999_v59, 16  ;;  %v19000_v47 = vmov 0  ;;  %v16437_v57 = vadd.s32 18, %v16293_v33 }
 0x1ab   : > { %18998 = vst [vmem:[#allocation32_spill] sm:$0xff] %v18997_v60  ;;  %v19001_v47 = vsel %vm16432_vm14, 4294967295, %v19000_v47  ;;  %vm19003_vm11 = vcmp.ne.s32.totalorder %v16296_v28, 0  ;;  %vm19004_vm9 = vcmp.lt.s32.totalorder %v16296_v28, 0  ;;  %v19005_v34 = vmov 0  ;;  %12969 = vmatmul.mubr.msk.bf16.gmra.mrb[20].mxu0 %vm19009_vm5, %v19008_v42  ;;  %v19026_v42 = vld [vmem:[#allocation16_spill] sm:$0xff] }
 0x1ac   : > { %19002 = vst [vmem:[#allocation33_spill] sm:$0xff] %v19001_v47  ;;  %vm16443_vm15 = vmand %vm19004_vm9, %vm19003_vm11  ;;  %v16448_v31 = vadd.s32 18, %v16296_v28  ;;  %v16451_v13 = vadd.s32 18, %v16330_v20  ;;  %v4141_v37 = vmul.u32 18, %v4140_v11  ;;  %v19013_v59 = vsel %vm15937_vm0, %v19011_v46, %v19012_v7  ;;  %v19019_v47 = vld [vmem:[#allocation11_spill] sm:$0xff] }
 0x1ad   : > { %v19006_v34 = vsel %vm16443_vm15, 4294967295, %v19005_v34  ;;  %vm16460_vm12 = vcmp.lt.s32.totalorder %v19013_v59, 16  ;;  %v19014_v41 = vmov 0  ;;  %v19020_v60 = vsel %vm15973_vm2, %v19018_v21, %v19019_v47  ;;  %v19024_v11 = vld [vmem:[#allocation19_spill] sm:$0xff] }
 0x1ae   : > { %19007 = vst [vmem:[#allocation34_spill] sm:$0xff] %v16448_v31  ;;  %v19015_v41 = vsel %vm16460_vm12, 4294967295, %v19014_v41  ;;  %vm16469_vm11 = vcmp.lt.s32.totalorder %v19020_v60, 16  ;;  %v19021_v36 = vmov 0  ;;  %vm19025_vm9 = vnez %v19024_v11 }
 0x1af   : > { %19016 = vst [vmem:[#allocation8_spill] sm:$0xff] %v19015_v41  ;;  %v19022_v36 = vsel %vm16469_vm11, 4294967295, %v19021_v36  ;;  %v19028_v27 = vsel %vm19025_vm9, %v19026_v42, %v19027_v8  ;;  %v19029_v46 = vmov 0  ;;  %vm19031_vm0 = vnez %v18964_v3  ;;  %v12818_v8 = vpop.f32.mrb[0].mxu1 }
 0x1b0   : > { %19023 = vst [vmem:[#allocation14_spill] sm:$0xff] %v19022_v36  ;;  %vm16478_vm5 = vcmp.lt.s32.totalorder %v19028_v27, 16  ;;  %v2175_v56 = vsel %vm19031_vm0, %v16309_v35, %v16242_v43  ;;  %vm19032_vm2 = vcmp.lt.s32.totalorder %v16330_v20, 0  ;;  %v16495_v60 = vadd.s32 18, %v16346_v39  ;;  %v16505_v43 = vld [vmem:[%s18773_s3] ss:$0 sm:$0xff] }
 0x1b1   : > { %v19030_v46 = vsel %vm16478_vm5, 4294967295, %v19029_v46  ;;  %vm16490_vm12 = vmand %vm19032_vm2, %vm2131_vm7  ;;  %v16498_v27 = vsub.s32 %v16181_v48, %v2094_v50  ;;  %v16500_v47 = vor.u32 %v5920_v32, %v5919_v58  ;;  %vm19035_vm9 = vnez %v18941_v26  ;;  %v16553_v32 = vld [vmem:[%s18774_s4] ss:$0 sm:$0xff] }
 0x1b2   : > { %v19036_v3 = vsel %vm19035_vm9, %v16120_v4, %v16002_v25  ;;  %v19037_v35 = vmov 0  ;;  %vm19040_vm0 = vcmask 392192   ;;  %vm19041_vm2 = vnez %v18969_v45 }
 0x1b3   : > { %vm16512_vm7 = vcmp.lt.s32.totalorder %v19036_v3, 16  ;;  %12978 = vmatprep.mubr.msk.bf16.mxu0 %vm19040_vm0, %v16163_v18  ;;  %v4222_v50 = vsel %vm19041_vm2, %v16325_v23, %v16254_v44  ;;  %vm19042_vm5 = vnez %v18973_v29  ;;  %vm19043_vm11 = vcmp.ne.s32.totalorder %v16346_v39, 0 }
 0x1b4   : > { %v19038_v35 = vsel %vm16512_vm7, 4294967295, %v19037_v35  ;;  %vm19044_vm9 = vcmp.lt.s32.totalorder %v16346_v39, 0  ;;  %v19045_v25 = vmov 0  ;;  %v5924_v4 = vshrl.u32 %v14280_v30, 16 }
 0x1b5   : > { %19039 = vst [vmem:[#allocation13_spill] sm:$0xff] %v19038_v35  ;;  %vm16530_vm14 = vmand %vm19044_vm9, %vm19043_vm11  ;;  %v5927_v18 = vshll.u32 %v14280_v30, 16  ;;  %vm19047_vm0 = vsmask.f32 6400  ;;  %v12656_v30 = vpop.f32.mrb[0].mxu0  ;;  %v16568_v11 = vsub.s32 %v16221_v19, %v4141_v37  ;;  %v3964_v37 = vpop.f32.mrb[1].mxu1  ;;  %vm19054_vm11 = vnez %v18947_v5 }
 0x1b6   : > { %v19046_v25 = vsel %vm16530_vm14, 4294967295, %v19045_v25  ;;  %v16540_v45 = vsel %vm19047_vm0, %v16205_v14, %v5917_v62  ;;  %v2198_v42 = vmul.f32 %v12656_v30, %v16505_v43  ;;  %v1916_v3 = vpop.f32.mrb[1].mxu0  ;;  %vm19048_vm2 = vmmov %vm19047_vm0  ;;  %v4241_v14 = vmul.f32 %v12818_v8, %v16505_v43  ;;  %v12819_v48 = vpop.f32.mrb[2].mxu1  ;;  %v14284_v8 = vld [vmem:[%s18772_s2 + $0x18] sm:$0xff]  }
 0x1b7   : > { %v16578_v7 = vsel %vm19048_vm2, %v5917_v62, %v16500_v47  ;;  %v2196_v19 = vmul.f32 %v16505_v43, %v1916_v3  ;;  %v12657_v59 = vpop.f32.mrb[2].mxu0  ;;  %v16582_v30 = vrot.slane %v5924_v4, 1  ;;  %v16584_v23 = vrot.slane %v5927_v18, 2  ;;  %v3967_v28 = vpop.f32.mrb[3].mxu1 }
 0x1b8   : > { %v2214_v44 = vadd.f32 %v16553_v32, %v2198_v42  ;;  %v4239_v58 = vmul.f32 %v16505_v43, %v3964_v37  ;;  %v2199_v26 = vmul.f32 %v12657_v59, %v16505_v43  ;;  %v1919_v62 = vpop.f32.mrb[3].mxu0  ;;  %v4253_v3 = vadd.f32 %v16553_v32, %v4241_v14 }
 0x1b9   : > { %v2212_v4 = vadd.f32 %v16553_v32, %v2196_v19  ;;  %v4242_v18 = vmul.f32 %v12819_v48, %v16505_v43  ;;  %v2197_v42 = vmul.f32 %v16505_v43, %v1919_v62  ;;  %vm19049_vm2 = vnez %v18944_v1  ;;  %v19055_v48 = vld [vmem:[#allocation26_spill] sm:$0xff]  ;;  %v19056_v1 = vld [vmem:[#allocation23_spill] sm:$0xff] }
 0x1ba   : > { %v19050_v59 = vsel %vm19049_vm2, %v16139_v9, %v16023_v17  ;;  %v19051_v37 = vmov 0  ;;  %v4251_v31 = vadd.f32 %v16553_v32, %v4239_v58  ;;  %v2215_v14 = vadd.f32 %v16553_v32, %v2199_v26  ;;  %v19062_v17 = vld [vmem:[#allocation25_spill] sm:$0xff] }
 0x1bb   : > { %vm16602_vm9 = vcmp.lt.s32.totalorder %v19050_v59, 16  ;;  %v4240_v19 = vmul.f32 %v16505_v43, %v3967_v28  ;;  %vm19053_vm0 = vcmask 392192   ;;  %v19057_v62 = vsel %vm19054_vm11, %v19055_v48, %v19056_v1  ;;  %v19079_v48 = vld [vmem:[#allocation29_spill] sm:$0xff] }
 0x1bc   : > { %v19052_v37 = vsel %vm16602_vm9, 4294967295, %v19051_v37  ;;  %12979 = vmatmul.mubr.msk.bf16.vlgmr.msra.gmra.mrb[12].mxu0 %vm19053_vm0, %v16174_v15  ;;  %vm16616_vm15 = vcmp.lt.s32.totalorder %v19057_v62, 16  ;;  %v19058_v9 = vmov 0  ;;  %vm19061_vm2 = vnez %v18952_v53 }
 0x1bd   : > { %v19059_v9 = vsel %vm16616_vm15, 4294967295, %v19058_v9  ;;  %v19063_v58 = vsel %vm19061_vm2, %v16177_v10, %v19062_v17  ;;  %vm19066_vm0 = vnez %v18954_v6  ;;  %v19068_v5 = vmov 0  ;;  %13135 = vmatpush3.bf16.msra.mxu0 %v19079_v48  ;;  %v19082_v17 = vld [vmem:[#allocation33_spill] sm:$0xff] }
 0x1be   : > { %19060 = vst [vmem:[#allocation9_spill] sm:$0xff] %v19059_v9  ;;  %vm16625_vm6 = vcmp.lt.s32.totalorder %v19063_v58, 16  ;;  %v19067_v15 = vsel %vm19066_vm0, %v16226_v49, %v16166_v2  ;;  %vm16638_vm11 = vcmp.lt.s32.totalorder %v2175_v56, 16  ;;  %v19071_v28 = vmov 0  ;;  %v19077_v49 = vld [vmem:[#allocation28_spill] sm:$0xff]  ;;  %13136 = vmatprep.subr.bf16.mxu0 %v14284_v8 }
 0x1bf   : > { %vm16634_vm14 = vcmp.lt.s32.totalorder %v19067_v15, 16  ;;  %v19072_v28 = vsel %vm16638_vm11, 4294967295, %v19071_v28  ;;  %v16643_v53 = vadd.s32 18, %v16498_v27  ;;  %v2250_v10 = vsel %vm16389_vm13, %v2214_v44, 0.0  ;;  %v19081_v44 = vld [vmem:[#allocation32_spill] sm:$0xff] }
 0x1c0   : > { %v19069_v5 = vsel %vm16634_vm14, 4294967295, %v19068_v5  ;;  %19073 = vst [vmem:[#allocation15_spill] sm:$0xff] %v19072_v28  ;;  %v4254_v59 = vadd.f32 %v16553_v32, %v4242_v18  ;;  %v2213_v6 = vadd.f32 %v16553_v32, %v2197_v42  ;;  %vm16649_vm2 = vcmp.lt.s32.totalorder %v4222_v50, 16 }
 0x1c1   : > { %19070 = vst [vmem:[#allocation18_spill] sm:$0xff] %v19069_v5  ;;  %v19074_v2 = vmov 0  ;;  %vm19078_vm0 = vcmask 392192   ;;  %v5930_v56 = vor.u32 %v16584_v23, %v16582_v30  ;;  %v4289_v62 = vsel %vm16414_vm3, %v4253_v3, 0.0  ;;  %v16670_v23 = vld [vmem:[%s18772_s2] sm:$0xff]   ;;  %13137 = vmatpush3.bf16.msra.mxu0 %v14284_v8 }
 0x1c2   : > { %v19075_v2 = vsel %vm16649_vm2, 4294967295, %v19074_v2  ;;  %12982 = vmatprep.mubr.msk.bf16.mxu0 %vm19078_vm0, %v19077_v49  ;;  %v2248_v18 = vsel %vm16423_vm1, %v2212_v4, 0.0  ;;  %vm19083_vm13 = vnez %v19082_v17  ;;  %v4252_v42 = vadd.f32 %v16553_v32, %v4240_v19  ;;  %v12660_v19 = vpop.f32.mrb[4].mxu0  ;;  %13150 = vmatprep.subr.bf16.mxu0 %v16670_v23 }
 0x1c3   : > { %19076 = vst [vmem:[#allocation11_spill] sm:$0xff] %v19075_v2  ;;  %v2251_v50 = vsel %vm19083_vm13, %v2215_v14, 0.0  ;;  %vm19084_vm3 = vnez %v19015_v41  ;;  %vm19085_vm1 = vnez %v19022_v36  ;;  %vm19086_vm13 = vnez %v19030_v46  ;;  %v1932_v49 = vpop.f32.mrb[5].mxu0 }
 0x1c4   : > { %v4287_v30 = vsel %vm19084_vm3, %v4251_v31, 0.0  ;;  %v16674_v3 = vpack.c.bf16 %v2251_v50, %v2250_v10  ;;  %v4290_v4 = vsel %vm19085_vm1, %v4254_v59, 0.0  ;;  %v2249_v14 = vsel %vm19086_vm13, %v2213_v6, 0.0 }
 0x1c5   : > { %v19087_v58 = vsel %vm19042_vm5, %v16341_v55, %v16258_v38  ;;  %v19090_v31 = vsel %vm16353_vm10, %v16371_v40, %v16269_v54  ;;  %v19091_v10 = vmov 0  ;;  %v16698_v59 = vpack.c.bf16 %v4290_v4, %v4289_v62  ;;  %v12822_v55 = vpop.f32.mrb[4].mxu1 }
 0x1c6   : > { %vm16685_vm0 = vcmp.lt.s32.totalorder %v19087_v58, 16  ;;  %vm16694_vm2 = vcmp.lt.s32.totalorder %v19090_v31, 16  ;;  %v2260_v6 = vpack.c.bf16 %v2249_v14, %v2248_v18  ;;  %v4288_v29 = vsel %vm16512_vm7, %v4252_v42, 0.0  ;;  %v3980_v54 = vpop.f32.mrb[5].mxu1  ;;  %v12661_v58 = vpop.f32.mrb[6].mxu0 }
 0x1c7   : > { %v19092_v10 = vsel %vm16694_vm2, 4294967295, %v19091_v10  ;;  %v2202_v38 = vmul.f32 %v12660_v19, %v16505_v43  ;;  %v2274_v48 = vrot.slane %v16674_v3, 4  ;;  %v4299_v51 = vpack.c.bf16 %v4288_v29, %v4287_v30  ;;  %v12823_v14 = vpop.f32.mrb[6].mxu1  ;;  %v1935_v19 = vpop.f32.mrb[7].mxu0 }
 0x1c8   : > { %19093 = vst [vmem:[#allocation19_spill] sm:$0xff] %v19092_v10  ;;  %v4245_v50 = vmul.f32 %v12822_v55, %v16505_v43  ;;  %v2200_v40 = vmul.f32 %v16505_v43, %v1932_v49  ;;  %v4312_v62 = vrot.slane %v16698_v59, 4  ;;  %v2273_v18 = vrot.slane %v2260_v6, 4 }
 0x1c9   : > { %v2218_v4 = vadd.f32 %v16553_v32, %v2202_v38  ;;  %v4243_v42 = vmul.f32 %v16505_v43, %v3980_v54  ;;  %vm19094_vm10 = vcmp.ne.s32.totalorder %v16498_v27, 0  ;;  %vm19095_vm5 = vcmp.lt.s32.totalorder %v16498_v27, 0  ;;  %v3983_v38 = vpop.f32.mrb[7].mxu1 }
 0x1ca   : > { %vm16713_vm1 = vmand %vm19095_vm5, %vm19094_vm10  ;;  %v4311_v8 = vrot.slane %v4299_v51, 4  ;;  %v4257_v31 = vadd.f32 %v16553_v32, %v4245_v50  ;;  %v2216_v6 = vadd.f32 %v16553_v32, %v2200_v40  ;;  %v2203_v29 = vmul.f32 %v12661_v58, %v16505_v43 }
 0x1cb   : > { %v19098_v55 = vsel %vm16361_vm8, %v16394_v61, %v16278_v52  ;;  %v19099_v49 = vmov 0  ;;  %vm19102_vm10 = vcmask 1043456   ;;  %vm19103_vm5 = vcmask 261124  }
 0x1cc   : > { %vm16726_vm7 = vcmp.lt.s32.totalorder %v19098_v55, 16  ;;  %v2275_v51 = vsel %vm19102_vm10, %v2273_v18, %v2274_v48  ;;  %2291 = vst.msk [vmem:[#allocation2 + $0x8] sm:$0xf0] %vm19103_vm5, %v2273_v18  ;;  %v4255_v50 = vadd.f32 %v16553_v32, %v4243_v42  ;;  %v4246_v40 = vmul.f32 %v12823_v14, %v16505_v43  ;;  %vm19106_vm13 = vmmov %vm19102_vm10 }
 0x1cd   : > { %v19100_v49 = vsel %vm16726_vm7, 4294967295, %v19099_v49  ;;  %vm19104_vm3 = vcmask 392192   ;;  %v16739_v0 = vadd.s32 18, %v16568_v11  ;;  %vm19105_vm8 = vcmask 261120   ;;  %vm19107_vm7 = vmmov %vm19103_vm5 }
 0x1ce   : > { %19101 = vst [vmem:[#allocation16_spill] sm:$0xff] %v19100_v49  ;;  %12983 = vmatmul.mubr.msk.bf16.gmra.mrb[16].mxu0 %vm19104_vm3, %v16540_v45  ;;  %2292 = vst.msk [vmem:[#allocation2 + $0x10] sm:$0xff] %vm19105_vm8, %v2275_v51  ;;  %v4313_v52 = vsel %vm19106_vm13, %v4311_v8, %v4312_v62  ;;  %v2219_v61 = vadd.f32 %v16553_v32, %v2203_v29  ;;  %v19108_v54 = vsel %vm16490_vm12, %v16451_v13, %v16330_v20  ;;  %v19109_v45 = vmov 0 }
 0x1cf   : > { %4329 = vst.msk [vmem:[#allocation2 + $0x38] sm:$0xf0] %vm19107_vm7, %v4311_v8  ;;  %vm16752_vm10 = vcmp.lt.s32.totalorder %v19108_v54, 16  ;;  %v2177_v58 = vsel %vm16713_vm1, %v16643_v53, %v16498_v27  ;;  %12986 = vmatprep.mubr.msk.bf16.mxu0 %vm19104_vm3, %v16578_v7  ;;  %vm19112_vm13 = vsmask.f32 6400  ;;  %vm19113_vm7 = vmmov %vm19105_vm8  ;;  %v2254_v20 = vsel %vm16602_vm9, %v2218_v4, 0.0 }
 0x1d0   : > { %v19110_v45 = vsel %vm16752_vm10, 4294967295, %v19109_v45  ;;  %v5931_v18 = vsel %vm19112_vm13, %v16500_v47, %v5930_v56  ;;  %4330 = vst.msk [vmem:[#allocation2 + $0x40] sm:$0xff] %vm19113_vm7, %v4313_v52  ;;  %v4258_v13 = vadd.f32 %v16553_v32, %v4246_v40  ;;  %v2201_v21 = vmul.f32 %v16505_v43, %v1935_v19  ;;  %v12664_v56 = vpop.f32.mrb[8].mxu0  ;;  %v19131_v40 = vld [vmem:[#allocation30_spill] sm:$0xff] }
 0x1d1   : > { %19111 = vst [vmem:[#allocation12_spill] sm:$0xff] %v19110_v45  ;;  %v4244_v42 = vmul.f32 %v16505_v43, %v3983_v38  ;;  %v4293_v27 = vsel %vm16616_vm15, %v4257_v31, 0.0  ;;  %v2252_v7 = vsel %vm16625_vm6, %v2216_v6, 0.0  ;;  %v4291_v47 = vsel %vm16634_vm14, %v4255_v50, 0.0  ;;  %v12826_v31 = vpop.f32.mrb[8].mxu1  ;;  %v1948_v6 = vpop.f32.mrb[9].mxu0 }
 0x1d2   : > { %v2255_v53 = vsel %vm16638_vm11, %v2219_v61, 0.0  ;;  %v19114_v4 = vsel %vm16400_vm4, %v16437_v57, %v16293_v33  ;;  %v19115_v14 = vmov 0  ;;  %vm19118_vm1 = vnez %v19046_v25  ;;  %v3996_v51 = vpop.f32.mrb[9].mxu1  ;;  %v19130_v50 = vld [vmem:[#allocation34_spill] sm:$0xff] }
 0x1d3   : > { %vm16783_vm12 = vcmp.lt.s32.totalorder %v19114_v4, 16  ;;  %v19119_v19 = vsel %vm19118_vm1, %v16495_v60, %v16346_v39  ;;  %v19120_v30 = vmov 0  ;;  %v16796_v8 = vpack.c.bf16 %v2255_v53, %v2254_v20 }
 0x1d4   : > { %v19116_v14 = vsel %vm16783_vm12, 4294967295, %v19115_v14  ;;  %vm16792_vm5 = vcmp.lt.s32.totalorder %v19119_v19, 16  ;;  %vm19123_vm8 = vnez %v19075_v2  ;;  %v2217_v33 = vadd.f32 %v16553_v32, %v2201_v21  ;;  %v12827_v21 = vpop.f32.mrb[10].mxu1 }
 0x1d5   : > { %19117 = vst [vmem:[#allocation26_spill] sm:$0xff] %v19116_v14  ;;  %v19121_v30 = vsel %vm16792_vm5, 4294967295, %v19120_v30  ;;  %v4294_v63 = vsel %vm19123_vm8, %v4258_v13, 0.0  ;;  %v4256_v57 = vadd.f32 %v16553_v32, %v4244_v42  ;;  %v2206_v25 = vmul.f32 %v12664_v56, %v16505_v43  ;;  %v3999_v19 = vpop.f32.mrb[11].mxu1 }
 0x1d6   : > { %19122 = vst [vmem:[#allocation23_spill] sm:$0xff] %v19121_v30  ;;  %v16802_v29 = vpack.c.bf16 %v4294_v63, %v4293_v27  ;;  %v4249_v39 = vmul.f32 %v12826_v31, %v16505_v43  ;;  %vm19124_vm4 = vnez %v18985_v24  ;;  %v19126_v38 = vmov 0  ;;  %v12665_v24 = vpop.f32.mrb[10].mxu0 }
 0x1d7   : > { %v19125_v60 = vsel %vm19124_vm4, %v16405_v16, %v16283_v12  ;;  %v2204_v55 = vmul.f32 %v16505_v43, %v1948_v6  ;;  %vm19129_vm13 = vnez %v19006_v34  ;;  %v19133_v61 = vmov 0  ;;  %v16833_v16 = vld [vmem:[#allocation2] sm:$0xf8]  ;;  %v1951_v42 = vpop.f32.mrb[11].mxu0 }
 0x1d8   : > { %vm16811_vm3 = vcmp.lt.s32.totalorder %v19125_v60, 16  ;;  %v19132_v52 = vsel %vm19129_vm13, %v19130_v50, %v19131_v40  ;;  %vm19136_vm1 = vcmp.ne.s32.totalorder %v16568_v11, 0  ;;  %vm19137_vm4 = vcmp.lt.s32.totalorder %v16568_v11, 0 }
 0x1d9   : > { %v19127_v38 = vsel %vm16811_vm3, 4294967295, %v19126_v38  ;;  %vm16821_vm7 = vcmp.lt.s32.totalorder %v19132_v52, 16  ;;  %vm16829_vm8 = vmand %vm19137_vm4, %vm19136_vm1  ;;  %v2278_v34 = vrot.slane %v16796_v8, 4  ;;  %v2253_v54 = vsel %vm16685_vm0, %v2217_v33, 0.0 }
 0x1da   : > { %19128 = vst [vmem:[#allocation25_spill] sm:$0xff] %v19127_v38  ;;  %v19134_v61 = vsel %vm16821_vm7, 4294967295, %v19133_v61  ;;  %v4292_v20 = vsel %vm16694_vm2, %v4256_v57, 0.0  ;;  %v4247_v13 = vmul.f32 %v16505_v43, %v3996_v51  ;;  %v4316_v27 = vrot.slane %v16802_v29, 4 }
 0x1db   : > { %19135 = vst [vmem:[#allocation28_spill] sm:$0xff] %v19134_v61  ;;  %v2262_v53 = vpack.c.bf16 %v2253_v54, %v2252_v7  ;;  %v4301_v56 = vpack.c.bf16 %v4292_v20, %v4291_v47  ;;  %v2222_v4 = vadd.f32 %v16553_v32, %v2206_v25  ;;  %v2207_v63 = vmul.f32 %v12665_v24, %v16505_v43 }
 0x1dc   : > { %vm16844_vm13 = vcmp.lt.s32.totalorder %v2177_v58, 16  ;;  %v19140_v31 = vmov 0  ;;  %v4224_v33 = vsel %vm16829_vm8, %v16739_v0, %v16568_v11  ;;  %vm19143_vm1 = vcmask 392192   ;;  %v16861_v11 = vld [vmem:[#allocation2 + $0x8] sm:$0xff]  ;;  %v16863_v0 = vld [vmem:[#allocation2 + $0x10] sm:$0xff] }
 0x1dd   : > { %v19141_v31 = vsel %vm16844_vm13, 4294967295, %v19140_v31  ;;  %12987 = vmatmul.mubr.msk.bf16.gmra.mrb[20].mxu0 %vm19143_vm1, %v5931_v18  ;;  %v6400_v57 = vrot.slane %v16833_v16, 3  ;;  %v2276_v7 = vrot.slane %v2262_v53, 4  ;;  %v4314_v47 = vrot.slane %v4301_v56, 4 }
 0x1de   : > { %19142 = vst [vmem:[#allocation29_spill] sm:$0xff] %v19141_v31  ;;  %v4261_v6 = vadd.f32 %v16553_v32, %v4249_v39  ;;  %v4250_v25 = vmul.f32 %v12827_v21, %v16505_v43  ;;  %vm19144_vm4 = vnez %v19100_v49  ;;  %v2220_v60 = vadd.f32 %v16553_v32, %v2204_v55 }
 0x1df   : > { %v2258_v58 = vsel %vm19144_vm4, %v2222_v4, 0.0  ;;  %v4259_v51 = vadd.f32 %v16553_v32, %v4247_v13  ;;  %v2223_v50 = vadd.f32 %v16553_v32, %v2207_v63  ;;  %vm19145_vm8 = vcmask 1043456  }
 0x1e0   : > { %v2277_v18 = vsel %vm19145_vm8, %v2274_v48, %v2276_v7  ;;  %vm19146_vm1 = vmmov %vm19145_vm8  ;;  %vm19149_vm14 = vcmask 261120   ;;  %v4262_v48 = vadd.f32 %v16553_v32, %v4250_v25  ;;  %v2205_v59 = vmul.f32 %v16505_v43, %v1951_v42 }
 0x1e1   : > { %v2279_v39 = vsel %vm19146_vm1, %v2276_v7, %v2278_v34  ;;  %vm19147_vm15 = vmmov %vm19146_vm1  ;;  %2293 = vst.msk [vmem:[#allocation2 + $0x18] sm:$0xff] %vm19149_vm14, %v2277_v18  ;;  %v2259_v3 = vsel %vm16752_vm10, %v2223_v50, 0.0  ;;  %v19153_v24 = vmov 0  ;;  %v6401_v12 = vrot.slane %v16861_v11, 3 }
 0x1e2   : > { %v4315_v55 = vsel %vm19147_vm15, %v4312_v62, %v4314_v47  ;;  %vm19148_vm2 = vmmov %vm19146_vm1  ;;  %v4248_v62 = vmul.f32 %v16505_v43, %v3999_v19  ;;  %v2265_v52 = vpack.c.bf16 %v2259_v3, %v2258_v58  ;;  %vm16886_vm15 = vcmp.lt.s32.totalorder %v4224_v33, 16  ;;  %v14283_v19 = vld [vmem:[%s18772_s2 + $0x8] sm:$0xff]   ;;  %v14333_v58 = vld [vmem:[%s18772_s2] sm:$0xff]  }
 0x1e3   : > { %v4317_v40 = vsel %vm19148_vm2, %v4314_v47, %v4316_v27  ;;  %vm19150_vm4 = vmmov %vm19149_vm14  ;;  %v19154_v24 = vsel %vm16886_vm15, 4294967295, %v19153_v24  ;;  %v6403_v54 = vrot.slane %v16863_v0, 3  ;;  %v4297_v20 = vsel %vm16783_vm12, %v4261_v6, 0.0 }
 0x1e4   : > { %2294 = vst.msk [vmem:[#allocation2 + $0x20] sm:$0xff] %vm19150_vm4, %v2279_v39  ;;  %vm19151_vm11 = vmmov %vm19150_vm4  ;;  %v4298_v13 = vsel %vm16792_vm5, %v4262_v48, 0.0  ;;  %v2221_v21 = vadd.f32 %v16553_v32, %v2205_v59  ;;  %v4260_v42 = vadd.f32 %v16553_v32, %v4248_v62  ;;  %v2282_v43 = vrot.slane %v2265_v52, 4 }
 0x1e5   : > { %4331 = vst.msk [vmem:[#allocation2 + $0x48] sm:$0xff] %vm19151_vm11, %v4315_v55  ;;  %vm19152_vm9 = vmmov %vm19150_vm4  ;;  %v4304_v53 = vpack.c.bf16 %v4298_v13, %v4297_v20  ;;  %vm19156_vm14 = vcmask 1044480   ;;  %v2256_v63 = vsel %vm16811_vm3, %v2220_v60, 0.0  ;;  %v4295_v33 = vsel %vm16821_vm7, %v4259_v51, 0.0  ;;  %v16920_v60 = vld [vmem:[%s18772_s2 + $0x20] sm:$0xff]  }
 0x1e6   : > { %4332 = vst.msk [vmem:[#allocation2 + $0x50] sm:$0xff] %vm19152_vm9, %v4317_v40  ;;  %19155 = vst [vmem:[#allocation32_spill] sm:$0xff] %v19154_v24  ;;  %v6402_v56 = vsel %vm19156_vm14, %v6400_v57, %v6401_v12  ;;  %v2257_v7 = vsel %vm16844_vm13, %v2221_v21, 0.0  ;;  %v4296_v32 = vsel %vm16886_vm15, %v4260_v42, 0.0  ;;  %v6376_v57 = vld [vmem:[#allocation2] sm:$0xfc] }
 0x1e7   : > { %vm19157_vm9 = vmmov %vm19156_vm14  ;;  %vm19159_vm2 = vcmask 257024   ;;  %v4320_v47 = vrot.slane %v4304_v53, 4  ;;  %v2264_v6 = vpack.c.bf16 %v2257_v7, %v2256_v63  ;;  %v4303_v25 = vpack.c.bf16 %v4296_v32, %v4295_v33  ;;  %v16956_v53 = vld [vmem:[#allocation2 + $0x40] sm:$0xff] }
 0x1e8   : > { %v6404_v4 = vsel %vm19157_vm9, %v6401_v12, %v6403_v54  ;;  %vm19158_vm11 = vmmov %vm19150_vm4  ;;  %2297 = vst.msk [vmem:[#allocation2 + $0x38] sm:$0xf] %vm19159_vm2, %v2282_v43  ;;  %v16923_v18 = vld [vmem:[#allocation2 + $0x18] sm:$0xff]  ;;  %v6525_v55 = vshrl.u32 %v6376_v57, 16  ;;  %v6528_v40 = vshll.u32 %v6376_v57, 16  ;;  %v18851_v59 = vshrl.u32 %v16861_v11, 16 }
 0x1e9   : > { %12994 = vmatprep.mubr.msk.bf16.mxu1 %vm19158_vm11, %v6402_v56  ;;  %vm19160_vm8 = vmmov %vm19159_vm2  ;;  %v2280_v51 = vrot.slane %v2264_v6, 4  ;;  %v4318_v50 = vrot.slane %v4303_v25, 4  ;;  %v6405_v3 = vrot.slane %v16923_v18, 3  ;;  %v18850_v62 = vshll.u32 %v16861_v11, 16 }
 0x1ea   : > { %12995 = vmatmul.mubr.msk.bf16.vlgmr.msra.gmra.mrb[12].mxu1 %vm19150_vm4, %v6404_v4  ;;  %4335 = vst.msk [vmem:[#allocation2 + $0x68] sm:$0xf] %vm19160_vm8, %v4320_v47  ;;  %vm19161_vm14 = vmmov %vm19146_vm1  ;;  %vm19168_vm12 = vcmask 1044480   ;;  %v6527_v29 = vrot.slane %v6525_v55, 2  ;;  %v6535_v21 = vrot.slane %v18851_v59, 2  ;;  %v16959_v56 = vshrl.u32 %v16863_v0, 16 }
 0x1eb   : > { %13007 = vmatpush3.bf16.msra.mxu1 %v14333_v58  ;;  %v16925_v39 = vld [vmem:[#allocation2 + $0x20] sm:$0xff]  ;;  %v2281_v52 = vsel %vm19146_vm1, %v2278_v34, %v2280_v51  ;;  %v2283_v12 = vsel %vm19161_vm14, %v2280_v51, %v2282_v43  ;;  %vm19162_vm9 = vmmov %vm19146_vm1  ;;  %v6406_v8 = vsel %vm19168_vm12, %v6403_v54, %v6405_v3  ;;  %v6538_v42 = vrot.slane %v18850_v62, 3 }
 0x1ec   : > { %13008 = vmatprep.subr.bf16.mxu1 %v14283_v19  ;;  %v6407_v48 = vrot.slane %v16925_v39, 3  ;;  %v4319_v20 = vsel %vm19162_vm9, %v4316_v27, %v4318_v50  ;;  %vm19163_vm11 = vmmov %vm19146_vm1  ;;  %v6530_v27 = vrot.slane %v6528_v40, 3  ;;  %v16954_v54 = vld [vmem:[#allocation2 + $0x48] sm:$0xff]  ;;  %v16962_v4 = vshll.u32 %v16863_v0, 16 }
 0x1ed   : > { %v4321_v13 = vsel %vm19163_vm11, %v4318_v50, %v4320_v47  ;;  %vm19164_vm2 = vmmov %vm19150_vm4  ;;  %v16968_v63 = vshll.u32 %v16923_v18, 16  ;;  %v6539_v6 = vor.u32 %v6538_v42, %v6535_v21  ;;  %v7999_v50 = vrot.slane %v16954_v54, 3  ;;  %v16999_v21 = vld [vmem:[#allocation2 + $0x50] sm:$0xff] }
 0x1ee   : > { %2295 = vst.msk [vmem:[#allocation2 + $0x28] sm:$0xff] %vm19164_vm2, %v2281_v52  ;;  %vm19165_vm4 = vmmov %vm19164_vm2  ;;  %v6531_v47 = vor.u32 %v6530_v27, %v6527_v29  ;;  %v7997_v55 = vrot.slane %v16956_v53, 3  ;;  %v6704_v14 = vshrl.u32 %v16833_v16, 16  ;;  %v17050_v24 = vshll.u32 %v16956_v53, 16 }
 0x1ef   : > { %2296 = vst.msk [vmem:[#allocation2 + $0x30] sm:$0xff] %vm19165_vm4, %v2283_v12  ;;  %vm19166_vm8 = vmmov %vm19164_vm2  ;;  %13009 = vmatpush3.bf16.msra.mxu1 %v14283_v19  ;;  %v16952_v43 = vld [vmem:[#allocation2 + $0x38] sm:$0xff]  ;;  %v16965_v19 = vshrl.u32 %v16923_v18, 16  ;;  %v6544_v12 = vrot.slane %v16959_v56, 2  ;;  %v19193_v36 = vshrl.u32 %v16861_v11, 16  ;;  %v19196_v45 = vshll.u32 %v16861_v11, 16 }
 0x1f0   : > { %4333 = vst.msk [vmem:[#allocation2 + $0x58] sm:$0xff] %vm19166_vm8, %v4319_v20  ;;  %vm19167_vm5 = vmmov %vm19164_vm2  ;;  %13022 = vmatprep.subr.bf16.mxu1 %v16920_v60  ;;  %v7995_v32 = vrot.slane %v16952_v43, 3  ;;  %v6706_v9 = vrot.slane %v6704_v14, 3  ;;  %v8141_v10 = vrot.slane %v17050_v24, 3  ;;  %v19211_v38 = vshrl.u32 %v16952_v43, 16 }
 0x1f1   : > { %4334 = vst.msk [vmem:[#allocation2 + $0x60] sm:$0xff] %vm19167_vm5, %v4321_v13  ;;  %vm19169_vm15 = vmmov %vm19168_vm12  ;;  %v6547_v13 = vrot.slane %v16962_v4, 3  ;;  %v6711_v1 = vrot.slane %v19193_v36, 3  ;;  %v6712_v49 = vrot.slane %v19196_v45, 4  ;;  %v17091_v45 = vshll.u32 %v16999_v21, 16 }
 0x1f2   : > { %v6408_v34 = vsel %vm19169_vm15, %v6405_v3, %v6407_v48  ;;  %vm19170_vm1 = vmmov %vm19164_vm2  ;;  %v8304_v28 = vrot.slane %v19211_v38, 3 }
 0x1f3   : > { %12998 = vmatprep.mubr.msk.bf16.mxu1 %vm19170_vm1, %v6406_v8  ;;  %vm19171_vm14 = vmmov %vm19170_vm1  ;;  %v6553_v8 = vrot.slane %v16965_v19, 2  ;;  %v6713_v11 = vor.u32 %v6712_v49, %v6711_v1  ;;  %v6719_v49 = vrot.slane %v16965_v19, 3 }
 0x1f4   : > { %12999 = vmatmul.mubr.msk.bf16.gmra.mrb[16].mxu1 %vm19171_vm14, %v6408_v34  ;;  %vm19172_vm5 = vmmov %vm19168_vm12  ;;  %v6556_v34 = vrot.slane %v16968_v63, 3 }
 0x1f5   : > { %v16970_v33 = vld [vmem:[#allocation2 + $0x28] sm:$0xff]  ;;  %vm19173_vm15 = vmmov %vm19172_vm5 }
 0x1f6   : > { %v16972_v7 = vld [vmem:[#allocation2 + $0x30] sm:$0xf8]  ;;  %v16975_v57 = vld [vmem:[#allocation2 + $0x30] sm:$0x7]  ;;  %v6409_v25 = vrot.slane %v16970_v33, 3  ;;  %vm19174_vm9 = vmmov %vm19170_vm1  ;;  %v7080_v38 = vrot.slane %v16970_v33, 4 }
 0x1f7   : > { %v7994_v58 = vrot.slane %v16972_v7, 3  ;;  %v6411_v51 = vrot.slane %v16975_v57, 3  ;;  %vm19175_vm11 = vmmov %vm19170_vm1  ;;  %v7971_v42 = vld [vmem:[#allocation2 + $0x30] sm:$0xfc]  ;;  %v6578_v2 = vshrl.u32 %v16975_v57, 16 }
 0x1f8   : > { %v6410_v40 = vsel %vm19168_vm12, %v6407_v48, %v6409_v25  ;;  %vm19176_vm2 = vmmov %vm19172_vm5  ;;  %v14288_v48 = vld [vmem:[%s18772_s2 + $0x8] sm:$0xff]   ;;  %v17035_v30 = vld [vmem:[#allocation2 + $0x60] sm:$0x7] }
 0x1f9   : > { %v7996_v3 = vsel %vm19172_vm5, %v7994_v58, %v7995_v32  ;;  %v6412_v52 = vsel %vm19173_vm15, %v6409_v25, %v6411_v51  ;;  %13002 = vmatprep.mubr.msk.bf16.mxu1 %vm19174_vm9, %v6410_v40  ;;  %v7998_v20 = vsel %vm19176_vm2, %v7995_v32, %v7997_v55  ;;  %vm19177_vm4 = vmmov %vm19170_vm1  ;;  %v17003_v32 = vld [vmem:[#allocation2 + $0x58] sm:$0xff]  ;;  %v17006_v25 = vshrl.u32 %v16925_v39, 16  ;;  %v17016_v40 = vld [vmem:[%s18772_s2 + $0x20] sm:$0xff]  }
 0x1fa   : > { %13138 = vmatprep.mubr.msk.bf16.mxu0 %vm19175_vm11, %v7996_v3  ;;  %vm19178_vm8 = vmmov %vm19170_vm1  ;;  %vm19179_vm1 = vsmask.f32 5376  ;;  %v17009_v58 = vshll.u32 %v16925_v39, 16  ;;  %v8001_v51 = vrot.slane %v16999_v21, 3  ;;  %v17019_v3 = vshrl.u32 %v16970_v33, 16 }
 0x1fb   : > { %13139 = vmatmul.mubr.msk.bf16.vlgmr.msra.gmra.mrb[24].mxu0 %vm19178_vm8, %v7998_v20  ;;  %v6540_v29 = vsel %vm19179_vm1, %v6531_v47, %v6539_v6  ;;  %vm19180_vm14 = vmmov %vm19176_vm2  ;;  %v6548_v47 = vor.u32 %v6547_v13, %v6544_v12  ;;  %v8119_v20 = vshrl.u32 %v7971_v42, 16  ;;  %v6562_v12 = vrot.slane %v17006_v25, 2 }
 0x1fc   : > { %13003 = vmatmul.mubr.msk.bf16.gmra.mrb[20].mxu1 %vm19177_vm4, %v6412_v52  ;;  %v8000_v27 = vsel %vm19180_vm14, %v7997_v55, %v7999_v50  ;;  %vm19181_vm12 = vmmov %vm19177_vm4  ;;  %13151 = vmatpush3.bf16.msra.mxu0 %v16670_v23  ;;  %v6557_v55 = vor.u32 %v6556_v34, %v6553_v8  ;;  %v17022_v52 = vshll.u32 %v16970_v33, 16  ;;  %v8003_v23 = vrot.slane %v17003_v32, 3  ;;  %v14304_v33 = vld [vmem:[%s18772_s2 + $0x58] sm:$0xff]  }
 0x1fd   : > { %13010 = vmatprep.mubr.msk.bf16.mxu1 %vm19181_vm12, %v6540_v29  ;;  %vm19182_vm5 = vmmov %vm19177_vm4  ;;  %13152 = vmatprep.subr.bf16.mxu0 %v14288_v48  ;;  %v8122_v29 = vshll.u32 %v7971_v42, 16  ;;  %v6565_v13 = vrot.slane %v17009_v58, 3  ;;  %v6571_v34 = vrot.slane %v17019_v3, 2  ;;  %v8121_v8 = vrot.slane %v8119_v20, 2 }
 0x1fe   : > { %13142 = vmatprep.mubr.msk.bf16.mxu0 %vm19182_vm5, %v8000_v27  ;;  %v14287_v27 = vld [vmem:[%s18772_s2 + $0x28] sm:$0xff]   ;;  %vm19183_vm15 = vmmov %vm19179_vm1  ;;  %v8005_v20 = vrot.slane %v17035_v30, 3  ;;  %v6580_v14 = vrot.slane %v6578_v2, 2 }
 0x1ff   : > { %v6549_v62 = vsel %vm19183_vm15, %v6539_v6, %v6548_v47  ;;  %vm19184_vm9 = vmmov %vm19176_vm2  ;;  %v8124_v6 = vrot.slane %v8122_v29, 3  ;;  %v19191_v29 = vshrl.u32 %v16952_v43, 16 }
 0x200   : > { %13153 = vmatpush3.bf16.msra.mxu0 %v14288_v48  ;;  %v8002_v59 = vsel %vm19184_vm9, %v7999_v50, %v8001_v51  ;;  %vm19185_vm11 = vmmov %vm19179_vm1  ;;  %v6574_v48 = vrot.slane %v17022_v52, 3 }
 0x201   : > { %v6558_v42 = vsel %vm19185_vm11, %v6548_v47, %v6557_v55  ;;  %13166 = vmatprep.subr.bf16.mxu0 %v17016_v40  ;;  %vm19186_vm2 = vmmov %vm19177_vm4  ;;  %v17047_v47 = vshrl.u32 %v16956_v53, 16 }
 0x202   : > { %vm19187_vm4 = vmmov %vm19186_vm2 }
 0x203   : > { %13143 = vmatmul.mubr.msk.bf16.gmra.mrb[28].mxu0 %vm19187_vm4, %v8002_v59  ;;  %vm19188_vm8 = vmmov %vm19186_vm2  ;;  %v6707_v59 = vshll.u32 %v16833_v16, 16  ;;  %v6581_v16 = vshll.u32 %v16975_v57, 16 }
 0x204   : > { %13011 = vmatmul.mubr.msk.bf16.vlgmr.msra.gmra.mrb[12].mxu1 %vm19186_vm2, %v6549_v62  ;;  %vm19189_vm1 = vmmov %vm19184_vm9  ;;  %v6566_v62 = vor.u32 %v6565_v13, %v6562_v12  ;;  %v17067_v12 = vshrl.u32 %v16954_v54, 16  ;;  %v17070_v13 = vshll.u32 %v16954_v54, 16 }
 0x205   : > { %13014 = vmatprep.mubr.msk.bf16.mxu1 %vm19188_vm8, %v6558_v42  ;;  %13023 = vmatpush3.bf16.msra.mxu1 %v16920_v60  ;;  %v8004_v50 = vsel %vm19189_vm1, %v8001_v51, %v8003_v23  ;;  %vm19190_vm14 = vmmov %vm19186_vm2  ;;  %v8129_v42 = vrot.slane %v19191_v29, 2  ;;  %v19192_v60 = vshll.u32 %v16952_v43, 16  ;;  %v17062_v51 = vld [vmem:[%s18772_s2 + $0x30] sm:$0xff]   ;;  %v8125_v29 = vor.u32 %v8124_v6, %v8121_v8 }
 0x206   : > { %13146 = vmatprep.mubr.msk.bf16.mxu0 %vm19190_vm14, %v8004_v50  ;;  %13024 = vmatprep.subr.bf16.mxu1 %v14287_v27  ;;  %v6575_v50 = vor.u32 %v6574_v48, %v6571_v34  ;;  %v6709_v5 = vrot.slane %v6707_v59, 4  ;;  %vm19194_vm12 = vmmov %vm19185_vm11  ;;  %v6583_v8 = vrot.slane %v6581_v16, 3  ;;  %v8147_v34 = vrot.slane %v17067_v12, 2 }
 0x207   : > { %v8132_v61 = vrot.slane %v19192_v60, 3  ;;  %v8138_v60 = vrot.slane %v17047_v47, 2  ;;  %v6567_v57 = vsel %vm19194_vm12, %v6557_v55, %v6566_v62  ;;  %vm19195_vm5 = vmmov %vm19189_vm1  ;;  %v17103_v16 = vshll.u32 %v17003_v32, 16 }
 0x208   : > { %v8006_v35 = vsel %vm19195_vm5, %v8003_v23, %v8005_v20  ;;  %vm19197_vm15 = vmmov %vm19186_vm2  ;;  %v6576_v36 = vsel %vm19185_vm11, %v6566_v62, %v6575_v50  ;;  %v6710_v2 = vor.u32 %v6709_v5, %v6706_v9  ;;  %v6715_v23 = vrot.slane %v16959_v56, 3 }
 0x209   : > { %13025 = vmatpush3.bf16.msra.mxu1 %v14287_v27  ;;  %v8133_v41 = vor.u32 %v8132_v61, %v8129_v42  ;;  %v8150_v27 = vrot.slane %v17070_v13, 3  ;;  %vm19198_vm9 = vmmov %vm19186_vm2  ;;  %v17088_v61 = vshrl.u32 %v16999_v21, 16  ;;  %v6584_v48 = vor.u32 %v6583_v8, %v6580_v14  ;;  %v14292_v14 = vld [vmem:[%s18772_s2 + $0x28] sm:$0xff]  }
 0x20a   : > { %13038 = vmatprep.subr.bf16.mxu1 %v17062_v51  ;;  %vm19199_vm2 = vmmov %vm19185_vm11  ;;  %v8142_v59 = vor.u32 %v8141_v10, %v8138_v60  ;;  %v8159_v20 = vrot.slane %v17091_v45, 3  ;;  %v17100_v42 = vshrl.u32 %v17003_v32, 16  ;;  %vm19202_vm14 = vsmask.f32 4352 }
 0x20b   : > { %13147 = vmatmul.mubr.msk.bf16.gmra.mrb[32].mxu0 %vm19198_vm9, %v8006_v35  ;;  %v8134_v55 = vsel %vm19199_vm2, %v8125_v29, %v8133_v41  ;;  %vm19200_vm8 = vmmov %vm19187_vm4  ;;  %v6716_v35 = vrot.slane %v16962_v4, 4  ;;  %v8151_v6 = vor.u32 %v8150_v27, %v8147_v34  ;;  %v8156_v62 = vrot.slane %v17088_v61, 2 }
 0x20c   : > { %13015 = vmatmul.mubr.msk.bf16.gmra.mrb[16].mxu1 %vm19197_vm15, %v6567_v57  ;;  %13154 = vmatprep.mubr.msk.bf16.mxu0 %vm19200_vm8, %v8134_v55  ;;  %vm19201_vm1 = vmmov %vm19199_vm2  ;;  %v6714_v5 = vsel %vm19202_vm14, %v6710_v2, %v6713_v11  ;;  %v6720_v60 = vrot.slane %v16968_v63, 4  ;;  %v6723_v57 = vrot.slane %v17006_v25, 3  ;;  %v6724_v8 = vrot.slane %v17009_v58, 4 }
 0x20d   : > { %13018 = vmatprep.mubr.msk.bf16.mxu1 %vm19187_vm4, %v6576_v36  ;;  %v8143_v9 = vsel %vm19201_vm1, %v8133_v41, %v8142_v59  ;;  %v17107_v1 = vor.u32 %v6716_v35, %v6715_v23  ;;  %vm19203_vm12 = vmmov %vm19201_vm1  ;;  %v8160_v41 = vor.u32 %v8159_v20, %v8156_v62  ;;  %v8172_v34 = vshrl.u32 %v17035_v30, 16 }
 0x20e   : > { %v6585_v10 = vsel %vm19203_vm12, %v6575_v50, %v6584_v48  ;;  %vm19204_vm5 = vmmov %vm19201_vm1  ;;  %v8175_v50 = vshll.u32 %v17035_v30, 16  ;;  %v8165_v27 = vrot.slane %v17100_v42, 2  ;;  %v8168_v36 = vrot.slane %v17103_v16, 3 }
 0x20f   : > { %v8152_v29 = vsel %vm19204_vm5, %v8142_v59, %v8151_v6  ;;  %vm19205_vm15 = vmmov %vm19187_vm4  ;;  %v6727_v55 = vrot.slane %v17019_v3, 3  ;;  %v6728_v2 = vrot.slane %v17022_v52, 4  ;;  %v8297_v23 = vshrl.u32 %v16972_v7, 16  ;;  %v17136_v59 = vld [vmem:[%s18772_s2 + $0x30] sm:$0xff]  }
 0x210   : > { %vm19206_vm9 = vmmov %vm19187_vm4  ;;  %v8300_v35 = vshll.u32 %v16972_v7, 16  ;;  %v6721_v48 = vor.u32 %v6720_v60, %v6719_v49  ;;  %v6725_v20 = vor.u32 %v6724_v8, %v6723_v57  ;;  %v7076_v7 = vrot.slane %v16923_v18, 4 }
 0x211   : > { %vm19207_vm11 = vmmov %vm19187_vm4  ;;  %v17142_v49 = vor.u32 %v6728_v2, %v6727_v55  ;;  %v8299_v60 = vrot.slane %v8297_v23, 3  ;;  %v19212_v57 = vshll.u32 %v16952_v43, 16 }
 0x212   : > { %vm19208_vm2 = vmmov %vm19187_vm4  ;;  %v8302_v31 = vrot.slane %v8300_v35, 4 }
 0x213   : > { %13155 = vmatmul.mubr.msk.bf16.vlgmr.msra.gmra.mrb[24].mxu0 %vm19206_vm9, %v8143_v9  ;;  %vm19209_vm4 = vmmov %vm19202_vm14  ;;  %v8174_v9 = vrot.slane %v8172_v34, 2  ;;  %v8305_v8 = vrot.slane %v19212_v57, 4 }
 0x214   : > { %13019 = vmatmul.mubr.msk.bf16.gmra.mrb[20].mxu1 %vm19205_vm15, %v6585_v10  ;;  %13158 = vmatprep.mubr.msk.bf16.mxu0 %vm19208_vm2, %v8152_v29  ;;  %v6718_v30 = vsel %vm19209_vm4, %v6713_v11, %v17107_v1  ;;  %vm19210_vm8 = vmmov %vm19201_vm1  ;;  %v6697_v10 = vld [vmem:[#allocation2 + $0x30] sm:$0xf]  ;;  %v7074_v29 = vrot.slane %v16863_v0, 4  ;;  %v7078_v11 = vrot.slane %v16925_v39, 4  ;;  %vm19213_vm1 = vcmask 1043456  }
 0x215   : > { %13026 = vmatprep.mubr.msk.bf16.mxu1 %vm19207_vm11, %v6714_v5  ;;  %13167 = vmatpush3.bf16.msra.mxu0 %v17016_v40  ;;  %v8161_v62 = vsel %vm19210_vm8, %v8151_v6, %v8160_v41  ;;  %v8177_v5 = vrot.slane %v8175_v50, 3  ;;  %v8169_v40 = vor.u32 %v8168_v36, %v8165_v27  ;;  %v14291_v6 = vld [vmem:[%s18772_s2 + $0x38] sm:$0xff]   ;;  %vm19214_vm14 = vmmov %vm19213_vm1  ;;  %v6732_v34 = vshrl.u32 %v6697_v10, 16  ;;  %v6863_v50 = vld [vmem:[#allocation2 + $0x8] sm:$0xf8] }
 0x216   : > { %13168 = vmatprep.subr.bf16.mxu0 %v14292_v14  ;;  %v17155_v18 = vsel %vm19213_vm1, %v7074_v29, %v7076_v7  ;;  %v17158_v39 = vsel %vm19214_vm14, %v7076_v7, %v7078_v11  ;;  %vm19215_vm12 = vmmov %vm19208_vm2  ;;  %v6735_v36 = vshll.u32 %v6697_v10, 16  ;;  %v8303_v35 = vor.u32 %v8302_v31, %v8299_v60  ;;  %v14302_v0 = vld [vmem:[%s18772_s2 + $0x50] sm:$0xff]  }
 0x217   : > { %vm19216_vm5 = vmmov %vm19208_vm2  ;;  %v8308_v10 = vrot.slane %v17047_v47, 3  ;;  %v8312_v7 = vrot.slane %v17067_v12, 3 }
 0x218   : > { %vm19217_vm15 = vmmov %vm19209_vm4  ;;  %v6737_v31 = vrot.slane %v6735_v36, 4  ;;  %v7233_v36 = vrot.slane %v17009_v58, 5  ;;  %v8813_v58 = vrot.slane %v17047_v47, 4  ;;  %v14296_v47 = vld [vmem:[%s18772_s2 + $0x38] sm:$0xff]  }
 0x219   : > { %13169 = vmatpush3.bf16.msra.mxu0 %v14292_v14  ;;  %v17165_v43 = vsel %vm19217_vm15, %v17107_v1, %v6721_v48  ;;  %v8178_v14 = vor.u32 %v8177_v5, %v8174_v9  ;;  %vm19218_vm9 = vmmov %vm19208_vm2  ;;  %v8667_v9 = vrot.slane %v16954_v54, 4  ;;  %v6734_v5 = vrot.slane %v6732_v34, 3 }
 0x21a   : > { %13182 = vmatprep.subr.bf16.mxu0 %v17136_v59  ;;  %vm19219_vm11 = vmmov %vm19210_vm8  ;;  %v8313_v54 = vrot.slane %v17070_v13, 4  ;;  %v8671_v34 = vrot.slane %v17003_v32, 4 }
 0x21b   : > { %13159 = vmatmul.mubr.msk.bf16.gmra.mrb[28].mxu0 %vm19216_vm5, %v8161_v62  ;;  %v8170_v27 = vsel %vm19219_vm11, %v8160_v41, %v8169_v40  ;;  %vm19220_vm2 = vmmov %vm19213_vm1  ;;  %v8306_v41 = vor.u32 %v8305_v8, %v8304_v28  ;;  %v8665_v62 = vrot.slane %v16956_v53, 4  ;;  %v7224_v28 = vrot.slane %v16959_v56, 4 }
 0x21c   : > { %13027 = vmatmul.mubr.msk.bf16.vlgmr.msra.gmra.mrb[12].mxu1 %vm19215_vm12, %v6718_v30  ;;  %v17174_v55 = vsel %vm19220_vm2, %v7078_v11, %v7080_v38  ;;  %vm19221_vm4 = vmmov %vm19216_vm5  ;;  %v6876_v30 = vshrl.u32 %v6863_v50, 16  ;;  %v7228_v8 = vrot.slane %v16965_v19, 4  ;;  %v8309_v19 = vrot.slane %v17050_v24, 4 }
 0x21d   : > { %13030 = vmatprep.mubr.msk.bf16.mxu1 %vm19218_vm9, %v17165_v43  ;;  %13039 = vmatpush3.bf16.msra.mxu1 %v17062_v51  ;;  %vm19222_vm8 = vmmov %vm19217_vm15  ;;  %v17187_v51 = vld [vmem:[%s18772_s2 + $0x40] sm:$0xff]  }
 0x21e   : > { %13162 = vmatprep.mubr.msk.bf16.mxu0 %vm19221_vm4, %v8170_v27  ;;  %v17178_v2 = vsel %vm19222_vm8, %v6721_v48, %v6725_v20  ;;  %vm19223_vm1 = vmmov %vm19222_vm8  ;;  %13040 = vmatprep.subr.bf16.mxu1 %v14291_v6  ;;  %v6878_v57 = vrot.slane %v6876_v30, 3  ;;  %v6738_v30 = vor.u32 %v6737_v31, %v6734_v5  ;;  %v8317_v5 = vrot.slane %v17091_v45, 4 }
 0x21f   : > { %v17182_v23 = vsel %vm19223_vm1, %v6725_v20, %v17142_v49  ;;  %vm19224_vm14 = vmmov %vm19219_vm11  ;;  %v6879_v20 = vshll.u32 %v6863_v50, 16 }
 0x220   : > { %v8179_v48 = vsel %vm19224_vm14, %v8169_v40, %v8178_v14  ;;  %vm19225_vm12 = vmmov %vm19220_vm2  ;;  %v7225_v40 = vrot.slane %v16962_v4, 5  ;;  %v7229_v14 = vrot.slane %v16968_v63, 5  ;;  %v7232_v4 = vrot.slane %v17006_v25, 4 }
 0x221   : > { %13041 = vmatpush3.bf16.msra.mxu1 %v14291_v6  ;;  %v17197_v11 = vsel %vm19225_vm12, %v8665_v62, %v8667_v9  ;;  %vm19226_vm5 = vmmov %vm19223_vm1  ;;  %v8669_v6 = vrot.slane %v16999_v21, 4  ;;  %v6881_v56 = vrot.slane %v6879_v20, 4  ;;  %vm18869_vm1 = vsmask.f32 3328 }
 0x222   : > { %v8307_v60 = vsel %vm19226_vm5, %v8303_v35, %v8306_v41  ;;  %13054 = vmatprep.subr.bf16.mxu1 %v17187_v51  ;;  %vm19227_vm15 = vmmov %vm19221_vm4  ;;  %v17211_v50 = vor.u32 %v7225_v40, %v7224_v28  ;;  %v7230_v63 = vor.u32 %v7229_v14, %v7228_v8  ;;  %v7236_v35 = vrot.slane %v17019_v3, 4  ;;  %v17266_v14 = vld [vmem:[#allocation2 + $0x30] sm:$0xff] }
 0x223   : > { %vm19228_vm9 = vmmov %vm19221_vm4  ;;  %v7237_v25 = vrot.slane %v17022_v52, 5  ;;  %v6882_v20 = vor.u32 %v6881_v56, %v6878_v57  ;;  %v8314_v28 = vor.u32 %v8313_v54, %v8312_v7  ;;  %v17235_v40 = vor.u32 %v8309_v19, %v8308_v10  ;;  %v8456_v19 = vld [vmem:[#allocation2 + $0x38] sm:$0xf8] }
 0x224   : > { %13031 = vmatmul.mubr.msk.bf16.gmra.mrb[16].mxu1 %vm19227_vm15, %v17178_v2  ;;  %13163 = vmatmul.mubr.msk.bf16.gmra.mrb[32].mxu0 %vm19228_vm9, %v8179_v48  ;;  %vm19229_vm11 = vmmov %vm19220_vm2  ;;  %v7234_v48 = vor.u32 %v7233_v36, %v7232_v4  ;;  %v8814_v3 = vrot.slane %v17050_v24, 5  ;;  %v8316_v52 = vrot.slane %v17088_v61, 3  ;;  %v8817_v24 = vrot.slane %v17067_v12, 4 }
 0x225   : > { %v17214_v27 = vsel %vm19229_vm11, %v8667_v9, %v8669_v6  ;;  %vm19230_vm2 = vmmov %vm19221_vm4  ;;  %v17231_v9 = vsel %vm18869_vm1, %v17211_v50, %v7230_v63  ;;  %v8818_v56 = vrot.slane %v17070_v13, 5  ;;  %v8320_v12 = vrot.slane %v17100_v42, 3 }
 0x226   : > { %13034 = vmatprep.mubr.msk.bf16.mxu1 %vm19230_vm2, %v17182_v23  ;;  %vm19231_vm4 = vmmov %vm19230_vm2  ;;  %v17255_v54 = vor.u32 %v8814_v3, %v8813_v58  ;;  %v8321_v4 = vrot.slane %v17103_v16, 4  ;;  %v8821_v36 = vrot.slane %v17088_v61, 4  ;;  %v17277_v13 = vshrl.u32 %v17266_v14, 16 }
 0x227   : > { %13170 = vmatprep.mubr.msk.bf16.mxu0 %vm19231_vm4, %v8307_v60  ;;  %vm19232_vm8 = vmmov %vm19229_vm11  ;;  %v17233_v60 = vor.u32 %v7237_v25, %v7236_v35  ;;  %v8471_v58 = vshll.u32 %v8456_v19, 16  ;;  %v8822_v61 = vrot.slane %v17091_v45, 5 }
 0x228   : > { %v17224_v21 = vsel %vm19232_vm8, %v8669_v6, %v8671_v34  ;;  %v17238_v6 = vsel %vm18869_vm1, %v7230_v63, %v7234_v48  ;;  %vm19233_vm14 = vmmov %vm19226_vm5  ;;  %v8819_v63 = vor.u32 %v8818_v56, %v8817_v24  ;;  %v17292_v3 = vor.u32 %v8321_v4, %v8320_v12  ;;  %v14297_v4 = vld [vmem:[%s18772_s2 + $0x50] sm:$0xff]  }
 0x229   : > { %v17246_v31 = vsel %vm18869_vm1, %v7234_v48, %v17233_v60  ;;  %v6739_v7 = vsel %vm19233_vm14, %v17142_v49, %v6738_v30  ;;  %vm19234_vm12 = vmmov %vm19226_vm5  ;;  %v17280_v30 = vshll.u32 %v17266_v14, 16  ;;  %v17285_v48 = vld [vmem:[%s18772_s2 + $0x40] sm:$0xff]   ;;  %v8826_v24 = vrot.slane %v17103_v16, 5 }
 0x22a   : > { %v8311_v10 = vsel %vm19234_vm12, %v8306_v41, %v17235_v40  ;;  %vm19235_vm5 = vmmov %vm19230_vm2  ;;  %v8291_v41 = vld [vmem:[#allocation2 + $0x60] sm:$0xf]  ;;  %v6922_v56 = vrot.slane %v17277_v13, 3 }
 0x22b   : > { %vm19236_vm15 = vmmov %vm19230_vm2  ;;  %v8325_v35 = vshrl.u32 %v8291_v41, 16  ;;  %v8328_v25 = vshll.u32 %v8291_v41, 16  ;;  %v6925_v45 = vrot.slane %v17280_v30, 4 }
 0x22c   : > { %13035 = vmatmul.mubr.msk.bf16.gmra.mrb[20].mxu1 %vm19235_vm5, %v6739_v7  ;;  %13171 = vmatmul.mubr.msk.bf16.vlgmr.msra.gmra.mrb[24].mxu0 %vm19236_vm15, %v8311_v10  ;;  %vm19237_vm9 = vmmov %vm19234_vm12  ;;  %v14295_v7 = vld [vmem:[%s18772_s2 + $0x48] sm:$0xff]   ;;  %v8823_v10 = vor.u32 %v8822_v61, %v8821_v36 }
 0x22d   : > { %v6891_v57 = vsel %vm19237_vm9, %v6882_v20, %v17107_v1  ;;  %vm19238_vm11 = vmmov %vm19237_vm9  ;;  %v8318_v1 = vor.u32 %v8317_v5, %v8316_v52  ;;  %13183 = vmatpush3.bf16.msra.mxu0 %v17136_v59  ;;  %v8468_v20 = vshrl.u32 %v8456_v19, 16  ;;  %v17289_v59 = vsel %vm18869_vm1, %v17255_v54, %v8819_v63 }
 0x22e   : > { %v17264_v8 = vsel %vm19238_vm11, %v17235_v40, %v8314_v28  ;;  %13042 = vmatprep.mubr.msk.bf16.mxu1 %vm19230_vm2, %v6891_v57  ;;  %vm19239_vm4 = vmmov %vm19230_vm2  ;;  %13184 = vmatprep.subr.bf16.mxu0 %v14296_v47  ;;  %v8825_v52 = vrot.slane %v17100_v42, 4  ;;  %v8327_v57 = vrot.slane %v8325_v35, 3  ;;  %v8330_v41 = vrot.slane %v8328_v25, 4 }
 0x22f   : > { %13174 = vmatprep.mubr.msk.bf16.mxu0 %vm19239_vm4, %v17264_v8  ;;  %vm19240_vm8 = vmmov %vm19237_vm9  ;;  %v8470_v42 = vrot.slane %v8468_v20, 3 }
 0x230   : > { %v8319_v5 = vsel %vm19240_vm8, %v8314_v28, %v8318_v1  ;;  %vm19241_vm14 = vmmov %vm19230_vm2  ;;  %v8473_v28 = vrot.slane %v8471_v58, 4  ;;  %v17309_v12 = vor.u32 %v8826_v24, %v8825_v52  ;;  %v7060_v52 = vld [vmem:[#allocation2 + $0x8] sm:$0xf0] }
 0x231   : > { %13185 = vmatpush3.bf16.msra.mxu0 %v14296_v47  ;;  %vm19242_vm12 = vmmov %vm19230_vm2  ;;  %v17307_v47 = vsel %vm18869_vm1, %v8819_v63, %v8823_v10  ;;  %v8331_v63 = vor.u32 %v8330_v41, %v8327_v57 }
 0x232   : > { %13198 = vmatprep.subr.bf16.mxu0 %v17285_v48  ;;  %vm19243_vm5 = vmmov %vm19230_vm2  ;;  %v17324_v19 = vsel %vm18869_vm1, %v8823_v10, %v17309_v12  ;;  %v8474_v36 = vor.u32 %v8473_v28, %v8470_v42  ;;  %v7073_v10 = vrot.slane %v7060_v52, 4  ;;  %v7750_v42 = vrot.slane %v17277_v13, 5 }
 0x233   : > { %vm19244_vm15 = vmmov %vm19240_vm8  ;;  %v7751_v28 = vrot.slane %v17280_v30, 6 }
 0x234   : > { %13043 = vmatmul.mubr.msk.bf16.vlgmr.msra.gmra.mrb[12].mxu1 %vm19241_vm14, %v17165_v43  ;;  %13175 = vmatmul.mubr.msk.bf16.gmra.mrb[28].mxu0 %vm19242_vm12, %v8319_v5  ;;  %v8323_v16 = vsel %vm19244_vm15, %v8318_v1, %v17292_v3  ;;  %vm19245_vm9 = vmmov %vm19230_vm2  ;;  %v17317_v43 = vld [vmem:[#allocation2 + $0x38] sm:$0xf] }
 0x235   : > { %13046 = vmatprep.mubr.msk.bf16.mxu1 %vm19243_vm5, %v17178_v2  ;;  %13055 = vmatpush3.bf16.msra.mxu1 %v17187_v51  ;;  %v6926_v2 = vor.u32 %v6925_v45, %v6922_v56  ;;  %v6929_v51 = vshrl.u32 %v17317_v43, 16  ;;  %v6932_v1 = vshll.u32 %v17317_v43, 16  ;;  %vm19246_vm11 = vmmov %vm19240_vm8 }
 0x236   : > { %13178 = vmatprep.mubr.msk.bf16.mxu0 %vm19245_vm9, %v8323_v16  ;;  %13056 = vmatprep.subr.bf16.mxu1 %v14295_v7  ;;  %v8332_v35 = vsel %vm19246_vm11, %v17292_v3, %v8331_v63  ;;  %vm19247_vm4 = vmmov %vm19230_vm2  ;;  %v17361_v63 = vld [vmem:[#allocation2 + $0x68] sm:$0xf] }
 0x237   : > { %v6927_v25 = vsel %vm19240_vm8, %v17142_v49, %v6926_v2  ;;  %vm19248_vm14 = vmmov %vm19240_vm8  ;;  %v6931_v58 = vrot.slane %v6929_v51, 3  ;;  %v6934_v61 = vrot.slane %v6932_v1, 4 }
 0x238   : > { %v8483_v20 = vsel %vm19248_vm14, %v8474_v36, %v17235_v40  ;;  %vm19249_vm12 = vmmov %vm19230_vm2  ;;  %v14300_v40 = vld [vmem:[%s18772_s2 + $0x48] sm:$0xff]   ;;  %v14299_v36 = vld [vmem:[%s18772_s2 + $0x58] sm:$0xff]  }
 0x239   : > { %13057 = vmatpush3.bf16.msra.mxu1 %v14295_v7  ;;  %vm19250_vm5 = vmmov %vm19230_vm2  ;;  %v17339_v7 = vld [vmem:[#allocation2 + $0x60] sm:$0xff]  ;;  %v6935_v24 = vor.u32 %v6934_v61, %v6931_v58  ;;  %v7220_v58 = vshll.u32 %v7060_v52, 16 }
 0x23a   : > { %13070 = vmatprep.subr.bf16.mxu1 %v14297_v4  ;;  %v8515_v57 = vshll.u32 %v17339_v7, 16  ;;  %vm19251_vm15 = vmmov %vm19240_vm8 }
 0x23b   : > { %v6936_v49 = vsel %vm19251_vm15, %v6926_v2, %v6935_v24  ;;  %vm19252_vm9 = vmmov %vm19230_vm2  ;;  %v8524_v2 = vshll.u32 %v17361_v63, 16 }
 0x23c   : > { %13047 = vmatmul.mubr.msk.bf16.gmra.mrb[16].mxu1 %vm19230_vm2, %v17182_v23  ;;  %13179 = vmatmul.mubr.msk.bf16.gmra.mrb[32].mxu0 %vm19247_vm4, %v8332_v35  ;;  %v8512_v23 = vshrl.u32 %v17339_v7, 16  ;;  %vm19253_vm11 = vmmov %vm19230_vm2  ;;  %vm19254_vm2 = vcmask 1043456   ;;  %v8517_v45 = vrot.slane %v8515_v57, 4  ;;  %v8652_v35 = vld [vmem:[#allocation2 + $0x38] sm:$0xf0] }
 0x23d   : > { %13050 = vmatprep.mubr.msk.bf16.mxu1 %vm19249_vm12, %v6927_v25  ;;  %13186 = vmatprep.mubr.msk.bf16.mxu0 %vm19250_vm5, %v8483_v20  ;;  %v7075_v41 = vsel %vm19254_vm2, %v7073_v10, %v7074_v29  ;;  %vm19255_vm8 = vmmov %vm19247_vm4  ;;  %v17367_v29 = vor.u32 %v7751_v28, %v7750_v42  ;;  %v8526_v1 = vrot.slane %v8524_v2, 4  ;;  %v14301_v25 = vld [vmem:[%s18772_s2 + $0x60] sm:$0xff]   ;;  %v7217_v20 = vshrl.u32 %v7060_v52, 16  ;;  %v17432_v42 = vld [vmem:[#allocation2 + $0x18] sm:$0xff] }
 0x23e   : > { %v8514_v56 = vrot.slane %v8512_v23, 3  ;;  %vm19256_vm14 = vmmov %vm19247_vm4  ;;  %v7222_v52 = vrot.slane %v7220_v58, 5  ;;  %v7397_v28 = vshrl.u32 %v17432_v42, 16  ;;  %v7400_v32 = vshll.u32 %v17432_v42, 16 }
 0x23f   : > { %vm19257_vm12 = vmmov %vm19247_vm4  ;;  %v7219_v10 = vrot.slane %v7217_v20, 4 }
 0x240   : > { %vm19258_vm5 = vmmov %vm19247_vm4 }
 0x241   : > { %vm19261_vm2 = vmmov %vm19247_vm4  ;;  %v7223_v24 = vor.u32 %v7222_v52, %v7219_v10 }
 0x243   : > { %v7227_v53 = vsel %vm18869_vm1, %v7223_v24, %v17211_v50  ;;  %v7240_v50 = vrot.slane %v17277_v13, 4  ;;  %v7376_v13 = vld [vmem:[#allocation2 + $0x10] sm:$0xf0] }
 0x244   : > { %13051 = vmatmul.mubr.msk.bf16.gmra.mrb[20].mxu1 %vm19252_vm9, %v6936_v49  ;;  %13187 = vmatmul.mubr.msk.bf16.vlgmr.msra.gmra.mrb[24].mxu0 %vm19253_vm11, %v17264_v8  ;;  %v8518_v8 = vor.u32 %v8517_v45, %v8514_v56  ;;  %vm19259_vm9 = vmmov %vm19247_vm4  ;;  %v7084_v49 = vrot.slane %v17317_v43, 4  ;;  %v8809_v43 = vshll.u32 %v8652_v35, 16  ;;  %v7392_v2 = vshll.u32 %v7376_v13, 16 }
 0x245   : > { %13058 = vmatprep.mubr.msk.bf16.mxu1 %vm19247_vm4, %v7075_v41  ;;  %13190 = vmatprep.mubr.msk.bf16.mxu0 %vm19255_vm8, %v8319_v5  ;;  %v8521_v5 = vshrl.u32 %v17361_v63, 16  ;;  %vm19260_vm11 = vmmov %vm19251_vm15  ;;  %vm19263_vm8 = vcmask 1043456  }
 0x246   : > { %13199 = vmatpush3.bf16.msra.mxu0 %v17285_v48  ;;  %v8519_v48 = vsel %vm19251_vm15, %v17292_v3, %v8518_v8  ;;  %vm19262_vm4 = vmmov %vm19261_vm2  ;;  %v8811_v56 = vrot.slane %v8809_v43, 5  ;;  %v8830_v43 = vrot.slane %v8515_v57, 5 }
 0x247   : > { %13200 = vmatprep.subr.bf16.mxu0 %v14300_v40  ;;  %v8523_v51 = vrot.slane %v8521_v5, 3  ;;  %vm19267_vm15 = vmmov %vm19263_vm8  ;;  %v7389_v5 = vshrl.u32 %v7376_v13, 16  ;;  %v19287_v13 = vld [vmem:[#allocation3_spill] sm:$0xff] }
 0x24a   : > { %13201 = vmatpush3.bf16.msra.mxu0 %v14300_v40  ;;  %v8673_v40 = vrot.slane %v17339_v7, 4  ;;  %v14306_v7 = vld [vmem:[%s18772_s2 + $0x78] sm:$0xff]  }
 0x24b   : > { %13214 = vmatprep.subr.bf16.mxu0 %v14302_v0 }
 0x24c   : > { %13059 = vmatmul.mubr.msk.bf16.vlgmr.msra.gmra.mrb[12].mxu1 %vm19256_vm14, %v17155_v18  ;;  %13191 = vmatmul.mubr.msk.bf16.gmra.mrb[28].mxu0 %vm19257_vm12, %v8323_v16  ;;  %v7082_v18 = vrot.slane %v17266_v14, 4  ;;  %v8664_v16 = vrot.slane %v8652_v35, 4  ;;  %vm19264_vm14 = vmmov %vm19263_vm8 }
 0x24d   : > { %13062 = vmatprep.mubr.msk.bf16.mxu1 %vm19258_vm5, %v17158_v39  ;;  %13071 = vmatpush3.bf16.msra.mxu1 %v14297_v4  ;;  %v8527_v39 = vor.u32 %v8526_v1, %v8523_v51  ;;  %vm19265_vm12 = vmmov %vm19261_vm2  ;;  %v7399_v51 = vrot.slane %v7397_v28, 4  ;;  %v7402_v1 = vrot.slane %v7400_v32, 5 }
 0x24e   : > { %13194 = vmatprep.mubr.msk.bf16.mxu0 %vm19259_vm9, %v8519_v48  ;;  %13072 = vmatprep.subr.bf16.mxu1 %v14299_v36  ;;  %v7083_v4 = vsel %vm19263_vm8, %v7080_v38, %v7082_v18  ;;  %v8666_v61 = vsel %vm19264_vm14, %v8664_v16, %v8665_v62  ;;  %vm19266_vm5 = vmmov %vm19261_vm2  ;;  %v17414_v38 = vld [vmem:[%s18772_s2 + $0x60] sm:$0xff]   ;;  %v8806_v62 = vshrl.u32 %v8652_v35, 16  ;;  %v7394_v16 = vrot.slane %v7392_v2, 5 }
 0x24f   : > { %v8528_v3 = vsel %vm19260_vm11, %v8518_v8, %v8527_v39  ;;  %vm19268_vm9 = vmmov %vm19261_vm2  ;;  %v17459_v35 = vld [vmem:[#allocation2 + $0x20] sm:$0xff]  ;;  %v7403_v58 = vor.u32 %v7402_v1, %v7399_v51 }
 0x250   : > { %vm19269_vm11 = vmmov %vm19261_vm2  ;;  %v8808_v41 = vrot.slane %v8806_v62, 4  ;;  %v7409_v20 = vshll.u32 %v17459_v35, 16  ;;  %v8829_v62 = vrot.slane %v8512_v23, 4  ;;  %v19290_v51 = vld [vmem:[#allocation6_spill] sm:$0xff] }
 0x251   : > { %13073 = vmatpush3.bf16.msra.mxu1 %v14299_v36  ;;  %vm19271_vm8 = vmmov %vm19261_vm2  ;;  %v17551_v1 = vadd.s32 192, %v19290_v51 }
 0x252   : > { %13086 = vmatprep.subr.bf16.mxu1 %v14301_v25  ;;  %vm19272_vm14 = vmmov %vm19261_vm2  ;;  %v7411_v24 = vrot.slane %v7409_v20, 5 }
 0x254   : > { %13063 = vmatmul.mubr.msk.bf16.gmra.mrb[16].mxu1 %vm19261_vm2, %v17174_v55  ;;  %13195 = vmatmul.mubr.msk.bf16.gmra.mrb[32].mxu0 %vm19262_vm4, %v8528_v3  ;;  %v7085_v55 = vsel %vm19267_vm15, %v7082_v18, %v7084_v49  ;;  %vm19270_vm4 = vmmov %vm19261_vm2  ;;  %v17463_v18 = vld [vmem:[#allocation2 + $0x28] sm:$0xff] }
 0x255   : > { %13066 = vmatprep.mubr.msk.bf16.mxu1 %vm19265_vm12, %v7083_v4  ;;  %13202 = vmatprep.mubr.msk.bf16.mxu0 %vm19266_vm5, %v8666_v61  ;;  %vm19273_vm12 = vmmov %vm19261_vm2  ;;  %v7415_v39 = vshrl.u32 %v17463_v18, 16  ;;  %v7418_v3 = vshll.u32 %v17463_v18, 16  ;;  %v14313_v49 = vld [vmem:[%s18772_s2 + $0x68] sm:$0xff]  }
 0x256   : > { %vm19274_vm5 = vmmov %vm19267_vm15 }
 0x257   : > { %v8674_v45 = vsel %vm19274_vm5, %v8671_v34, %v8673_v40  ;;  %vm19275_vm15 = vmmov %vm19261_vm2  ;;  %v8675_v34 = vrot.slane %v17361_v63, 4 }
 0x25c   : > { %13067 = vmatmul.mubr.msk.bf16.gmra.mrb[20].mxu1 %vm19268_vm9, %v7085_v55  ;;  %13203 = vmatmul.mubr.msk.bf16.vlgmr.msra.gmra.mrb[24].mxu0 %vm19269_vm11, %v17197_v11  ;;  %v14303_v11 = vld [vmem:[%s18772_s2 + $0x68] sm:$0xff]   ;;  %vm19276_vm9 = vmmov %vm19274_vm5 }
 0x25d   : > { %13074 = vmatprep.mubr.msk.bf16.mxu1 %vm19261_vm2, %v7227_v53  ;;  %13206 = vmatprep.mubr.msk.bf16.mxu0 %vm19270_vm4, %v17214_v27  ;;  %v7241_v27 = vrot.slane %v17280_v30, 5  ;;  %v8676_v36 = vsel %vm19276_vm9, %v8673_v40, %v8675_v34  ;;  %vm19277_vm11 = vmmov %vm19261_vm2  ;;  %v7420_v53 = vrot.slane %v7418_v3, 5  ;;  %v17494_v40 = vld [vmem:[#allocation2 + $0x38] sm:$0xff] }
 0x25e   : > { %13215 = vmatpush3.bf16.msra.mxu0 %v14302_v0  ;;  %vm19278_vm4 = vmmov %vm19261_vm2  ;;  %v7436_v23 = vshll.u32 %v17494_v40, 16 }
 0x25f   : > { %13216 = vmatprep.subr.bf16.mxu0 %v14304_v33  ;;  %v17440_v30 = vor.u32 %v7241_v27, %v7240_v50  ;;  %vm19282_vm5 = vmmov %vm19261_vm2  ;;  %v17501_v27 = vor.u32 %v8830_v43, %v8829_v62  ;;  %v7590_v62 = vrot.slane %v17459_v35, 5  ;;  %v19294_v43 = vld [vmem:[#allocation17_spill] sm:$0xff] }
 0x260   : > { %vm19284_vm9 = vmmov %vm19261_vm2  ;;  %v7438_v34 = vrot.slane %v7436_v23, 5 }
 0x261   : > { %v7243_v48 = vsel %vm18869_vm1, %v17233_v60, %v17440_v30  ;;  %v7391_v60 = vrot.slane %v7389_v5, 4 }
 0x262   : > { %13217 = vmatpush3.bf16.msra.mxu0 %v14304_v33  ;;  %v7417_v33 = vrot.slane %v7415_v39, 4 }
 0x263   : > { %13230 = vmatprep.subr.bf16.mxu0 %v17414_v38  ;;  %v7395_v61 = vor.u32 %v7394_v16, %v7391_v60 }
 0x264   : > { %13075 = vmatmul.mubr.msk.bf16.vlgmr.msra.gmra.mrb[12].mxu1 %vm19271_vm8, %v17231_v9  ;;  %13207 = vmatmul.mubr.msk.bf16.gmra.mrb[28].mxu0 %vm19272_vm14, %v17224_v21  ;;  %v7209_v21 = vld [vmem:[#allocation2 + $0x38] sm:$0x1f]  ;;  %v17438_v9 = vld [vmem:[%s18772_s2 + $0x70] sm:$0xff]   ;;  %vm19279_vm8 = vmmov %vm19261_vm2  ;;  %v7421_v50 = vor.u32 %v7420_v53, %v7417_v33 }
 0x265   : > { %13078 = vmatprep.mubr.msk.bf16.mxu1 %vm19273_vm12, %v17238_v6  ;;  %13087 = vmatpush3.bf16.msra.mxu1 %v14301_v25  ;;  %v8812_v6 = vor.u32 %v8811_v56, %v8808_v41  ;;  %v7245_v0 = vshrl.u32 %v7209_v21, 16  ;;  %v7248_v8 = vshll.u32 %v7209_v21, 16  ;;  %vm19280_vm14 = vmmov %vm19261_vm2  ;;  %v7404_v55 = vsel %vm18869_vm1, %v7395_v61, %v7403_v58  ;;  %v19286_v41 = vld [vmem:[#allocation4_spill] sm:$0xff]  ;;  %v17522_v21 = vld [vmem:[#allocation2 + $0x40] sm:$0x1f] }
 0x266   : > { %13210 = vmatprep.mubr.msk.bf16.mxu0 %vm19275_vm15, %v8674_v45  ;;  %13088 = vmatprep.subr.bf16.mxu1 %v14303_v11  ;;  %vm19281_vm12 = vmmov %vm19261_vm2  ;;  %v17515_v56 = vadd.s32 192, %v19286_v41  ;;  %v8832_v45 = vsel %vm18869_vm1, %v17309_v12, %v17501_v27  ;;  %v19289_v12 = vld [vmem:[#allocation5_spill] sm:$0xff]  ;;  %v7573_v61 = vld [vmem:[#allocation2 + $0x10] sm:$0xe0] }
 0x267   : > { %v8816_v63 = vsel %vm18869_vm1, %v8812_v6, %v17255_v54  ;;  %v7250_v25 = vrot.slane %v7248_v8, 5  ;;  %v7406_v54 = vshrl.u32 %v17459_v35, 16  ;;  %vm19283_vm15 = vmmov %vm19261_vm2  ;;  %v17525_v6 = vadd.s32 192, %v19287_v13  ;;  %v19295_v13 = vld [vmem:[#allocation10_spill] sm:$0xff]  ;;  %v14308_v35 = vld [vmem:[%s18772_s2 + $0x88] sm:$0xff]  }
 0x268   : > { %v7442_v8 = vshrl.u32 %v17522_v21, 16  ;;  %v17542_v5 = vmul.u32.u64.low 3817748708, %v17515_v56  ;;  %v17543_v2 = vmul.u32.u64.high 3817748708, %v17515_v56, %v17542_v5  ;;  %v7587_v53 = vrot.slane %v7573_v61, 5 }
 0x269   : > { %13089 = vmatpush3.bf16.msra.mxu1 %v14303_v11  ;;  %v7408_v52 = vrot.slane %v7406_v54, 4  ;;  %v17499_v11 = vld [vmem:[%s18772_s2 + $0x70] sm:$0xff]  }
 0x26a   : > { %13102 = vmatprep.subr.bf16.mxu1 %v17438_v9  ;;  %v19296_v5 = vld [vmem:[#allocation20_spill] sm:$0xff] }
 0x26c   : > { %13079 = vmatmul.mubr.msk.bf16.gmra.mrb[16].mxu1 %vm19277_vm11, %v17246_v31  ;;  %13211 = vmatmul.mubr.msk.bf16.gmra.mrb[32].mxu0 %vm19261_vm2, %v8676_v36  ;;  %v7247_v31 = vrot.slane %v7245_v0, 4  ;;  %vm19285_vm11 = vmmov %vm19261_vm2  ;;  %v17538_v0 = vadd.s32 192, %v19289_v12  ;;  %v7445_v36 = vshll.u32 %v17522_v21, 16 }
 0x26d   : > { %13082 = vmatprep.mubr.msk.bf16.mxu1 %vm19278_vm4, %v7243_v48  ;;  %13218 = vmatprep.mubr.msk.bf16.mxu0 %vm19279_vm8, %v8816_v63  ;;  %vm19288_vm4 = vmmov %vm19261_vm2  ;;  %v17547_v48 = vmul.u32.u64.low 3817748708, %v17525_v6  ;;  %v17548_v63 = vmul.u32.u64.high 3817748708, %v17525_v6, %v17547_v48 }
 0x26e   : > { %v7251_v4 = vor.u32 %v7250_v25, %v7247_v31  ;;  %v7431_v25 = vsel %vm18869_vm1, %v7421_v50, %v17440_v30  ;;  %v17557_v60 = vmul.u32.u64.low 3817748708, %v17538_v0  ;;  %v17558_v16 = vmul.u32.u64.high 3817748708, %v17538_v0, %v17557_v60  ;;  %vm19291_vm8 = vmmov %vm19261_vm2 }
 0x26f   : > { %v7738_v60 = vrot.slane %v7397_v28, 5 }
 0x270   : > { %v7252_v10 = vsel %vm18869_vm1, %v17440_v30, %v7251_v4  ;;  %v7444_v4 = vrot.slane %v7442_v8, 4 }
 0x274   : > { %13083 = vmatmul.mubr.msk.bf16.gmra.mrb[20].mxu1 %vm19280_vm14, %v7252_v10  ;;  %13219 = vmatmul.mubr.msk.bf16.vlgmr.msra.gmra.mrb[24].mxu0 %vm19281_vm12, %v17289_v59  ;;  %v7412_v59 = vor.u32 %v7411_v24, %v7408_v52  ;;  %vm19292_vm14 = vmmov %vm19261_vm2  ;;  %v7447_v10 = vrot.slane %v7445_v36, 5  ;;  %v7588_v52 = vrot.slane %v17432_v42, 5  ;;  %vm18868_vm12 = vcmask 1042432  }
 0x275   : > { %13090 = vmatprep.mubr.msk.bf16.mxu1 %vm19282_vm5, %v7404_v55  ;;  %13222 = vmatprep.mubr.msk.bf16.mxu0 %vm19283_vm15, %v17307_v47  ;;  %v7433_v47 = vshrl.u32 %v17494_v40, 16  ;;  %v19293_v55 = vld [vmem:[#allocation7_spill] sm:$0xff]  ;;  %v17589_v36 = vadd.s32 192, %v19296_v5  ;;  %vm19297_vm5 = vmmov %vm19261_vm2  ;;  %v19302_v5 = vld [vmem:[#allocation22_spill] sm:$0xff] }
 0x276   : > { %13231 = vmatpush3.bf16.msra.mxu0 %v17414_v38  ;;  %v7413_v57 = vsel %vm18869_vm1, %v7403_v58, %v7412_v59  ;;  %v7422_v38 = vsel %vm18869_vm1, %v7412_v59, %v7421_v50  ;;  %v17570_v33 = vadd.s32 192, %v19293_v55  ;;  %v7592_v59 = vrot.slane %v17463_v18, 5  ;;  %vm19298_vm15 = vmmov %vm19261_vm2  ;;  %v17669_v18 = vld [vmem:[%s18772_s2 + $0x10] sm:$0xff]  }
 0x277   : > { %13232 = vmatprep.subr.bf16.mxu0 %v14313_v49  ;;  %v7594_v50 = vrot.slane %v17266_v14, 5  ;;  %v7589_v41 = vsel %vm18868_vm12, %v7587_v53, %v7588_v52  ;;  %v17614_v55 = vmul.u32.u64.low 3817748708, %v17589_v36  ;;  %v17615_v53 = vmul.u32.u64.high 3817748708, %v17589_v36, %v17614_v55 }
 0x278   : > { %v17585_v12 = vmul.u32.u64.low 3817748708, %v17570_v33  ;;  %v17586_v8 = vmul.u32.u64.high 3817748708, %v17570_v33, %v17585_v12 }
 0x27a   : > { %13233 = vmatpush3.bf16.msra.mxu0 %v14313_v49  ;;  %v17566_v24 = vmul.u32.u64.low 3817748708, %v17551_v1  ;;  %v17567_v49 = vmul.u32.u64.high 3817748708, %v17551_v1, %v17566_v24 }
 0x27b   : > { %13246 = vmatprep.subr.bf16.mxu0 %v17499_v11  ;;  %v7739_v24 = vrot.slane %v7400_v32, 6  ;;  %v7595_v32 = vsel %vm18868_vm12, %v7592_v59, %v7594_v50 }
 0x27c   : > { %13091 = vmatmul.mubr.msk.bf16.vlgmr.msra.gmra.mrb[12].mxu1 %vm19284_vm9, %v7413_v57  ;;  %13223 = vmatmul.mubr.msk.bf16.gmra.mrb[28].mxu0 %vm19285_vm11, %v17324_v19  ;;  %v7435_v19 = vrot.slane %v7433_v47, 4  ;;  %v6101_v57 = vshrl.u32 %v17543_v2, 4  ;;  %v6112_v2 = vshrl.u32 %v17558_v16, 4  ;;  %vm18870_vm9 = vsmask.f32 2304  ;;  %vm19299_vm11 = vmmov %vm19261_vm2 }
 0x27d   : > { %13094 = vmatprep.mubr.msk.bf16.mxu1 %vm19261_vm2, %v7422_v38  ;;  %13103 = vmatpush3.bf16.msra.mxu1 %v17438_v9  ;;  %v17535_v9 = vld [vmem:[%s18772_s2 + $0x80] sm:$0xff]   ;;  %v7448_v38 = vor.u32 %v7447_v10, %v7444_v4 }
 0x27e   : > { %13226 = vmatprep.mubr.msk.bf16.mxu0 %vm19288_vm4, %v8832_v45  ;;  %13104 = vmatprep.subr.bf16.mxu1 %v14306_v7  ;;  %v7439_v31 = vor.u32 %v7438_v34, %v7435_v19  ;;  %v6079_v45 = vshrl.u32 %v17548_v63, 4  ;;  %v17582_v19 = vadd.s32 192, %v19295_v13  ;;  %v7734_v34 = vshll.u32 %v7573_v61, 16 }
 0x27f   : > { %v7596_v63 = vrot.slane %v17494_v40, 5  ;;  %v6113_v28 = vmul.u32 18, %v6112_v2  ;;  %v7747_v13 = vrot.slane %v7418_v3, 6  ;;  %v19342_v40 = vmov 0 }
 0x280   : > { %v7440_v58 = vsel %vm18869_vm1, %v17440_v30, %v7439_v31  ;;  %v17574_v30 = vadd.s32 192, %v19294_v43  ;;  %v7449_v14 = vsel %vm18869_vm1, %v7439_v31, %v7448_v38  ;;  %v6080_v4 = vmul.u32 18, %v6079_v45 }
 0x281   : > { %13105 = vmatpush3.bf16.msra.mxu1 %v14306_v7  ;;  %v7731_v7 = vshrl.u32 %v7573_v61, 16  ;;  %v6090_v31 = vshrl.u32 %v17567_v49, 4  ;;  %v17606_v16 = vmul.u32.u64.low 3817748708, %v17582_v19  ;;  %v17607_v61 = vmul.u32.u64.high 3817748708, %v17582_v19, %v17606_v16 }
 0x282   : > { %13118 = vmatprep.subr.bf16.mxu1 %v17535_v9  ;;  %v17594_v48 = vmul.u32.u64.low 3817748708, %v17574_v30  ;;  %v17595_v51 = vmul.u32.u64.high 3817748708, %v17574_v30, %v17594_v48  ;;  %v17609_v10 = vrot.slane %v7734_v34, 6  ;;  %v7742_v43 = vrot.slane %v7406_v54, 5  ;;  %v19300_v34 = vld [vmem:[#allocation21_spill] sm:$0xff] }
 0x283   : > { %v7743_v49 = vrot.slane %v7409_v20, 6  ;;  %v7598_v38 = vrot.slane %v17522_v21, 5  ;;  %v17630_v45 = vsub.s32 %v17525_v6, %v6080_v4  ;;  %v6091_v54 = vmul.u32 18, %v6090_v31  ;;  %v19303_v48 = vld [vmem:[#allocation24_spill] sm:$0xff]  ;;  %v19306_v31 = vld [vmem:[#allocation27_spill] sm:$0xff] }
 0x284   : > { %13095 = vmatmul.mubr.msk.bf16.gmra.mrb[16].mxu1 %vm19291_vm8, %v7431_v25  ;;  %v17599_v25 = vrot.slane %v7731_v7, 5  ;;  %v7591_v7 = vsel %vm18868_vm12, %v7588_v52, %v7590_v62  ;;  %v6145_v52 = vshrl.u32 %v17586_v8, 4  ;;  %v7746_v6 = vrot.slane %v7415_v39, 5  ;;  %vm19301_vm8 = vmmov %vm19297_vm5 }
 0x285   : > { %13098 = vmatprep.mubr.msk.bf16.mxu1 %vm19292_vm14, %v7440_v58  ;;  %v6102_v58 = vmul.u32 18, %v6101_v57  ;;  %v7593_v57 = vsel %vm18868_vm12, %v7590_v62, %v7592_v59  ;;  %v17636_v20 = vsel %vm18868_vm12, %v7596_v63, %v7598_v38  ;;  %v17642_v62 = vsub.s32 %v17538_v0, %v6113_v28 }
 0x286   : > { %v7737_v21 = vor.u32 %v17609_v10, %v17599_v25  ;;  %v17644_v59 = vor.u32 %v7743_v49, %v7742_v43  ;;  %v17655_v12 = vadd.s32 192, %v19300_v34  ;;  %vm6205_vm14 = vcmp.ne.s32.totalorder %v17630_v45, 0 }
 0x287   : > { %v17625_v42 = vsub.s32 %v17515_v56, %v6102_v58  ;;  %v7740_v56 = vor.u32 %v7739_v24, %v7738_v60  ;;  %v17662_v0 = vsub.s32 %v17551_v1, %v6091_v54  ;;  %v6123_v8 = vshrl.u32 %v17607_v61, 4 }
 0x288   : > { %v6146_v3 = vmul.u32 18, %v6145_v52  ;;  %v6241_v2 = vadd.s32 18, %v17630_v45  ;;  %v17683_v25 = vmul.u32.u64.low 3817748708, %v17655_v12  ;;  %v17684_v60 = vmul.u32.u64.high 3817748708, %v17655_v12, %v17683_v25  ;;  %v7723_v52 = vld [vmem:[#allocation2 + $0x40] sm:$0x3f] }
 0x289   : > { %vm6207_vm2 = vcmp.ne.s32.totalorder %v17625_v42, 0  ;;  %vm6219_vm4 = vcmp.lt.s32.totalorder %v17625_v42, 0  ;;  %v6243_v39 = vadd.s32 18, %v17625_v42  ;;  %vm6218_vm1 = vcmp.lt.s32.totalorder %v17662_v0, 0 }
 0x28a   : > { %v6124_v4 = vmul.u32 18, %v6123_v8  ;;  %v17697_v16 = vadd.s32 192, %v19306_v31  ;;  %v17709_v10 = vsub.s32 %v17570_v33, %v6146_v3  ;;  %v7741_v28 = vsel %vm18870_vm9, %v7737_v21, %v7740_v56 }
 0x28b   : > { %v17737_v38 = vsel %vm18870_vm9, %v7740_v56, %v17644_v59  ;;  %v6242_v54 = vadd.s32 18, %v17662_v0  ;;  %v19316_v34 = vmov 0  ;;  %v7762_v3 = vshll.u32 %v7723_v52, 16 }
 0x28c   : > { %13099 = vmatmul.mubr.msk.bf16.gmra.mrb[20].mxu1 %vm19297_vm5, %v7449_v14  ;;  %vm6217_vm5 = vcmp.lt.s32.totalorder %v17630_v45, 0  ;;  %v17673_v14 = vadd.s32 192, %v19302_v5  ;;  %v17756_v21 = vmul.u32.u64.low 3817748708, %v17697_v16  ;;  %v17757_v56 = vmul.u32.u64.high 3817748708, %v17697_v16, %v17756_v21 }
 0x28d   : > { %13106 = vmatprep.mubr.msk.bf16.mxu1 %vm19298_vm15, %v7589_v41  ;;  %v7597_v41 = vsel %vm18868_vm12, %v7594_v50, %v7596_v63  ;;  %v6156_v50 = vshrl.u32 %v17595_v51, 4  ;;  %vm6208_vm15 = vcmp.ne.s32.totalorder %v17642_v62, 0  ;;  %v17678_v51 = vadd.s32 192, %v19303_v48  ;;  %v17824_v48 = vld [vmem:[#allocation2 + $0x40] sm:$0xf0] }
 0x28e   : > { %v6244_v63 = vadd.s32 18, %v17642_v62  ;;  %vm6206_vm12 = vcmp.ne.s32.totalorder %v17662_v0, 0  ;;  %v17883_v21 = vld [vmem:[%s18774_s4] ss:$0 sm:$0xff] }
 0x28f   : > { %v6157_v1 = vmul.u32 18, %v6156_v50  ;;  %v12980_v31 = vpop.f32.mrb[12].mxu0 }
 0x291   : > { %v17725_v49 = vsub.s32 %v17574_v30, %v6157_v1 }
 0x294   : > { %13107 = vmatmul.mubr.msk.bf16.vlgmr.msra.gmra.mrb[12].mxu1 %vm19299_vm11, %v7591_v7  ;;  %vm17703_vm11 = vmand %vm6217_vm5, %vm6205_vm14  ;;  %v17728_v33 = vmul.u32.u64.low 3817748708, %v17678_v51  ;;  %v17729_v7 = vmul.u32.u64.high 3817748708, %v17678_v51, %v17728_v33  ;;  %vm19312_vm14 = vcmask 261120  }
 0x295   : > { %13110 = vmatprep.mubr.msk.bf16.mxu1 %vm19301_vm8, %v7593_v57  ;;  %13119 = vmatpush3.bf16.msra.mxu1 %v17535_v9  ;;  %v6134_v9 = vshrl.u32 %v17615_v53, 4  ;;  %vm17690_vm8 = vmand %vm6219_vm4, %vm6207_vm2  ;;  %v17712_v55 = vmul.u32.u64.low 3817748708, %v17673_v14  ;;  %v17713_v53 = vmul.u32.u64.high 3817748708, %v17673_v14, %v17712_v55  ;;  %vm19309_vm2 = vcmp.lt.s32.totalorder %v17642_v62, 0 }
 0x296   : > { %13120 = vmatprep.subr.bf16.mxu1 %v14308_v35  ;;  %vm17720_vm4 = vmand %vm19309_vm2, %vm6208_vm15  ;;  %v6255_v57 = vsel %vm17690_vm8, %v6243_v39, %v17625_v42  ;;  %v6253_v30 = vsel %vm17703_vm11, %v6241_v2, %v17630_v45  ;;  %v17753_v42 = vsub.s32 %v17582_v19, %v6124_v4  ;;  %vm6211_vm11 = vcmp.ne.s32.totalorder %v17709_v10, 0 }
 0x297   : > { %v6135_v24 = vmul.u32 18, %v6134_v9  ;;  %vm19313_vm5 = vmmov %vm19312_vm14  ;;  %vm6223_vm8 = vcmp.lt.s32.totalorder %v17709_v10, 0  ;;  %v7754_v19 = vrot.slane %v7433_v47, 5  ;;  %vm17782_vm2 = vcmp.lt.s32.totalorder %v6255_v57, 16 }
 0x298   : > { %vm17748_vm15 = vmand %vm6218_vm1, %vm6206_vm12  ;;  %vm6212_vm1 = vcmp.ne.s32.totalorder %v17725_v49, 0  ;;  %vm6224_vm12 = vcmp.lt.s32.totalorder %v17725_v49, 0  ;;  %v19317_v34 = vsel %vm17782_vm2, 4294967295, %v19316_v34  ;;  %v19319_v47 = vmov 0 }
 0x299   : > { %13121 = vmatpush3.bf16.msra.mxu1 %v14308_v35  ;;  %v7748_v35 = vor.u32 %v7747_v13, %v7746_v6  ;;  %v17765_v45 = vsub.s32 %v17589_v36, %v6135_v24  ;;  %v7755_v6 = vrot.slane %v7436_v23, 6  ;;  %v6247_v36 = vadd.s32 18, %v17709_v10  ;;  %19318 = vst [vmem:[#allocation33_spill] sm:$0xff] %v19317_v34  ;;  %vm17809_vm7 = vmand %vm6224_vm12, %vm6212_vm1 }
 0x29a   : > { %13278 = vmatprep.subr.bf16.mxu1 %v17669_v18  ;;  %v6189_v13 = vshrl.u32 %v17684_v60, 4  ;;  %v6248_v23 = vadd.s32 18, %v17725_v49  ;;  %v19324_v39 = vmov 0  ;;  %v6167_v8 = vshrl.u32 %v17713_v53, 4 }
 0x29b   : > { %v17778_v50 = vsel %vm18870_vm9, %v17644_v59, %v7748_v35  ;;  %v7759_v59 = vshrl.u32 %v7723_v52, 16  ;;  %vm17801_vm9 = vcmp.lt.s32.totalorder %v6253_v30, 16  ;;  %v6245_v9 = vadd.s32 18, %v17753_v42 }
 0x29c   : > { %13111 = vmatmul.mubr.msk.bf16.gmra.mrb[16].mxu1 %vm19312_vm14, %v7595_v32  ;;  %vm17794_vm14 = vmand %vm6223_vm8, %vm6211_vm11  ;;  %v19325_v39 = vsel %vm17801_vm9, 4294967295, %v19324_v39  ;;  %vm6210_vm11 = vcmp.ne.s32.totalorder %v17765_v45, 0  ;;  %v17821_v2 = vor.u32 %v7755_v6, %v7754_v19  ;;  %v6200_v1 = vshrl.u32 %v17729_v7, 4 }
 0x29d   : > { %13114 = vmatprep.mubr.msk.bf16.mxu1 %vm19313_vm5, %v7597_v41  ;;  %v6256_v41 = vsel %vm17720_vm4, %v6244_v63, %v17642_v62  ;;  %v6254_v62 = vsel %vm17748_vm15, %v6242_v54, %v17662_v0  ;;  %vm6209_vm5 = vcmp.ne.s32.totalorder %v17753_v42, 0  ;;  %vm19328_vm15 = vsmask.f32 2304  ;;  %v14310_v0 = vld [vmem:[%s18772_s2 + $0x18] sm:$0xff]  }
 0x29e   : > { %vm17786_vm4 = vcmp.lt.s32.totalorder %v6256_v41, 16  ;;  %v17819_v5 = vsel %vm19328_vm15, %v7748_v35, %v17367_v29  ;;  %vm19329_vm1 = vcmask 261120   ;;  %vm17828_vm12 = vcmp.lt.s32.totalorder %v6254_v62, 16 }
 0x29f   : > { %v19320_v47 = vsel %vm17786_vm4, 4294967295, %v19319_v47  ;;  %v19330_v63 = vmov 0  ;;  %v6259_v25 = vsel %vm17794_vm14, %v6247_v36, %v17709_v10  ;;  %vm19332_vm15 = vcmp.lt.s32.totalorder %v17753_v42, 0 }
 0x2a0   : > { %19321 = vst [vmem:[#allocation34_spill] sm:$0xff] %v19320_v47  ;;  %v19331_v63 = vsel %vm17828_vm12, 4294967295, %v19330_v63  ;;  %vm17839_vm8 = vmand %vm19332_vm15, %vm6209_vm5  ;;  %v6246_v58 = vadd.s32 18, %v17765_v45  ;;  %v6190_v4 = vmul.u32 18, %v6189_v13  ;;  %v6260_v61 = vsel %vm17809_vm7, %v6248_v23, %v17725_v49  ;;  %v6002_v49 = vpop.f32.mrb[13].mxu0 }
 0x2a1   : > { %vm19335_vm14 = vcmp.lt.s32.totalorder %v17765_v45, 0  ;;  %vm19338_vm15 = vsmask.f32 2304  ;;  %v17863_v55 = vrot.slane %v7759_v59, 5  ;;  %v6178_v53 = vshrl.u32 %v17757_v56, 4  ;;  %v12981_v54 = vpop.f32.mrb[14].mxu0 }
 0x2a2   : > { %vm17854_vm5 = vmand %vm19335_vm14, %vm6210_vm11  ;;  %v17861_v24 = vsel %vm19338_vm15, %v17367_v29, %v17821_v2  ;;  %v6168_v33 = vmul.u32 18, %v6167_v8  ;;  %v17872_v7 = vrot.slane %v7762_v3, 6  ;;  %v8977_v57 = vshrl.u32 %v17824_v48, 16  ;;  %v6005_v52 = vpop.f32.mrb[15].mxu0 }
 0x2a3   : > { %v6257_v35 = vsel %vm17839_vm8, %v6245_v9, %v17753_v42  ;;  %v6201_v30 = vmul.u32 18, %v6200_v1  ;;  %v6258_v19 = vsel %vm17854_vm5, %v6246_v58, %v17765_v45  ;;  %v17891_v6 = vsub.s32 %v17655_v12, %v6190_v4  ;;  %v17893_v42 = vld [vmem:[#allocation2 + $0x48] sm:$0xff] }
 0x2a4   : > { %13115 = vmatmul.mubr.msk.bf16.gmra.mrb[20].mxu1 %vm19329_vm1, %v17636_v20  ;;  %v17844_v20 = vld [vmem:[#allocation2 + $0x60] sm:$0xf8]  ;;  %vm17897_vm7 = vcmp.lt.s32.totalorder %v6259_v25, 16  ;;  %v19339_v13 = vmov 0  ;;  %vm17901_vm11 = vcmp.lt.s32.totalorder %v6260_v61, 16  ;;  %v6179_v23 = vmul.u32 18, %v6178_v53 }
 0x2a5   : > { %13122 = vmatprep.mubr.msk.bf16.mxu1 %vm19329_vm1, %v7741_v28  ;;  %v17869_v28 = vld [vmem:[%s18773_s3] ss:$0 sm:$0xff]  ;;  %v9591_v32 = vrot.slane %v17844_v20, 3  ;;  %v19340_v13 = vsel %vm17897_vm7, 4294967295, %v19339_v13  ;;  %v19343_v40 = vsel %vm17901_vm11, 4294967295, %v19342_v40  ;;  %v8980_v45 = vshll.u32 %v17824_v48, 16 }
 0x2a6   : > { %v6279_v43 = vmul.f32 %v17869_v28, %v12980_v31  ;;  %v6277_v29 = vmul.f32 %v17869_v28, %v6002_v49  ;;  %v6280_v41 = vmul.f32 %v17869_v28, %v12981_v54  ;;  %v6278_v36 = vmul.f32 %v17869_v28, %v6005_v52  ;;  %19341 = vst [vmem:[#allocation30_spill] sm:$0xff] %v19340_v13  ;;  %v12984_v61 = vpop.f32.mrb[16].mxu0  ;;  %v17956_v49 = vld [vmem:[%s18772_s2] sm:$0xff]  }
 0x2a7   : > { %19344 = vst [vmem:[#allocation4_spill] sm:$0xff] %v19343_v40  ;;  %vm17907_vm8 = vcmp.lt.s32.totalorder %v6257_v35, 16  ;;  %v19345_v59 = vmov 0  ;;  %v17915_v8 = vsub.s32 %v17673_v14, %v6168_v33  ;;  %v7765_v3 = vor.u32 %v17872_v7, %v17863_v55  ;;  %v6018_v53 = vpop.f32.mrb[17].mxu0 }
 0x2a8   : > { %v6291_v56 = vadd.f32 %v17883_v21, %v6279_v43  ;;  %v6289_v62 = vadd.f32 %v17883_v21, %v6277_v29  ;;  %v6292_v12 = vadd.f32 %v17883_v21, %v6280_v41  ;;  %v19346_v59 = vsel %vm17907_vm8, 4294967295, %v19345_v59 }
 0x2a9   : > { %19347 = vst [vmem:[#allocation3_spill] sm:$0xff] %v19346_v59  ;;  %v17919_v9 = vrot.slane %v8977_v57, 4  ;;  %v6290_v1 = vadd.f32 %v17883_v21, %v6278_v36  ;;  %vm17922_vm1 = vcmp.lt.s32.totalorder %v6258_v19, 16  ;;  %v19348_v48 = vmov 0 }
 0x2aa   : > { %v19349_v48 = vsel %vm17922_vm1, 4294967295, %v19348_v48  ;;  %v17927_v25 = vsub.s32 %v17678_v51, %v6201_v30  ;;  %v18886_v60 = vshrl.u32 %v17893_v42, 16  ;;  %v6327_v14 = vsel %vm17782_vm2, %v6291_v56, 0.0  ;;  %v18056_v30 = vld [vmem:[#allocation2 + $0x50] sm:$0xff] }
 0x2ab   : > { %19350 = vst [vmem:[#allocation5_spill] sm:$0xff] %v19349_v48  ;;  %v6328_v58 = vsel %vm17786_vm4, %v6292_v12, 0.0  ;;  %vm19351_vm14 = vcmask 261120   ;;  %vm6215_vm5 = vcmp.ne.s32.totalorder %v17891_v6, 0  ;;  %v6325_v4 = vsel %vm17801_vm9, %v6289_v62, 0.0 }
 0x2ac   : > { %13123 = vmatmul.mubr.msk.bf16.vlgmr.msra.gmra.mrb[12].mxu1 %vm19351_vm14, %v17737_v38  ;;  %v17940_v51 = vpack.c.bf16 %v6328_v58, %v6327_v14  ;;  %v6326_v31 = vsel %vm17828_vm12, %v6290_v1, 0.0  ;;  %vm19352_vm2 = vmmov %vm19351_vm14  ;;  %v17948_v38 = vsub.s32 %v17697_v16, %v6179_v23  ;;  %v6283_v55 = vmul.f32 %v17869_v28, %v12984_v61  ;;  %v12985_v16 = vpop.f32.mrb[18].mxu0 }
 0x2ad   : > { %13126 = vmatprep.mubr.msk.bf16.mxu1 %vm19352_vm2, %v17778_v50  ;;  %13279 = vmatpush3.bf16.msra.mxu1 %v17669_v18  ;;  %v6337_v10 = vpack.c.bf16 %v6326_v31, %v6325_v4  ;;  %v6251_v43 = vadd.s32 18, %v17891_v6  ;;  %v6281_v50 = vmul.f32 %v17869_v28, %v6018_v53  ;;  %v6284_v57 = vmul.f32 %v17869_v28, %v12985_v16  ;;  %v6021_v29 = vpop.f32.mrb[19].mxu0 }
 0x2ae   : > { %13280 = vmatprep.subr.bf16.mxu1 %v14310_v0  ;;  %v6350_v18 = vrot.slane %v17940_v51, 4  ;;  %v6295_v7 = vadd.f32 %v17883_v21, %v6283_v55  ;;  %v6282_v35 = vmul.f32 %v17869_v28, %v6021_v29  ;;  %vm19353_vm4 = vcmp.lt.s32.totalorder %v17891_v6, 0 }
 0x2af   : > { %v6349_v33 = vrot.slane %v6337_v10, 4  ;;  %v6293_v54 = vadd.f32 %v17883_v21, %v6281_v50  ;;  %vm17971_vm2 = vmand %vm19353_vm4, %vm6215_vm5  ;;  %vm6214_vm15 = vcmp.ne.s32.totalorder %v17948_v38, 0  ;;  %vm19356_vm14 = vcmask 1043456  }
 0x2b0   : > { %vm19357_vm9 = vcmask 261124   ;;  %v6296_v41 = vadd.f32 %v17883_v21, %v6284_v57  ;;  %vm19358_vm10 = vcmp.ne.s32.totalorder %v17915_v8, 0  ;;  %vm19359_vm13 = vcmp.lt.s32.totalorder %v17915_v8, 0 }
 0x2b1   : > { %13281 = vmatpush3.bf16.msra.mxu1 %v14310_v0  ;;  %v6351_v56 = vsel %vm19356_vm14, %v6349_v33, %v6350_v18  ;;  %6367 = vst.msk [vmem:[#allocation2 + $0x68] sm:$0xf0] %vm19357_vm9, %v6349_v33  ;;  %vm17986_vm4 = vmand %vm19359_vm13, %vm19358_vm10  ;;  %v6249_v19 = vadd.s32 18, %v17915_v8  ;;  %v6252_v62 = vadd.s32 18, %v17927_v25  ;;  %vm19362_vm5 = vcmask 261120  }
 0x2b2   : > { %13294 = vmatprep.subr.bf16.mxu1 %v17956_v49  ;;  %6368 = vst.msk [vmem:[#allocation2 + $0x70] sm:$0xff] %vm19362_vm5, %v6351_v56  ;;  %v6294_v36 = vadd.f32 %v17883_v21, %v6282_v35  ;;  %vm19363_vm9 = vcmp.ne.s32.totalorder %v17927_v25, 0  ;;  %vm19364_vm14 = vcmp.lt.s32.totalorder %v17927_v25, 0  ;;  %vm19367_vm10 = vsmask.f32 2304  ;;  %vm19368_vm13 = vmmov %vm19362_vm5 }
 0x2b3   : > { %vm17999_vm12 = vmand %vm19364_vm14, %vm19363_vm9  ;;  %v7766_v12 = vsel %vm19367_vm10, %v17821_v2, %v7765_v3  ;;  %v6250_v0 = vadd.s32 18, %v17948_v38  ;;  %v18006_v1 = vrot.slane %v8980_v45, 5  ;;  %v6331_v14 = vsel %vm17897_vm7, %v6295_v7, 0.0 }
 0x2b4   : > { %v6332_v58 = vsel %vm17901_vm11, %v6296_v41, 0.0  ;;  %13127 = vmatmul.mubr.msk.bf16.gmra.mrb[16].mxu1 %vm19368_vm13, %v17819_v5  ;;  %v6263_v4 = vsel %vm17971_vm2, %v6251_v43, %v17891_v6  ;;  %vm19369_vm5 = vcmp.lt.s32.totalorder %v17948_v38, 0  ;;  %v18885_v45 = vshll.u32 %v17893_v42, 16  ;;  %vm19372_vm2 = vmmov %vm19368_vm13  ;;  %v12988_v6 = vpop.f32.mrb[20].mxu0 }
 0x2b5   : > { %vm18021_vm9 = vmand %vm19369_vm5, %vm6214_vm15  ;;  %v6329_v3 = vsel %vm17907_vm8, %v6293_v54, 0.0  ;;  %v18028_v31 = vpack.c.bf16 %v6332_v58, %v6331_v14  ;;  %v6330_v5 = vsel %vm17922_vm1, %v6294_v36, 0.0  ;;  %13130 = vmatprep.mubr.msk.bf16.mxu1 %vm19372_vm2, %v17861_v24  ;;  %v8987_v61 = vrot.slane %v18886_v60, 4  ;;  %v6034_v53 = vpop.f32.mrb[21].mxu0 }
 0x2b6   : > { %v6339_v10 = vpack.c.bf16 %v6330_v5, %v6329_v3  ;;  %v6287_v55 = vmul.f32 %v17869_v28, %v12988_v6  ;;  %v6261_v43 = vsel %vm17986_vm4, %v6249_v19, %v17915_v8  ;;  %v6264_v50 = vsel %vm17999_vm12, %v6252_v62, %v17927_v25  ;;  %v12989_v7 = vpop.f32.mrb[22].mxu0  ;;  %vm19387_vm5 = vmmov %vm19372_vm2  ;;  %v18093_v6 = vld [vmem:[#allocation2 + $0x58] sm:$0xff] }
 0x2b7   : > { %v6354_v16 = vrot.slane %v18028_v31, 4  ;;  %vm18044_vm15 = vcmp.lt.s32.totalorder %v6263_v4, 16  ;;  %v19373_v24 = vmov 0  ;;  %v6285_v33 = vmul.f32 %v17869_v28, %v6034_v53  ;;  %v6037_v35 = vpop.f32.mrb[23].mxu0 }
 0x2b8   : > { %v19374_v24 = vsel %vm18044_vm15, 4294967295, %v19373_v24  ;;  %v6262_v57 = vsel %vm18021_vm9, %v6250_v0, %v17948_v38  ;;  %v6352_v29 = vrot.slane %v6339_v10, 4  ;;  %v6299_v8 = vadd.f32 %v17883_v21, %v6287_v55  ;;  %v18068_v19 = vld [vmem:[#allocation2 + $0x68] sm:$0xff]  ;;  %vm19388_vm9 = vmmov %vm19372_vm2 }
 0x2b9   : > { %19375 = vst [vmem:[#allocation6_spill] sm:$0xff] %v19374_v24  ;;  %v6288_v54 = vmul.f32 %v17869_v28, %v12989_v7  ;;  %v8990_v25 = vrot.slane %v18885_v45, 5  ;;  %vm18058_vm12 = vcmp.lt.s32.totalorder %v6261_v43, 16  ;;  %v19376_v56 = vmov 0  ;;  %v8800_v62 = vld [vmem:[#allocation2 + $0x68] sm:$0x1f] }
 0x2ba   : > { %v19377_v56 = vsel %vm18058_vm12, 4294967295, %v19376_v56  ;;  %v6297_v41 = vadd.f32 %v17883_v21, %v6285_v33  ;;  %vm18063_vm4 = vcmp.lt.s32.totalorder %v6264_v50, 16  ;;  %v19379_v52 = vmov 0  ;;  %v18079_v58 = vld [vmem:[#allocation2 + $0x70] sm:$0xff] }
 0x2bb   : > { %19378 = vst [vmem:[#allocation7_spill] sm:$0xff] %v19377_v56  ;;  %v19380_v52 = vsel %vm18063_vm4, 4294967295, %v19379_v52  ;;  %v6286_v38 = vmul.f32 %v17869_v28, %v6037_v35  ;;  %vm19382_vm14 = vcmask 1043456   ;;  %v6300_v0 = vadd.f32 %v17883_v21, %v6288_v54 }
 0x2bc   : > { %19381 = vst [vmem:[#allocation17_spill] sm:$0xff] %v19380_v52  ;;  %v6353_v36 = vsel %vm19382_vm14, %v6350_v18, %v6352_v29  ;;  %vm19383_vm10 = vmmov %vm19382_vm14  ;;  %vm18075_vm13 = vcmp.lt.s32.totalorder %v6262_v57, 16  ;;  %v19384_v14 = vmov 0  ;;  %v6335_v28 = vsel %vm18044_vm15, %v6299_v8, 0.0  ;;  %13131 = vmatmul.mubr.msk.bf16.gmra.mrb[20].mxu1 %vm19372_vm2, %v7766_v12 }
 0x2bd   : > { %v6355_v23 = vsel %vm19383_vm10, %v6352_v29, %v6354_v16  ;;  %v19385_v14 = vsel %vm18075_vm13, 4294967295, %v19384_v14  ;;  %6369 = vst.msk [vmem:[#allocation2 + $0x78] sm:$0xff] %vm19387_vm5, %v6353_v36  ;;  %v6298_v51 = vadd.f32 %v17883_v21, %v6286_v38  ;;  %v9592_v18 = vrot.slane %v18068_v19, 3  ;;  %vm19390_vm10 = vmmov %vm19372_vm2 }
 0x2be   : > { %19386 = vst [vmem:[#allocation10_spill] sm:$0xff] %v19385_v14  ;;  %6370 = vst.msk [vmem:[#allocation2 + $0x80] sm:$0xff] %vm19388_vm9, %v6355_v23  ;;  %v18884_v4 = vshrl.u32 %v18056_v30, 16  ;;  %v6333_v2 = vsel %vm18058_vm12, %v6297_v41, 0.0  ;;  %v6336_v3 = vsel %vm18063_vm4, %v6300_v0, 0.0  ;;  %v8834_v31 = vshrl.u32 %v8800_v62, 16 }
 0x2bf   : > { %v8837_v5 = vshll.u32 %v8800_v62, 16  ;;  %v6342_v10 = vpack.c.bf16 %v6336_v3, %v6335_v28  ;;  %v6334_v21 = vsel %vm18075_vm13, %v6298_v51, 0.0  ;;  %vm19389_vm14 = vcmask 1044480   ;;  %v18111_v62 = vld [vmem:[#allocation2 + $0x60] sm:$0xff] }
 0x2c0   : > { %v9593_v55 = vsel %vm19389_vm14, %v9591_v32, %v9592_v18  ;;  %v9594_v53 = vrot.slane %v18079_v58, 3  ;;  %v6341_v43 = vpack.c.bf16 %v6334_v21, %v6333_v2  ;;  %v8836_v50 = vrot.slane %v8834_v31, 4  ;;  %vm19392_vm9 = vmmov %vm19389_vm14  ;;  %v9568_v3 = vld [vmem:[#allocation2 + $0x60] sm:$0xfc] }
 0x2c1   : > { %13282 = vmatprep.mubr.msk.bf16.mxu1 %vm19390_vm10, %v9593_v55  ;;  %v8839_v33 = vrot.slane %v8837_v5, 5  ;;  %v18883_v12 = vshll.u32 %v18056_v30, 16  ;;  %v6358_v7 = vrot.slane %v6342_v10, 4  ;;  %v8991_v57 = vor.u32 %v8990_v25, %v8987_v61  ;;  %v18146_v21 = vld [vmem:[%s18772_s2 + $0x20] sm:$0xff]  }
 0x2c2   : > { %v18882_v29 = vshrl.u32 %v18093_v6, 16  ;;  %v18881_v8 = vshll.u32 %v18093_v6, 16  ;;  %v6356_v54 = vrot.slane %v6341_v43, 4  ;;  %vm19391_vm5 = vcmask 257024  }
 0x2c3   : > { %v8840_v35 = vor.u32 %v8839_v33, %v8836_v50  ;;  %6373 = vst.msk [vmem:[#allocation2 + $0x98] sm:$0xf] %vm19391_vm5, %v6358_v7  ;;  %v9595_v32 = vsel %vm19392_vm9, %v9592_v18, %v9594_v53  ;;  %v8983_v41 = vor.u32 %v18006_v1, %v17919_v9  ;;  %v8996_v38 = vrot.slane %v18884_v4, 4  ;;  %v14314_v9 = vld [vmem:[%s18772_s2 + $0x8] sm:$0xff]  }
 0x2c4   : > { %vm19393_vm2 = vcmask 1043456   ;;  %vm19395_vm10 = vsmask.f32 3328  ;;  %v18117_v23 = vld [vmem:[#allocation2 + $0x78] sm:$0xff]  ;;  %v8999_v28 = vrot.slane %v18883_v12, 5  ;;  %vm19396_vm5 = vcmask 261120  }
 0x2c5   : > { %v6357_v61 = vsel %vm19393_vm2, %v6354_v16, %v6356_v54  ;;  %vm19394_vm14 = vmmov %vm19393_vm2  ;;  %v8841_v36 = vsel %vm19395_vm10, %v17501_v27, %v8840_v35  ;;  %v18119_v0 = vld [vmem:[#allocation2 + $0x80] sm:$0xff]  ;;  %v9596_v27 = vrot.slane %v18117_v23, 3  ;;  %v9005_v16 = vrot.slane %v18882_v29, 4 }
 0x2c6   : > { %v6359_v25 = vsel %vm19394_vm14, %v6356_v54, %v6358_v7  ;;  %6371 = vst.msk [vmem:[#allocation2 + $0x88] sm:$0xff] %vm19396_vm5, %v6357_v61  ;;  %vm19397_vm9 = vmmov %vm19396_vm5  ;;  %v9008_v51 = vrot.slane %v18881_v8, 5  ;;  %v9598_v2 = vrot.slane %v18119_v0, 3  ;;  %v18880_v31 = vshrl.u32 %v18111_v62, 16 }
 0x2c7   : > { %6372 = vst.msk [vmem:[#allocation2 + $0x90] sm:$0xff] %vm19397_vm9, %v6359_v25  ;;  %vm19398_vm2 = vmmov %vm19396_vm5  ;;  %vm19402_vm5 = vcmask 1044480   ;;  %v18879_v5 = vshll.u32 %v18111_v62, 16  ;;  %v9000_v10 = vor.u32 %v8999_v28, %v8996_v38  ;;  %v9716_v43 = vshrl.u32 %v9568_v3, 16  ;;  %v14317_v38 = vld [vmem:[%s18772_s2 + $0x78] sm:$0xff]  }
 0x2c8   : > { %13227 = vmatmul.mubr.msk.bf16.gmra.mrb[32].mxu0 %vm19398_vm2, %v8841_v36  ;;  %vm19399_vm14 = vmmov %vm19395_vm10  ;;  %v9597_v18 = vsel %vm19402_vm5, %v9594_v53, %v9596_v27  ;;  %v9009_v55 = vor.u32 %v9008_v51, %v9005_v16  ;;  %v18152_v53 = vshll.u32 %v18068_v19, 16  ;;  %v9719_v33 = vshll.u32 %v9568_v3, 16  ;;  %v18173_v28 = vld [vmem:[#allocation2 + $0x70] sm:$0x1f] }
 0x2c9   : > { %v8992_v1 = vsel %vm19399_vm14, %v8983_v41, %v8991_v57  ;;  %vm19400_vm10 = vmmov %vm19398_vm2  ;;  %v9014_v7 = vrot.slane %v18880_v31, 4  ;;  %v9017_v54 = vrot.slane %v18879_v5, 5  ;;  %v10264_v4 = vrot.slane %v18117_v23, 4 }
 0x2ca   : > { %13283 = vmatmul.mubr.msk.bf16.vlgmr.msra.gmra.mrb[24].mxu1 %vm19400_vm10, %v9595_v32  ;;  %vm19401_vm4 = vmmov %vm19398_vm2 }
 0x2cb   : > { %13234 = vmatprep.mubr.msk.bf16.mxu0 %vm19401_vm4, %v8992_v1  ;;  %13295 = vmatpush3.bf16.msra.mxu1 %v17956_v49  ;;  %vm19403_vm9 = vmmov %vm19398_vm2  ;;  %v18149_v49 = vshrl.u32 %v18068_v19, 16  ;;  %v9018_v3 = vor.u32 %v9017_v54, %v9014_v7  ;;  %v18197_v7 = vshrl.u32 %v18117_v23, 16  ;;  %v18200_v54 = vshll.u32 %v18117_v23, 16 }
 0x2cc   : > { %13286 = vmatprep.mubr.msk.bf16.mxu1 %vm19403_vm9, %v9597_v18  ;;  %13296 = vmatprep.subr.bf16.mxu1 %v14314_v9  ;;  %vm19404_vm4 = vmmov %vm19402_vm5  ;;  %v9721_v18 = vrot.slane %v9719_v33, 3 }
 0x2cd   : > { %v9599_v50 = vsel %vm19404_vm4, %v9596_v27, %v9598_v2  ;;  %vm19405_vm2 = vmmov %vm19399_vm14  ;;  %v18160_v32 = vld [vmem:[#allocation2 + $0x88] sm:$0xff]  ;;  %v9023_v36 = vrot.slane %v18149_v49, 4  ;;  %v9726_v1 = vrot.slane %v18149_v49, 2  ;;  %v9729_v27 = vrot.slane %v18152_v53, 3 }
 0x2ce   : > { %v9001_v35 = vsel %vm19405_vm2, %v8991_v57, %v9000_v10  ;;  %v18162_v41 = vld [vmem:[#allocation2 + $0x90] sm:$0x7]  ;;  %vm19406_vm14 = vmmov %vm19403_vm9  ;;  %v9600_v25 = vrot.slane %v18160_v32, 3  ;;  %v9026_v57 = vrot.slane %v18152_v53, 5  ;;  %v10414_v40 = vrot.slane %v18197_v7, 4 }
 0x2cf   : > { %13297 = vmatpush3.bf16.msra.mxu1 %v14314_v9  ;;  %vm19407_vm10 = vmmov %vm19405_vm2  ;;  %v9718_v9 = vrot.slane %v9716_v43, 2  ;;  %v9602_v51 = vrot.slane %v18162_v41, 3  ;;  %v9030_v43 = vshrl.u32 %v18173_v28, 16  ;;  %v9769_v52 = vshrl.u32 %v18162_v41, 16 }
 0x2d0   : > { %13310 = vmatprep.subr.bf16.mxu1 %v18146_v21  ;;  %13235 = vmatmul.mubr.msk.bf16.vlgmr.msra.gmra.mrb[24].mxu0 %vm19406_vm14, %v9001_v35  ;;  %v9010_v61 = vsel %vm19407_vm10, %v9000_v10, %v9009_v55  ;;  %vm19408_vm5 = vmmov %vm19403_vm9  ;;  %v9601_v16 = vsel %vm19404_vm4, %v9598_v2, %v9600_v25  ;;  %v18184_v10 = vshrl.u32 %v18079_v58, 16  ;;  %v9033_v35 = vshll.u32 %v18173_v28, 16  ;;  %v18194_v2 = vld [vmem:[%s18772_s2 + $0x80] sm:$0xff]  }
 0x2d1   : > { %vm19409_vm9 = vmmov %vm19408_vm5  ;;  %13247 = vmatpush3.bf16.msra.mxu0 %v17499_v11  ;;  %v9027_v33 = vor.u32 %v9026_v57, %v9023_v36  ;;  %v9730_v11 = vor.u32 %v9729_v27, %v9726_v1  ;;  %v9019_v5 = vsel %vm19407_vm10, %v9009_v55, %v9018_v3  ;;  %v9032_v29 = vrot.slane %v9030_v43, 4  ;;  %v18214_v57 = vld [vmem:[#allocation2 + $0x40] sm:$0xe0] }
 0x2d2   : > { %13287 = vmatmul.mubr.msk.bf16.gmra.mrb[28].mxu1 %vm19408_vm5, %v9599_v50  ;;  %13238 = vmatprep.mubr.msk.bf16.mxu0 %vm19409_vm9, %v9010_v61  ;;  %vm19410_vm2 = vmmov %vm19408_vm5  ;;  %v18187_v50 = vshll.u32 %v18079_v58, 16  ;;  %v9735_v31 = vrot.slane %v18184_v10, 2  ;;  %v9035_v12 = vrot.slane %v9033_v35, 5  ;;  %v9744_v55 = vrot.slane %v18197_v7, 2 }
 0x2d3   : > { %13290 = vmatprep.mubr.msk.bf16.mxu1 %vm19410_vm2, %v9601_v16  ;;  %13248 = vmatprep.subr.bf16.mxu0 %v14317_v38  ;;  %vm19411_vm14 = vmmov %vm19404_vm4  ;;  %v9722_v16 = vor.u32 %v9721_v18, %v9718_v9  ;;  %v9174_v9 = vrot.slane %v17893_v42, 5  ;;  %v9173_v18 = vrot.slane %v18214_v57, 5  ;;  %v18227_v35 = vshrl.u32 %v18160_v32, 16 }
 0x2d4   : > { %v9603_v61 = vsel %vm19411_vm14, %v9600_v25, %v9602_v51  ;;  %v9738_v8 = vrot.slane %v18187_v50, 3  ;;  %vm19412_vm5 = vmmov %vm19410_vm2  ;;  %v9036_v27 = vor.u32 %v9035_v12, %v9032_v29  ;;  %v18220_v51 = vshrl.u32 %v18119_v0, 16 }
 0x2d5   : > { %13249 = vmatpush3.bf16.msra.mxu0 %v14317_v38  ;;  %vm19413_vm9 = vmmov %vm19407_vm10  ;;  %v9747_v38 = vrot.slane %v18200_v54, 3  ;;  %v9178_v12 = vrot.slane %v18093_v6, 5  ;;  %v9894_v29 = vshrl.u32 %v17844_v20, 16  ;;  %v10410_v24 = vrot.slane %v18184_v10, 4 }
 0x2d6   : > { %13262 = vmatprep.subr.bf16.mxu0 %v18194_v2  ;;  %v9028_v36 = vsel %vm19413_vm9, %v9018_v3, %v9027_v33  ;;  %vm19414_vm4 = vmmov %vm19410_vm2  ;;  %vm19415_vm2 = vsmask.f32 5376  ;;  %v9739_v1 = vor.u32 %v9738_v8, %v9735_v31  ;;  %v18224_v3 = vshll.u32 %v18119_v0, 16 }
 0x2d7   : > { %v9731_v25 = vsel %vm19415_vm2, %v9722_v16, %v9730_v11  ;;  %vm19416_vm14 = vmmov %vm19414_vm4  ;;  %v9748_v43 = vor.u32 %v9747_v38, %v9744_v55  ;;  %v14318_v55 = vld [vmem:[%s18772_s2 + $0x28] sm:$0xff]   ;;  %v9897_v38 = vshll.u32 %v17844_v20, 16  ;;  %v18257_v60 = vrot.slane %v9894_v29, 3 }
 0x2d8   : > { %13239 = vmatmul.mubr.msk.bf16.gmra.mrb[28].mxu0 %vm19412_vm5, %v9019_v5  ;;  %vm19417_vm10 = vmmov %vm19414_vm4  ;;  %v9176_v5 = vrot.slane %v18056_v30, 5  ;;  %vm19418_vm5 = vcmask 1042432   ;;  %v10411_v56 = vrot.slane %v18187_v50, 5  ;;  %v9318_v13 = vshll.u32 %v18214_v57, 16 }
 0x2d9   : > { %13242 = vmatprep.mubr.msk.bf16.mxu0 %vm19416_vm14, %v9028_v36  ;;  %v9175_v16 = vsel %vm19418_vm5, %v9173_v18, %v9174_v9  ;;  %vm19419_vm9 = vmmov %vm19418_vm5  ;;  %v18887_v18 = vrot.slane %v18079_v58, 4  ;;  %v9771_v48 = vrot.slane %v9769_v52, 2 }
 0x2da   : > { %13291 = vmatmul.mubr.msk.bf16.gmra.mrb[32].mxu1 %vm19414_vm4, %v9603_v61  ;;  %v18230_v61 = vshll.u32 %v18160_v32, 16  ;;  %v9177_v8 = vsel %vm19419_vm9, %v9174_v9, %v9176_v5  ;;  %vm19420_vm4 = vmmov %vm19415_vm2  ;;  %vm19421_vm2 = vsmask.f32 3328  ;;  %v9756_v9 = vrot.slane %v18224_v3, 3 }
 0x2db   : > { %13298 = vmatprep.mubr.msk.bf16.mxu1 %vm19417_vm10, %v9731_v25  ;;  %v9740_v31 = vsel %vm19420_vm4, %v9730_v11, %v9739_v1  ;;  %v9037_v36 = vsel %vm19421_vm2, %v9027_v33, %v9036_v27  ;;  %v9753_v25 = vrot.slane %v18220_v51, 2  ;;  %vm19422_vm14 = vmmov %vm19417_vm10  ;;  %v10266_v11 = vrot.slane %v18119_v0, 4 }
 0x2dc   : > { %vm19423_vm5 = vmmov %vm19420_vm4  ;;  %v9762_v27 = vrot.slane %v18227_v35, 2  ;;  %v9765_v20 = vrot.slane %v18230_v61, 3  ;;  %vm19426_vm2 = vcmask 1042432  }
 0x2dd   : > { %v9749_v33 = vsel %vm19423_vm5, %v9739_v1, %v9748_v43  ;;  %vm19424_vm9 = vmmov %vm19417_vm10  ;;  %v9179_v45 = vsel %vm19426_vm2, %v9176_v5, %v9178_v12 }
 0x2de   : > { %vm19425_vm4 = vmmov %vm19424_vm9  ;;  %v9766_v14 = vor.u32 %v9765_v20, %v9762_v27  ;;  %v14321_v27 = vld [vmem:[%s18772_s2 + $0x88] sm:$0xff]   ;;  %v18296_v20 = vor.u32 %v10411_v56, %v10410_v24  ;;  %v9902_v24 = vrot.slane %v18152_v53, 4 }
 0x2df   : > { %vm19431_vm2 = vmmov %vm19425_vm4 }
 0x2e0   : > { %13243 = vmatmul.mubr.msk.bf16.gmra.mrb[32].mxu0 %vm19422_vm14, %v9037_v36  ;;  %v18894_v36 = vrot.slane %v18160_v32, 4  ;;  %vm19427_vm14 = vcmask 1043456  }
 0x2e1   : > { %13250 = vmatprep.mubr.msk.bf16.mxu0 %vm19424_vm9, %v9175_v16  ;;  %v18263_v1 = vsel %vm19427_vm14, %v18887_v18, %v10264_v4  ;;  %v18265_v16 = vrot.slane %v9897_v38, 4  ;;  %v9757_v18 = vor.u32 %v9756_v9, %v9753_v25  ;;  %v9772_v38 = vshll.u32 %v18162_v41, 16 }
 0x2e2   : > { %13299 = vmatmul.mubr.msk.bf16.vlgmr.msra.gmra.mrb[24].mxu1 %vm19417_vm10, %v9740_v31  ;;  %v9180_v31 = vrot.slane %v18111_v62, 5  ;;  %vm19428_vm10 = vmmov %vm19427_vm14  ;;  %v10419_v25 = vrot.slane %v18224_v3, 5  ;;  %v10422_v9 = vrot.slane %v18227_v35, 4  ;;  %v9901_v41 = vrot.slane %v18149_v49, 3 }
 0x2e3   : > { %13302 = vmatprep.mubr.msk.bf16.mxu1 %vm19425_vm4, %v9749_v33  ;;  %13311 = vmatpush3.bf16.msra.mxu1 %v18146_v21  ;;  %v18270_v33 = vld [vmem:[%s18772_s2 + $0x30] sm:$0xff]   ;;  %v9315_v21 = vshrl.u32 %v18214_v57, 16  ;;  %v18274_v5 = vsel %vm19428_vm10, %v10264_v4, %v10266_v11  ;;  %vm19429_vm5 = vmmov %vm19428_vm10  ;;  %v10415_v4 = vrot.slane %v18200_v54, 5  ;;  %v10423_v57 = vrot.slane %v18230_v61, 5 }
 0x2e4   : > { %13312 = vmatprep.subr.bf16.mxu1 %v14318_v55  ;;  %v18279_v29 = vsel %vm19429_vm5, %v10266_v11, %v18894_v36  ;;  %v10418_v11 = vrot.slane %v18220_v51, 4  ;;  %vm19430_vm9 = vsmask.f32 5376  ;;  %v9774_v59 = vrot.slane %v9772_v38, 3  ;;  %vm19433_vm10 = vmmov %vm19431_vm2 }
 0x2e5   : > { %v18298_v36 = vor.u32 %v10415_v4, %v10414_v40  ;;  %vm19432_vm14 = vmmov %vm19430_vm9  ;;  %vm19434_vm5 = vsmask.f32 3328  ;;  %v18312_v56 = vor.u32 %v10423_v57, %v10422_v9  ;;  %v9182_v38 = vrot.slane %v18068_v19, 5 }
 0x2e6   : > { %v10420_v47 = vor.u32 %v10419_v25, %v10418_v11  ;;  %v9767_v34 = vsel %vm19432_vm14, %v9757_v18, %v9766_v14  ;;  %v19439_v4 = vshll.u32 %v17893_v42, 16  ;;  %v9320_v9 = vrot.slane %v9318_v13, 6 }
 0x2e7   : > { %13313 = vmatpush3.bf16.msra.mxu1 %v14318_v55  ;;  %v9758_v55 = vsel %vm19430_vm9, %v9748_v43, %v9757_v18  ;;  %v18310_v40 = vsel %vm19434_vm5, %v18296_v20, %v18298_v36  ;;  %vm19435_vm9 = vmmov %vm19431_vm2  ;;  %v9317_v43 = vrot.slane %v9315_v21, 5  ;;  %v9903_v21 = vor.u32 %v9902_v24, %v9901_v41 }
 0x2e8   : > { %13326 = vmatprep.subr.bf16.mxu1 %v18270_v33  ;;  %13251 = vmatmul.mubr.msk.bf16.vlgmr.msra.gmra.mrb[24].mxu0 %vm19425_vm4, %v9177_v8  ;;  %vm19436_vm4 = vcmask 1042432   ;;  %v19437_v8 = vshrl.u32 %v17893_v42, 16  ;;  %v9323_v11 = vrot.slane %v19439_v4, 6  ;;  %v9905_v57 = vrot.slane %v18184_v10, 3 }
 0x2e9   : > { %13254 = vmatprep.mubr.msk.bf16.mxu0 %vm19433_vm10, %v9179_v45  ;;  %v9181_v52 = vsel %vm19436_vm4, %v9178_v12, %v9180_v31  ;;  %13263 = vmatpush3.bf16.msra.mxu0 %v18194_v2  ;;  %v9775_v12 = vor.u32 %v9774_v59, %v9771_v48  ;;  %v9900_v42 = vor.u32 %v18265_v16, %v18257_v60  ;;  %vm19442_vm10 = vmmov %vm19436_vm4  ;;  %v9910_v13 = vrot.slane %v18200_v54, 4  ;;  %v18345_v59 = vld [vmem:[#allocation2 + $0x90] sm:$0xff] }
 0x2ea   : > { %13303 = vmatmul.mubr.msk.bf16.gmra.mrb[28].mxu1 %vm19431_vm2, %v9758_v55  ;;  %v9322_v18 = vrot.slane %v19437_v8, 5  ;;  %vm19438_vm2 = vmmov %vm19434_vm5  ;;  %13264 = vmatprep.subr.bf16.mxu0 %v14321_v27  ;;  %v9906_v55 = vrot.slane %v18187_v50, 4  ;;  %v9183_v19 = vsel %vm19442_vm10, %v9180_v31, %v9182_v38  ;;  %vm19443_vm5 = vsmask.f32 5376 }
 0x2eb   : > { %13306 = vmatprep.mubr.msk.bf16.mxu1 %vm19435_vm9, %v9767_v34  ;;  %v18321_v45 = vsel %vm19438_vm2, %v18298_v36, %v10420_v47  ;;  %v19440_v34 = vshrl.u32 %v18056_v30, 16  ;;  %vm19441_vm14 = vmmov %vm19438_vm2  ;;  %v9776_v4 = vsel %vm19443_vm5, %v9766_v14, %v9775_v12  ;;  %vm19445_vm2 = vsmask.f32 4352 }
 0x2ec   : > { %v18332_v2 = vsel %vm19441_vm14, %v10420_v47, %v18312_v56  ;;  %v18339_v8 = vor.u32 %v9323_v11, %v9322_v18  ;;  %v9909_v47 = vrot.slane %v18197_v7, 3  ;;  %vm19444_vm4 = vmmov %vm19435_vm9  ;;  %v9904_v48 = vsel %vm19445_vm2, %v9900_v42, %v9903_v21 }
 0x2ed   : > { %v18328_v25 = vrot.slane %v19440_v34, 5  ;;  %13265 = vmatpush3.bf16.msra.mxu0 %v14321_v27  ;;  %vm19446_vm14 = vmmov %vm19444_vm4  ;;  %v19447_v60 = vshll.u32 %v18056_v30, 16  ;;  %v19448_v50 = vshrl.u32 %v18093_v6, 16  ;;  %v18355_v31 = vor.u32 %v9906_v55, %v9905_v57 }
 0x2ee   : > { %vm19449_vm10 = vmmov %vm19444_vm4  ;;  %v9184_v16 = vrot.slane %v18173_v28, 5  ;;  %v9321_v41 = vor.u32 %v9320_v9, %v9317_v43  ;;  %v10771_v27 = vrot.slane %v18117_v23, 5  ;;  %v10773_v24 = vrot.slane %v18119_v0, 5 }
 0x2ef   : > { %v9327_v10 = vrot.slane %v19447_v60, 6  ;;  %v9330_v14 = vrot.slane %v19448_v50, 5  ;;  %v18899_v18 = vrot.slane %v18345_v59, 5  ;;  %v9911_v30 = vor.u32 %v9910_v13, %v9909_v47  ;;  %v14322_v47 = vld [vmem:[%s18772_s2 + $0x38] sm:$0xff]  }
 0x2f0   : > { %13255 = vmatmul.mubr.msk.bf16.gmra.mrb[28].mxu0 %vm19435_vm9, %v9181_v52  ;;  %v10775_v52 = vrot.slane %v18160_v32, 5  ;;  %vm19450_vm5 = vsmask.f32 2304  ;;  %v19451_v34 = vshll.u32 %v18093_v6, 16  ;;  %v18367_v57 = vshrl.u32 %v18345_v59, 16 }
 0x2f1   : > { %13258 = vmatprep.mubr.msk.bf16.mxu0 %vm19446_vm14, %v9183_v19  ;;  %v9325_v11 = vsel %vm19450_vm5, %v9321_v41, %v18339_v8  ;;  %v18370_v28 = vshll.u32 %v18345_v59, 16  ;;  %vm19452_vm9 = vcmask 1042432   ;;  %vm19455_vm14 = vsmask.f32 4352 }
 0x2f2   : > { %13307 = vmatmul.mubr.msk.bf16.gmra.mrb[32].mxu1 %vm19444_vm4, %v9776_v4  ;;  %v9331_v12 = vrot.slane %v19451_v34, 6  ;;  %v18375_v0 = vsel %vm19452_vm9, %v10771_v27, %v10773_v24  ;;  %vm19453_vm4 = vmmov %vm19452_vm9  ;;  %v9908_v6 = vsel %vm19455_vm14, %v9903_v21, %v18355_v31  ;;  %v9913_v55 = vrot.slane %v18220_v51, 3 }
 0x2f3   : > { %13314 = vmatprep.mubr.msk.bf16.mxu1 %vm19449_vm10, %v9904_v48  ;;  %v18378_v43 = vsel %vm19453_vm4, %v10773_v24, %v10775_v52  ;;  %vm19454_vm2 = vmmov %vm19453_vm4  ;;  %v9914_v42 = vrot.slane %v18224_v3, 4  ;;  %v9917_v19 = vrot.slane %v18227_v35, 3  ;;  %v10919_v13 = vrot.slane %v18197_v7, 5  ;;  %v9888_v7 = vld [vmem:[#allocation2 + $0x90] sm:$0xf] }
 0x2f4   : > { %v18383_v9 = vsel %vm19454_vm2, %v10775_v52, %v18899_v18  ;;  %vm19456_vm10 = vmmov %vm19454_vm2  ;;  %v10920_v48 = vrot.slane %v18200_v54, 6  ;;  %v10923_v60 = vrot.slane %v18220_v51, 5  ;;  %vm19457_vm5 = vcmask 261120  }
 0x2f5   : > { %v9185_v4 = vsel %vm19456_vm10, %v9182_v38, %v9184_v16  ;;  %v9918_v21 = vrot.slane %v18230_v61, 4  ;;  %v10924_v50 = vrot.slane %v18224_v3, 6  ;;  %v10927_v41 = vrot.slane %v18227_v35, 5  ;;  %vm19458_vm9 = vmmov %vm19457_vm5  ;;  %v10053_v3 = vld [vmem:[#allocation2 + $0x68] sm:$0xf8] }
 0x2f6   : > { %v10928_v38 = vrot.slane %v18230_v61, 6  ;;  %vm19459_vm4 = vmmov %vm19455_vm14  ;;  %v18408_v54 = vor.u32 %v10920_v48, %v10919_v13  ;;  %v10931_v51 = vrot.slane %v18367_v57, 5  ;;  %v10932_v24 = vrot.slane %v18370_v28, 6 }
 0x2f7   : > { %v18405_v16 = vsel %vm19459_vm4, %v18355_v31, %v9911_v30  ;;  %vm19460_vm2 = vmmov %vm19457_vm5  ;;  %v10925_v35 = vor.u32 %v10924_v50, %v10923_v60  ;;  %v9915_v52 = vor.u32 %v9914_v42, %v9913_v55  ;;  %v9328_v34 = vor.u32 %v9327_v10, %v18328_v25 }
 0x2f8   : > { %13259 = vmatmul.mubr.msk.bf16.gmra.mrb[32].mxu0 %vm19457_vm5, %v9185_v4  ;;  %vm19461_vm14 = vmmov %vm19460_vm2  ;;  %v10929_v61 = vor.u32 %v10928_v38, %v10927_v41  ;;  %v18419_v4 = vor.u32 %v10932_v24, %v10931_v51  ;;  %v9922_v13 = vshrl.u32 %v9888_v7, 16  ;;  %v9925_v48 = vshll.u32 %v9888_v7, 16  ;;  %v9309_v24 = vld [vmem:[#allocation2 + $0x70] sm:$0x3f] }
 0x2f9   : > { %13266 = vmatprep.mubr.msk.bf16.mxu0 %vm19460_vm2, %v9325_v11  ;;  %v14323_v11 = vld [vmem:[%s18772_s2 + $0x40] sm:$0xff]   ;;  %vm19462_vm10 = vsmask.f32 2304  ;;  %v9919_v55 = vor.u32 %v9918_v21, %v9917_v19  ;;  %v10065_v42 = vshrl.u32 %v10053_v3, 16  ;;  %v10068_v25 = vshll.u32 %v10053_v3, 16 }
 0x2fa   : > { %13315 = vmatmul.mubr.msk.bf16.vlgmr.msra.gmra.mrb[24].mxu1 %vm19458_vm9, %v9908_v6  ;;  %v9332_v6 = vor.u32 %v9331_v12, %v9330_v14  ;;  %v18423_v18 = vsel %vm19462_vm10, %v18408_v54, %v10925_v35  ;;  %vm19463_vm5 = vmmov %vm19462_vm10  ;;  %v19465_v14 = vshrl.u32 %v18111_v62, 16  ;;  %v9916_v60 = vsel %vm19459_vm4, %v9911_v30, %v9915_v52 }
 0x2fb   : > { %13318 = vmatprep.mubr.msk.bf16.mxu1 %vm19461_vm14, %v18405_v16  ;;  %13327 = vmatpush3.bf16.msra.mxu1 %v18270_v33  ;;  %v18426_v33 = vsel %vm19463_vm5, %v10925_v35, %v10929_v61  ;;  %vm19464_vm9 = vmmov %vm19463_vm5  ;;  %v19468_v38 = vshll.u32 %v18111_v62, 16  ;;  %vm19469_vm10 = vcmask 261120   ;;  %v9924_v21 = vrot.slane %v9922_v13, 3 }
 0x2fc   : > { %13328 = vmatprep.subr.bf16.mxu1 %v14322_v47  ;;  %v18430_v10 = vsel %vm19464_vm9, %v10929_v61, %v18419_v4  ;;  %v9334_v12 = vrot.slane %v19465_v14, 5  ;;  %vm19466_vm2 = vmmov %vm19463_vm5  ;;  %v9927_v7 = vrot.slane %v9925_v48, 4  ;;  %v9339_v51 = vrot.slane %v18152_v53, 6 }
 0x2fd   : > { %v9329_v50 = vsel %vm19466_vm2, %v18339_v8, %v9328_v34  ;;  %vm19467_vm14 = vmmov %vm19466_vm2  ;;  %v9335_v19 = vrot.slane %v19468_v38, 6  ;;  %v10067_v8 = vrot.slane %v10065_v42, 3  ;;  %v10070_v3 = vrot.slane %v10068_v25, 4  ;;  %v10059_v38 = vld [vmem:[#allocation2 + $0x98] sm:$0xf] }
 0x2fe   : > { %v9333_v41 = vsel %vm19467_vm14, %v9328_v34, %v9332_v6  ;;  %vm19470_vm5 = vmmov %vm19469_vm10  ;;  %v9343_v35 = vshrl.u32 %v9309_v24, 16  ;;  %v9346_v61 = vshll.u32 %v9309_v24, 16  ;;  %v9928_v34 = vor.u32 %v9927_v7, %v9924_v21 }
 0x2ff   : > { %13329 = vmatpush3.bf16.msra.mxu1 %v14322_v47  ;;  %v9338_v47 = vrot.slane %v18149_v49, 5  ;;  %vm19471_vm9 = vmmov %vm19459_vm4  ;;  %v9336_v62 = vor.u32 %v9335_v19, %v9334_v12  ;;  %v10071_v48 = vor.u32 %v10070_v3, %v10067_v8  ;;  %v14324_v12 = vld [vmem:[%s18772_s2 + $0x48] sm:$0xff]   ;;  %v14325_v19 = vld [vmem:[%s18772_s2 + $0x50] sm:$0xff]   ;;  %v10118_v7 = vshrl.u32 %v10059_v38, 16 }
 0x300   : > { %13342 = vmatprep.subr.bf16.mxu1 %v14323_v11  ;;  %13267 = vmatmul.mubr.msk.bf16.vlgmr.msra.gmra.mrb[24].mxu0 %vm19469_vm10, %v9329_v50  ;;  %v9920_v30 = vsel %vm19471_vm9, %v9915_v52, %v9919_v55  ;;  %vm19472_vm4 = vmmov %vm19470_vm5  ;;  %v9345_v53 = vrot.slane %v9343_v35, 5  ;;  %v9348_v14 = vrot.slane %v9346_v61, 6 }
 0x301   : > { %13270 = vmatprep.mubr.msk.bf16.mxu0 %vm19472_vm4, %v9333_v41  ;;  %vm19473_vm2 = vmmov %vm19472_vm4  ;;  %v9340_v13 = vor.u32 %v9339_v51, %v9338_v47  ;;  %v9337_v49 = vsel %vm19467_vm14, %v9332_v6, %v9336_v62  ;;  %v10111_v41 = vrot.slane %v18367_v57, 3  ;;  %v10121_v47 = vshll.u32 %v10059_v38, 16 }
 0x302   : > { %13319 = vmatmul.mubr.msk.bf16.gmra.mrb[28].mxu1 %vm19470_vm5, %v9916_v60  ;;  %vm19474_vm10 = vmmov %vm19471_vm9  ;;  %v9349_v25 = vor.u32 %v9348_v14, %v9345_v53  ;;  %v10120_v51 = vrot.slane %v10118_v7, 3  ;;  %v10272_v53 = vrot.slane %v10059_v38, 4 }
 0x303   : > { %13322 = vmatprep.mubr.msk.bf16.mxu1 %vm19473_vm2, %v9920_v30  ;;  %v9929_v50 = vsel %vm19474_vm10, %v9919_v55, %v9928_v34  ;;  %vm19475_vm5 = vmmov %vm19473_vm2 }
 0x304   : > { %vm19476_vm9 = vmmov %vm19467_vm14 }
 0x305   : > { %v9341_v52 = vsel %vm19476_vm9, %v9336_v62, %v9340_v13  ;;  %vm19477_vm4 = vmmov %vm19473_vm2  ;;  %v19489_v62 = vrot.slane %v18079_v58, 4  ;;  %v14327_v58 = vld [vmem:[%s18772_s2 + $0x60] sm:$0xff]  }
 0x306   : > { %vm19478_vm2 = vmmov %vm19474_vm10 }
 0x307   : > { %v10080_v42 = vsel %vm19478_vm2, %v10071_v48, %v18355_v31  ;;  %vm19479_vm15 = vmmov %vm19477_vm4  ;;  %v10114_v31 = vrot.slane %v18370_v28, 4 }
 0x308   : > { %13271 = vmatmul.mubr.msk.bf16.gmra.mrb[28].mxu0 %vm19475_vm5, %v9337_v49  ;;  %vm19480_vm13 = vmmov %vm19477_vm4 }
 0x309   : > { %13274 = vmatprep.mubr.msk.bf16.mxu0 %vm19479_vm15, %v9341_v52  ;;  %vm19481_vm12 = vmmov %vm19476_vm9  ;;  %v10115_v21 = vor.u32 %v10114_v31, %v10111_v41  ;;  %v10427_v52 = vrot.slane %v18370_v28, 5 }
 0x30a   : > { %13323 = vmatmul.mubr.msk.bf16.gmra.mrb[32].mxu1 %vm19477_vm4, %v9929_v50  ;;  %v9350_v6 = vsel %vm19481_vm12, %v9340_v13, %v9349_v25  ;;  %vm19482_vm14 = vmmov %vm19477_vm4  ;;  %v10562_v25 = vld [vmem:[#allocation2 + $0x70] sm:$0xf0] }
 0x30b   : > { %13330 = vmatprep.mubr.msk.bf16.mxu1 %vm19480_vm13, %v10080_v42  ;;  %vm19483_vm10 = vmmov %vm19477_vm4  ;;  %v10397_v42 = vld [vmem:[#allocation2 + $0x98] sm:$0x1f]  ;;  %v10577_v31 = vshll.u32 %v10562_v25, 16 }
 0x30c   : > { %vm19484_vm5 = vmmov %vm19477_vm4  ;;  %v10434_v41 = vshll.u32 %v10397_v42, 16 }
 0x30d   : > { %vm19485_vm15 = vmmov %vm19477_vm4 }
 0x30e   : > { %vm19486_vm12 = vmmov %vm19478_vm2  ;;  %v10436_v38 = vrot.slane %v10434_v41, 5 }
 0x30f   : > { %vm19487_vm13 = vmmov %vm19477_vm4 }
 0x310   : > { %13275 = vmatmul.mubr.msk.bf16.gmra.mrb[32].mxu0 %vm19482_vm14, %v9350_v6  ;;  %vm19488_vm9 = vmmov %vm19478_vm2  ;;  %vm19490_vm2 = vcmask 1043456  }
 0x311   : > { %vm19491_vm14 = vmmov %vm19477_vm4 }
 0x312   : > { %13331 = vmatmul.mubr.msk.bf16.vlgmr.msra.gmra.mrb[24].mxu1 %vm19483_vm10, %v18405_v16  ;;  %v10116_v16 = vsel %vm19486_vm12, %v9919_v55, %v10115_v21  ;;  %v14326_v55 = vld [vmem:[%s18772_s2 + $0x58] sm:$0xff]   ;;  %vm19492_vm10 = vmmov %vm19477_vm4 }
 0x313   : > { %13334 = vmatprep.mubr.msk.bf16.mxu1 %vm19484_vm5, %v9916_v60  ;;  %13343 = vmatpush3.bf16.msra.mxu1 %v14323_v11  ;;  %v10123_v60 = vrot.slane %v10121_v47, 4  ;;  %v10249_v11 = vld [vmem:[#allocation2 + $0x68] sm:$0xf0]  ;;  %vm19493_vm5 = vmmov %vm19477_vm4 }
 0x314   : > { %13344 = vmatprep.subr.bf16.mxu1 %v14324_v12  ;;  %v10261_v24 = vrot.slane %v10249_v11, 4  ;;  %v10403_v61 = vshrl.u32 %v10249_v11, 16  ;;  %v10406_v34 = vshll.u32 %v10249_v11, 16  ;;  %vm19496_vm12 = vmmov %vm19490_vm2 }
 0x315   : > { %v10124_v8 = vor.u32 %v10123_v60, %v10120_v51  ;;  %v18522_v60 = vld [vmem:[#allocation2 + $0x98] sm:$0xff] }
 0x316   : > { %v10263_v35 = vsel %vm19490_vm2, %v10261_v24, %v19489_v62  ;;  %v10408_v48 = vrot.slane %v10406_v34, 5  ;;  %v10621_v11 = vshll.u32 %v18522_v60, 16  ;;  %v14330_v24 = vld [vmem:[%s18772_s2 + $0x78] sm:$0xff]   ;;  %v14331_v62 = vld [vmem:[%s18772_s2 + $0x80] sm:$0xff]   ;;  %v10758_v34 = vld [vmem:[#allocation2 + $0x70] sm:$0xe0] }
 0x317   : > { %13345 = vmatpush3.bf16.msra.mxu1 %v14324_v12  ;;  %v10125_v3 = vsel %vm19488_vm9, %v10115_v21, %v10124_v8  ;;  %vm19498_vm9 = vmmov %vm19490_vm2  ;;  %vm19499_vm2 = vsmask.f32 3328  ;;  %v10431_v12 = vshrl.u32 %v10397_v42, 16  ;;  %v10579_v21 = vrot.slane %v10577_v31, 5  ;;  %v10568_v8 = vld [vmem:[#allocation2 + $0xa0] sm:$0x1f] }
 0x318   : > { %13358 = vmatprep.subr.bf16.mxu1 %v14325_v19  ;;  %v10912_v23 = vshrl.u32 %v10758_v34, 16 }
 0x319   : > { %v10433_v28 = vrot.slane %v10431_v12, 4 }
 0x31a   : > { %13335 = vmatmul.mubr.msk.bf16.gmra.mrb[28].mxu1 %vm19485_vm15, %v9920_v30  ;;  %v10270_v30 = vrot.slane %v18345_v59, 4  ;;  %vm19494_vm15 = vmmov %vm19477_vm4 }
 0x31b   : > { %13338 = vmatprep.mubr.msk.bf16.mxu1 %vm19487_vm13, %v10116_v16  ;;  %vm19497_vm13 = vmmov %vm19477_vm4  ;;  %v10437_v7 = vor.u32 %v10436_v38, %v10433_v28 }
 0x31c   : > { %v10273_v14 = vsel %vm19498_vm9, %v10270_v30, %v10272_v53  ;;  %vm19506_vm9 = vmmov %vm19499_vm2  ;;  %v10915_v53 = vshll.u32 %v10758_v34, 16 }
 0x322   : > { %13339 = vmatmul.mubr.msk.bf16.gmra.mrb[32].mxu1 %vm19477_vm4, %v10125_v3  ;;  %v10623_v3 = vrot.slane %v10621_v11, 5 }
 0x323   : > { %13346 = vmatprep.mubr.msk.bf16.mxu1 %vm19491_vm14, %v10263_v35  ;;  %vm19500_vm14 = vmmov %vm19477_vm4  ;;  %v10627_v35 = vshrl.u32 %v10568_v8, 16 }
 0x32a   : > { %13347 = vmatmul.mubr.msk.bf16.vlgmr.msra.gmra.mrb[24].mxu1 %vm19492_vm10, %v18263_v1  ;;  %v19495_v1 = vrot.slane %v18160_v32, 4  ;;  %v14328_v32 = vld [vmem:[%s18772_s2 + $0x68] sm:$0xff]   ;;  %vm19501_vm10 = vmmov %vm19477_vm4 }
 0x32b   : > { %13350 = vmatprep.mubr.msk.bf16.mxu1 %vm19493_vm5, %v18274_v5  ;;  %13359 = vmatpush3.bf16.msra.mxu1 %v14325_v19  ;;  %v10405_v5 = vrot.slane %v10403_v61, 4  ;;  %vm19502_vm5 = vmmov %vm19477_vm4 }
 0x32c   : > { %13360 = vmatprep.subr.bf16.mxu1 %v14326_v55  ;;  %v10271_v13 = vsel %vm19496_vm12, %v19495_v1, %v10270_v30  ;;  %vm19504_vm12 = vmmov %vm19499_vm2  ;;  %v10770_v1 = vrot.slane %v10758_v34, 5 }
 0x32d   : > { %v10409_v49 = vor.u32 %v10408_v48, %v10405_v5  ;;  %v14332_v48 = vld [vmem:[%s18772_s2 + $0x88] sm:$0xff]  }
 0x32f   : > { %13361 = vmatpush3.bf16.msra.mxu1 %v14326_v55  ;;  %v10413_v50 = vsel %vm19499_vm2, %v10409_v49, %v18296_v20  ;;  %v14329_v20 = vld [vmem:[%s18772_s2 + $0x70] sm:$0xff]   ;;  %v10630_v55 = vshll.u32 %v10568_v8, 16  ;;  %v10779_v49 = vrot.slane %v18522_v60, 5 }
 0x330   : > { %13374 = vmatprep.subr.bf16.mxu1 %v14327_v58 }
 0x331   : > { %v10632_v30 = vrot.slane %v10630_v55, 5 }
 0x332   : > { %13351 = vmatmul.mubr.msk.bf16.gmra.mrb[28].mxu1 %vm19494_vm15, %v18279_v29  ;;  %v10426_v29 = vrot.slane %v18367_v57, 4  ;;  %vm19503_vm15 = vmmov %vm19477_vm4 }
 0x333   : > { %13354 = vmatprep.mubr.msk.bf16.mxu1 %vm19497_vm13, %v10271_v13  ;;  %vm19505_vm13 = vmmov %vm19477_vm4 }
 0x334   : > { %v10428_v6 = vor.u32 %v10427_v52, %v10426_v29 }
 0x336   : > { %v10429_v57 = vsel %vm19504_vm12, %v18312_v56, %v10428_v6  ;;  %v10438_v16 = vsel %vm19506_vm9, %v10428_v6, %v10437_v7  ;;  %v10618_v56 = vshrl.u32 %v18522_v60, 16  ;;  %vm19511_vm12 = vmmov %vm19499_vm2 }
 0x337   : > { %vm19513_vm9 = vmmov %vm19499_vm2 }
 0x338   : > { %v10935_v38 = vrot.slane %v10618_v56, 5 }
 0x33a   : > { %13355 = vmatmul.mubr.msk.bf16.gmra.mrb[32].mxu1 %vm19477_vm4, %v10273_v14 }
 0x33b   : > { %13362 = vmatprep.mubr.msk.bf16.mxu1 %vm19500_vm14, %v10413_v50  ;;  %vm19507_vm14 = vmmov %vm19477_vm4  ;;  %v10917_v50 = vrot.slane %v10915_v53, 6 }
 0x342   : > { %13363 = vmatmul.mubr.msk.bf16.vlgmr.msra.gmra.mrb[24].mxu1 %vm19501_vm10, %v18310_v40  ;;  %v10574_v40 = vshrl.u32 %v10562_v25, 16  ;;  %vm19508_vm10 = vmmov %vm19477_vm4 }
 0x343   : > { %13366 = vmatprep.mubr.msk.bf16.mxu1 %vm19502_vm5, %v18321_v45  ;;  %13375 = vmatpush3.bf16.msra.mxu1 %v14327_v58  ;;  %vm19509_vm5 = vmmov %vm19477_vm4  ;;  %v10629_v58 = vrot.slane %v10627_v35, 4 }
 0x344   : > { %13376 = vmatprep.subr.bf16.mxu1 %v14328_v32  ;;  %v10576_v19 = vrot.slane %v10574_v40, 4  ;;  %v10906_v40 = vld [vmem:[#allocation2 + $0xa0] sm:$0x3f] }
 0x345   : > { %v10633_v61 = vor.u32 %v10632_v30, %v10629_v58  ;;  %v10943_v7 = vshll.u32 %v10906_v40, 16 }
 0x346   : > { %v10580_v47 = vor.u32 %v10579_v21, %v10576_v19  ;;  %v10936_v19 = vrot.slane %v10621_v11, 6 }
 0x347   : > { %13377 = vmatpush3.bf16.msra.mxu1 %v14328_v32  ;;  %v10781_v32 = vrot.slane %v10568_v8, 5 }
 0x348   : > { %13390 = vmatprep.subr.bf16.mxu1 %v14329_v20  ;;  %v10589_v51 = vsel %vm19499_vm2, %v10580_v47, %v18298_v36  ;;  %v10620_v36 = vrot.slane %v10618_v56, 4  ;;  %vm19514_vm2 = vcmask 1042432   ;;  %v10937_v8 = vor.u32 %v10936_v19, %v10935_v38  ;;  %v19545_v19 = vld [vmem:[#allocation8_spill] sm:$0xff] }
 0x349   : > { %v10772_v5 = vsel %vm19514_vm2, %v10770_v1, %v10771_v27  ;;  %v19519_v27 = vrot.slane %v18345_v59, 5  ;;  %v18571_v59 = vld [vmem:[%s18773_s3 + $0x1] ss:$0 sm:$0xff]  ;;  %v10945_v56 = vrot.slane %v10943_v7, 6 }
 0x34a   : > { %13367 = vmatmul.mubr.msk.bf16.gmra.mrb[28].mxu1 %vm19503_vm15, %v18332_v2  ;;  %vm19510_vm15 = vmmov %vm19477_vm4 }
 0x34b   : > { %13370 = vmatprep.mubr.msk.bf16.mxu1 %vm19505_vm13, %v10429_v57  ;;  %vm19512_vm13 = vmmov %vm19477_vm4 }
 0x352   : > { %13371 = vmatmul.mubr.msk.bf16.gmra.mrb[32].mxu1 %vm19477_vm4, %v10438_v16 }
 0x353   : > { %13378 = vmatprep.mubr.msk.bf16.mxu1 %vm19507_vm14, %v10589_v51  ;;  %vm19515_vm14 = vmmov %vm19477_vm4 }
 0x35a   : > { %13379 = vmatmul.mubr.msk.bf16.vlgmr.msra.gmra.mrb[24].mxu1 %vm19508_vm10, %v18321_v45  ;;  %v10624_v45 = vor.u32 %v10623_v3, %v10620_v36  ;;  %vm19516_vm10 = vmmov %vm19477_vm4 }
 0x35b   : > { %13382 = vmatprep.mubr.msk.bf16.mxu1 %vm19509_vm5, %v18332_v2  ;;  %13391 = vmatpush3.bf16.msra.mxu1 %v14329_v20  ;;  %vm19517_vm5 = vmmov %vm19477_vm4  ;;  %v18576_v20 = vld [vmem:[%s18774_s4 + $0x1] ss:$0 sm:$0xff] }
 0x35c   : > { %13392 = vmatprep.subr.bf16.mxu1 %v14330_v24  ;;  %v10625_v2 = vsel %vm19511_vm12, %v10428_v6, %v10624_v45  ;;  %v10634_v13 = vsel %vm19513_vm9, %v10624_v45, %v10633_v61  ;;  %vm19520_vm12 = vmmov %vm19514_vm2 }
 0x35d   : > { %v10780_v14 = vsel %vm19520_vm12, %v19519_v27, %v10779_v49  ;;  %vm19522_vm9 = vmmov %vm19514_vm2  ;;  %vm19523_vm2 = vsmask.f32 2304  ;;  %vm19528_vm12 = vnez %v19030_v46 }
 0x35e   : > { %v10782_v29 = vsel %vm19522_vm9, %v10779_v49, %v10781_v32  ;;  %vm19530_vm9 = vmmov %vm19523_vm2  ;;  %v19539_v32 = vld [vmem:[#allocation29_spill] sm:$0xff] }
 0x35f   : > { %13393 = vmatpush3.bf16.msra.mxu1 %v14330_v24  ;;  %v10938_v60 = vsel %vm19530_vm9, %v18419_v4, %v10937_v8 }
 0x360   : > { %13406 = vmatprep.subr.bf16.mxu1 %v14331_v62 }
 0x362   : > { %13383 = vmatmul.mubr.msk.bf16.gmra.mrb[28].mxu1 %vm19510_vm15, %v10429_v57  ;;  %vm19518_vm15 = vmmov %vm19477_vm4 }
 0x363   : > { %13386 = vmatprep.mubr.msk.bf16.mxu1 %vm19512_vm13, %v10625_v2  ;;  %vm19521_vm13 = vmmov %vm19477_vm4 }
 0x36a   : > { %13387 = vmatmul.mubr.msk.bf16.gmra.mrb[32].mxu1 %vm19477_vm4, %v10634_v13 }
 0x36b   : > { %13394 = vmatprep.mubr.msk.bf16.mxu1 %vm19515_vm14, %v10772_v5  ;;  %vm19524_vm14 = vmmov %vm19477_vm4 }
 0x372   : > { %13395 = vmatmul.mubr.msk.bf16.vlgmr.msra.gmra.mrb[24].mxu1 %vm19516_vm10, %v18375_v0  ;;  %v10914_v0 = vrot.slane %v10912_v23, 5  ;;  %vm19525_vm10 = vmmov %vm19477_vm4  ;;  %v19536_v23 = vld [vmem:[#allocation15_spill] sm:$0xff] }
 0x373   : > { %13398 = vmatprep.mubr.msk.bf16.mxu1 %vm19517_vm5, %v18378_v43  ;;  %13407 = vmatpush3.bf16.msra.mxu1 %v14331_v62  ;;  %vm19526_vm5 = vmmov %vm19477_vm4 }
 0x374   : > { %13408 = vmatprep.subr.bf16.mxu1 %v14332_v48  ;;  %v10918_v43 = vor.u32 %v10917_v50, %v10914_v0 }
 0x376   : > { %v10922_v52 = vsel %vm19523_vm2, %v10918_v43, %v18408_v54  ;;  %vm19531_vm2 = vnez %v18988_v22 }
 0x377   : > { %13409 = vmatpush3.bf16.msra.mxu1 %v14332_v48 }
 0x37a   : > { %13399 = vmatmul.mubr.msk.bf16.gmra.mrb[28].mxu1 %vm19518_vm15, %v18383_v9  ;;  %vm19527_vm15 = vnez %v19081_v44 }
 0x37b   : > { %13402 = vmatprep.mubr.msk.bf16.mxu1 %vm19521_vm13, %v10780_v14  ;;  %vm19529_vm13 = vmmov %vm19477_vm4  ;;  %v19561_v14 = vld [vmem:[#allocation28_spill] sm:$0xff] }
 0x37f   : > { %v13124_v9 = vpop.f32.mrb[12].mxu1 }
 0x380   : > { %v7831_v42 = vpop.f32.mrb[13].mxu1  ;;  %v7896_v31 = vmul.f32 %v13124_v9, %v18571_v59 }
 0x381   : > { %v7894_v25 = vmul.f32 %v18571_v59, %v7831_v42  ;;  %v13125_v6 = vpop.f32.mrb[14].mxu1 }
 0x382   : > { %13403 = vmatmul.mubr.msk.bf16.gmra.mrb[32].mxu1 %vm19477_vm4, %v10782_v29  ;;  %v7834_v12 = vpop.f32.mrb[15].mxu1  ;;  %v7897_v16 = vmul.f32 %v13125_v6, %v18571_v59 }
 0x383   : > { %13410 = vmatprep.mubr.msk.bf16.mxu1 %vm19524_vm14, %v10922_v52  ;;  %v7895_v54 = vmul.f32 %v18571_v59, %v7834_v12  ;;  %v7910_v41 = vadd.f32 %v18576_v20, %v7894_v25  ;;  %vm19532_vm14 = vnez %v19082_v17  ;;  %v19541_v52 = vld [vmem:[#allocation16_spill] sm:$0xff] }
 0x384   : > { %v7913_v3 = vadd.f32 %v18576_v20, %v7897_v16  ;;  %v19543_v25 = vld [vmem:[#allocation12_spill] sm:$0xff] }
 0x385   : > { %v7922_v57 = vsel %vm19527_vm15, %v7910_v41, 0.0  ;;  %v7911_v28 = vadd.f32 %v18576_v20, %v7895_v54  ;;  %vm19535_vm15 = vnez %v19052_v37 }
 0x386   : > { %7934 = vxpose.xlu0.b32.start [1/12] (short) (narrow) %v7922_v57, 32 }
 0x387   : > { %v13128_v21 = vpop.f32.mrb[16].mxu1  ;;  %v7923_v44 = vsel %vm19528_vm12, %v7911_v28, 0.0  ;;  %vm19542_vm12 = vnez %v19541_v52  ;;  %v19565_v52 = vld [vmem:[#allocation26_spill] sm:$0xff] }
 0x388   : > { %v7847_v47 = vpop.f32.mrb[17].mxu1  ;;  %v7900_v22 = vmul.f32 %v13128_v21, %v18571_v59 }
 0x389   : > { %v13129_v51 = vpop.f32.mrb[18].mxu1  ;;  %v7898_v11 = vmul.f32 %v18571_v59, %v7847_v47 }
 0x38a   : > { %13411 = vmatmul.mubr.msk.bf16.vlgmr.msra.gmra.mrb[24].mxu1 %vm19525_vm10, %v18423_v18  ;;  %v10940_v18 = vshrl.u32 %v10906_v40, 16  ;;  %7935 = vxpose.xlu0.b32.cont [2/12] (short) (narrow) %v7923_v44, 32  ;;  %v7850_v24 = vpop.f32.mrb[19].mxu1  ;;  %vm19533_vm10 = vmmov %vm19530_vm9  ;;  %v7901_v1 = vmul.f32 %v13129_v51, %v18571_v59  ;;  %v7916_v13 = vadd.f32 %v18576_v20, %v7900_v22  ;;  %v19547_v44 = vld [vmem:[#allocation13_spill] sm:$0xff] }
 0x38b   : > { %13414 = vmatprep.mubr.msk.bf16.mxu1 %vm19526_vm5, %v18426_v33  ;;  %v7912_v33 = vadd.f32 %v18576_v20, %v7896_v31  ;;  %v7899_v45 = vmul.f32 %v18571_v59, %v7850_v24  ;;  %v7914_v4 = vadd.f32 %v18576_v20, %v7898_v11  ;;  %vm19534_vm5 = vmmov %vm19477_vm4  ;;  %vm19548_vm9 = vnez %v19547_v44 }
 0x38c   : > { %v10942_v36 = vrot.slane %v10940_v18, 5  ;;  %v7928_v48 = vsel %vm19535_vm15, %v7916_v13, 0.0  ;;  %v7917_v49 = vadd.f32 %v18576_v20, %v7901_v1 }
 0x38d   : > { %v7924_v46 = vsel %vm19531_vm2, %v7912_v33, 0.0  ;;  %v7926_v61 = vsel %vm16625_vm6, %v7914_v4, 0.0  ;;  %v7915_v34 = vadd.f32 %v18576_v20, %v7899_v45  ;;  %vm19537_vm6 = vnez %v19536_v23  ;;  %v19559_v23 = vld [vmem:[#allocation11_spill] sm:$0xff] }
 0x38e   : > { %7936 = vxpose.xlu0.b32.cont [3/12] (short) (narrow) %v7924_v46, 32  ;;  %v10946_v35 = vor.u32 %v10945_v56, %v10942_v36  ;;  %v7929_v53 = vsel %vm19537_vm6, %v7917_v49, 0.0  ;;  %v19549_v56 = vld [vmem:[#allocation31_spill] sm:$0xff]  ;;  %vm19560_vm15 = vnez %v19559_v23  ;;  %vm19562_vm6 = vnez %v19561_v14 }
 0x38f   : > { %v13132_v62 = vpop.f32.mrb[20].mxu1  ;;  %v7927_v17 = vsel %vm16685_vm0, %v7915_v34, 0.0  ;;  %vm19540_vm0 = vnez %v19539_v32  ;;  %v19555_v34 = vld [vmem:[#allocation19_spill] sm:$0xff]  ;;  %v19563_v32 = vld [vmem:[#allocation32_spill] sm:$0xff] }
 0x390   : > { %v7863_v55 = vpop.f32.mrb[21].mxu1  ;;  %v10947_v2 = vsel %vm19533_vm10, %v10937_v8, %v10946_v35  ;;  %v7904_v15 = vmul.f32 %v13132_v62, %v18571_v59  ;;  %vm19556_vm10 = vnez %v19555_v34 }
 0x391   : > { %v13133_v58 = vpop.f32.mrb[22].mxu1  ;;  %v7902_v5 = vmul.f32 %v18571_v59, %v7863_v55  ;;  %v19551_v55 = vld [vmem:[#allocation14_spill] sm:$0xff] }
 0x392   : > { %13415 = vmatmul.mubr.msk.bf16.gmra.mrb[28].mxu1 %vm19529_vm13, %v18430_v10  ;;  %v7925_v10 = vsel %vm19532_vm14, %v7913_v3, 0.0  ;;  %v7866_v30 = vpop.f32.mrb[23].mxu1  ;;  %v7905_v37 = vmul.f32 %v13133_v58, %v18571_v59  ;;  %v7920_v29 = vadd.f32 %v18576_v20, %v7904_v15  ;;  %vm19544_vm13 = vnez %v19543_v25  ;;  %v19567_v25 = vld [vmem:[#allocation23_spill] sm:$0xff] }
 0x393   : > { %13418 = vmatprep.mubr.msk.bf16.mxu1 %vm19477_vm4, %v10938_v60  ;;  %7937 = vxpose.xlu0.b32.cont [4/12] (short) (narrow) %v7925_v10, 32  ;;  %v7903_v26 = vmul.f32 %v18571_v59, %v7866_v30  ;;  %v7918_v27 = vadd.f32 %v18576_v20, %v7902_v5  ;;  %vm19550_vm4 = vnez %v19549_v56  ;;  %vm19552_vm2 = vnez %v19551_v55  ;;  %v19553_v30 = vld [vmem:[#allocation18_spill] sm:$0xff]  ;;  %v19557_v5 = vld [vmem:[#allocation9_spill] sm:$0xff] }
 0x394   : > { %v7932_v9 = vsel %vm19542_vm12, %v7920_v29, 0.0  ;;  %v7921_v42 = vadd.f32 %v18576_v20, %v7905_v37  ;;  %vm19554_vm14 = vnez %v19553_v30  ;;  %vm19566_vm12 = vnez %v19565_v52  ;;  %v19573_v30 = vld [vmem:[#allocation34_spill] sm:$0xff] }
 0x395   : > { %v7930_v0 = vsel %vm16811_vm3, %v7918_v27, 0.0  ;;  %v7919_v50 = vadd.f32 %v18576_v20, %v7903_v26  ;;  %vm19546_vm3 = vnez %v19545_v19 }
 0x396   : > { %v7933_v6 = vsel %vm19544_vm13, %v7921_v42, 0.0  ;;  %vm19568_vm13 = vnez %v19567_v25 }
 0x397   : > { %7938 = vxpose.xlu0.b32.cont [5/12] (short) (narrow) %v7926_v61, 32  ;;  %v7931_v43 = vsel %vm19540_vm0, %v7919_v50, 0.0  ;;  %vm19564_vm0 = vnez %v19563_v32 }
 0x39a   : > { %13419 = vmatmul.mubr.msk.bf16.gmra.mrb[32].mxu1 %vm19534_vm5, %v10947_v2  ;;  %vm19558_vm5 = vnez %v19557_v5 }
 0x39b   : > { %7939 = vxpose.xlu0.b32.cont [6/12] (short) (narrow) %v7927_v17, 32 }
 0x39f   : > { %7940 = vxpose.xlu0.b32.cont [7/12] (short) (narrow) %v7928_v48, 32 }
 0x3a3   : > { %7941 = vxpose.xlu0.b32.cont [8/12] (short) (narrow) %v7929_v53, 32 }
 0x3a7   : > { %7942 = vxpose.xlu0.b32.cont [9/12] (short) (narrow) %v7930_v0, 32 }
 0x3ab   : > { %7943 = vxpose.xlu0.b32.cont [10/12] (short) (narrow) %v7931_v43, 32 }
 0x3af   : > { %7944 = vxpose.xlu0.b32.cont [11/12] (short) (narrow) %v7932_v9, 32 }
 0x3b3   : > { %7945 = vxpose.xlu0.b32.end [12/12] (short) (narrow) %v7933_v6, 32 }
 0x3d3   : > { %v13268_v12 = vpop.f32.mrb[24].mxu0 }
 0x3d4   : > { %v9415_v54 = vpop.f32.mrb[25].mxu0  ;;  %v9476_v38 = vmul.f32 %v13268_v12, %v18571_v59 }
 0x3d5   : > { %v9474_v41 = vmul.f32 %v18571_v59, %v9415_v54  ;;  %v13269_v40 = vpop.f32.mrb[26].mxu0 }
 0x3d6   : > { %v9418_v31 = vpop.f32.mrb[27].mxu0  ;;  %v9477_v16 = vmul.f32 %v13269_v40, %v18571_v59  ;;  %v9488_v24 = vadd.f32 %v18576_v20, %v9476_v38 }
 0x3d7   : > { %v9475_v57 = vmul.f32 %v18571_v59, %v9418_v31  ;;  %v9486_v28 = vadd.f32 %v18576_v20, %v9474_v41 }
 0x3d8   : > { %v9500_v60 = vsel %vm19550_vm4, %v9488_v24, 0.0  ;;  %v9489_v11 = vadd.f32 %v18576_v20, %v9477_v16  ;;  %vm19570_vm4 = vnez %v19331_v63 }
 0x3d9   : > { %v9498_v21 = vsel %vm19546_vm3, %v9486_v28, 0.0  ;;  %v9487_v18 = vadd.f32 %v18576_v20, %v9475_v57  ;;  %vm7966_vm3 = vcmask 785408  }
 0x3da   : > { %9510 = vxpose.xlu1.b32.start [1/12] (short) (narrow) %v9498_v21, 32  ;;  %v9501_v45 = vsel %vm19552_vm2, %v9489_v11, 0.0 }
 0x3db   : > { %v13272_v7 = vpop.f32.mrb[28].mxu0  ;;  %v9499_v33 = vsel %vm19548_vm9, %v9487_v18, 0.0  ;;  %vm19569_vm9 = vnez %v19325_v39 }
 0x3dc   : > { %v9431_v47 = vpop.f32.mrb[29].mxu0  ;;  %v9480_v4 = vmul.f32 %v13272_v7, %v18571_v59 }
 0x3dd   : > { %v13273_v51 = vpop.f32.mrb[30].mxu0  ;;  %v9478_v36 = vmul.f32 %v18571_v59, %v9431_v47 }
 0x3de   : > { %9511 = vxpose.xlu1.b32.cont [2/12] (short) (narrow) %v9499_v33, 32  ;;  %v9434_v8 = vpop.f32.mrb[31].mxu0  ;;  %v9481_v61 = vmul.f32 %v13273_v51, %v18571_v59  ;;  %v9492_v17 = vadd.f32 %v18576_v20, %v9480_v4 }
 0x3df   : > { %v9479_v62 = vmul.f32 %v18571_v59, %v9434_v8  ;;  %v9490_v58 = vadd.f32 %v18576_v20, %v9478_v36 }
 0x3e0   : > { %v9504_v48 = vsel %vm19558_vm5, %v9492_v17, 0.0  ;;  %v9493_v49 = vadd.f32 %v18576_v20, %v9481_v61  ;;  %vm9560_vm5 = vcmask 523264  }
 0x3e1   : > { %v9502_v2 = vsel %vm19554_vm14, %v9490_v58, 0.0  ;;  %v9491_v22 = vadd.f32 %v18576_v20, %v9479_v62  ;;  %vm19574_vm14 = vnez %v19573_v30 }
 0x3e2   : > { %9512 = vxpose.xlu1.b32.cont [3/12] (short) (narrow) %v9500_v60, 32  ;;  %v9505_v53 = vsel %vm19560_vm15, %v9493_v49, 0.0  ;;  %vm11155_vm15 = vcmask 1048064  }
 0x3e3   : > { %v13276_v46 = vpop.f32.mrb[32].mxu0  ;;  %v9503_v1 = vsel %vm19556_vm10, %v9491_v22, 0.0  ;;  %vm9558_vm10 = vcmask 1048320  }
 0x3e4   : > { %v9447_v3 = vpop.f32.mrb[33].mxu0  ;;  %v9484_v15 = vmul.f32 %v13276_v46, %v18571_v59 }
 0x3e5   : > { %v13277_v35 = vpop.f32.mrb[34].mxu0  ;;  %v9482_v13 = vmul.f32 %v18571_v59, %v9447_v3 }
 0x3e6   : > { %9513 = vxpose.xlu1.b32.cont [4/12] (short) (narrow) %v9501_v45, 32  ;;  %v9450_v10 = vpop.f32.mrb[35].mxu0  ;;  %v9485_v37 = vmul.f32 %v13277_v35, %v18571_v59  ;;  %v9496_v29 = vadd.f32 %v18576_v20, %v9484_v15  ;;  %v19571_v35 = vld [vmem:[#allocation33_spill] sm:$0xff] }
 0x3e7   : > { %v9483_v26 = vmul.f32 %v18571_v59, %v9450_v10  ;;  %v9494_v27 = vadd.f32 %v18576_v20, %v9482_v13  ;;  %vm19572_vm2 = vnez %v19571_v35 }
 0x3e8   : > { %v9508_v9 = vsel %vm19566_vm12, %v9496_v29, 0.0  ;;  %v9497_v42 = vadd.f32 %v18576_v20, %v9485_v37 }
 0x3e9   : > { %v9506_v0 = vsel %vm19562_vm6, %v9494_v27, 0.0  ;;  %v9495_v50 = vadd.f32 %v18576_v20, %v9483_v26  ;;  %vm19587_vm6 = vcmask 261120  }
 0x3ea   : > { %9514 = vxpose.xlu1.b32.cont [5/12] (short) (narrow) %v9502_v2, 32  ;;  %v9509_v6 = vsel %vm19568_vm13, %v9497_v42, 0.0  ;;  %v19581_v42 = vld [vmem:[#allocation10_spill] sm:$0xff] }
 0x3eb   : > { %v9507_v43 = vsel %vm19564_vm0, %v9495_v50, 0.0  ;;  %vm19588_vm0 = vmmov %vm19587_vm6 }
 0x3ec   : > { %vm19589_vm12 = vmmov %vm19588_vm0 }
 0x3ed   : > { %vm19590_vm13 = vmmov %vm19588_vm0 }
 0x3ee   : > { %9515 = vxpose.xlu1.b32.cont [6/12] (short) (narrow) %v9503_v1, 32 }
 0x3f2   : > { %9516 = vxpose.xlu1.b32.cont [7/12] (short) (narrow) %v9504_v48, 32 }
 0x3f6   : > { %9517 = vxpose.xlu1.b32.cont [8/12] (short) (narrow) %v9505_v53, 32 }
 0x3fa   : > { %9518 = vxpose.xlu1.b32.cont [9/12] (short) (narrow) %v9506_v0, 32 }
 0x3fe   : > { %9519 = vxpose.xlu1.b32.cont [10/12] (short) (narrow) %v9507_v43, 32  ;;  %v19579_v43 = vld [vmem:[#allocation7_spill] sm:$0xff] }
 0x402   : > { %9520 = vxpose.xlu1.b32.cont [11/12] (short) (narrow) %v9508_v9, 32 }
 0x406   : > { %9521 = vxpose.xlu1.b32.end [12/12] (short) (narrow) %v9509_v6, 32 }
 0x407   : > { %v7950_v12 = vpop.trf.xlu0 }
 0x408   : > { %7967 = vst.msk [vmem:[%s18693_s16] sm:$0xff] %vm7966_vm3, %v7950_v12  ;;  %v19583_v12 = vld [vmem:[#allocation6_spill] sm:$0xff] }
 0x40b   : > { %v7951_v54 = vpop.trf.xlu0 }
 0x40c   : > { %7968 = vst.msk [vmem:[%s18693_s16 + $0x18] sm:$0xff] %vm7966_vm3, %v7951_v54 }
 0x40f   : > { %v7952_v41 = vpop.trf.xlu0 }
 0x410   : > { %7969 = vst.msk [vmem:[%s18693_s16 + $0x30] sm:$0xff] %vm7966_vm3, %v7952_v41  ;;  %v19585_v41 = vld [vmem:[#allocation17_spill] sm:$0xff] }
 0x413   : > { %v7953_v40 = vpop.trf.xlu0 }
 0x414   : > { %7970 = vst.msk [vmem:[%s18693_s16 + $0x48] sm:$0xff] %vm7966_vm3, %v7953_v40 }
 0x45a   : > { %v9526_v31 = vpop.trf.xlu1 }
 0x45b   : > { %9546 = vrot.lane.b32.xlu1 %v9526_v31, %s14345_s19 }
 0x45d   : > { %v13412_v57 = vpop.f32.mrb[24].mxu1 }
 0x45e   : > { %v11012_v28 = vpop.f32.mrb[25].mxu1  ;;  %v9527_v21 = vpop.trf.xlu1  ;;  %v11073_v16 = vmul.f32 %v13412_v57, %v18571_v59 }
 0x45f   : > { %v11071_v38 = vmul.f32 %v18571_v59, %v11012_v28  ;;  %v13413_v19 = vpop.f32.mrb[26].mxu1  ;;  %9548 = vrot.lane.b32.xlu1 %v9527_v21, %s14345_s19 }
 0x460   : > { %v11015_v18 = vpop.f32.mrb[27].mxu1  ;;  %v11085_v36 = vadd.f32 %v18576_v20, %v11073_v16  ;;  %v11074_v56 = vmul.f32 %v13413_v19, %v18571_v59 }
 0x461   : > { %v11072_v7 = vmul.f32 %v18571_v59, %v11015_v18  ;;  %v11083_v47 = vadd.f32 %v18576_v20, %v11071_v38 }
 0x462   : > { %v9528_v33 = vpop.trf.xlu1  ;;  %v11086_v39 = vadd.f32 %v18576_v20, %v11074_v56  ;;  %v11097_v55 = vsel %vm19572_vm2, %v11085_v36, 0.0 }
 0x463   : > { %v11084_v51 = vadd.f32 %v18576_v20, %v11072_v7  ;;  %v11095_v44 = vsel %vm19569_vm9, %v11083_v47, 0.0  ;;  %9550 = vrot.lane.b32.xlu1 %v9528_v33, %s14345_s19 }
 0x464   : > { %11107 = vxpose.xlu0.b32.start [1/12] (short) (narrow) %v11095_v44, 32  ;;  %v11098_v2 = vsel %vm19574_vm14, %v11086_v39, 0.0 }
 0x465   : > { %v13416_v24 = vpop.f32.mrb[28].mxu1  ;;  %v11096_v11 = vsel %vm19570_vm4, %v11084_v51, 0.0 }
 0x466   : > { %v11028_v8 = vpop.f32.mrb[29].mxu1  ;;  %v9529_v46 = vpop.trf.xlu1  ;;  %v11077_v61 = vmul.f32 %v13416_v24, %v18571_v59 }
 0x467   : > { %v13417_v60 = vpop.f32.mrb[30].mxu1  ;;  %9552 = vrot.lane.b32.xlu1 %v9529_v46, %s14345_s19  ;;  %v11075_v62 = vmul.f32 %v18571_v59, %v11028_v8 }
 0x468   : > { %v11031_v3 = vpop.f32.mrb[31].mxu1  ;;  %11108 = vxpose.xlu0.b32.cont [2/12] (short) (narrow) %v11096_v11, 32  ;;  %v11089_v13 = vadd.f32 %v18576_v20, %v11077_v61  ;;  %v11078_v5 = vmul.f32 %v13417_v60, %v18571_v59 }
 0x469   : > { %v11087_v10 = vadd.f32 %v18576_v20, %v11075_v62  ;;  %v11076_v4 = vmul.f32 %v18571_v59, %v11031_v3 }
 0x46a   : > { %v11090_v26 = vadd.f32 %v18576_v20, %v11078_v5  ;;  %v11101_v27 = vsel %vm17897_vm7, %v11089_v13, 0.0  ;;  %vm19582_vm7 = vnez %v19581_v42 }
 0x46b   : > { %v11088_v34 = vadd.f32 %v18576_v20, %v11076_v4  ;;  %v11099_v17 = vsel %vm17907_vm8, %v11087_v10, 0.0  ;;  %vm19580_vm8 = vnez %v19579_v43 }
 0x46c   : > { %11109 = vxpose.xlu0.b32.cont [3/12] (short) (narrow) %v11097_v55, 32  ;;  %v11102_v50 = vsel %vm17901_vm11, %v11090_v26, 0.0  ;;  %vm19584_vm11 = vnez %v19583_v12 }
 0x46d   : > { %v13420_v45 = vpop.f32.mrb[32].mxu1  ;;  %v11100_v49 = vsel %vm17922_vm1, %v11088_v34, 0.0  ;;  %vm19586_vm1 = vnez %v19585_v41 }
 0x46e   : > { %v11044_v58 = vpop.f32.mrb[33].mxu1  ;;  %v11081_v37 = vmul.f32 %v13420_v45, %v18571_v59 }
 0x46f   : > { %v13421_v63 = vpop.f32.mrb[34].mxu1  ;;  %v11079_v23 = vmul.f32 %v18571_v59, %v11044_v58 }
 0x470   : > { %v11047_v22 = vpop.f32.mrb[35].mxu1  ;;  %11110 = vxpose.xlu0.b32.cont [4/12] (short) (narrow) %v11098_v2, 32  ;;  %v11093_v52 = vadd.f32 %v18576_v20, %v11081_v37  ;;  %v11082_v9 = vmul.f32 %v13421_v63, %v18571_v59 }
 0x471   : > { %v11091_v15 = vadd.f32 %v18576_v20, %v11079_v23  ;;  %v11080_v14 = vmul.f32 %v18571_v59, %v11047_v22 }
 0x472   : > { %v11094_v6 = vadd.f32 %v18576_v20, %v11082_v9  ;;  %v11105_v54 = vsel %vm19584_vm11, %v11093_v52, 0.0 }
 0x473   : > { %v11092_v32 = vadd.f32 %v18576_v20, %v11080_v14  ;;  %v11103_v29 = vsel %vm19580_vm8, %v11091_v15, 0.0 }
 0x474   : > { %11111 = vxpose.xlu0.b32.cont [5/12] (short) (narrow) %v11099_v17, 32  ;;  %v11106_v40 = vsel %vm19586_vm1, %v11094_v6, 0.0 }
 0x475   : > { %v11104_v25 = vsel %vm19582_vm7, %v11092_v32, 0.0 }
 0x478   : > { %11112 = vxpose.xlu0.b32.cont [6/12] (short) (narrow) %v11100_v49, 32 }
 0x47c   : > { %11113 = vxpose.xlu0.b32.cont [7/12] (short) (narrow) %v11101_v27, 32 }
 0x480   : > { %11114 = vxpose.xlu0.b32.cont [8/12] (short) (narrow) %v11102_v50, 32 }
 0x484   : > { %11115 = vxpose.xlu0.b32.cont [9/12] (short) (narrow) %v11103_v29, 32 }
 0x488   : > { %11116 = vxpose.xlu0.b32.cont [10/12] (short) (narrow) %v11104_v25, 32 }
 0x48c   : > { %11117 = vxpose.xlu0.b32.cont [11/12] (short) (narrow) %v11105_v54, 32 }
 0x490   : > { %11118 = vxpose.xlu0.b32.end [12/12] (short) (narrow) %v11106_v40, 32 }
 0x4cd   : > { %v9547_v59 = vpop.permute.xlu1 %9546 }
 0x4ce   : > { %9559 = vst.msk [vmem:[%s18693_s16] sm:$0xff] %vm9558_vm10, %v9547_v59 }
 0x4cf   : > { %9561 = vst.msk [vmem:[%s18693_s16 + $0x8] sm:$0xff] %vm9560_vm5, %v9547_v59 }
 0x4d1   : > { %v9549_v31 = vpop.permute.xlu1 %9548 }
 0x4d2   : > { %9562 = vst.msk [vmem:[%s18693_s16 + $0x18] sm:$0xff] %vm9558_vm10, %v9549_v31 }
 0x4d3   : > { %9563 = vst.msk [vmem:[%s18693_s16 + $0x20] sm:$0xff] %vm9560_vm5, %v9549_v31 }
 0x4d5   : > { %v9551_v57 = vpop.permute.xlu1 %9550 }
 0x4d6   : > { %9564 = vst.msk [vmem:[%s18693_s16 + $0x30] sm:$0xff] %vm9558_vm10, %v9551_v57 }
 0x4d7   : > { %9565 = vst.msk [vmem:[%s18693_s16 + $0x38] sm:$0xff] %vm9560_vm5, %v9551_v57 }
 0x4d9   : > { %v9553_v20 = vpop.permute.xlu1 %9552 }
 0x4da   : > { %9566 = vst.msk [vmem:[%s18693_s16 + $0x48] sm:$0xff] %vm9558_vm10, %v9553_v20 }
 0x4db   : > { %9567 = vst.msk [vmem:[%s18693_s16 + $0x50] sm:$0xff] %vm9560_vm5, %v9553_v20 }
 0x4e4   : > { %v11123_v28 = vpop.trf.xlu0 }
 0x4e5   : > { %11143 = vrot.lane.b32.xlu1 %v11123_v28, %s14346_s17 }
 0x4e8   : > { %v11124_v38 = vpop.trf.xlu0 }
 0x4e9   : > { %11145 = vrot.lane.b32.xlu1 %v11124_v38, %s14346_s17 }
 0x4ec   : > { %v11125_v19 = vpop.trf.xlu0 }
 0x4ed   : > { %11147 = vrot.lane.b32.xlu0 %v11125_v19, %s14346_s17 }
 0x4f0   : > { %v11126_v21 = vpop.trf.xlu0 }
 0x4f1   : > { %11149 = vrot.lane.b32.xlu1 %v11126_v21, %s14346_s17 }
 0x557   : > { %v11144_v18 = vpop.permute.xlu1 %11143 }
 0x558   : > { %11156 = vst.msk [vmem:[%s18693_s16 + $0x8] sm:$0xff] %vm11155_vm15, %v11144_v18 }
 0x559   : > { %11157 = vst.msk [vmem:[%s18693_s16 + $0x10] sm:$0xff] %vm19587_vm6, %v11144_v18 }
 0x55b   : > { %v11146_v7 = vpop.permute.xlu1 %11145 }
 0x55c   : > { %11158 = vst.msk [vmem:[%s18693_s16 + $0x20] sm:$0xff] %vm11155_vm15, %v11146_v7 }
 0x55d   : > { %11159 = vst.msk [vmem:[%s18693_s16 + $0x28] sm:$0xff] %vm19588_vm0, %v11146_v7 }
 0x55f   : > { %v11148_v47 = vpop.permute.xlu0 %11147 }
 0x560   : > { %11160 = vst.msk [vmem:[%s18693_s16 + $0x38] sm:$0xff] %vm11155_vm15, %v11148_v47 }
 0x561   : > { %11161 = vst.msk [vmem:[%s18693_s16 + $0x40] sm:$0xff] %vm19589_vm12, %v11148_v47 }
 0x563   : > { %v11150_v16 = vpop.permute.xlu1 %11149 }
 0x564   : > { %11162 = vst.msk [vmem:[%s18693_s16 + $0x50] sm:$0xff] %vm11155_vm15, %v11150_v16 }
 0x565   : > { %11163 = vst.msk [vmem:[%s18693_s16 + $0x58] sm:$0xff] %vm19590_vm13, %v11150_v16 }
 0x566 PF: > { %s15_s18 = sadd.s32 1, %s14342_s18  }
 0x567   : > { %p12_p4 = scmp.ge.s32.totalorder %s15_s18, 4  }
 0x569   :  { %14 = sbr.rel (!%p12_p4) target bundleno = 1 (0x1), region = 86 }

</bundles_post_ra>
